<compile_context>
chip_gen: v7x
topology: tpu7x:2x2x1
jax: 0.10.0
libtpu: 0.0.40
codegen_flags: <defaults>
</compile_context>

<pallas_src>
import functools

import jax
import jax.numpy as jnp
from jax.experimental import pallas as pl
from jax.experimental.pallas import tpu as pltpu

LANES = 128
SUBLANES = 8


def _round_up(n: int, m: int) -> int:
    return ((n + m - 1) // m) * m


# ----------------------------------------------------------------------------
# Static geometry of the conv stack
# ----------------------------------------------------------------------------
def conv_geometry(obs_shape, hidden_size_list, kernel_size, stride):
    c, h, w = obs_shape
    layers = []
    cin = c
    for li in range(len(kernel_size)):
        k, s, oc = kernel_size[li], stride[li], hidden_size_list[li]
        oh = (h - k) // s + 1
        ow = (w - k) // s + 1
        layers.append(dict(
            k=k, s=s, cin=cin, oc=oc,
            cin_p=_round_up(cin, LANES), oc_p=_round_up(oc, LANES),
            hin=h, win=w, oh=oh, ow=ow, m=oh * ow))
        cin, h, w = oc, oh, ow
    return layers


# ----------------------------------------------------------------------------
# One-time host-side weight packing (outside the forward hot path):
#   * conv0 weight -> one [k*k*C (pad 128), OC0 (pad 128)] matrix (matches the
#     wrapper-side im2col patch ordering (i, j, c)).
#   * conv1.. weights -> per-tap stacks [k*k, cin_p, oc_p].
#   * linear weight rows pre-permuted from PyTorch (c, y, x) flatten order to
#     per-position (y, x) NHWC order -> [oh*ow, c_p, out_dim].
# ----------------------------------------------------------------------------
def prepare_params(params, obs_shape, hidden_size_list, kernel_size, stride,
                   compute_dtype=jnp.float32):
    layers = conv_geometry(obs_shape, hidden_size_list, kernel_size, stride)
    n_conv = len(layers)

    g0 = layers[0]
    patch = g0["k"] * g0["k"] * g0["cin"]
    patch_pad = _round_up(patch, LANES)
    m0_pad = _round_up(g0["m"], SUBLANES)

    conv_mats = []
    # layer 0
    w0, b0 = params["convs"][0]
    w0m = jnp.transpose(w0, (2, 3, 1, 0)).reshape(patch, g0["oc"])   # rows (i,j,c)
    w0p = jnp.zeros((patch_pad, g0["oc_p"]), compute_dtype)
    w0p = w0p.at[:patch, :g0["oc"]].set(w0m.astype(compute_dtype))
    b0p = jnp.zeros((1, g0["oc_p"]), jnp.float32).at[0, :g0["oc"]].set(
        b0.astype(jnp.float32))
    conv_mats.append((w0p, b0p))

    # layers 1..
    for li in range(1, n_conv):
        g = layers[li]
        w, b = params["convs"][li]
        k, cin, cin_p = g["k"], g["cin"], g["cin_p"]
        oc, oc_p = g["oc"], g["oc_p"]
        wt = jnp.transpose(w, (2, 3, 1, 0)).reshape(k * k, cin, oc)  # tap = i*k+j
        wp = jnp.zeros((k * k, cin_p, oc_p), compute_dtype)
        wp = wp.at[:, :cin, :oc].set(wt.astype(compute_dtype))
        bp = jnp.zeros((1, oc_p), jnp.float32).at[0, :oc].set(b.astype(jnp.float32))
        conv_mats.append((wp, bp))

    # linear
    gl = layers[-1]
    w_lin, b_lin = params["linear"]
    out_dim = w_lin.shape[0]
    oh, ow, c, c_p = gl["oh"], gl["ow"], gl["oc"], gl["oc_p"]
    wl = jnp.transpose(w_lin.reshape(out_dim, c, oh, ow), (2, 3, 1, 0))  # [oh,ow,c,out]
    wlp = jnp.zeros((oh * ow, c_p, out_dim), compute_dtype)
    wlp = wlp.at[:, :c, :].set(wl.reshape(oh * ow, c, out_dim).astype(compute_dtype))
    blp = b_lin.reshape(1, out_dim).astype(jnp.float32)

    return dict(layers=layers, conv=conv_mats, linear=(wlp, blp), out_dim=out_dim,
                compute_dtype=compute_dtype, m0_pad=m0_pad, patch=patch,
                patch_pad=patch_pad)


# ----------------------------------------------------------------------------
# Fused encoder kernel: one grid step = B_TILE images.
#   refs = (x0, [w,b] * n_conv, w_lin, b_lin, out, act_scratch * n_conv)
# Activations live in VMEM scratch, position-major: [position, batch, channels].
# ----------------------------------------------------------------------------
def _encoder_kernel(*refs, layers, m0_pad, patch_pad, n_conv, bt, out_dim, cdt):
    x0_ref = refs[0]
    wb = refs[1:1 + 2 * n_conv]
    wl_ref = refs[1 + 2 * n_conv]
    bl_ref = refs[2 + 2 * n_conv]
    out_ref = refs[3 + 2 * n_conv]
    acts = refs[4 + 2 * n_conv:]

    # ---- layer 0: ONE lane-dense matmul over wrapper-side im2col patches ----
    g0 = layers[0]
    lhs = x0_ref[...].reshape(m0_pad * bt, patch_pad)        # free: bt % 8 == 0
    h = jnp.dot(lhs, wb[0][...], preferred_element_type=jnp.float32)
    h = jnp.maximum(h + wb[1][...], 0.0)
    acts[0][...] = h.reshape(m0_pad, bt, g0["oc_p"]).astype(cdt)   # single store

    # ---- remaining conv layers: per output position, accumulate over taps ---
    # Every tap read (src[r]) and every store (dst[p]) is a full, unmasked
    # [bt, 128] tile; each dot is [bt, 128] x [128, 128] with f32 accumulation.
    for li in range(1, n_conv):
        g = layers[li]
        k, s, win = g["k"], g["s"], g["win"]
        oh, ow, oc_p = g["oh"], g["ow"], g["oc_p"]
        w_ref, b_ref = wb[2 * li], wb[2 * li + 1]
        src, dst = acts[li - 1], acts[li]
        bias = b_ref[...]                                    # [1, oc_p], f32
        for oy in range(oh):
            for ox in range(ow):
                acc = jnp.zeros((bt, oc_p), jnp.float32)
                for i in range(k):
                    for j in range(k):
                        r = (s * oy + i) * win + (s * ox + j)
                        acc = acc + jnp.dot(src[r], w_ref[i * k + j],
                                            preferred_element_type=jnp.float32)
                dst[oy * ow + ox] = jnp.maximum(acc + bias, 0.0).astype(cdt)

    # ---- flatten (NHWC; linear rows pre-permuted to match) + Linear ---------
    gl = layers[-1]
    last = acts[-1]
    acc = jnp.zeros((bt, out_dim), jnp.float32)
    for p in range(gl["m"]):
        acc = acc + jnp.dot(last[p], wl_ref[p], preferred_element_type=jnp.float32)
    out_ref[...] = acc + bl_ref[...]


# ----------------------------------------------------------------------------
# Forward wrapper: single pallas_call, grid over batch tiles ("parallel").
# ----------------------------------------------------------------------------
def conv_encoder_forward(x_nchw, prepared, batch_tile=64):
    layers = prepared["layers"]
    conv_mats = prepared["conv"]
    wl, bl = prepared["linear"]
    out_dim = prepared["out_dim"]
    cdt = prepared["compute_dtype"]
    m0_pad = prepared["m0_pad"]
    patch = prepared["patch"]
    patch_pad = prepared["patch_pad"]
    n_conv = len(conv_mats)

    n = x_nchw.shape[0]
    g0 = layers[0]
    k0, s0 = g0["k"], g0["s"]
    oh0, ow0, m0 = g0["oh"], g0["ow"], g0["m"]

    bt = _round_up(min(batch_tile, _round_up(n, SUBLANES)), SUBLANES)
    n_pad = _round_up(n, bt)

    # Layer-0 im2col in the wrapper (raw obs is tiny); zero-pad + transpose to
    # position-major [m0_pad, n_pad, patch_pad] so the kernel sees lane-dense,
    # sublane-aligned tiles.  Done once, in the compute dtype.
    x_nhwc = jnp.transpose(x_nchw, (0, 2, 3, 1)).astype(cdt)         # [n,H,W,C]
    iy = jnp.arange(oh0)[:, None] * s0 + jnp.arange(k0)[None, :]     # [oh, k]
    ix = jnp.arange(ow0)[:, None] * s0 + jnp.arange(k0)[None, :]     # [ow, k]
    p = x_nhwc[:, iy][:, :, :, ix]                                   # [n,oh,k,ow,k,C]
    p = jnp.transpose(p, (0, 1, 3, 2, 4, 5)).reshape(n, m0, patch)   # rows (i,j,c)
    x0 = jnp.zeros((n_pad, m0_pad, patch_pad), cdt).at[:n, :m0, :patch].set(p)
    x0 = jnp.transpose(x0, (1, 0, 2))                                # [m0p,n_pad,Kp]

    def resident(a):
        zeros = (0,) * a.ndim
        return pl.BlockSpec(a.shape, lambda b, _z=zeros: _z)         # VMEM-resident

    args = [x0]
    in_specs = [pl.BlockSpec((m0_pad, bt, patch_pad), lambda b: (0, b, 0))]
    for wm, bm in conv_mats:
        args += [wm, bm]
        in_specs += [resident(wm), resident(bm)]
    args += [wl, bl]
    in_specs += [resident(wl), resident(bl)]

    scratch = [pltpu.VMEM((m0_pad, bt, layers[0]["oc_p"]), cdt)]
    scratch += [pltpu.VMEM((layers[li]["m"], bt, layers[li]["oc_p"]), cdt)
                for li in range(1, n_conv)]

    # Advisory cost estimate with TRUE (unpadded) dims.
    flops = 0
    for g in layers:
        flops += 2 * g["m"] * g["k"] * g["k"] * g["cin"] * g["oc"]
    flops += 2 * layers[-1]["m"] * layers[-1]["oc"] * out_dim
    flops *= n
    bytes_accessed = int(x0.size * x0.dtype.itemsize
                         + sum(int(a.size) * a.dtype.itemsize for a in args[1:])
                         + n_pad * out_dim * 4)

    kernel = functools.partial(
        _encoder_kernel, layers=layers, m0_pad=m0_pad, patch_pad=patch_pad,
        n_conv=n_conv, bt=bt, out_dim=out_dim, cdt=cdt)

    out = pl.pallas_call(
        kernel,
        out_shape=jax.ShapeDtypeStruct((n_pad, out_dim), jnp.float32),
        grid=(n_pad // bt,),
        in_specs=in_specs,
        out_specs=pl.BlockSpec((bt, out_dim), lambda b: (b, 0)),
        scratch_shapes=scratch,
        compiler_params=pltpu.CompilerParams(
            dimension_semantics=("parallel",)),
        cost_estimate=pl.CostEstimate(flops=flops, transcendentals=0,
                                      bytes_accessed=bytes_accessed),
    )(*args)
    return out[:n]


# ----------------------------------------------------------------------------
# Deterministic parameter construction (shapes from the module __init__)
# ----------------------------------------------------------------------------
def make_params(key, obs_shape, hidden_size_list, kernel_size, stride):
    c, h, w = obs_shape
    params = {"convs": []}
    in_c = c
    sp = [h, w]
    for i in range(len(kernel_size)):
        oc = hidden_size_list[i]
        key, k1, k2 = jax.random.split(key, 3)
        fan_in = in_c * kernel_size[i] * kernel_size[i]
        scale = 1.0 / jnp.sqrt(fan_in)
        w_conv = jax.random.uniform(
            k1, (oc, in_c, kernel_size[i], kernel_size[i]),
            minval=-scale, maxval=scale, dtype=jnp.float32)
        b_conv = jax.random.uniform(k2, (oc,), minval=-scale, maxval=scale,
                                    dtype=jnp.float32)
        params["convs"].append((w_conv, b_conv))
        in_c = oc
        sp = [(d - kernel_size[i]) // stride[i] + 1 for d in sp]
    flatten_size = in_c * sp[0] * sp[1]
    out_size = hidden_size_list[-1]
    key, k1, k2 = jax.random.split(key, 3)
    scale = 1.0 / jnp.sqrt(flatten_size)
    w_lin = jax.random.uniform(k1, (out_size, flatten_size),
                               minval=-scale, maxval=scale, dtype=jnp.float32)
    b_lin = jax.random.uniform(k2, (out_size,), minval=-scale, maxval=scale,
                               dtype=jnp.float32)
    params["linear"] = (w_lin, b_lin)
    return params


# ----------------------------------------------------------------------------
# Pure-JAX reference (for correctness check)
# ----------------------------------------------------------------------------
def reference_forward(x_nchw, params, kernel_size, stride):
    x = x_nchw
    for li, (w, b) in enumerate(params["convs"]):
        x = jax.lax.conv_general_dilated(
            x, w, window_strides=(stride[li], stride[li]), padding="VALID",
            dimension_numbers=("NCHW", "OIHW", "NCHW"),
            precision=jax.lax.Precision.HIGHEST)
        x = jnp.maximum(x + b[None, :, None, None], 0.0)
    flat = x.reshape(x.shape[0], -1)
    w_lin, b_lin = params["linear"]
    return jnp.dot(flat, w_lin.T, precision=jax.lax.Precision.HIGHEST) + b_lin


if __name__ == "__main__":
    obs_shape = (4, 16, 16)            # (C, H, W)
    hidden_size_list = [32, 64, 128]
    kernel_size = [3, 3, 3]
    stride = [2, 2, 2]
    batch = 2

    key = jax.random.PRNGKey(0)
    key, kx, kp = jax.random.split(key, 3)
    x = jax.random.normal(kx, (batch, *obs_shape), dtype=jnp.float32)
    params = make_params(kp, obs_shape, hidden_size_list, kernel_size, stride)
    ref = reference_forward(x, params, kernel_size, stride)

    # 1) f32 compute path — tight numerical check against the XLA reference.
    prep_f32 = prepare_params(params, obs_shape, hidden_size_list, kernel_size,
                              stride, compute_dtype=jnp.float32)
    out_f32 = jax.block_until_ready(conv_encoder_forward(x, prep_f32))
    assert out_f32.shape == (batch, hidden_size_list[-1]), out_f32.shape
    assert jnp.allclose(out_f32, ref, atol=2e-4, rtol=2e-4), \
        float(jnp.max(jnp.abs(out_f32 - ref)))

    # 2) bf16 compute / f32 accumulate (MXU fast path) — loose check.
    prep_bf16 = prepare_params(params, obs_shape, hidden_size_list, kernel_size,
                               stride, compute_dtype=jnp.bfloat16)
    out_bf16 = jax.block_until_ready(conv_encoder_forward(x, prep_bf16))
    assert out_bf16.shape == (batch, hidden_size_list[-1]), out_bf16.shape
    assert jnp.allclose(out_bf16, ref, atol=1.5e-1, rtol=1.5e-1), \
        float(jnp.max(jnp.abs(out_bf16 - ref)))

    print("KERNEL_OK")
</pallas_src>

<mosaic_0001>
module attributes {stable_mosaic.version = 11 : i64} {
  func.func @_encoder_kernel(%arg0: i32, %arg1: memref<56x8x128xf32, #tpu.memory_space<vmem>>, %arg2: memref<128x128xf32, #tpu.memory_space<vmem>>, %arg3: memref<1x128xf32, #tpu.memory_space<vmem>>, %arg4: memref<9x128x128xf32, #tpu.memory_space<vmem>>, %arg5: memref<1x128xf32, #tpu.memory_space<vmem>>, %arg6: memref<9x128x128xf32, #tpu.memory_space<vmem>>, %arg7: memref<1x128xf32, #tpu.memory_space<vmem>>, %arg8: memref<1x128x128xf32, #tpu.memory_space<vmem>>, %arg9: memref<1x128xf32, #tpu.memory_space<vmem>>, %arg10: memref<8x128xf32, #tpu.memory_space<vmem>>, %arg11: memref<56x8x128xf32, #tpu.memory_space<vmem>>, %arg12: memref<9x8x128xf32, #tpu.memory_space<vmem>>, %arg13: memref<1x8x128xf32, #tpu.memory_space<vmem>>) attributes {dimension_semantics = [#tpu.dimension_semantics<parallel>], iteration_bounds = array<i64: 1>, scalar_prefetch = 0 : i64, scratch_operands = 3 : i64, tpu.core_type = #tpu.core_type<tc>, window_params = [{transform_indices = @transform_0, window_bounds = array<i64: 56, 8, 128>}, {pipeline_mode = #tpu.pipeline_mode<synchronous>, transform_indices = @transform_1, window_bounds = array<i64: 128, 128>}, {pipeline_mode = #tpu.pipeline_mode<synchronous>, transform_indices = @transform_2, window_bounds = array<i64: 1, 128>}, {pipeline_mode = #tpu.pipeline_mode<synchronous>, transform_indices = @transform_3, window_bounds = array<i64: 9, 128, 128>}, {pipeline_mode = #tpu.pipeline_mode<synchronous>, transform_indices = @transform_4, window_bounds = array<i64: 1, 128>}, {pipeline_mode = #tpu.pipeline_mode<synchronous>, transform_indices = @transform_5, window_bounds = array<i64: 9, 128, 128>}, {pipeline_mode = #tpu.pipeline_mode<synchronous>, transform_indices = @transform_6, window_bounds = array<i64: 1, 128>}, {pipeline_mode = #tpu.pipeline_mode<synchronous>, transform_indices = @transform_7, window_bounds = array<i64: 1, 128, 128>}, {pipeline_mode = #tpu.pipeline_mode<synchronous>, transform_indices = @transform_8, window_bounds = array<i64: 1, 128>}, {transform_indices = @transform_9, window_bounds = array<i64: 8, 128>}]} {
    %c0 = arith.constant 0 : index
    %c0_0 = arith.constant 0 : index
    %c0_1 = arith.constant 0 : index
    %0 = vector.load %arg1[%c0, %c0_0, %c0_1] : memref<56x8x128xf32, #tpu.memory_space<vmem>>, vector<56x8x128xf32>
    %1 = vector.shape_cast %0 : vector<56x8x128xf32> to vector<448x128xf32>
    %c0_2 = arith.constant 0 : index
    %c0_3 = arith.constant 0 : index
    %2 = vector.load %arg2[%c0_2, %c0_3] : memref<128x128xf32, #tpu.memory_space<vmem>>, vector<128x128xf32>
    %cst = arith.constant dense<0.000000e+00> : vector<448x128xf32>
    %3 = tpu.matmul %1, %2, %cst {dimension_numbers = #tpu.dot_dimension_numbers<[1], [0], [0], [1], [0, 0, 1, 1], [], []>} : vector<448x128xf32>, vector<128x128xf32>, vector<448x128xf32> -> vector<448x128xf32>
    %c0_4 = arith.constant 0 : index
    %c0_5 = arith.constant 0 : index
    %4 = vector.load %arg3[%c0_4, %c0_5] : memref<1x128xf32, #tpu.memory_space<vmem>>, vector<1x128xf32>
    %5 = vector.broadcast %4 : vector<1x128xf32> to vector<448x128xf32>
    %6 = arith.addf %3, %5 : vector<448x128xf32>
    %cst_6 = arith.constant 0.000000e+00 : f32
    %7 = vector.broadcast %cst_6 : f32 to vector<448x128xf32>
    %8 = arith.maximumf %6, %7 : vector<448x128xf32>
    %9 = vector.shape_cast %8 : vector<448x128xf32> to vector<56x8x128xf32>
    %c0_7 = arith.constant 0 : index
    %c0_8 = arith.constant 0 : index
    %c0_9 = arith.constant 0 : index
    %10 = vector.load %arg11[%c0_7, %c0_8, %c0_9] : memref<56x8x128xf32, #tpu.memory_space<vmem>>, vector<56x8x128xf32>
    tpu.vector_store %arg11[%c0_7, %c0_8, %c0_9], %9 {strides = array<i32>} : memref<56x8x128xf32, #tpu.memory_space<vmem>>, vector<56x8x128xf32>,
    %c0_10 = arith.constant 0 : index
    %c0_11 = arith.constant 0 : index
    %11 = vector.load %arg5[%c0_10, %c0_11] : memref<1x128xf32, #tpu.memory_space<vmem>>, vector<1x128xf32>
    %cst_12 = arith.constant 0.000000e+00 : f32
    %12 = vector.broadcast %cst_12 : f32 to vector<8x128xf32>
    %c0_13 = arith.constant 0 : index
    %c0_14 = arith.constant 0 : index
    %c0_15 = arith.constant 0 : index
    %13 = vector.load %arg11[%c0_13, %c0_14, %c0_15] : memref<56x8x128xf32, #tpu.memory_space<vmem>>, vector<1x8x128xf32>
    %14 = vector.shape_cast %13 : vector<1x8x128xf32> to vector<8x128xf32>
    %c0_16 = arith.constant 0 : index
    %c0_17 = arith.constant 0 : index
    %c0_18 = arith.constant 0 : index
    %15 = vector.load %arg4[%c0_16, %c0_17, %c0_18] : memref<9x128x128xf32, #tpu.memory_space<vmem>>, vector<1x128x128xf32>
    %16 = vector.shape_cast %15 : vector<1x128x128xf32> to vector<128x128xf32>
    %cst_19 = arith.constant dense<0.000000e+00> : vector<8x128xf32>
    %17 = tpu.matmul %14, %16, %cst_19 {dimension_numbers = #tpu.dot_dimension_numbers<[1], [0], [0], [1], [0, 0, 1, 1], [], []>} : vector<8x128xf32>, vector<128x128xf32>, vector<8x128xf32> -> vector<8x128xf32>
    %18 = arith.addf %12, %17 : vector<8x128xf32>
    %c1 = arith.constant 1 : index
    %c0_20 = arith.constant 0 : index
    %c0_21 = arith.constant 0 : index
    %19 = vector.load %arg11[%c1, %c0_20, %c0_21] : memref<56x8x128xf32, #tpu.memory_space<vmem>>, vector<1x8x128xf32>
    %20 = vector.shape_cast %19 : vector<1x8x128xf32> to vector<8x128xf32>
    %c1_22 = arith.constant 1 : index
    %c0_23 = arith.constant 0 : index
    %c0_24 = arith.constant 0 : index
    %21 = vector.load %arg4[%c1_22, %c0_23, %c0_24] : memref<9x128x128xf32, #tpu.memory_space<vmem>>, vector<1x128x128xf32>
    %22 = vector.shape_cast %21 : vector<1x128x128xf32> to vector<128x128xf32>
    %cst_25 = arith.constant dense<0.000000e+00> : vector<8x128xf32>
    %23 = tpu.matmul %20, %22, %cst_25 {dimension_numbers = #tpu.dot_dimension_numbers<[1], [0], [0], [1], [0, 0, 1, 1], [], []>} : vector<8x128xf32>, vector<128x128xf32>, vector<8x128xf32> -> vector<8x128xf32>
    %24 = arith.addf %18, %23 : vector<8x128xf32>
    %c2 = arith.constant 2 : index
    %c0_26 = arith.constant 0 : index
    %c0_27 = arith.constant 0 : index
    %25 = vector.load %arg11[%c2, %c0_26, %c0_27] : memref<56x8x128xf32, #tpu.memory_space<vmem>>, vector<1x8x128xf32>
    %26 = vector.shape_cast %25 : vector<1x8x128xf32> to vector<8x128xf32>
    %c2_28 = arith.constant 2 : index
    %c0_29 = arith.constant 0 : index
    %c0_30 = arith.constant 0 : index
    %27 = vector.load %arg4[%c2_28, %c0_29, %c0_30] : memref<9x128x128xf32, #tpu.memory_space<vmem>>, vector<1x128x128xf32>
    %28 = vector.shape_cast %27 : vector<1x128x128xf32> to vector<128x128xf32>
    %cst_31 = arith.constant dense<0.000000e+00> : vector<8x128xf32>
    %29 = tpu.matmul %26, %28, %cst_31 {dimension_numbers = #tpu.dot_dimension_numbers<[1], [0], [0], [1], [0, 0, 1, 1], [], []>} : vector<8x128xf32>, vector<128x128xf32>, vector<8x128xf32> -> vector<8x128xf32>
    %30 = arith.addf %24, %29 : vector<8x128xf32>
    %c7 = arith.constant 7 : index
    %c0_32 = arith.constant 0 : index
    %c0_33 = arith.constant 0 : index
    %31 = vector.load %arg11[%c7, %c0_32, %c0_33] : memref<56x8x128xf32, #tpu.memory_space<vmem>>, vector<1x8x128xf32>
    %32 = vector.shape_cast %31 : vector<1x8x128xf32> to vector<8x128xf32>
    %c3 = arith.constant 3 : index
    %c0_34 = arith.constant 0 : index
    %c0_35 = arith.constant 0 : index
    %33 = vector.load %arg4[%c3, %c0_34, %c0_35] : memref<9x128x128xf32, #tpu.memory_space<vmem>>, vector<1x128x128xf32>
    %34 = vector.shape_cast %33 : vector<1x128x128xf32> to vector<128x128xf32>
    %cst_36 = arith.constant dense<0.000000e+00> : vector<8x128xf32>
    %35 = tpu.matmul %32, %34, %cst_36 {dimension_numbers = #tpu.dot_dimension_numbers<[1], [0], [0], [1], [0, 0, 1, 1], [], []>} : vector<8x128xf32>, vector<128x128xf32>, vector<8x128xf32> -> vector<8x128xf32>
    %36 = arith.addf %30, %35 : vector<8x128xf32>
    %c8 = arith.constant 8 : index
    %c0_37 = arith.constant 0 : index
    %c0_38 = arith.constant 0 : index
    %37 = vector.load %arg11[%c8, %c0_37, %c0_38] : memref<56x8x128xf32, #tpu.memory_space<vmem>>, vector<1x8x128xf32>
    %38 = vector.shape_cast %37 : vector<1x8x128xf32> to vector<8x128xf32>
    %c4 = arith.constant 4 : index
    %c0_39 = arith.constant 0 : index
    %c0_40 = arith.constant 0 : index
    %39 = vector.load %arg4[%c4, %c0_39, %c0_40] : memref<9x128x128xf32, #tpu.memory_space<vmem>>, vector<1x128x128xf32>
    %40 = vector.shape_cast %39 : vector<1x128x128xf32> to vector<128x128xf32>
    %cst_41 = arith.constant dense<0.000000e+00> : vector<8x128xf32>
    %41 = tpu.matmul %38, %40, %cst_41 {dimension_numbers = #tpu.dot_dimension_numbers<[1], [0], [0], [1], [0, 0, 1, 1], [], []>} : vector<8x128xf32>, vector<128x128xf32>, vector<8x128xf32> -> vector<8x128xf32>
    %42 = arith.addf %36, %41 : vector<8x128xf32>
    %c9 = arith.constant 9 : index
    %c0_42 = arith.constant 0 : index
    %c0_43 = arith.constant 0 : index
    %43 = vector.load %arg11[%c9, %c0_42, %c0_43] : memref<56x8x128xf32, #tpu.memory_space<vmem>>, vector<1x8x128xf32>
    %44 = vector.shape_cast %43 : vector<1x8x128xf32> to vector<8x128xf32>
    %c5 = arith.constant 5 : index
    %c0_44 = arith.constant 0 : index
    %c0_45 = arith.constant 0 : index
    %45 = vector.load %arg4[%c5, %c0_44, %c0_45] : memref<9x128x128xf32, #tpu.memory_space<vmem>>, vector<1x128x128xf32>
    %46 = vector.shape_cast %45 : vector<1x128x128xf32> to vector<128x128xf32>
    %cst_46 = arith.constant dense<0.000000e+00> : vector<8x128xf32>
    %47 = tpu.matmul %44, %46, %cst_46 {dimension_numbers = #tpu.dot_dimension_numbers<[1], [0], [0], [1], [0, 0, 1, 1], [], []>} : vector<8x128xf32>, vector<128x128xf32>, vector<8x128xf32> -> vector<8x128xf32>
    %48 = arith.addf %42, %47 : vector<8x128xf32>
    %c14 = arith.constant 14 : index
    %c0_47 = arith.constant 0 : index
    %c0_48 = arith.constant 0 : index
    %49 = vector.load %arg11[%c14, %c0_47, %c0_48] : memref<56x8x128xf32, #tpu.memory_space<vmem>>, vector<1x8x128xf32>
    %50 = vector.shape_cast %49 : vector<1x8x128xf32> to vector<8x128xf32>
    %c6 = arith.constant 6 : index
    %c0_49 = arith.constant 0 : index
    %c0_50 = arith.constant 0 : index
    %51 = vector.load %arg4[%c6, %c0_49, %c0_50] : memref<9x128x128xf32, #tpu.memory_space<vmem>>, vector<1x128x128xf32>
    %52 = vector.shape_cast %51 : vector<1x128x128xf32> to vector<128x128xf32>
    %cst_51 = arith.constant dense<0.000000e+00> : vector<8x128xf32>
    %53 = tpu.matmul %50, %52, %cst_51 {dimension_numbers = #tpu.dot_dimension_numbers<[1], [0], [0], [1], [0, 0, 1, 1], [], []>} : vector<8x128xf32>, vector<128x128xf32>, vector<8x128xf32> -> vector<8x128xf32>
    %54 = arith.addf %48, %53 : vector<8x128xf32>
    %c15 = arith.constant 15 : index
    %c0_52 = arith.constant 0 : index
    %c0_53 = arith.constant 0 : index
    %55 = vector.load %arg11[%c15, %c0_52, %c0_53] : memref<56x8x128xf32, #tpu.memory_space<vmem>>, vector<1x8x128xf32>
    %56 = vector.shape_cast %55 : vector<1x8x128xf32> to vector<8x128xf32>
    %c7_54 = arith.constant 7 : index
    %c0_55 = arith.constant 0 : index
    %c0_56 = arith.constant 0 : index
    %57 = vector.load %arg4[%c7_54, %c0_55, %c0_56] : memref<9x128x128xf32, #tpu.memory_space<vmem>>, vector<1x128x128xf32>
    %58 = vector.shape_cast %57 : vector<1x128x128xf32> to vector<128x128xf32>
    %cst_57 = arith.constant dense<0.000000e+00> : vector<8x128xf32>
    %59 = tpu.matmul %56, %58, %cst_57 {dimension_numbers = #tpu.dot_dimension_numbers<[1], [0], [0], [1], [0, 0, 1, 1], [], []>} : vector<8x128xf32>, vector<128x128xf32>, vector<8x128xf32> -> vector<8x128xf32>
    %60 = arith.addf %54, %59 : vector<8x128xf32>
    %c16 = arith.constant 16 : index
    %c0_58 = arith.constant 0 : index
    %c0_59 = arith.constant 0 : index
    %61 = vector.load %arg11[%c16, %c0_58, %c0_59] : memref<56x8x128xf32, #tpu.memory_space<vmem>>, vector<1x8x128xf32>
    %62 = vector.shape_cast %61 : vector<1x8x128xf32> to vector<8x128xf32>
    %c8_60 = arith.constant 8 : index
    %c0_61 = arith.constant 0 : index
    %c0_62 = arith.constant 0 : index
    %63 = vector.load %arg4[%c8_60, %c0_61, %c0_62] : memref<9x128x128xf32, #tpu.memory_space<vmem>>, vector<1x128x128xf32>
    %64 = vector.shape_cast %63 : vector<1x128x128xf32> to vector<128x128xf32>
    %cst_63 = arith.constant dense<0.000000e+00> : vector<8x128xf32>
    %65 = tpu.matmul %62, %64, %cst_63 {dimension_numbers = #tpu.dot_dimension_numbers<[1], [0], [0], [1], [0, 0, 1, 1], [], []>} : vector<8x128xf32>, vector<128x128xf32>, vector<8x128xf32> -> vector<8x128xf32>
    %66 = arith.addf %60, %65 : vector<8x128xf32>
    %67 = vector.broadcast %11 : vector<1x128xf32> to vector<8x128xf32>
    %68 = arith.addf %66, %67 : vector<8x128xf32>
    %cst_64 = arith.constant 0.000000e+00 : f32
    %69 = vector.broadcast %cst_64 : f32 to vector<8x128xf32>
    %70 = arith.maximumf %68, %69 : vector<8x128xf32>
    %c0_65 = arith.constant 0 : index
    %c0_66 = arith.constant 0 : index
    %c0_67 = arith.constant 0 : index
    %71 = vector.load %arg12[%c0_65, %c0_66, %c0_67] : memref<9x8x128xf32, #tpu.memory_space<vmem>>, vector<1x8x128xf32>
    %72 = vector.shape_cast %71 : vector<1x8x128xf32> to vector<8x128xf32>
    %73 = vector.shape_cast %70 : vector<8x128xf32> to vector<1x8x128xf32>
    tpu.vector_store %arg12[%c0_65, %c0_66, %c0_67], %73 {strides = array<i32>} : memref<9x8x128xf32, #tpu.memory_space<vmem>>, vector<1x8x128xf32>,
    %cst_68 = arith.constant 0.000000e+00 : f32
    %74 = vector.broadcast %cst_68 : f32 to vector<8x128xf32>
    %c2_69 = arith.constant 2 : index
    %c0_70 = arith.constant 0 : index
    %c0_71 = arith.constant 0 : index
    %75 = vector.load %arg11[%c2_69, %c0_70, %c0_71] : memref<56x8x128xf32, #tpu.memory_space<vmem>>, vector<1x8x128xf32>
    %76 = vector.shape_cast %75 : vector<1x8x128xf32> to vector<8x128xf32>
    %c0_72 = arith.constant 0 : index
    %c0_73 = arith.constant 0 : index
    %c0_74 = arith.constant 0 : index
    %77 = vector.load %arg4[%c0_72, %c0_73, %c0_74] : memref<9x128x128xf32, #tpu.memory_space<vmem>>, vector<1x128x128xf32>
    %78 = vector.shape_cast %77 : vector<1x128x128xf32> to vector<128x128xf32>
    %cst_75 = arith.constant dense<0.000000e+00> : vector<8x128xf32>
    %79 = tpu.matmul %76, %78, %cst_75 {dimension_numbers = #tpu.dot_dimension_numbers<[1], [0], [0], [1], [0, 0, 1, 1], [], []>} : vector<8x128xf32>, vector<128x128xf32>, vector<8x128xf32> -> vector<8x128xf32>
    %80 = arith.addf %74, %79 : vector<8x128xf32>
    %c3_76 = arith.constant 3 : index
    %c0_77 = arith.constant 0 : index
    %c0_78 = arith.constant 0 : index
    %81 = vector.load %arg11[%c3_76, %c0_77, %c0_78] : memref<56x8x128xf32, #tpu.memory_space<vmem>>, vector<1x8x128xf32>
    %82 = vector.shape_cast %81 : vector<1x8x128xf32> to vector<8x128xf32>
    %c1_79 = arith.constant 1 : index
    %c0_80 = arith.constant 0 : index
    %c0_81 = arith.constant 0 : index
    %83 = vector.load %arg4[%c1_79, %c0_80, %c0_81] : memref<9x128x128xf32, #tpu.memory_space<vmem>>, vector<1x128x128xf32>
    %84 = vector.shape_cast %83 : vector<1x128x128xf32> to vector<128x128xf32>
    %cst_82 = arith.constant dense<0.000000e+00> : vector<8x128xf32>
    %85 = tpu.matmul %82, %84, %cst_82 {dimension_numbers = #tpu.dot_dimension_numbers<[1], [0], [0], [1], [0, 0, 1, 1], [], []>} : vector<8x128xf32>, vector<128x128xf32>, vector<8x128xf32> -> vector<8x128xf32>
    %86 = arith.addf %80, %85 : vector<8x128xf32>
    %c4_83 = arith.constant 4 : index
    %c0_84 = arith.constant 0 : index
    %c0_85 = arith.constant 0 : index
    %87 = vector.load %arg11[%c4_83, %c0_84, %c0_85] : memref<56x8x128xf32, #tpu.memory_space<vmem>>, vector<1x8x128xf32>
    %88 = vector.shape_cast %87 : vector<1x8x128xf32> to vector<8x128xf32>
    %c2_86 = arith.constant 2 : index
    %c0_87 = arith.constant 0 : index
    %c0_88 = arith.constant 0 : index
    %89 = vector.load %arg4[%c2_86, %c0_87, %c0_88] : memref<9x128x128xf32, #tpu.memory_space<vmem>>, vector<1x128x128xf32>
    %90 = vector.shape_cast %89 : vector<1x128x128xf32> to vector<128x128xf32>
    %cst_89 = arith.constant dense<0.000000e+00> : vector<8x128xf32>
    %91 = tpu.matmul %88, %90, %cst_89 {dimension_numbers = #tpu.dot_dimension_numbers<[1], [0], [0], [1], [0, 0, 1, 1], [], []>} : vector<8x128xf32>, vector<128x128xf32>, vector<8x128xf32> -> vector<8x128xf32>
    %92 = arith.addf %86, %91 : vector<8x128xf32>
    %c9_90 = arith.constant 9 : index
    %c0_91 = arith.constant 0 : index
    %c0_92 = arith.constant 0 : index
    %93 = vector.load %arg11[%c9_90, %c0_91, %c0_92] : memref<56x8x128xf32, #tpu.memory_space<vmem>>, vector<1x8x128xf32>
    %94 = vector.shape_cast %93 : vector<1x8x128xf32> to vector<8x128xf32>
    %c3_93 = arith.constant 3 : index
    %c0_94 = arith.constant 0 : index
    %c0_95 = arith.constant 0 : index
    %95 = vector.load %arg4[%c3_93, %c0_94, %c0_95] : memref<9x128x128xf32, #tpu.memory_space<vmem>>, vector<1x128x128xf32>
    %96 = vector.shape_cast %95 : vector<1x128x128xf32> to vector<128x128xf32>
    %cst_96 = arith.constant dense<0.000000e+00> : vector<8x128xf32>
    %97 = tpu.matmul %94, %96, %cst_96 {dimension_numbers = #tpu.dot_dimension_numbers<[1], [0], [0], [1], [0, 0, 1, 1], [], []>} : vector<8x128xf32>, vector<128x128xf32>, vector<8x128xf32> -> vector<8x128xf32>
    %98 = arith.addf %92, %97 : vector<8x128xf32>
    %c10 = arith.constant 10 : index
    %c0_97 = arith.constant 0 : index
    %c0_98 = arith.constant 0 : index
    %99 = vector.load %arg11[%c10, %c0_97, %c0_98] : memref<56x8x128xf32, #tpu.memory_space<vmem>>, vector<1x8x128xf32>
    %100 = vector.shape_cast %99 : vector<1x8x128xf32> to vector<8x128xf32>
    %c4_99 = arith.constant 4 : index
    %c0_100 = arith.constant 0 : index
    %c0_101 = arith.constant 0 : index
    %101 = vector.load %arg4[%c4_99, %c0_100, %c0_101] : memref<9x128x128xf32, #tpu.memory_space<vmem>>, vector<1x128x128xf32>
    %102 = vector.shape_cast %101 : vector<1x128x128xf32> to vector<128x128xf32>
    %cst_102 = arith.constant dense<0.000000e+00> : vector<8x128xf32>
    %103 = tpu.matmul %100, %102, %cst_102 {dimension_numbers = #tpu.dot_dimension_numbers<[1], [0], [0], [1], [0, 0, 1, 1], [], []>} : vector<8x128xf32>, vector<128x128xf32>, vector<8x128xf32> -> vector<8x128xf32>
    %104 = arith.addf %98, %103 : vector<8x128xf32>
    %c11 = arith.constant 11 : index
    %c0_103 = arith.constant 0 : index
    %c0_104 = arith.constant 0 : index
    %105 = vector.load %arg11[%c11, %c0_103, %c0_104] : memref<56x8x128xf32, #tpu.memory_space<vmem>>, vector<1x8x128xf32>
    %106 = vector.shape_cast %105 : vector<1x8x128xf32> to vector<8x128xf32>
    %c5_105 = arith.constant 5 : index
    %c0_106 = arith.constant 0 : index
    %c0_107 = arith.constant 0 : index
    %107 = vector.load %arg4[%c5_105, %c0_106, %c0_107] : memref<9x128x128xf32, #tpu.memory_space<vmem>>, vector<1x128x128xf32>
    %108 = vector.shape_cast %107 : vector<1x128x128xf32> to vector<128x128xf32>
    %cst_108 = arith.constant dense<0.000000e+00> : vector<8x128xf32>
    %109 = tpu.matmul %106, %108, %cst_108 {dimension_numbers = #tpu.dot_dimension_numbers<[1], [0], [0], [1], [0, 0, 1, 1], [], []>} : vector<8x128xf32>, vector<128x128xf32>, vector<8x128xf32> -> vector<8x128xf32>
    %110 = arith.addf %104, %109 : vector<8x128xf32>
    %c16_109 = arith.constant 16 : index
    %c0_110 = arith.constant 0 : index
    %c0_111 = arith.constant 0 : index
    %111 = vector.load %arg11[%c16_109, %c0_110, %c0_111] : memref<56x8x128xf32, #tpu.memory_space<vmem>>, vector<1x8x128xf32>
    %112 = vector.shape_cast %111 : vector<1x8x128xf32> to vector<8x128xf32>
    %c6_112 = arith.constant 6 : index
    %c0_113 = arith.constant 0 : index
    %c0_114 = arith.constant 0 : index
    %113 = vector.load %arg4[%c6_112, %c0_113, %c0_114] : memref<9x128x128xf32, #tpu.memory_space<vmem>>, vector<1x128x128xf32>
    %114 = vector.shape_cast %113 : vector<1x128x128xf32> to vector<128x128xf32>
    %cst_115 = arith.constant dense<0.000000e+00> : vector<8x128xf32>
    %115 = tpu.matmul %112, %114, %cst_115 {dimension_numbers = #tpu.dot_dimension_numbers<[1], [0], [0], [1], [0, 0, 1, 1], [], []>} : vector<8x128xf32>, vector<128x128xf32>, vector<8x128xf32> -> vector<8x128xf32>
    %116 = arith.addf %110, %115 : vector<8x128xf32>
    %c17 = arith.constant 17 : index
    %c0_116 = arith.constant 0 : index
    %c0_117 = arith.constant 0 : index
    %117 = vector.load %arg11[%c17, %c0_116, %c0_117] : memref<56x8x128xf32, #tpu.memory_space<vmem>>, vector<1x8x128xf32>
    %118 = vector.shape_cast %117 : vector<1x8x128xf32> to vector<8x128xf32>
    %c7_118 = arith.constant 7 : index
    %c0_119 = arith.constant 0 : index
    %c0_120 = arith.constant 0 : index
    %119 = vector.load %arg4[%c7_118, %c0_119, %c0_120] : memref<9x128x128xf32, #tpu.memory_space<vmem>>, vector<1x128x128xf32>
    %120 = vector.shape_cast %119 : vector<1x128x128xf32> to vector<128x128xf32>
    %cst_121 = arith.constant dense<0.000000e+00> : vector<8x128xf32>
    %121 = tpu.matmul %118, %120, %cst_121 {dimension_numbers = #tpu.dot_dimension_numbers<[1], [0], [0], [1], [0, 0, 1, 1], [], []>} : vector<8x128xf32>, vector<128x128xf32>, vector<8x128xf32> -> vector<8x128xf32>
    %122 = arith.addf %116, %121 : vector<8x128xf32>
    %c18 = arith.constant 18 : index
    %c0_122 = arith.constant 0 : index
    %c0_123 = arith.constant 0 : index
    %123 = vector.load %arg11[%c18, %c0_122, %c0_123] : memref<56x8x128xf32, #tpu.memory_space<vmem>>, vector<1x8x128xf32>
    %124 = vector.shape_cast %123 : vector<1x8x128xf32> to vector<8x128xf32>
    %c8_124 = arith.constant 8 : index
    %c0_125 = arith.constant 0 : index
    %c0_126 = arith.constant 0 : index
    %125 = vector.load %arg4[%c8_124, %c0_125, %c0_126] : memref<9x128x128xf32, #tpu.memory_space<vmem>>, vector<1x128x128xf32>
    %126 = vector.shape_cast %125 : vector<1x128x128xf32> to vector<128x128xf32>
    %cst_127 = arith.constant dense<0.000000e+00> : vector<8x128xf32>
    %127 = tpu.matmul %124, %126, %cst_127 {dimension_numbers = #tpu.dot_dimension_numbers<[1], [0], [0], [1], [0, 0, 1, 1], [], []>} : vector<8x128xf32>, vector<128x128xf32>, vector<8x128xf32> -> vector<8x128xf32>
    %128 = arith.addf %122, %127 : vector<8x128xf32>
    %129 = vector.broadcast %11 : vector<1x128xf32> to vector<8x128xf32>
    %130 = arith.addf %128, %129 : vector<8x128xf32>
    %cst_128 = arith.constant 0.000000e+00 : f32
    %131 = vector.broadcast %cst_128 : f32 to vector<8x128xf32>
    %132 = arith.maximumf %130, %131 : vector<8x128xf32>
    %c1_129 = arith.constant 1 : index
    %c0_130 = arith.constant 0 : index
    %c0_131 = arith.constant 0 : index
    %133 = vector.load %arg12[%c1_129, %c0_130, %c0_131] : memref<9x8x128xf32, #tpu.memory_space<vmem>>, vector<1x8x128xf32>
    %134 = vector.shape_cast %133 : vector<1x8x128xf32> to vector<8x128xf32>
    %135 = vector.shape_cast %132 : vector<8x128xf32> to vector<1x8x128xf32>
    tpu.vector_store %arg12[%c1_129, %c0_130, %c0_131], %135 {strides = array<i32>} : memref<9x8x128xf32, #tpu.memory_space<vmem>>, vector<1x8x128xf32>,
    %cst_132 = arith.constant 0.000000e+00 : f32
    %136 = vector.broadcast %cst_132 : f32 to vector<8x128xf32>
    %c4_133 = arith.constant 4 : index
    %c0_134 = arith.constant 0 : index
    %c0_135 = arith.constant 0 : index
    %137 = vector.load %arg11[%c4_133, %c0_134, %c0_135] : memref<56x8x128xf32, #tpu.memory_space<vmem>>, vector<1x8x128xf32>
    %138 = vector.shape_cast %137 : vector<1x8x128xf32> to vector<8x128xf32>
    %c0_136 = arith.constant 0 : index
    %c0_137 = arith.constant 0 : index
    %c0_138 = arith.constant 0 : index
    %139 = vector.load %arg4[%c0_136, %c0_137, %c0_138] : memref<9x128x128xf32, #tpu.memory_space<vmem>>, vector<1x128x128xf32>
    %140 = vector.shape_cast %139 : vector<1x128x128xf32> to vector<128x128xf32>
    %cst_139 = arith.constant dense<0.000000e+00> : vector<8x128xf32>
    %141 = tpu.matmul %138, %140, %cst_139 {dimension_numbers = #tpu.dot_dimension_numbers<[1], [0], [0], [1], [0, 0, 1, 1], [], []>} : vector<8x128xf32>, vector<128x128xf32>, vector<8x128xf32> -> vector<8x128xf32>
    %142 = arith.addf %136, %141 : vector<8x128xf32>
    %c5_140 = arith.constant 5 : index
    %c0_141 = arith.constant 0 : index
    %c0_142 = arith.constant 0 : index
    %143 = vector.load %arg11[%c5_140, %c0_141, %c0_142] : memref<56x8x128xf32, #tpu.memory_space<vmem>>, vector<1x8x128xf32>
    %144 = vector.shape_cast %143 : vector<1x8x128xf32> to vector<8x128xf32>
    %c1_143 = arith.constant 1 : index
    %c0_144 = arith.constant 0 : index
    %c0_145 = arith.constant 0 : index
    %145 = vector.load %arg4[%c1_143, %c0_144, %c0_145] : memref<9x128x128xf32, #tpu.memory_space<vmem>>, vector<1x128x128xf32>
    %146 = vector.shape_cast %145 : vector<1x128x128xf32> to vector<128x128xf32>
    %cst_146 = arith.constant dense<0.000000e+00> : vector<8x128xf32>
    %147 = tpu.matmul %144, %146, %cst_146 {dimension_numbers = #tpu.dot_dimension_numbers<[1], [0], [0], [1], [0, 0, 1, 1], [], []>} : vector<8x128xf32>, vector<128x128xf32>, vector<8x128xf32> -> vector<8x128xf32>
    %148 = arith.addf %142, %147 : vector<8x128xf32>
    %c6_147 = arith.constant 6 : index
    %c0_148 = arith.constant 0 : index
    %c0_149 = arith.constant 0 : index
    %149 = vector.load %arg11[%c6_147, %c0_148, %c0_149] : memref<56x8x128xf32, #tpu.memory_space<vmem>>, vector<1x8x128xf32>
    %150 = vector.shape_cast %149 : vector<1x8x128xf32> to vector<8x128xf32>
    %c2_150 = arith.constant 2 : index
    %c0_151 = arith.constant 0 : index
    %c0_152 = arith.constant 0 : index
    %151 = vector.load %arg4[%c2_150, %c0_151, %c0_152] : memref<9x128x128xf32, #tpu.memory_space<vmem>>, vector<1x128x128xf32>
    %152 = vector.shape_cast %151 : vector<1x128x128xf32> to vector<128x128xf32>
    %cst_153 = arith.constant dense<0.000000e+00> : vector<8x128xf32>
    %153 = tpu.matmul %150, %152, %cst_153 {dimension_numbers = #tpu.dot_dimension_numbers<[1], [0], [0], [1], [0, 0, 1, 1], [], []>} : vector<8x128xf32>, vector<128x128xf32>, vector<8x128xf32> -> vector<8x128xf32>
    %154 = arith.addf %148, %153 : vector<8x128xf32>
    %c11_154 = arith.constant 11 : index
    %c0_155 = arith.constant 0 : index
    %c0_156 = arith.constant 0 : index
    %155 = vector.load %arg11[%c11_154, %c0_155, %c0_156] : memref<56x8x128xf32, #tpu.memory_space<vmem>>, vector<1x8x128xf32>
    %156 = vector.shape_cast %155 : vector<1x8x128xf32> to vector<8x128xf32>
    %c3_157 = arith.constant 3 : index
    %c0_158 = arith.constant 0 : index
    %c0_159 = arith.constant 0 : index
    %157 = vector.load %arg4[%c3_157, %c0_158, %c0_159] : memref<9x128x128xf32, #tpu.memory_space<vmem>>, vector<1x128x128xf32>
    %158 = vector.shape_cast %157 : vector<1x128x128xf32> to vector<128x128xf32>
    %cst_160 = arith.constant dense<0.000000e+00> : vector<8x128xf32>
    %159 = tpu.matmul %156, %158, %cst_160 {dimension_numbers = #tpu.dot_dimension_numbers<[1], [0], [0], [1], [0, 0, 1, 1], [], []>} : vector<8x128xf32>, vector<128x128xf32>, vector<8x128xf32> -> vector<8x128xf32>
    %160 = arith.addf %154, %159 : vector<8x128xf32>
    %c12 = arith.constant 12 : index
    %c0_161 = arith.constant 0 : index
    %c0_162 = arith.constant 0 : index
    %161 = vector.load %arg11[%c12, %c0_161, %c0_162] : memref<56x8x128xf32, #tpu.memory_space<vmem>>, vector<1x8x128xf32>
    %162 = vector.shape_cast %161 : vector<1x8x128xf32> to vector<8x128xf32>
    %c4_163 = arith.constant 4 : index
    %c0_164 = arith.constant 0 : index
    %c0_165 = arith.constant 0 : index
    %163 = vector.load %arg4[%c4_163, %c0_164, %c0_165] : memref<9x128x128xf32, #tpu.memory_space<vmem>>, vector<1x128x128xf32>
    %164 = vector.shape_cast %163 : vector<1x128x128xf32> to vector<128x128xf32>
    %cst_166 = arith.constant dense<0.000000e+00> : vector<8x128xf32>
    %165 = tpu.matmul %162, %164, %cst_166 {dimension_numbers = #tpu.dot_dimension_numbers<[1], [0], [0], [1], [0, 0, 1, 1], [], []>} : vector<8x128xf32>, vector<128x128xf32>, vector<8x128xf32> -> vector<8x128xf32>
    %166 = arith.addf %160, %165 : vector<8x128xf32>
    %c13 = arith.constant 13 : index
    %c0_167 = arith.constant 0 : index
    %c0_168 = arith.constant 0 : index
    %167 = vector.load %arg11[%c13, %c0_167, %c0_168] : memref<56x8x128xf32, #tpu.memory_space<vmem>>, vector<1x8x128xf32>
    %168 = vector.shape_cast %167 : vector<1x8x128xf32> to vector<8x128xf32>
    %c5_169 = arith.constant 5 : index
    %c0_170 = arith.constant 0 : index
    %c0_171 = arith.constant 0 : index
    %169 = vector.load %arg4[%c5_169, %c0_170, %c0_171] : memref<9x128x128xf32, #tpu.memory_space<vmem>>, vector<1x128x128xf32>
    %170 = vector.shape_cast %169 : vector<1x128x128xf32> to vector<128x128xf32>
    %cst_172 = arith.constant dense<0.000000e+00> : vector<8x128xf32>
    %171 = tpu.matmul %168, %170, %cst_172 {dimension_numbers = #tpu.dot_dimension_numbers<[1], [0], [0], [1], [0, 0, 1, 1], [], []>} : vector<8x128xf32>, vector<128x128xf32>, vector<8x128xf32> -> vector<8x128xf32>
    %172 = arith.addf %166, %171 : vector<8x128xf32>
    %c18_173 = arith.constant 18 : index
    %c0_174 = arith.constant 0 : index
    %c0_175 = arith.constant 0 : index
    %173 = vector.load %arg11[%c18_173, %c0_174, %c0_175] : memref<56x8x128xf32, #tpu.memory_space<vmem>>, vector<1x8x128xf32>
    %174 = vector.shape_cast %173 : vector<1x8x128xf32> to vector<8x128xf32>
    %c6_176 = arith.constant 6 : index
    %c0_177 = arith.constant 0 : index
    %c0_178 = arith.constant 0 : index
    %175 = vector.load %arg4[%c6_176, %c0_177, %c0_178] : memref<9x128x128xf32, #tpu.memory_space<vmem>>, vector<1x128x128xf32>
    %176 = vector.shape_cast %175 : vector<1x128x128xf32> to vector<128x128xf32>
    %cst_179 = arith.constant dense<0.000000e+00> : vector<8x128xf32>
    %177 = tpu.matmul %174, %176, %cst_179 {dimension_numbers = #tpu.dot_dimension_numbers<[1], [0], [0], [1], [0, 0, 1, 1], [], []>} : vector<8x128xf32>, vector<128x128xf32>, vector<8x128xf32> -> vector<8x128xf32>
    %178 = arith.addf %172, %177 : vector<8x128xf32>
    %c19 = arith.constant 19 : index
    %c0_180 = arith.constant 0 : index
    %c0_181 = arith.constant 0 : index
    %179 = vector.load %arg11[%c19, %c0_180, %c0_181] : memref<56x8x128xf32, #tpu.memory_space<vmem>>, vector<1x8x128xf32>
    %180 = vector.shape_cast %179 : vector<1x8x128xf32> to vector<8x128xf32>
    %c7_182 = arith.constant 7 : index
    %c0_183 = arith.constant 0 : index
    %c0_184 = arith.constant 0 : index
    %181 = vector.load %arg4[%c7_182, %c0_183, %c0_184] : memref<9x128x128xf32, #tpu.memory_space<vmem>>, vector<1x128x128xf32>
    %182 = vector.shape_cast %181 : vector<1x128x128xf32> to vector<128x128xf32>
    %cst_185 = arith.constant dense<0.000000e+00> : vector<8x128xf32>
    %183 = tpu.matmul %180, %182, %cst_185 {dimension_numbers = #tpu.dot_dimension_numbers<[1], [0], [0], [1], [0, 0, 1, 1], [], []>} : vector<8x128xf32>, vector<128x128xf32>, vector<8x128xf32> -> vector<8x128xf32>
    %184 = arith.addf %178, %183 : vector<8x128xf32>
    %c20 = arith.constant 20 : index
    %c0_186 = arith.constant 0 : index
    %c0_187 = arith.constant 0 : index
    %185 = vector.load %arg11[%c20, %c0_186, %c0_187] : memref<56x8x128xf32, #tpu.memory_space<vmem>>, vector<1x8x128xf32>
    %186 = vector.shape_cast %185 : vector<1x8x128xf32> to vector<8x128xf32>
    %c8_188 = arith.constant 8 : index
    %c0_189 = arith.constant 0 : index
    %c0_190 = arith.constant 0 : index
    %187 = vector.load %arg4[%c8_188, %c0_189, %c0_190] : memref<9x128x128xf32, #tpu.memory_space<vmem>>, vector<1x128x128xf32>
    %188 = vector.shape_cast %187 : vector<1x128x128xf32> to vector<128x128xf32>
    %cst_191 = arith.constant dense<0.000000e+00> : vector<8x128xf32>
    %189 = tpu.matmul %186, %188, %cst_191 {dimension_numbers = #tpu.dot_dimension_numbers<[1], [0], [0], [1], [0, 0, 1, 1], [], []>} : vector<8x128xf32>, vector<128x128xf32>, vector<8x128xf32> -> vector<8x128xf32>
    %190 = arith.addf %184, %189 : vector<8x128xf32>
    %191 = vector.broadcast %11 : vector<1x128xf32> to vector<8x128xf32>
    %192 = arith.addf %190, %191 : vector<8x128xf32>
    %cst_192 = arith.constant 0.000000e+00 : f32
    %193 = vector.broadcast %cst_192 : f32 to vector<8x128xf32>
    %194 = arith.maximumf %192, %193 : vector<8x128xf32>
    %c2_193 = arith.constant 2 : index
    %c0_194 = arith.constant 0 : index
    %c0_195 = arith.constant 0 : index
    %195 = vector.load %arg12[%c2_193, %c0_194, %c0_195] : memref<9x8x128xf32, #tpu.memory_space<vmem>>, vector<1x8x128xf32>
    %196 = vector.shape_cast %195 : vector<1x8x128xf32> to vector<8x128xf32>
    %197 = vector.shape_cast %194 : vector<8x128xf32> to vector<1x8x128xf32>
    tpu.vector_store %arg12[%c2_193, %c0_194, %c0_195], %197 {strides = array<i32>} : memref<9x8x128xf32, #tpu.memory_space<vmem>>, vector<1x8x128xf32>,
    %cst_196 = arith.constant 0.000000e+00 : f32
    %198 = vector.broadcast %cst_196 : f32 to vector<8x128xf32>
    %c14_197 = arith.constant 14 : index
    %c0_198 = arith.constant 0 : index
    %c0_199 = arith.constant 0 : index
    %199 = vector.load %arg11[%c14_197, %c0_198, %c0_199] : memref<56x8x128xf32, #tpu.memory_space<vmem>>, vector<1x8x128xf32>
    %200 = vector.shape_cast %199 : vector<1x8x128xf32> to vector<8x128xf32>
    %c0_200 = arith.constant 0 : index
    %c0_201 = arith.constant 0 : index
    %c0_202 = arith.constant 0 : index
    %201 = vector.load %arg4[%c0_200, %c0_201, %c0_202] : memref<9x128x128xf32, #tpu.memory_space<vmem>>, vector<1x128x128xf32>
    %202 = vector.shape_cast %201 : vector<1x128x128xf32> to vector<128x128xf32>
    %cst_203 = arith.constant dense<0.000000e+00> : vector<8x128xf32>
    %203 = tpu.matmul %200, %202, %cst_203 {dimension_numbers = #tpu.dot_dimension_numbers<[1], [0], [0], [1], [0, 0, 1, 1], [], []>} : vector<8x128xf32>, vector<128x128xf32>, vector<8x128xf32> -> vector<8x128xf32>
    %204 = arith.addf %198, %203 : vector<8x128xf32>
    %c15_204 = arith.constant 15 : index
    %c0_205 = arith.constant 0 : index
    %c0_206 = arith.constant 0 : index
    %205 = vector.load %arg11[%c15_204, %c0_205, %c0_206] : memref<56x8x128xf32, #tpu.memory_space<vmem>>, vector<1x8x128xf32>
    %206 = vector.shape_cast %205 : vector<1x8x128xf32> to vector<8x128xf32>
    %c1_207 = arith.constant 1 : index
    %c0_208 = arith.constant 0 : index
    %c0_209 = arith.constant 0 : index
    %207 = vector.load %arg4[%c1_207, %c0_208, %c0_209] : memref<9x128x128xf32, #tpu.memory_space<vmem>>, vector<1x128x128xf32>
    %208 = vector.shape_cast %207 : vector<1x128x128xf32> to vector<128x128xf32>
    %cst_210 = arith.constant dense<0.000000e+00> : vector<8x128xf32>
    %209 = tpu.matmul %206, %208, %cst_210 {dimension_numbers = #tpu.dot_dimension_numbers<[1], [0], [0], [1], [0, 0, 1, 1], [], []>} : vector<8x128xf32>, vector<128x128xf32>, vector<8x128xf32> -> vector<8x128xf32>
    %210 = arith.addf %204, %209 : vector<8x128xf32>
    %c16_211 = arith.constant 16 : index
    %c0_212 = arith.constant 0 : index
    %c0_213 = arith.constant 0 : index
    %211 = vector.load %arg11[%c16_211, %c0_212, %c0_213] : memref<56x8x128xf32, #tpu.memory_space<vmem>>, vector<1x8x128xf32>
    %212 = vector.shape_cast %211 : vector<1x8x128xf32> to vector<8x128xf32>
    %c2_214 = arith.constant 2 : index
    %c0_215 = arith.constant 0 : index
    %c0_216 = arith.constant 0 : index
    %213 = vector.load %arg4[%c2_214, %c0_215, %c0_216] : memref<9x128x128xf32, #tpu.memory_space<vmem>>, vector<1x128x128xf32>
    %214 = vector.shape_cast %213 : vector<1x128x128xf32> to vector<128x128xf32>
    %cst_217 = arith.constant dense<0.000000e+00> : vector<8x128xf32>
    %215 = tpu.matmul %212, %214, %cst_217 {dimension_numbers = #tpu.dot_dimension_numbers<[1], [0], [0], [1], [0, 0, 1, 1], [], []>} : vector<8x128xf32>, vector<128x128xf32>, vector<8x128xf32> -> vector<8x128xf32>
    %216 = arith.addf %210, %215 : vector<8x128xf32>
    %c21 = arith.constant 21 : index
    %c0_218 = arith.constant 0 : index
    %c0_219 = arith.constant 0 : index
    %217 = vector.load %arg11[%c21, %c0_218, %c0_219] : memref<56x8x128xf32, #tpu.memory_space<vmem>>, vector<1x8x128xf32>
    %218 = vector.shape_cast %217 : vector<1x8x128xf32> to vector<8x128xf32>
    %c3_220 = arith.constant 3 : index
    %c0_221 = arith.constant 0 : index
    %c0_222 = arith.constant 0 : index
    %219 = vector.load %arg4[%c3_220, %c0_221, %c0_222] : memref<9x128x128xf32, #tpu.memory_space<vmem>>, vector<1x128x128xf32>
    %220 = vector.shape_cast %219 : vector<1x128x128xf32> to vector<128x128xf32>
    %cst_223 = arith.constant dense<0.000000e+00> : vector<8x128xf32>
    %221 = tpu.matmul %218, %220, %cst_223 {dimension_numbers = #tpu.dot_dimension_numbers<[1], [0], [0], [1], [0, 0, 1, 1], [], []>} : vector<8x128xf32>, vector<128x128xf32>, vector<8x128xf32> -> vector<8x128xf32>
    %222 = arith.addf %216, %221 : vector<8x128xf32>
    %c22 = arith.constant 22 : index
    %c0_224 = arith.constant 0 : index
    %c0_225 = arith.constant 0 : index
    %223 = vector.load %arg11[%c22, %c0_224, %c0_225] : memref<56x8x128xf32, #tpu.memory_space<vmem>>, vector<1x8x128xf32>
    %224 = vector.shape_cast %223 : vector<1x8x128xf32> to vector<8x128xf32>
    %c4_226 = arith.constant 4 : index
    %c0_227 = arith.constant 0 : index
    %c0_228 = arith.constant 0 : index
    %225 = vector.load %arg4[%c4_226, %c0_227, %c0_228] : memref<9x128x128xf32, #tpu.memory_space<vmem>>, vector<1x128x128xf32>
    %226 = vector.shape_cast %225 : vector<1x128x128xf32> to vector<128x128xf32>
    %cst_229 = arith.constant dense<0.000000e+00> : vector<8x128xf32>
    %227 = tpu.matmul %224, %226, %cst_229 {dimension_numbers = #tpu.dot_dimension_numbers<[1], [0], [0], [1], [0, 0, 1, 1], [], []>} : vector<8x128xf32>, vector<128x128xf32>, vector<8x128xf32> -> vector<8x128xf32>
    %228 = arith.addf %222, %227 : vector<8x128xf32>
    %c23 = arith.constant 23 : index
    %c0_230 = arith.constant 0 : index
    %c0_231 = arith.constant 0 : index
    %229 = vector.load %arg11[%c23, %c0_230, %c0_231] : memref<56x8x128xf32, #tpu.memory_space<vmem>>, vector<1x8x128xf32>
    %230 = vector.shape_cast %229 : vector<1x8x128xf32> to vector<8x128xf32>
    %c5_232 = arith.constant 5 : index
    %c0_233 = arith.constant 0 : index
    %c0_234 = arith.constant 0 : index
    %231 = vector.load %arg4[%c5_232, %c0_233, %c0_234] : memref<9x128x128xf32, #tpu.memory_space<vmem>>, vector<1x128x128xf32>
    %232 = vector.shape_cast %231 : vector<1x128x128xf32> to vector<128x128xf32>
    %cst_235 = arith.constant dense<0.000000e+00> : vector<8x128xf32>
    %233 = tpu.matmul %230, %232, %cst_235 {dimension_numbers = #tpu.dot_dimension_numbers<[1], [0], [0], [1], [0, 0, 1, 1], [], []>} : vector<8x128xf32>, vector<128x128xf32>, vector<8x128xf32> -> vector<8x128xf32>
    %234 = arith.addf %228, %233 : vector<8x128xf32>
    %c28 = arith.constant 28 : index
    %c0_236 = arith.constant 0 : index
    %c0_237 = arith.constant 0 : index
    %235 = vector.load %arg11[%c28, %c0_236, %c0_237] : memref<56x8x128xf32, #tpu.memory_space<vmem>>, vector<1x8x128xf32>
    %236 = vector.shape_cast %235 : vector<1x8x128xf32> to vector<8x128xf32>
    %c6_238 = arith.constant 6 : index
    %c0_239 = arith.constant 0 : index
    %c0_240 = arith.constant 0 : index
    %237 = vector.load %arg4[%c6_238, %c0_239, %c0_240] : memref<9x128x128xf32, #tpu.memory_space<vmem>>, vector<1x128x128xf32>
    %238 = vector.shape_cast %237 : vector<1x128x128xf32> to vector<128x128xf32>
    %cst_241 = arith.constant dense<0.000000e+00> : vector<8x128xf32>
    %239 = tpu.matmul %236, %238, %cst_241 {dimension_numbers = #tpu.dot_dimension_numbers<[1], [0], [0], [1], [0, 0, 1, 1], [], []>} : vector<8x128xf32>, vector<128x128xf32>, vector<8x128xf32> -> vector<8x128xf32>
    %240 = arith.addf %234, %239 : vector<8x128xf32>
    %c29 = arith.constant 29 : index
    %c0_242 = arith.constant 0 : index
    %c0_243 = arith.constant 0 : index
    %241 = vector.load %arg11[%c29, %c0_242, %c0_243] : memref<56x8x128xf32, #tpu.memory_space<vmem>>, vector<1x8x128xf32>
    %242 = vector.shape_cast %241 : vector<1x8x128xf32> to vector<8x128xf32>
    %c7_244 = arith.constant 7 : index
    %c0_245 = arith.constant 0 : index
    %c0_246 = arith.constant 0 : index
    %243 = vector.load %arg4[%c7_244, %c0_245, %c0_246] : memref<9x128x128xf32, #tpu.memory_space<vmem>>, vector<1x128x128xf32>
    %244 = vector.shape_cast %243 : vector<1x128x128xf32> to vector<128x128xf32>
    %cst_247 = arith.constant dense<0.000000e+00> : vector<8x128xf32>
    %245 = tpu.matmul %242, %244, %cst_247 {dimension_numbers = #tpu.dot_dimension_numbers<[1], [0], [0], [1], [0, 0, 1, 1], [], []>} : vector<8x128xf32>, vector<128x128xf32>, vector<8x128xf32> -> vector<8x128xf32>
    %246 = arith.addf %240, %245 : vector<8x128xf32>
    %c30 = arith.constant 30 : index
    %c0_248 = arith.constant 0 : index
    %c0_249 = arith.constant 0 : index
    %247 = vector.load %arg11[%c30, %c0_248, %c0_249] : memref<56x8x128xf32, #tpu.memory_space<vmem>>, vector<1x8x128xf32>
    %248 = vector.shape_cast %247 : vector<1x8x128xf32> to vector<8x128xf32>
    %c8_250 = arith.constant 8 : index
    %c0_251 = arith.constant 0 : index
    %c0_252 = arith.constant 0 : index
    %249 = vector.load %arg4[%c8_250, %c0_251, %c0_252] : memref<9x128x128xf32, #tpu.memory_space<vmem>>, vector<1x128x128xf32>
    %250 = vector.shape_cast %249 : vector<1x128x128xf32> to vector<128x128xf32>
    %cst_253 = arith.constant dense<0.000000e+00> : vector<8x128xf32>
    %251 = tpu.matmul %248, %250, %cst_253 {dimension_numbers = #tpu.dot_dimension_numbers<[1], [0], [0], [1], [0, 0, 1, 1], [], []>} : vector<8x128xf32>, vector<128x128xf32>, vector<8x128xf32> -> vector<8x128xf32>
    %252 = arith.addf %246, %251 : vector<8x128xf32>
    %253 = vector.broadcast %11 : vector<1x128xf32> to vector<8x128xf32>
    %254 = arith.addf %252, %253 : vector<8x128xf32>
    %cst_254 = arith.constant 0.000000e+00 : f32
    %255 = vector.broadcast %cst_254 : f32 to vector<8x128xf32>
    %256 = arith.maximumf %254, %255 : vector<8x128xf32>
    %c3_255 = arith.constant 3 : index
    %c0_256 = arith.constant 0 : index
    %c0_257 = arith.constant 0 : index
    %257 = vector.load %arg12[%c3_255, %c0_256, %c0_257] : memref<9x8x128xf32, #tpu.memory_space<vmem>>, vector<1x8x128xf32>
    %258 = vector.shape_cast %257 : vector<1x8x128xf32> to vector<8x128xf32>
    %259 = vector.shape_cast %256 : vector<8x128xf32> to vector<1x8x128xf32>
    tpu.vector_store %arg12[%c3_255, %c0_256, %c0_257], %259 {strides = array<i32>} : memref<9x8x128xf32, #tpu.memory_space<vmem>>, vector<1x8x128xf32>,
    %cst_258 = arith.constant 0.000000e+00 : f32
    %260 = vector.broadcast %cst_258 : f32 to vector<8x128xf32>
    %c16_259 = arith.constant 16 : index
    %c0_260 = arith.constant 0 : index
    %c0_261 = arith.constant 0 : index
    %261 = vector.load %arg11[%c16_259, %c0_260, %c0_261] : memref<56x8x128xf32, #tpu.memory_space<vmem>>, vector<1x8x128xf32>
    %262 = vector.shape_cast %261 : vector<1x8x128xf32> to vector<8x128xf32>
    %c0_262 = arith.constant 0 : index
    %c0_263 = arith.constant 0 : index
    %c0_264 = arith.constant 0 : index
    %263 = vector.load %arg4[%c0_262, %c0_263, %c0_264] : memref<9x128x128xf32, #tpu.memory_space<vmem>>, vector<1x128x128xf32>
    %264 = vector.shape_cast %263 : vector<1x128x128xf32> to vector<128x128xf32>
    %cst_265 = arith.constant dense<0.000000e+00> : vector<8x128xf32>
    %265 = tpu.matmul %262, %264, %cst_265 {dimension_numbers = #tpu.dot_dimension_numbers<[1], [0], [0], [1], [0, 0, 1, 1], [], []>} : vector<8x128xf32>, vector<128x128xf32>, vector<8x128xf32> -> vector<8x128xf32>
    %266 = arith.addf %260, %265 : vector<8x128xf32>
    %c17_266 = arith.constant 17 : index
    %c0_267 = arith.constant 0 : index
    %c0_268 = arith.constant 0 : index
    %267 = vector.load %arg11[%c17_266, %c0_267, %c0_268] : memref<56x8x128xf32, #tpu.memory_space<vmem>>, vector<1x8x128xf32>
    %268 = vector.shape_cast %267 : vector<1x8x128xf32> to vector<8x128xf32>
    %c1_269 = arith.constant 1 : index
    %c0_270 = arith.constant 0 : index
    %c0_271 = arith.constant 0 : index
    %269 = vector.load %arg4[%c1_269, %c0_270, %c0_271] : memref<9x128x128xf32, #tpu.memory_space<vmem>>, vector<1x128x128xf32>
    %270 = vector.shape_cast %269 : vector<1x128x128xf32> to vector<128x128xf32>
    %cst_272 = arith.constant dense<0.000000e+00> : vector<8x128xf32>
    %271 = tpu.matmul %268, %270, %cst_272 {dimension_numbers = #tpu.dot_dimension_numbers<[1], [0], [0], [1], [0, 0, 1, 1], [], []>} : vector<8x128xf32>, vector<128x128xf32>, vector<8x128xf32> -> vector<8x128xf32>
    %272 = arith.addf %266, %271 : vector<8x128xf32>
    %c18_273 = arith.constant 18 : index
    %c0_274 = arith.constant 0 : index
    %c0_275 = arith.constant 0 : index
    %273 = vector.load %arg11[%c18_273, %c0_274, %c0_275] : memref<56x8x128xf32, #tpu.memory_space<vmem>>, vector<1x8x128xf32>
    %274 = vector.shape_cast %273 : vector<1x8x128xf32> to vector<8x128xf32>
    %c2_276 = arith.constant 2 : index
    %c0_277 = arith.constant 0 : index
    %c0_278 = arith.constant 0 : index
    %275 = vector.load %arg4[%c2_276, %c0_277, %c0_278] : memref<9x128x128xf32, #tpu.memory_space<vmem>>, vector<1x128x128xf32>
    %276 = vector.shape_cast %275 : vector<1x128x128xf32> to vector<128x128xf32>
    %cst_279 = arith.constant dense<0.000000e+00> : vector<8x128xf32>
    %277 = tpu.matmul %274, %276, %cst_279 {dimension_numbers = #tpu.dot_dimension_numbers<[1], [0], [0], [1], [0, 0, 1, 1], [], []>} : vector<8x128xf32>, vector<128x128xf32>, vector<8x128xf32> -> vector<8x128xf32>
    %278 = arith.addf %272, %277 : vector<8x128xf32>
    %c23_280 = arith.constant 23 : index
    %c0_281 = arith.constant 0 : index
    %c0_282 = arith.constant 0 : index
    %279 = vector.load %arg11[%c23_280, %c0_281, %c0_282] : memref<56x8x128xf32, #tpu.memory_space<vmem>>, vector<1x8x128xf32>
    %280 = vector.shape_cast %279 : vector<1x8x128xf32> to vector<8x128xf32>
    %c3_283 = arith.constant 3 : index
    %c0_284 = arith.constant 0 : index
    %c0_285 = arith.constant 0 : index
    %281 = vector.load %arg4[%c3_283, %c0_284, %c0_285] : memref<9x128x128xf32, #tpu.memory_space<vmem>>, vector<1x128x128xf32>
    %282 = vector.shape_cast %281 : vector<1x128x128xf32> to vector<128x128xf32>
    %cst_286 = arith.constant dense<0.000000e+00> : vector<8x128xf32>
    %283 = tpu.matmul %280, %282, %cst_286 {dimension_numbers = #tpu.dot_dimension_numbers<[1], [0], [0], [1], [0, 0, 1, 1], [], []>} : vector<8x128xf32>, vector<128x128xf32>, vector<8x128xf32> -> vector<8x128xf32>
    %284 = arith.addf %278, %283 : vector<8x128xf32>
    %c24 = arith.constant 24 : index
    %c0_287 = arith.constant 0 : index
    %c0_288 = arith.constant 0 : index
    %285 = vector.load %arg11[%c24, %c0_287, %c0_288] : memref<56x8x128xf32, #tpu.memory_space<vmem>>, vector<1x8x128xf32>
    %286 = vector.shape_cast %285 : vector<1x8x128xf32> to vector<8x128xf32>
    %c4_289 = arith.constant 4 : index
    %c0_290 = arith.constant 0 : index
    %c0_291 = arith.constant 0 : index
    %287 = vector.load %arg4[%c4_289, %c0_290, %c0_291] : memref<9x128x128xf32, #tpu.memory_space<vmem>>, vector<1x128x128xf32>
    %288 = vector.shape_cast %287 : vector<1x128x128xf32> to vector<128x128xf32>
    %cst_292 = arith.constant dense<0.000000e+00> : vector<8x128xf32>
    %289 = tpu.matmul %286, %288, %cst_292 {dimension_numbers = #tpu.dot_dimension_numbers<[1], [0], [0], [1], [0, 0, 1, 1], [], []>} : vector<8x128xf32>, vector<128x128xf32>, vector<8x128xf32> -> vector<8x128xf32>
    %290 = arith.addf %284, %289 : vector<8x128xf32>
    %c25 = arith.constant 25 : index
    %c0_293 = arith.constant 0 : index
    %c0_294 = arith.constant 0 : index
    %291 = vector.load %arg11[%c25, %c0_293, %c0_294] : memref<56x8x128xf32, #tpu.memory_space<vmem>>, vector<1x8x128xf32>
    %292 = vector.shape_cast %291 : vector<1x8x128xf32> to vector<8x128xf32>
    %c5_295 = arith.constant 5 : index
    %c0_296 = arith.constant 0 : index
    %c0_297 = arith.constant 0 : index
    %293 = vector.load %arg4[%c5_295, %c0_296, %c0_297] : memref<9x128x128xf32, #tpu.memory_space<vmem>>, vector<1x128x128xf32>
    %294 = vector.shape_cast %293 : vector<1x128x128xf32> to vector<128x128xf32>
    %cst_298 = arith.constant dense<0.000000e+00> : vector<8x128xf32>
    %295 = tpu.matmul %292, %294, %cst_298 {dimension_numbers = #tpu.dot_dimension_numbers<[1], [0], [0], [1], [0, 0, 1, 1], [], []>} : vector<8x128xf32>, vector<128x128xf32>, vector<8x128xf32> -> vector<8x128xf32>
    %296 = arith.addf %290, %295 : vector<8x128xf32>
    %c30_299 = arith.constant 30 : index
    %c0_300 = arith.constant 0 : index
    %c0_301 = arith.constant 0 : index
    %297 = vector.load %arg11[%c30_299, %c0_300, %c0_301] : memref<56x8x128xf32, #tpu.memory_space<vmem>>, vector<1x8x128xf32>
    %298 = vector.shape_cast %297 : vector<1x8x128xf32> to vector<8x128xf32>
    %c6_302 = arith.constant 6 : index
    %c0_303 = arith.constant 0 : index
    %c0_304 = arith.constant 0 : index
    %299 = vector.load %arg4[%c6_302, %c0_303, %c0_304] : memref<9x128x128xf32, #tpu.memory_space<vmem>>, vector<1x128x128xf32>
    %300 = vector.shape_cast %299 : vector<1x128x128xf32> to vector<128x128xf32>
    %cst_305 = arith.constant dense<0.000000e+00> : vector<8x128xf32>
    %301 = tpu.matmul %298, %300, %cst_305 {dimension_numbers = #tpu.dot_dimension_numbers<[1], [0], [0], [1], [0, 0, 1, 1], [], []>} : vector<8x128xf32>, vector<128x128xf32>, vector<8x128xf32> -> vector<8x128xf32>
    %302 = arith.addf %296, %301 : vector<8x128xf32>
    %c31 = arith.constant 31 : index
    %c0_306 = arith.constant 0 : index
    %c0_307 = arith.constant 0 : index
    %303 = vector.load %arg11[%c31, %c0_306, %c0_307] : memref<56x8x128xf32, #tpu.memory_space<vmem>>, vector<1x8x128xf32>
    %304 = vector.shape_cast %303 : vector<1x8x128xf32> to vector<8x128xf32>
    %c7_308 = arith.constant 7 : index
    %c0_309 = arith.constant 0 : index
    %c0_310 = arith.constant 0 : index
    %305 = vector.load %arg4[%c7_308, %c0_309, %c0_310] : memref<9x128x128xf32, #tpu.memory_space<vmem>>, vector<1x128x128xf32>
    %306 = vector.shape_cast %305 : vector<1x128x128xf32> to vector<128x128xf32>
    %cst_311 = arith.constant dense<0.000000e+00> : vector<8x128xf32>
    %307 = tpu.matmul %304, %306, %cst_311 {dimension_numbers = #tpu.dot_dimension_numbers<[1], [0], [0], [1], [0, 0, 1, 1], [], []>} : vector<8x128xf32>, vector<128x128xf32>, vector<8x128xf32> -> vector<8x128xf32>
    %308 = arith.addf %302, %307 : vector<8x128xf32>
    %c32 = arith.constant 32 : index
    %c0_312 = arith.constant 0 : index
    %c0_313 = arith.constant 0 : index
    %309 = vector.load %arg11[%c32, %c0_312, %c0_313] : memref<56x8x128xf32, #tpu.memory_space<vmem>>, vector<1x8x128xf32>
    %310 = vector.shape_cast %309 : vector<1x8x128xf32> to vector<8x128xf32>
    %c8_314 = arith.constant 8 : index
    %c0_315 = arith.constant 0 : index
    %c0_316 = arith.constant 0 : index
    %311 = vector.load %arg4[%c8_314, %c0_315, %c0_316] : memref<9x128x128xf32, #tpu.memory_space<vmem>>, vector<1x128x128xf32>
    %312 = vector.shape_cast %311 : vector<1x128x128xf32> to vector<128x128xf32>
    %cst_317 = arith.constant dense<0.000000e+00> : vector<8x128xf32>
    %313 = tpu.matmul %310, %312, %cst_317 {dimension_numbers = #tpu.dot_dimension_numbers<[1], [0], [0], [1], [0, 0, 1, 1], [], []>} : vector<8x128xf32>, vector<128x128xf32>, vector<8x128xf32> -> vector<8x128xf32>
    %314 = arith.addf %308, %313 : vector<8x128xf32>
    %315 = vector.broadcast %11 : vector<1x128xf32> to vector<8x128xf32>
    %316 = arith.addf %314, %315 : vector<8x128xf32>
    %cst_318 = arith.constant 0.000000e+00 : f32
    %317 = vector.broadcast %cst_318 : f32 to vector<8x128xf32>
    %318 = arith.maximumf %316, %317 : vector<8x128xf32>
    %c4_319 = arith.constant 4 : index
    %c0_320 = arith.constant 0 : index
    %c0_321 = arith.constant 0 : index
    %319 = vector.load %arg12[%c4_319, %c0_320, %c0_321] : memref<9x8x128xf32, #tpu.memory_space<vmem>>, vector<1x8x128xf32>
    %320 = vector.shape_cast %319 : vector<1x8x128xf32> to vector<8x128xf32>
    %321 = vector.shape_cast %318 : vector<8x128xf32> to vector<1x8x128xf32>
    tpu.vector_store %arg12[%c4_319, %c0_320, %c0_321], %321 {strides = array<i32>} : memref<9x8x128xf32, #tpu.memory_space<vmem>>, vector<1x8x128xf32>,
    %cst_322 = arith.constant 0.000000e+00 : f32
    %322 = vector.broadcast %cst_322 : f32 to vector<8x128xf32>
    %c18_323 = arith.constant 18 : index
    %c0_324 = arith.constant 0 : index
    %c0_325 = arith.constant 0 : index
    %323 = vector.load %arg11[%c18_323, %c0_324, %c0_325] : memref<56x8x128xf32, #tpu.memory_space<vmem>>, vector<1x8x128xf32>
    %324 = vector.shape_cast %323 : vector<1x8x128xf32> to vector<8x128xf32>
    %c0_326 = arith.constant 0 : index
    %c0_327 = arith.constant 0 : index
    %c0_328 = arith.constant 0 : index
    %325 = vector.load %arg4[%c0_326, %c0_327, %c0_328] : memref<9x128x128xf32, #tpu.memory_space<vmem>>, vector<1x128x128xf32>
    %326 = vector.shape_cast %325 : vector<1x128x128xf32> to vector<128x128xf32>
    %cst_329 = arith.constant dense<0.000000e+00> : vector<8x128xf32>
    %327 = tpu.matmul %324, %326, %cst_329 {dimension_numbers = #tpu.dot_dimension_numbers<[1], [0], [0], [1], [0, 0, 1, 1], [], []>} : vector<8x128xf32>, vector<128x128xf32>, vector<8x128xf32> -> vector<8x128xf32>
    %328 = arith.addf %322, %327 : vector<8x128xf32>
    %c19_330 = arith.constant 19 : index
    %c0_331 = arith.constant 0 : index
    %c0_332 = arith.constant 0 : index
    %329 = vector.load %arg11[%c19_330, %c0_331, %c0_332] : memref<56x8x128xf32, #tpu.memory_space<vmem>>, vector<1x8x128xf32>
    %330 = vector.shape_cast %329 : vector<1x8x128xf32> to vector<8x128xf32>
    %c1_333 = arith.constant 1 : index
    %c0_334 = arith.constant 0 : index
    %c0_335 = arith.constant 0 : index
    %331 = vector.load %arg4[%c1_333, %c0_334, %c0_335] : memref<9x128x128xf32, #tpu.memory_space<vmem>>, vector<1x128x128xf32>
    %332 = vector.shape_cast %331 : vector<1x128x128xf32> to vector<128x128xf32>
    %cst_336 = arith.constant dense<0.000000e+00> : vector<8x128xf32>
    %333 = tpu.matmul %330, %332, %cst_336 {dimension_numbers = #tpu.dot_dimension_numbers<[1], [0], [0], [1], [0, 0, 1, 1], [], []>} : vector<8x128xf32>, vector<128x128xf32>, vector<8x128xf32> -> vector<8x128xf32>
    %334 = arith.addf %328, %333 : vector<8x128xf32>
    %c20_337 = arith.constant 20 : index
    %c0_338 = arith.constant 0 : index
    %c0_339 = arith.constant 0 : index
    %335 = vector.load %arg11[%c20_337, %c0_338, %c0_339] : memref<56x8x128xf32, #tpu.memory_space<vmem>>, vector<1x8x128xf32>
    %336 = vector.shape_cast %335 : vector<1x8x128xf32> to vector<8x128xf32>
    %c2_340 = arith.constant 2 : index
    %c0_341 = arith.constant 0 : index
    %c0_342 = arith.constant 0 : index
    %337 = vector.load %arg4[%c2_340, %c0_341, %c0_342] : memref<9x128x128xf32, #tpu.memory_space<vmem>>, vector<1x128x128xf32>
    %338 = vector.shape_cast %337 : vector<1x128x128xf32> to vector<128x128xf32>
    %cst_343 = arith.constant dense<0.000000e+00> : vector<8x128xf32>
    %339 = tpu.matmul %336, %338, %cst_343 {dimension_numbers = #tpu.dot_dimension_numbers<[1], [0], [0], [1], [0, 0, 1, 1], [], []>} : vector<8x128xf32>, vector<128x128xf32>, vector<8x128xf32> -> vector<8x128xf32>
    %340 = arith.addf %334, %339 : vector<8x128xf32>
    %c25_344 = arith.constant 25 : index
    %c0_345 = arith.constant 0 : index
    %c0_346 = arith.constant 0 : index
    %341 = vector.load %arg11[%c25_344, %c0_345, %c0_346] : memref<56x8x128xf32, #tpu.memory_space<vmem>>, vector<1x8x128xf32>
    %342 = vector.shape_cast %341 : vector<1x8x128xf32> to vector<8x128xf32>
    %c3_347 = arith.constant 3 : index
    %c0_348 = arith.constant 0 : index
    %c0_349 = arith.constant 0 : index
    %343 = vector.load %arg4[%c3_347, %c0_348, %c0_349] : memref<9x128x128xf32, #tpu.memory_space<vmem>>, vector<1x128x128xf32>
    %344 = vector.shape_cast %343 : vector<1x128x128xf32> to vector<128x128xf32>
    %cst_350 = arith.constant dense<0.000000e+00> : vector<8x128xf32>
    %345 = tpu.matmul %342, %344, %cst_350 {dimension_numbers = #tpu.dot_dimension_numbers<[1], [0], [0], [1], [0, 0, 1, 1], [], []>} : vector<8x128xf32>, vector<128x128xf32>, vector<8x128xf32> -> vector<8x128xf32>
    %346 = arith.addf %340, %345 : vector<8x128xf32>
    %c26 = arith.constant 26 : index
    %c0_351 = arith.constant 0 : index
    %c0_352 = arith.constant 0 : index
    %347 = vector.load %arg11[%c26, %c0_351, %c0_352] : memref<56x8x128xf32, #tpu.memory_space<vmem>>, vector<1x8x128xf32>
    %348 = vector.shape_cast %347 : vector<1x8x128xf32> to vector<8x128xf32>
    %c4_353 = arith.constant 4 : index
    %c0_354 = arith.constant 0 : index
    %c0_355 = arith.constant 0 : index
    %349 = vector.load %arg4[%c4_353, %c0_354, %c0_355] : memref<9x128x128xf32, #tpu.memory_space<vmem>>, vector<1x128x128xf32>
    %350 = vector.shape_cast %349 : vector<1x128x128xf32> to vector<128x128xf32>
    %cst_356 = arith.constant dense<0.000000e+00> : vector<8x128xf32>
    %351 = tpu.matmul %348, %350, %cst_356 {dimension_numbers = #tpu.dot_dimension_numbers<[1], [0], [0], [1], [0, 0, 1, 1], [], []>} : vector<8x128xf32>, vector<128x128xf32>, vector<8x128xf32> -> vector<8x128xf32>
    %352 = arith.addf %346, %351 : vector<8x128xf32>
    %c27 = arith.constant 27 : index
    %c0_357 = arith.constant 0 : index
    %c0_358 = arith.constant 0 : index
    %353 = vector.load %arg11[%c27, %c0_357, %c0_358] : memref<56x8x128xf32, #tpu.memory_space<vmem>>, vector<1x8x128xf32>
    %354 = vector.shape_cast %353 : vector<1x8x128xf32> to vector<8x128xf32>
    %c5_359 = arith.constant 5 : index
    %c0_360 = arith.constant 0 : index
    %c0_361 = arith.constant 0 : index
    %355 = vector.load %arg4[%c5_359, %c0_360, %c0_361] : memref<9x128x128xf32, #tpu.memory_space<vmem>>, vector<1x128x128xf32>
    %356 = vector.shape_cast %355 : vector<1x128x128xf32> to vector<128x128xf32>
    %cst_362 = arith.constant dense<0.000000e+00> : vector<8x128xf32>
    %357 = tpu.matmul %354, %356, %cst_362 {dimension_numbers = #tpu.dot_dimension_numbers<[1], [0], [0], [1], [0, 0, 1, 1], [], []>} : vector<8x128xf32>, vector<128x128xf32>, vector<8x128xf32> -> vector<8x128xf32>
    %358 = arith.addf %352, %357 : vector<8x128xf32>
    %c32_363 = arith.constant 32 : index
    %c0_364 = arith.constant 0 : index
    %c0_365 = arith.constant 0 : index
    %359 = vector.load %arg11[%c32_363, %c0_364, %c0_365] : memref<56x8x128xf32, #tpu.memory_space<vmem>>, vector<1x8x128xf32>
    %360 = vector.shape_cast %359 : vector<1x8x128xf32> to vector<8x128xf32>
    %c6_366 = arith.constant 6 : index
    %c0_367 = arith.constant 0 : index
    %c0_368 = arith.constant 0 : index
    %361 = vector.load %arg4[%c6_366, %c0_367, %c0_368] : memref<9x128x128xf32, #tpu.memory_space<vmem>>, vector<1x128x128xf32>
    %362 = vector.shape_cast %361 : vector<1x128x128xf32> to vector<128x128xf32>
    %cst_369 = arith.constant dense<0.000000e+00> : vector<8x128xf32>
    %363 = tpu.matmul %360, %362, %cst_369 {dimension_numbers = #tpu.dot_dimension_numbers<[1], [0], [0], [1], [0, 0, 1, 1], [], []>} : vector<8x128xf32>, vector<128x128xf32>, vector<8x128xf32> -> vector<8x128xf32>
    %364 = arith.addf %358, %363 : vector<8x128xf32>
    %c33 = arith.constant 33 : index
    %c0_370 = arith.constant 0 : index
    %c0_371 = arith.constant 0 : index
    %365 = vector.load %arg11[%c33, %c0_370, %c0_371] : memref<56x8x128xf32, #tpu.memory_space<vmem>>, vector<1x8x128xf32>
    %366 = vector.shape_cast %365 : vector<1x8x128xf32> to vector<8x128xf32>
    %c7_372 = arith.constant 7 : index
    %c0_373 = arith.constant 0 : index
    %c0_374 = arith.constant 0 : index
    %367 = vector.load %arg4[%c7_372, %c0_373, %c0_374] : memref<9x128x128xf32, #tpu.memory_space<vmem>>, vector<1x128x128xf32>
    %368 = vector.shape_cast %367 : vector<1x128x128xf32> to vector<128x128xf32>
    %cst_375 = arith.constant dense<0.000000e+00> : vector<8x128xf32>
    %369 = tpu.matmul %366, %368, %cst_375 {dimension_numbers = #tpu.dot_dimension_numbers<[1], [0], [0], [1], [0, 0, 1, 1], [], []>} : vector<8x128xf32>, vector<128x128xf32>, vector<8x128xf32> -> vector<8x128xf32>
    %370 = arith.addf %364, %369 : vector<8x128xf32>
    %c34 = arith.constant 34 : index
    %c0_376 = arith.constant 0 : index
    %c0_377 = arith.constant 0 : index
    %371 = vector.load %arg11[%c34, %c0_376, %c0_377] : memref<56x8x128xf32, #tpu.memory_space<vmem>>, vector<1x8x128xf32>
    %372 = vector.shape_cast %371 : vector<1x8x128xf32> to vector<8x128xf32>
    %c8_378 = arith.constant 8 : index
    %c0_379 = arith.constant 0 : index
    %c0_380 = arith.constant 0 : index
    %373 = vector.load %arg4[%c8_378, %c0_379, %c0_380] : memref<9x128x128xf32, #tpu.memory_space<vmem>>, vector<1x128x128xf32>
    %374 = vector.shape_cast %373 : vector<1x128x128xf32> to vector<128x128xf32>
    %cst_381 = arith.constant dense<0.000000e+00> : vector<8x128xf32>
    %375 = tpu.matmul %372, %374, %cst_381 {dimension_numbers = #tpu.dot_dimension_numbers<[1], [0], [0], [1], [0, 0, 1, 1], [], []>} : vector<8x128xf32>, vector<128x128xf32>, vector<8x128xf32> -> vector<8x128xf32>
    %376 = arith.addf %370, %375 : vector<8x128xf32>
    %377 = vector.broadcast %11 : vector<1x128xf32> to vector<8x128xf32>
    %378 = arith.addf %376, %377 : vector<8x128xf32>
    %cst_382 = arith.constant 0.000000e+00 : f32
    %379 = vector.broadcast %cst_382 : f32 to vector<8x128xf32>
    %380 = arith.maximumf %378, %379 : vector<8x128xf32>
    %c5_383 = arith.constant 5 : index
    %c0_384 = arith.constant 0 : index
    %c0_385 = arith.constant 0 : index
    %381 = vector.load %arg12[%c5_383, %c0_384, %c0_385] : memref<9x8x128xf32, #tpu.memory_space<vmem>>, vector<1x8x128xf32>
    %382 = vector.shape_cast %381 : vector<1x8x128xf32> to vector<8x128xf32>
    %383 = vector.shape_cast %380 : vector<8x128xf32> to vector<1x8x128xf32>
    tpu.vector_store %arg12[%c5_383, %c0_384, %c0_385], %383 {strides = array<i32>} : memref<9x8x128xf32, #tpu.memory_space<vmem>>, vector<1x8x128xf32>,
    %cst_386 = arith.constant 0.000000e+00 : f32
    %384 = vector.broadcast %cst_386 : f32 to vector<8x128xf32>
    %c28_387 = arith.constant 28 : index
    %c0_388 = arith.constant 0 : index
    %c0_389 = arith.constant 0 : index
    %385 = vector.load %arg11[%c28_387, %c0_388, %c0_389] : memref<56x8x128xf32, #tpu.memory_space<vmem>>, vector<1x8x128xf32>
    %386 = vector.shape_cast %385 : vector<1x8x128xf32> to vector<8x128xf32>
    %c0_390 = arith.constant 0 : index
    %c0_391 = arith.constant 0 : index
    %c0_392 = arith.constant 0 : index
    %387 = vector.load %arg4[%c0_390, %c0_391, %c0_392] : memref<9x128x128xf32, #tpu.memory_space<vmem>>, vector<1x128x128xf32>
    %388 = vector.shape_cast %387 : vector<1x128x128xf32> to vector<128x128xf32>
    %cst_393 = arith.constant dense<0.000000e+00> : vector<8x128xf32>
    %389 = tpu.matmul %386, %388, %cst_393 {dimension_numbers = #tpu.dot_dimension_numbers<[1], [0], [0], [1], [0, 0, 1, 1], [], []>} : vector<8x128xf32>, vector<128x128xf32>, vector<8x128xf32> -> vector<8x128xf32>
    %390 = arith.addf %384, %389 : vector<8x128xf32>
    %c29_394 = arith.constant 29 : index
    %c0_395 = arith.constant 0 : index
    %c0_396 = arith.constant 0 : index
    %391 = vector.load %arg11[%c29_394, %c0_395, %c0_396] : memref<56x8x128xf32, #tpu.memory_space<vmem>>, vector<1x8x128xf32>
    %392 = vector.shape_cast %391 : vector<1x8x128xf32> to vector<8x128xf32>
    %c1_397 = arith.constant 1 : index
    %c0_398 = arith.constant 0 : index
    %c0_399 = arith.constant 0 : index
    %393 = vector.load %arg4[%c1_397, %c0_398, %c0_399] : memref<9x128x128xf32, #tpu.memory_space<vmem>>, vector<1x128x128xf32>
    %394 = vector.shape_cast %393 : vector<1x128x128xf32> to vector<128x128xf32>
    %cst_400 = arith.constant dense<0.000000e+00> : vector<8x128xf32>
    %395 = tpu.matmul %392, %394, %cst_400 {dimension_numbers = #tpu.dot_dimension_numbers<[1], [0], [0], [1], [0, 0, 1, 1], [], []>} : vector<8x128xf32>, vector<128x128xf32>, vector<8x128xf32> -> vector<8x128xf32>
    %396 = arith.addf %390, %395 : vector<8x128xf32>
    %c30_401 = arith.constant 30 : index
    %c0_402 = arith.constant 0 : index
    %c0_403 = arith.constant 0 : index
    %397 = vector.load %arg11[%c30_401, %c0_402, %c0_403] : memref<56x8x128xf32, #tpu.memory_space<vmem>>, vector<1x8x128xf32>
    %398 = vector.shape_cast %397 : vector<1x8x128xf32> to vector<8x128xf32>
    %c2_404 = arith.constant 2 : index
    %c0_405 = arith.constant 0 : index
    %c0_406 = arith.constant 0 : index
    %399 = vector.load %arg4[%c2_404, %c0_405, %c0_406] : memref<9x128x128xf32, #tpu.memory_space<vmem>>, vector<1x128x128xf32>
    %400 = vector.shape_cast %399 : vector<1x128x128xf32> to vector<128x128xf32>
    %cst_407 = arith.constant dense<0.000000e+00> : vector<8x128xf32>
    %401 = tpu.matmul %398, %400, %cst_407 {dimension_numbers = #tpu.dot_dimension_numbers<[1], [0], [0], [1], [0, 0, 1, 1], [], []>} : vector<8x128xf32>, vector<128x128xf32>, vector<8x128xf32> -> vector<8x128xf32>
    %402 = arith.addf %396, %401 : vector<8x128xf32>
    %c35 = arith.constant 35 : index
    %c0_408 = arith.constant 0 : index
    %c0_409 = arith.constant 0 : index
    %403 = vector.load %arg11[%c35, %c0_408, %c0_409] : memref<56x8x128xf32, #tpu.memory_space<vmem>>, vector<1x8x128xf32>
    %404 = vector.shape_cast %403 : vector<1x8x128xf32> to vector<8x128xf32>
    %c3_410 = arith.constant 3 : index
    %c0_411 = arith.constant 0 : index
    %c0_412 = arith.constant 0 : index
    %405 = vector.load %arg4[%c3_410, %c0_411, %c0_412] : memref<9x128x128xf32, #tpu.memory_space<vmem>>, vector<1x128x128xf32>
    %406 = vector.shape_cast %405 : vector<1x128x128xf32> to vector<128x128xf32>
    %cst_413 = arith.constant dense<0.000000e+00> : vector<8x128xf32>
    %407 = tpu.matmul %404, %406, %cst_413 {dimension_numbers = #tpu.dot_dimension_numbers<[1], [0], [0], [1], [0, 0, 1, 1], [], []>} : vector<8x128xf32>, vector<128x128xf32>, vector<8x128xf32> -> vector<8x128xf32>
    %408 = arith.addf %402, %407 : vector<8x128xf32>
    %c36 = arith.constant 36 : index
    %c0_414 = arith.constant 0 : index
    %c0_415 = arith.constant 0 : index
    %409 = vector.load %arg11[%c36, %c0_414, %c0_415] : memref<56x8x128xf32, #tpu.memory_space<vmem>>, vector<1x8x128xf32>
    %410 = vector.shape_cast %409 : vector<1x8x128xf32> to vector<8x128xf32>
    %c4_416 = arith.constant 4 : index
    %c0_417 = arith.constant 0 : index
    %c0_418 = arith.constant 0 : index
    %411 = vector.load %arg4[%c4_416, %c0_417, %c0_418] : memref<9x128x128xf32, #tpu.memory_space<vmem>>, vector<1x128x128xf32>
    %412 = vector.shape_cast %411 : vector<1x128x128xf32> to vector<128x128xf32>
    %cst_419 = arith.constant dense<0.000000e+00> : vector<8x128xf32>
    %413 = tpu.matmul %410, %412, %cst_419 {dimension_numbers = #tpu.dot_dimension_numbers<[1], [0], [0], [1], [0, 0, 1, 1], [], []>} : vector<8x128xf32>, vector<128x128xf32>, vector<8x128xf32> -> vector<8x128xf32>
    %414 = arith.addf %408, %413 : vector<8x128xf32>
    %c37 = arith.constant 37 : index
    %c0_420 = arith.constant 0 : index
    %c0_421 = arith.constant 0 : index
    %415 = vector.load %arg11[%c37, %c0_420, %c0_421] : memref<56x8x128xf32, #tpu.memory_space<vmem>>, vector<1x8x128xf32>
    %416 = vector.shape_cast %415 : vector<1x8x128xf32> to vector<8x128xf32>
    %c5_422 = arith.constant 5 : index
    %c0_423 = arith.constant 0 : index
    %c0_424 = arith.constant 0 : index
    %417 = vector.load %arg4[%c5_422, %c0_423, %c0_424] : memref<9x128x128xf32, #tpu.memory_space<vmem>>, vector<1x128x128xf32>
    %418 = vector.shape_cast %417 : vector<1x128x128xf32> to vector<128x128xf32>
    %cst_425 = arith.constant dense<0.000000e+00> : vector<8x128xf32>
    %419 = tpu.matmul %416, %418, %cst_425 {dimension_numbers = #tpu.dot_dimension_numbers<[1], [0], [0], [1], [0, 0, 1, 1], [], []>} : vector<8x128xf32>, vector<128x128xf32>, vector<8x128xf32> -> vector<8x128xf32>
    %420 = arith.addf %414, %419 : vector<8x128xf32>
    %c42 = arith.constant 42 : index
    %c0_426 = arith.constant 0 : index
    %c0_427 = arith.constant 0 : index
    %421 = vector.load %arg11[%c42, %c0_426, %c0_427] : memref<56x8x128xf32, #tpu.memory_space<vmem>>, vector<1x8x128xf32>
    %422 = vector.shape_cast %421 : vector<1x8x128xf32> to vector<8x128xf32>
    %c6_428 = arith.constant 6 : index
    %c0_429 = arith.constant 0 : index
    %c0_430 = arith.constant 0 : index
    %423 = vector.load %arg4[%c6_428, %c0_429, %c0_430] : memref<9x128x128xf32, #tpu.memory_space<vmem>>, vector<1x128x128xf32>
    %424 = vector.shape_cast %423 : vector<1x128x128xf32> to vector<128x128xf32>
    %cst_431 = arith.constant dense<0.000000e+00> : vector<8x128xf32>
    %425 = tpu.matmul %422, %424, %cst_431 {dimension_numbers = #tpu.dot_dimension_numbers<[1], [0], [0], [1], [0, 0, 1, 1], [], []>} : vector<8x128xf32>, vector<128x128xf32>, vector<8x128xf32> -> vector<8x128xf32>
    %426 = arith.addf %420, %425 : vector<8x128xf32>
    %c43 = arith.constant 43 : index
    %c0_432 = arith.constant 0 : index
    %c0_433 = arith.constant 0 : index
    %427 = vector.load %arg11[%c43, %c0_432, %c0_433] : memref<56x8x128xf32, #tpu.memory_space<vmem>>, vector<1x8x128xf32>
    %428 = vector.shape_cast %427 : vector<1x8x128xf32> to vector<8x128xf32>
    %c7_434 = arith.constant 7 : index
    %c0_435 = arith.constant 0 : index
    %c0_436 = arith.constant 0 : index
    %429 = vector.load %arg4[%c7_434, %c0_435, %c0_436] : memref<9x128x128xf32, #tpu.memory_space<vmem>>, vector<1x128x128xf32>
    %430 = vector.shape_cast %429 : vector<1x128x128xf32> to vector<128x128xf32>
    %cst_437 = arith.constant dense<0.000000e+00> : vector<8x128xf32>
    %431 = tpu.matmul %428, %430, %cst_437 {dimension_numbers = #tpu.dot_dimension_numbers<[1], [0], [0], [1], [0, 0, 1, 1], [], []>} : vector<8x128xf32>, vector<128x128xf32>, vector<8x128xf32> -> vector<8x128xf32>
    %432 = arith.addf %426, %431 : vector<8x128xf32>
    %c44 = arith.constant 44 : index
    %c0_438 = arith.constant 0 : index
    %c0_439 = arith.constant 0 : index
    %433 = vector.load %arg11[%c44, %c0_438, %c0_439] : memref<56x8x128xf32, #tpu.memory_space<vmem>>, vector<1x8x128xf32>
    %434 = vector.shape_cast %433 : vector<1x8x128xf32> to vector<8x128xf32>
    %c8_440 = arith.constant 8 : index
    %c0_441 = arith.constant 0 : index
    %c0_442 = arith.constant 0 : index
    %435 = vector.load %arg4[%c8_440, %c0_441, %c0_442] : memref<9x128x128xf32, #tpu.memory_space<vmem>>, vector<1x128x128xf32>
    %436 = vector.shape_cast %435 : vector<1x128x128xf32> to vector<128x128xf32>
    %cst_443 = arith.constant dense<0.000000e+00> : vector<8x128xf32>
    %437 = tpu.matmul %434, %436, %cst_443 {dimension_numbers = #tpu.dot_dimension_numbers<[1], [0], [0], [1], [0, 0, 1, 1], [], []>} : vector<8x128xf32>, vector<128x128xf32>, vector<8x128xf32> -> vector<8x128xf32>
    %438 = arith.addf %432, %437 : vector<8x128xf32>
    %439 = vector.broadcast %11 : vector<1x128xf32> to vector<8x128xf32>
    %440 = arith.addf %438, %439 : vector<8x128xf32>
    %cst_444 = arith.constant 0.000000e+00 : f32
    %441 = vector.broadcast %cst_444 : f32 to vector<8x128xf32>
    %442 = arith.maximumf %440, %441 : vector<8x128xf32>
    %c6_445 = arith.constant 6 : index
    %c0_446 = arith.constant 0 : index
    %c0_447 = arith.constant 0 : index
    %443 = vector.load %arg12[%c6_445, %c0_446, %c0_447] : memref<9x8x128xf32, #tpu.memory_space<vmem>>, vector<1x8x128xf32>
    %444 = vector.shape_cast %443 : vector<1x8x128xf32> to vector<8x128xf32>
    %445 = vector.shape_cast %442 : vector<8x128xf32> to vector<1x8x128xf32>
    tpu.vector_store %arg12[%c6_445, %c0_446, %c0_447], %445 {strides = array<i32>} : memref<9x8x128xf32, #tpu.memory_space<vmem>>, vector<1x8x128xf32>,
    %cst_448 = arith.constant 0.000000e+00 : f32
    %446 = vector.broadcast %cst_448 : f32 to vector<8x128xf32>
    %c30_449 = arith.constant 30 : index
    %c0_450 = arith.constant 0 : index
    %c0_451 = arith.constant 0 : index
    %447 = vector.load %arg11[%c30_449, %c0_450, %c0_451] : memref<56x8x128xf32, #tpu.memory_space<vmem>>, vector<1x8x128xf32>
    %448 = vector.shape_cast %447 : vector<1x8x128xf32> to vector<8x128xf32>
    %c0_452 = arith.constant 0 : index
    %c0_453 = arith.constant 0 : index
    %c0_454 = arith.constant 0 : index
    %449 = vector.load %arg4[%c0_452, %c0_453, %c0_454] : memref<9x128x128xf32, #tpu.memory_space<vmem>>, vector<1x128x128xf32>
    %450 = vector.shape_cast %449 : vector<1x128x128xf32> to vector<128x128xf32>
    %cst_455 = arith.constant dense<0.000000e+00> : vector<8x128xf32>
    %451 = tpu.matmul %448, %450, %cst_455 {dimension_numbers = #tpu.dot_dimension_numbers<[1], [0], [0], [1], [0, 0, 1, 1], [], []>} : vector<8x128xf32>, vector<128x128xf32>, vector<8x128xf32> -> vector<8x128xf32>
    %452 = arith.addf %446, %451 : vector<8x128xf32>
    %c31_456 = arith.constant 31 : index
    %c0_457 = arith.constant 0 : index
    %c0_458 = arith.constant 0 : index
    %453 = vector.load %arg11[%c31_456, %c0_457, %c0_458] : memref<56x8x128xf32, #tpu.memory_space<vmem>>, vector<1x8x128xf32>
    %454 = vector.shape_cast %453 : vector<1x8x128xf32> to vector<8x128xf32>
    %c1_459 = arith.constant 1 : index
    %c0_460 = arith.constant 0 : index
    %c0_461 = arith.constant 0 : index
    %455 = vector.load %arg4[%c1_459, %c0_460, %c0_461] : memref<9x128x128xf32, #tpu.memory_space<vmem>>, vector<1x128x128xf32>
    %456 = vector.shape_cast %455 : vector<1x128x128xf32> to vector<128x128xf32>
    %cst_462 = arith.constant dense<0.000000e+00> : vector<8x128xf32>
    %457 = tpu.matmul %454, %456, %cst_462 {dimension_numbers = #tpu.dot_dimension_numbers<[1], [0], [0], [1], [0, 0, 1, 1], [], []>} : vector<8x128xf32>, vector<128x128xf32>, vector<8x128xf32> -> vector<8x128xf32>
    %458 = arith.addf %452, %457 : vector<8x128xf32>
    %c32_463 = arith.constant 32 : index
    %c0_464 = arith.constant 0 : index
    %c0_465 = arith.constant 0 : index
    %459 = vector.load %arg11[%c32_463, %c0_464, %c0_465] : memref<56x8x128xf32, #tpu.memory_space<vmem>>, vector<1x8x128xf32>
    %460 = vector.shape_cast %459 : vector<1x8x128xf32> to vector<8x128xf32>
    %c2_466 = arith.constant 2 : index
    %c0_467 = arith.constant 0 : index
    %c0_468 = arith.constant 0 : index
    %461 = vector.load %arg4[%c2_466, %c0_467, %c0_468] : memref<9x128x128xf32, #tpu.memory_space<vmem>>, vector<1x128x128xf32>
    %462 = vector.shape_cast %461 : vector<1x128x128xf32> to vector<128x128xf32>
    %cst_469 = arith.constant dense<0.000000e+00> : vector<8x128xf32>
    %463 = tpu.matmul %460, %462, %cst_469 {dimension_numbers = #tpu.dot_dimension_numbers<[1], [0], [0], [1], [0, 0, 1, 1], [], []>} : vector<8x128xf32>, vector<128x128xf32>, vector<8x128xf32> -> vector<8x128xf32>
    %464 = arith.addf %458, %463 : vector<8x128xf32>
    %c37_470 = arith.constant 37 : index
    %c0_471 = arith.constant 0 : index
    %c0_472 = arith.constant 0 : index
    %465 = vector.load %arg11[%c37_470, %c0_471, %c0_472] : memref<56x8x128xf32, #tpu.memory_space<vmem>>, vector<1x8x128xf32>
    %466 = vector.shape_cast %465 : vector<1x8x128xf32> to vector<8x128xf32>
    %c3_473 = arith.constant 3 : index
    %c0_474 = arith.constant 0 : index
    %c0_475 = arith.constant 0 : index
    %467 = vector.load %arg4[%c3_473, %c0_474, %c0_475] : memref<9x128x128xf32, #tpu.memory_space<vmem>>, vector<1x128x128xf32>
    %468 = vector.shape_cast %467 : vector<1x128x128xf32> to vector<128x128xf32>
    %cst_476 = arith.constant dense<0.000000e+00> : vector<8x128xf32>
    %469 = tpu.matmul %466, %468, %cst_476 {dimension_numbers = #tpu.dot_dimension_numbers<[1], [0], [0], [1], [0, 0, 1, 1], [], []>} : vector<8x128xf32>, vector<128x128xf32>, vector<8x128xf32> -> vector<8x128xf32>
    %470 = arith.addf %464, %469 : vector<8x128xf32>
    %c38 = arith.constant 38 : index
    %c0_477 = arith.constant 0 : index
    %c0_478 = arith.constant 0 : index
    %471 = vector.load %arg11[%c38, %c0_477, %c0_478] : memref<56x8x128xf32, #tpu.memory_space<vmem>>, vector<1x8x128xf32>
    %472 = vector.shape_cast %471 : vector<1x8x128xf32> to vector<8x128xf32>
    %c4_479 = arith.constant 4 : index
    %c0_480 = arith.constant 0 : index
    %c0_481 = arith.constant 0 : index
    %473 = vector.load %arg4[%c4_479, %c0_480, %c0_481] : memref<9x128x128xf32, #tpu.memory_space<vmem>>, vector<1x128x128xf32>
    %474 = vector.shape_cast %473 : vector<1x128x128xf32> to vector<128x128xf32>
    %cst_482 = arith.constant dense<0.000000e+00> : vector<8x128xf32>
    %475 = tpu.matmul %472, %474, %cst_482 {dimension_numbers = #tpu.dot_dimension_numbers<[1], [0], [0], [1], [0, 0, 1, 1], [], []>} : vector<8x128xf32>, vector<128x128xf32>, vector<8x128xf32> -> vector<8x128xf32>
    %476 = arith.addf %470, %475 : vector<8x128xf32>
    %c39 = arith.constant 39 : index
    %c0_483 = arith.constant 0 : index
    %c0_484 = arith.constant 0 : index
    %477 = vector.load %arg11[%c39, %c0_483, %c0_484] : memref<56x8x128xf32, #tpu.memory_space<vmem>>, vector<1x8x128xf32>
    %478 = vector.shape_cast %477 : vector<1x8x128xf32> to vector<8x128xf32>
    %c5_485 = arith.constant 5 : index
    %c0_486 = arith.constant 0 : index
    %c0_487 = arith.constant 0 : index
    %479 = vector.load %arg4[%c5_485, %c0_486, %c0_487] : memref<9x128x128xf32, #tpu.memory_space<vmem>>, vector<1x128x128xf32>
    %480 = vector.shape_cast %479 : vector<1x128x128xf32> to vector<128x128xf32>
    %cst_488 = arith.constant dense<0.000000e+00> : vector<8x128xf32>
    %481 = tpu.matmul %478, %480, %cst_488 {dimension_numbers = #tpu.dot_dimension_numbers<[1], [0], [0], [1], [0, 0, 1, 1], [], []>} : vector<8x128xf32>, vector<128x128xf32>, vector<8x128xf32> -> vector<8x128xf32>
    %482 = arith.addf %476, %481 : vector<8x128xf32>
    %c44_489 = arith.constant 44 : index
    %c0_490 = arith.constant 0 : index
    %c0_491 = arith.constant 0 : index
    %483 = vector.load %arg11[%c44_489, %c0_490, %c0_491] : memref<56x8x128xf32, #tpu.memory_space<vmem>>, vector<1x8x128xf32>
    %484 = vector.shape_cast %483 : vector<1x8x128xf32> to vector<8x128xf32>
    %c6_492 = arith.constant 6 : index
    %c0_493 = arith.constant 0 : index
    %c0_494 = arith.constant 0 : index
    %485 = vector.load %arg4[%c6_492, %c0_493, %c0_494] : memref<9x128x128xf32, #tpu.memory_space<vmem>>, vector<1x128x128xf32>
    %486 = vector.shape_cast %485 : vector<1x128x128xf32> to vector<128x128xf32>
    %cst_495 = arith.constant dense<0.000000e+00> : vector<8x128xf32>
    %487 = tpu.matmul %484, %486, %cst_495 {dimension_numbers = #tpu.dot_dimension_numbers<[1], [0], [0], [1], [0, 0, 1, 1], [], []>} : vector<8x128xf32>, vector<128x128xf32>, vector<8x128xf32> -> vector<8x128xf32>
    %488 = arith.addf %482, %487 : vector<8x128xf32>
    %c45 = arith.constant 45 : index
    %c0_496 = arith.constant 0 : index
    %c0_497 = arith.constant 0 : index
    %489 = vector.load %arg11[%c45, %c0_496, %c0_497] : memref<56x8x128xf32, #tpu.memory_space<vmem>>, vector<1x8x128xf32>
    %490 = vector.shape_cast %489 : vector<1x8x128xf32> to vector<8x128xf32>
    %c7_498 = arith.constant 7 : index
    %c0_499 = arith.constant 0 : index
    %c0_500 = arith.constant 0 : index
    %491 = vector.load %arg4[%c7_498, %c0_499, %c0_500] : memref<9x128x128xf32, #tpu.memory_space<vmem>>, vector<1x128x128xf32>
    %492 = vector.shape_cast %491 : vector<1x128x128xf32> to vector<128x128xf32>
    %cst_501 = arith.constant dense<0.000000e+00> : vector<8x128xf32>
    %493 = tpu.matmul %490, %492, %cst_501 {dimension_numbers = #tpu.dot_dimension_numbers<[1], [0], [0], [1], [0, 0, 1, 1], [], []>} : vector<8x128xf32>, vector<128x128xf32>, vector<8x128xf32> -> vector<8x128xf32>
    %494 = arith.addf %488, %493 : vector<8x128xf32>
    %c46 = arith.constant 46 : index
    %c0_502 = arith.constant 0 : index
    %c0_503 = arith.constant 0 : index
    %495 = vector.load %arg11[%c46, %c0_502, %c0_503] : memref<56x8x128xf32, #tpu.memory_space<vmem>>, vector<1x8x128xf32>
    %496 = vector.shape_cast %495 : vector<1x8x128xf32> to vector<8x128xf32>
    %c8_504 = arith.constant 8 : index
    %c0_505 = arith.constant 0 : index
    %c0_506 = arith.constant 0 : index
    %497 = vector.load %arg4[%c8_504, %c0_505, %c0_506] : memref<9x128x128xf32, #tpu.memory_space<vmem>>, vector<1x128x128xf32>
    %498 = vector.shape_cast %497 : vector<1x128x128xf32> to vector<128x128xf32>
    %cst_507 = arith.constant dense<0.000000e+00> : vector<8x128xf32>
    %499 = tpu.matmul %496, %498, %cst_507 {dimension_numbers = #tpu.dot_dimension_numbers<[1], [0], [0], [1], [0, 0, 1, 1], [], []>} : vector<8x128xf32>, vector<128x128xf32>, vector<8x128xf32> -> vector<8x128xf32>
    %500 = arith.addf %494, %499 : vector<8x128xf32>
    %501 = vector.broadcast %11 : vector<1x128xf32> to vector<8x128xf32>
    %502 = arith.addf %500, %501 : vector<8x128xf32>
    %cst_508 = arith.constant 0.000000e+00 : f32
    %503 = vector.broadcast %cst_508 : f32 to vector<8x128xf32>
    %504 = arith.maximumf %502, %503 : vector<8x128xf32>
    %c7_509 = arith.constant 7 : index
    %c0_510 = arith.constant 0 : index
    %c0_511 = arith.constant 0 : index
    %505 = vector.load %arg12[%c7_509, %c0_510, %c0_511] : memref<9x8x128xf32, #tpu.memory_space<vmem>>, vector<1x8x128xf32>
    %506 = vector.shape_cast %505 : vector<1x8x128xf32> to vector<8x128xf32>
    %507 = vector.shape_cast %504 : vector<8x128xf32> to vector<1x8x128xf32>
    tpu.vector_store %arg12[%c7_509, %c0_510, %c0_511], %507 {strides = array<i32>} : memref<9x8x128xf32, #tpu.memory_space<vmem>>, vector<1x8x128xf32>,
    %cst_512 = arith.constant 0.000000e+00 : f32
    %508 = vector.broadcast %cst_512 : f32 to vector<8x128xf32>
    %c32_513 = arith.constant 32 : index
    %c0_514 = arith.constant 0 : index
    %c0_515 = arith.constant 0 : index
    %509 = vector.load %arg11[%c32_513, %c0_514, %c0_515] : memref<56x8x128xf32, #tpu.memory_space<vmem>>, vector<1x8x128xf32>
    %510 = vector.shape_cast %509 : vector<1x8x128xf32> to vector<8x128xf32>
    %c0_516 = arith.constant 0 : index
    %c0_517 = arith.constant 0 : index
    %c0_518 = arith.constant 0 : index
    %511 = vector.load %arg4[%c0_516, %c0_517, %c0_518] : memref<9x128x128xf32, #tpu.memory_space<vmem>>, vector<1x128x128xf32>
    %512 = vector.shape_cast %511 : vector<1x128x128xf32> to vector<128x128xf32>
    %cst_519 = arith.constant dense<0.000000e+00> : vector<8x128xf32>
    %513 = tpu.matmul %510, %512, %cst_519 {dimension_numbers = #tpu.dot_dimension_numbers<[1], [0], [0], [1], [0, 0, 1, 1], [], []>} : vector<8x128xf32>, vector<128x128xf32>, vector<8x128xf32> -> vector<8x128xf32>
    %514 = arith.addf %508, %513 : vector<8x128xf32>
    %c33_520 = arith.constant 33 : index
    %c0_521 = arith.constant 0 : index
    %c0_522 = arith.constant 0 : index
    %515 = vector.load %arg11[%c33_520, %c0_521, %c0_522] : memref<56x8x128xf32, #tpu.memory_space<vmem>>, vector<1x8x128xf32>
    %516 = vector.shape_cast %515 : vector<1x8x128xf32> to vector<8x128xf32>
    %c1_523 = arith.constant 1 : index
    %c0_524 = arith.constant 0 : index
    %c0_525 = arith.constant 0 : index
    %517 = vector.load %arg4[%c1_523, %c0_524, %c0_525] : memref<9x128x128xf32, #tpu.memory_space<vmem>>, vector<1x128x128xf32>
    %518 = vector.shape_cast %517 : vector<1x128x128xf32> to vector<128x128xf32>
    %cst_526 = arith.constant dense<0.000000e+00> : vector<8x128xf32>
    %519 = tpu.matmul %516, %518, %cst_526 {dimension_numbers = #tpu.dot_dimension_numbers<[1], [0], [0], [1], [0, 0, 1, 1], [], []>} : vector<8x128xf32>, vector<128x128xf32>, vector<8x128xf32> -> vector<8x128xf32>
    %520 = arith.addf %514, %519 : vector<8x128xf32>
    %c34_527 = arith.constant 34 : index
    %c0_528 = arith.constant 0 : index
    %c0_529 = arith.constant 0 : index
    %521 = vector.load %arg11[%c34_527, %c0_528, %c0_529] : memref<56x8x128xf32, #tpu.memory_space<vmem>>, vector<1x8x128xf32>
    %522 = vector.shape_cast %521 : vector<1x8x128xf32> to vector<8x128xf32>
    %c2_530 = arith.constant 2 : index
    %c0_531 = arith.constant 0 : index
    %c0_532 = arith.constant 0 : index
    %523 = vector.load %arg4[%c2_530, %c0_531, %c0_532] : memref<9x128x128xf32, #tpu.memory_space<vmem>>, vector<1x128x128xf32>
    %524 = vector.shape_cast %523 : vector<1x128x128xf32> to vector<128x128xf32>
    %cst_533 = arith.constant dense<0.000000e+00> : vector<8x128xf32>
    %525 = tpu.matmul %522, %524, %cst_533 {dimension_numbers = #tpu.dot_dimension_numbers<[1], [0], [0], [1], [0, 0, 1, 1], [], []>} : vector<8x128xf32>, vector<128x128xf32>, vector<8x128xf32> -> vector<8x128xf32>
    %526 = arith.addf %520, %525 : vector<8x128xf32>
    %c39_534 = arith.constant 39 : index
    %c0_535 = arith.constant 0 : index
    %c0_536 = arith.constant 0 : index
    %527 = vector.load %arg11[%c39_534, %c0_535, %c0_536] : memref<56x8x128xf32, #tpu.memory_space<vmem>>, vector<1x8x128xf32>
    %528 = vector.shape_cast %527 : vector<1x8x128xf32> to vector<8x128xf32>
    %c3_537 = arith.constant 3 : index
    %c0_538 = arith.constant 0 : index
    %c0_539 = arith.constant 0 : index
    %529 = vector.load %arg4[%c3_537, %c0_538, %c0_539] : memref<9x128x128xf32, #tpu.memory_space<vmem>>, vector<1x128x128xf32>
    %530 = vector.shape_cast %529 : vector<1x128x128xf32> to vector<128x128xf32>
    %cst_540 = arith.constant dense<0.000000e+00> : vector<8x128xf32>
    %531 = tpu.matmul %528, %530, %cst_540 {dimension_numbers = #tpu.dot_dimension_numbers<[1], [0], [0], [1], [0, 0, 1, 1], [], []>} : vector<8x128xf32>, vector<128x128xf32>, vector<8x128xf32> -> vector<8x128xf32>
    %532 = arith.addf %526, %531 : vector<8x128xf32>
    %c40 = arith.constant 40 : index
    %c0_541 = arith.constant 0 : index
    %c0_542 = arith.constant 0 : index
    %533 = vector.load %arg11[%c40, %c0_541, %c0_542] : memref<56x8x128xf32, #tpu.memory_space<vmem>>, vector<1x8x128xf32>
    %534 = vector.shape_cast %533 : vector<1x8x128xf32> to vector<8x128xf32>
    %c4_543 = arith.constant 4 : index
    %c0_544 = arith.constant 0 : index
    %c0_545 = arith.constant 0 : index
    %535 = vector.load %arg4[%c4_543, %c0_544, %c0_545] : memref<9x128x128xf32, #tpu.memory_space<vmem>>, vector<1x128x128xf32>
    %536 = vector.shape_cast %535 : vector<1x128x128xf32> to vector<128x128xf32>
    %cst_546 = arith.constant dense<0.000000e+00> : vector<8x128xf32>
    %537 = tpu.matmul %534, %536, %cst_546 {dimension_numbers = #tpu.dot_dimension_numbers<[1], [0], [0], [1], [0, 0, 1, 1], [], []>} : vector<8x128xf32>, vector<128x128xf32>, vector<8x128xf32> -> vector<8x128xf32>
    %538 = arith.addf %532, %537 : vector<8x128xf32>
    %c41 = arith.constant 41 : index
    %c0_547 = arith.constant 0 : index
    %c0_548 = arith.constant 0 : index
    %539 = vector.load %arg11[%c41, %c0_547, %c0_548] : memref<56x8x128xf32, #tpu.memory_space<vmem>>, vector<1x8x128xf32>
    %540 = vector.shape_cast %539 : vector<1x8x128xf32> to vector<8x128xf32>
    %c5_549 = arith.constant 5 : index
    %c0_550 = arith.constant 0 : index
    %c0_551 = arith.constant 0 : index
    %541 = vector.load %arg4[%c5_549, %c0_550, %c0_551] : memref<9x128x128xf32, #tpu.memory_space<vmem>>, vector<1x128x128xf32>
    %542 = vector.shape_cast %541 : vector<1x128x128xf32> to vector<128x128xf32>
    %cst_552 = arith.constant dense<0.000000e+00> : vector<8x128xf32>
    %543 = tpu.matmul %540, %542, %cst_552 {dimension_numbers = #tpu.dot_dimension_numbers<[1], [0], [0], [1], [0, 0, 1, 1], [], []>} : vector<8x128xf32>, vector<128x128xf32>, vector<8x128xf32> -> vector<8x128xf32>
    %544 = arith.addf %538, %543 : vector<8x128xf32>
    %c46_553 = arith.constant 46 : index
    %c0_554 = arith.constant 0 : index
    %c0_555 = arith.constant 0 : index
    %545 = vector.load %arg11[%c46_553, %c0_554, %c0_555] : memref<56x8x128xf32, #tpu.memory_space<vmem>>, vector<1x8x128xf32>
    %546 = vector.shape_cast %545 : vector<1x8x128xf32> to vector<8x128xf32>
    %c6_556 = arith.constant 6 : index
    %c0_557 = arith.constant 0 : index
    %c0_558 = arith.constant 0 : index
    %547 = vector.load %arg4[%c6_556, %c0_557, %c0_558] : memref<9x128x128xf32, #tpu.memory_space<vmem>>, vector<1x128x128xf32>
    %548 = vector.shape_cast %547 : vector<1x128x128xf32> to vector<128x128xf32>
    %cst_559 = arith.constant dense<0.000000e+00> : vector<8x128xf32>
    %549 = tpu.matmul %546, %548, %cst_559 {dimension_numbers = #tpu.dot_dimension_numbers<[1], [0], [0], [1], [0, 0, 1, 1], [], []>} : vector<8x128xf32>, vector<128x128xf32>, vector<8x128xf32> -> vector<8x128xf32>
    %550 = arith.addf %544, %549 : vector<8x128xf32>
    %c47 = arith.constant 47 : index
    %c0_560 = arith.constant 0 : index
    %c0_561 = arith.constant 0 : index
    %551 = vector.load %arg11[%c47, %c0_560, %c0_561] : memref<56x8x128xf32, #tpu.memory_space<vmem>>, vector<1x8x128xf32>
    %552 = vector.shape_cast %551 : vector<1x8x128xf32> to vector<8x128xf32>
    %c7_562 = arith.constant 7 : index
    %c0_563 = arith.constant 0 : index
    %c0_564 = arith.constant 0 : index
    %553 = vector.load %arg4[%c7_562, %c0_563, %c0_564] : memref<9x128x128xf32, #tpu.memory_space<vmem>>, vector<1x128x128xf32>
    %554 = vector.shape_cast %553 : vector<1x128x128xf32> to vector<128x128xf32>
    %cst_565 = arith.constant dense<0.000000e+00> : vector<8x128xf32>
    %555 = tpu.matmul %552, %554, %cst_565 {dimension_numbers = #tpu.dot_dimension_numbers<[1], [0], [0], [1], [0, 0, 1, 1], [], []>} : vector<8x128xf32>, vector<128x128xf32>, vector<8x128xf32> -> vector<8x128xf32>
    %556 = arith.addf %550, %555 : vector<8x128xf32>
    %c48 = arith.constant 48 : index
    %c0_566 = arith.constant 0 : index
    %c0_567 = arith.constant 0 : index
    %557 = vector.load %arg11[%c48, %c0_566, %c0_567] : memref<56x8x128xf32, #tpu.memory_space<vmem>>, vector<1x8x128xf32>
    %558 = vector.shape_cast %557 : vector<1x8x128xf32> to vector<8x128xf32>
    %c8_568 = arith.constant 8 : index
    %c0_569 = arith.constant 0 : index
    %c0_570 = arith.constant 0 : index
    %559 = vector.load %arg4[%c8_568, %c0_569, %c0_570] : memref<9x128x128xf32, #tpu.memory_space<vmem>>, vector<1x128x128xf32>
    %560 = vector.shape_cast %559 : vector<1x128x128xf32> to vector<128x128xf32>
    %cst_571 = arith.constant dense<0.000000e+00> : vector<8x128xf32>
    %561 = tpu.matmul %558, %560, %cst_571 {dimension_numbers = #tpu.dot_dimension_numbers<[1], [0], [0], [1], [0, 0, 1, 1], [], []>} : vector<8x128xf32>, vector<128x128xf32>, vector<8x128xf32> -> vector<8x128xf32>
    %562 = arith.addf %556, %561 : vector<8x128xf32>
    %563 = vector.broadcast %11 : vector<1x128xf32> to vector<8x128xf32>
    %564 = arith.addf %562, %563 : vector<8x128xf32>
    %cst_572 = arith.constant 0.000000e+00 : f32
    %565 = vector.broadcast %cst_572 : f32 to vector<8x128xf32>
    %566 = arith.maximumf %564, %565 : vector<8x128xf32>
    %c8_573 = arith.constant 8 : index
    %c0_574 = arith.constant 0 : index
    %c0_575 = arith.constant 0 : index
    %567 = vector.load %arg12[%c8_573, %c0_574, %c0_575] : memref<9x8x128xf32, #tpu.memory_space<vmem>>, vector<1x8x128xf32>
    %568 = vector.shape_cast %567 : vector<1x8x128xf32> to vector<8x128xf32>
    %569 = vector.shape_cast %566 : vector<8x128xf32> to vector<1x8x128xf32>
    tpu.vector_store %arg12[%c8_573, %c0_574, %c0_575], %569 {strides = array<i32>} : memref<9x8x128xf32, #tpu.memory_space<vmem>>, vector<1x8x128xf32>,
    %c0_576 = arith.constant 0 : index
    %c0_577 = arith.constant 0 : index
    %570 = vector.load %arg7[%c0_576, %c0_577] : memref<1x128xf32, #tpu.memory_space<vmem>>, vector<1x128xf32>
    %cst_578 = arith.constant 0.000000e+00 : f32
    %571 = vector.broadcast %cst_578 : f32 to vector<8x128xf32>
    %c0_579 = arith.constant 0 : index
    %c0_580 = arith.constant 0 : index
    %c0_581 = arith.constant 0 : index
    %572 = vector.load %arg12[%c0_579, %c0_580, %c0_581] : memref<9x8x128xf32, #tpu.memory_space<vmem>>, vector<1x8x128xf32>
    %573 = vector.shape_cast %572 : vector<1x8x128xf32> to vector<8x128xf32>
    %c0_582 = arith.constant 0 : index
    %c0_583 = arith.constant 0 : index
    %c0_584 = arith.constant 0 : index
    %574 = vector.load %arg6[%c0_582, %c0_583, %c0_584] : memref<9x128x128xf32, #tpu.memory_space<vmem>>, vector<1x128x128xf32>
    %575 = vector.shape_cast %574 : vector<1x128x128xf32> to vector<128x128xf32>
    %cst_585 = arith.constant dense<0.000000e+00> : vector<8x128xf32>
    %576 = tpu.matmul %573, %575, %cst_585 {dimension_numbers = #tpu.dot_dimension_numbers<[1], [0], [0], [1], [0, 0, 1, 1], [], []>} : vector<8x128xf32>, vector<128x128xf32>, vector<8x128xf32> -> vector<8x128xf32>
    %577 = arith.addf %571, %576 : vector<8x128xf32>
    %c1_586 = arith.constant 1 : index
    %c0_587 = arith.constant 0 : index
    %c0_588 = arith.constant 0 : index
    %578 = vector.load %arg12[%c1_586, %c0_587, %c0_588] : memref<9x8x128xf32, #tpu.memory_space<vmem>>, vector<1x8x128xf32>
    %579 = vector.shape_cast %578 : vector<1x8x128xf32> to vector<8x128xf32>
    %c1_589 = arith.constant 1 : index
    %c0_590 = arith.constant 0 : index
    %c0_591 = arith.constant 0 : index
    %580 = vector.load %arg6[%c1_589, %c0_590, %c0_591] : memref<9x128x128xf32, #tpu.memory_space<vmem>>, vector<1x128x128xf32>
    %581 = vector.shape_cast %580 : vector<1x128x128xf32> to vector<128x128xf32>
    %cst_592 = arith.constant dense<0.000000e+00> : vector<8x128xf32>
    %582 = tpu.matmul %579, %581, %cst_592 {dimension_numbers = #tpu.dot_dimension_numbers<[1], [0], [0], [1], [0, 0, 1, 1], [], []>} : vector<8x128xf32>, vector<128x128xf32>, vector<8x128xf32> -> vector<8x128xf32>
    %583 = arith.addf %577, %582 : vector<8x128xf32>
    %c2_593 = arith.constant 2 : index
    %c0_594 = arith.constant 0 : index
    %c0_595 = arith.constant 0 : index
    %584 = vector.load %arg12[%c2_593, %c0_594, %c0_595] : memref<9x8x128xf32, #tpu.memory_space<vmem>>, vector<1x8x128xf32>
    %585 = vector.shape_cast %584 : vector<1x8x128xf32> to vector<8x128xf32>
    %c2_596 = arith.constant 2 : index
    %c0_597 = arith.constant 0 : index
    %c0_598 = arith.constant 0 : index
    %586 = vector.load %arg6[%c2_596, %c0_597, %c0_598] : memref<9x128x128xf32, #tpu.memory_space<vmem>>, vector<1x128x128xf32>
    %587 = vector.shape_cast %586 : vector<1x128x128xf32> to vector<128x128xf32>
    %cst_599 = arith.constant dense<0.000000e+00> : vector<8x128xf32>
    %588 = tpu.matmul %585, %587, %cst_599 {dimension_numbers = #tpu.dot_dimension_numbers<[1], [0], [0], [1], [0, 0, 1, 1], [], []>} : vector<8x128xf32>, vector<128x128xf32>, vector<8x128xf32> -> vector<8x128xf32>
    %589 = arith.addf %583, %588 : vector<8x128xf32>
    %c3_600 = arith.constant 3 : index
    %c0_601 = arith.constant 0 : index
    %c0_602 = arith.constant 0 : index
    %590 = vector.load %arg12[%c3_600, %c0_601, %c0_602] : memref<9x8x128xf32, #tpu.memory_space<vmem>>, vector<1x8x128xf32>
    %591 = vector.shape_cast %590 : vector<1x8x128xf32> to vector<8x128xf32>
    %c3_603 = arith.constant 3 : index
    %c0_604 = arith.constant 0 : index
    %c0_605 = arith.constant 0 : index
    %592 = vector.load %arg6[%c3_603, %c0_604, %c0_605] : memref<9x128x128xf32, #tpu.memory_space<vmem>>, vector<1x128x128xf32>
    %593 = vector.shape_cast %592 : vector<1x128x128xf32> to vector<128x128xf32>
    %cst_606 = arith.constant dense<0.000000e+00> : vector<8x128xf32>
    %594 = tpu.matmul %591, %593, %cst_606 {dimension_numbers = #tpu.dot_dimension_numbers<[1], [0], [0], [1], [0, 0, 1, 1], [], []>} : vector<8x128xf32>, vector<128x128xf32>, vector<8x128xf32> -> vector<8x128xf32>
    %595 = arith.addf %589, %594 : vector<8x128xf32>
    %c4_607 = arith.constant 4 : index
    %c0_608 = arith.constant 0 : index
    %c0_609 = arith.constant 0 : index
    %596 = vector.load %arg12[%c4_607, %c0_608, %c0_609] : memref<9x8x128xf32, #tpu.memory_space<vmem>>, vector<1x8x128xf32>
    %597 = vector.shape_cast %596 : vector<1x8x128xf32> to vector<8x128xf32>
    %c4_610 = arith.constant 4 : index
    %c0_611 = arith.constant 0 : index
    %c0_612 = arith.constant 0 : index
    %598 = vector.load %arg6[%c4_610, %c0_611, %c0_612] : memref<9x128x128xf32, #tpu.memory_space<vmem>>, vector<1x128x128xf32>
    %599 = vector.shape_cast %598 : vector<1x128x128xf32> to vector<128x128xf32>
    %cst_613 = arith.constant dense<0.000000e+00> : vector<8x128xf32>
    %600 = tpu.matmul %597, %599, %cst_613 {dimension_numbers = #tpu.dot_dimension_numbers<[1], [0], [0], [1], [0, 0, 1, 1], [], []>} : vector<8x128xf32>, vector<128x128xf32>, vector<8x128xf32> -> vector<8x128xf32>
    %601 = arith.addf %595, %600 : vector<8x128xf32>
    %c5_614 = arith.constant 5 : index
    %c0_615 = arith.constant 0 : index
    %c0_616 = arith.constant 0 : index
    %602 = vector.load %arg12[%c5_614, %c0_615, %c0_616] : memref<9x8x128xf32, #tpu.memory_space<vmem>>, vector<1x8x128xf32>
    %603 = vector.shape_cast %602 : vector<1x8x128xf32> to vector<8x128xf32>
    %c5_617 = arith.constant 5 : index
    %c0_618 = arith.constant 0 : index
    %c0_619 = arith.constant 0 : index
    %604 = vector.load %arg6[%c5_617, %c0_618, %c0_619] : memref<9x128x128xf32, #tpu.memory_space<vmem>>, vector<1x128x128xf32>
    %605 = vector.shape_cast %604 : vector<1x128x128xf32> to vector<128x128xf32>
    %cst_620 = arith.constant dense<0.000000e+00> : vector<8x128xf32>
    %606 = tpu.matmul %603, %605, %cst_620 {dimension_numbers = #tpu.dot_dimension_numbers<[1], [0], [0], [1], [0, 0, 1, 1], [], []>} : vector<8x128xf32>, vector<128x128xf32>, vector<8x128xf32> -> vector<8x128xf32>
    %607 = arith.addf %601, %606 : vector<8x128xf32>
    %c6_621 = arith.constant 6 : index
    %c0_622 = arith.constant 0 : index
    %c0_623 = arith.constant 0 : index
    %608 = vector.load %arg12[%c6_621, %c0_622, %c0_623] : memref<9x8x128xf32, #tpu.memory_space<vmem>>, vector<1x8x128xf32>
    %609 = vector.shape_cast %608 : vector<1x8x128xf32> to vector<8x128xf32>
    %c6_624 = arith.constant 6 : index
    %c0_625 = arith.constant 0 : index
    %c0_626 = arith.constant 0 : index
    %610 = vector.load %arg6[%c6_624, %c0_625, %c0_626] : memref<9x128x128xf32, #tpu.memory_space<vmem>>, vector<1x128x128xf32>
    %611 = vector.shape_cast %610 : vector<1x128x128xf32> to vector<128x128xf32>
    %cst_627 = arith.constant dense<0.000000e+00> : vector<8x128xf32>
    %612 = tpu.matmul %609, %611, %cst_627 {dimension_numbers = #tpu.dot_dimension_numbers<[1], [0], [0], [1], [0, 0, 1, 1], [], []>} : vector<8x128xf32>, vector<128x128xf32>, vector<8x128xf32> -> vector<8x128xf32>
    %613 = arith.addf %607, %612 : vector<8x128xf32>
    %c7_628 = arith.constant 7 : index
    %c0_629 = arith.constant 0 : index
    %c0_630 = arith.constant 0 : index
    %614 = vector.load %arg12[%c7_628, %c0_629, %c0_630] : memref<9x8x128xf32, #tpu.memory_space<vmem>>, vector<1x8x128xf32>
    %615 = vector.shape_cast %614 : vector<1x8x128xf32> to vector<8x128xf32>
    %c7_631 = arith.constant 7 : index
    %c0_632 = arith.constant 0 : index
    %c0_633 = arith.constant 0 : index
    %616 = vector.load %arg6[%c7_631, %c0_632, %c0_633] : memref<9x128x128xf32, #tpu.memory_space<vmem>>, vector<1x128x128xf32>
    %617 = vector.shape_cast %616 : vector<1x128x128xf32> to vector<128x128xf32>
    %cst_634 = arith.constant dense<0.000000e+00> : vector<8x128xf32>
    %618 = tpu.matmul %615, %617, %cst_634 {dimension_numbers = #tpu.dot_dimension_numbers<[1], [0], [0], [1], [0, 0, 1, 1], [], []>} : vector<8x128xf32>, vector<128x128xf32>, vector<8x128xf32> -> vector<8x128xf32>
    %619 = arith.addf %613, %618 : vector<8x128xf32>
    %c8_635 = arith.constant 8 : index
    %c0_636 = arith.constant 0 : index
    %c0_637 = arith.constant 0 : index
    %620 = vector.load %arg12[%c8_635, %c0_636, %c0_637] : memref<9x8x128xf32, #tpu.memory_space<vmem>>, vector<1x8x128xf32>
    %621 = vector.shape_cast %620 : vector<1x8x128xf32> to vector<8x128xf32>
    %c8_638 = arith.constant 8 : index
    %c0_639 = arith.constant 0 : index
    %c0_640 = arith.constant 0 : index
    %622 = vector.load %arg6[%c8_638, %c0_639, %c0_640] : memref<9x128x128xf32, #tpu.memory_space<vmem>>, vector<1x128x128xf32>
    %623 = vector.shape_cast %622 : vector<1x128x128xf32> to vector<128x128xf32>
    %cst_641 = arith.constant dense<0.000000e+00> : vector<8x128xf32>
    %624 = tpu.matmul %621, %623, %cst_641 {dimension_numbers = #tpu.dot_dimension_numbers<[1], [0], [0], [1], [0, 0, 1, 1], [], []>} : vector<8x128xf32>, vector<128x128xf32>, vector<8x128xf32> -> vector<8x128xf32>
    %625 = arith.addf %619, %624 : vector<8x128xf32>
    %626 = vector.broadcast %570 : vector<1x128xf32> to vector<8x128xf32>
    %627 = arith.addf %625, %626 : vector<8x128xf32>
    %cst_642 = arith.constant 0.000000e+00 : f32
    %628 = vector.broadcast %cst_642 : f32 to vector<8x128xf32>
    %629 = arith.maximumf %627, %628 : vector<8x128xf32>
    %c0_643 = arith.constant 0 : index
    %c0_644 = arith.constant 0 : index
    %c0_645 = arith.constant 0 : index
    %630 = vector.load %arg13[%c0_643, %c0_644, %c0_645] : memref<1x8x128xf32, #tpu.memory_space<vmem>>, vector<1x8x128xf32>
    %631 = vector.shape_cast %630 : vector<1x8x128xf32> to vector<8x128xf32>
    %632 = vector.shape_cast %629 : vector<8x128xf32> to vector<1x8x128xf32>
    tpu.vector_store %arg13[%c0_643, %c0_644, %c0_645], %632 {strides = array<i32>} : memref<1x8x128xf32, #tpu.memory_space<vmem>>, vector<1x8x128xf32>,
    %cst_646 = arith.constant 0.000000e+00 : f32
    %633 = vector.broadcast %cst_646 : f32 to vector<8x128xf32>
    %c0_647 = arith.constant 0 : index
    %c0_648 = arith.constant 0 : index
    %c0_649 = arith.constant 0 : index
    %634 = vector.load %arg13[%c0_647, %c0_648, %c0_649] : memref<1x8x128xf32, #tpu.memory_space<vmem>>, vector<1x8x128xf32>
    %635 = vector.shape_cast %634 : vector<1x8x128xf32> to vector<8x128xf32>
    %c0_650 = arith.constant 0 : index
    %c0_651 = arith.constant 0 : index
    %c0_652 = arith.constant 0 : index
    %636 = vector.load %arg8[%c0_650, %c0_651, %c0_652] : memref<1x128x128xf32, #tpu.memory_space<vmem>>, vector<1x128x128xf32>
    %637 = vector.shape_cast %636 : vector<1x128x128xf32> to vector<128x128xf32>
    %cst_653 = arith.constant dense<0.000000e+00> : vector<8x128xf32>
    %638 = tpu.matmul %635, %637, %cst_653 {dimension_numbers = #tpu.dot_dimension_numbers<[1], [0], [0], [1], [0, 0, 1, 1], [], []>} : vector<8x128xf32>, vector<128x128xf32>, vector<8x128xf32> -> vector<8x128xf32>
    %639 = arith.addf %633, %638 : vector<8x128xf32>
    %c0_654 = arith.constant 0 : index
    %c0_655 = arith.constant 0 : index
    %640 = vector.load %arg9[%c0_654, %c0_655] : memref<1x128xf32, #tpu.memory_space<vmem>>, vector<1x128xf32>
    %641 = vector.broadcast %640 : vector<1x128xf32> to vector<8x128xf32>
    %642 = arith.addf %639, %641 : vector<8x128xf32>
    %c0_656 = arith.constant 0 : index
    %c0_657 = arith.constant 0 : index
    %643 = vector.load %arg10[%c0_656, %c0_657] : memref<8x128xf32, #tpu.memory_space<vmem>>, vector<8x128xf32>
    tpu.vector_store %arg10[%c0_656, %c0_657], %642 {strides = array<i32>} : memref<8x128xf32, #tpu.memory_space<vmem>>, vector<8x128xf32>,
    return
  }
  func.func @transform_0(%arg0: i32) -> (i32, i32, i32) {
    %c0_i32 = arith.constant 0 : i32
    %c0_i32_0 = arith.constant 0 : i32
    %c0_i32_1 = arith.constant 0 : i32
    return %c0_i32, %arg0, %c0_i32_0 : i32, i32, i32
  }
  func.func @transform_1(%arg0: i32) -> (i32, i32) {
    %c0_i32 = arith.constant 0 : i32
    %c0_i32_0 = arith.constant 0 : i32
    %c0_i32_1 = arith.constant 0 : i32
    return %c0_i32, %c0_i32_0 : i32, i32
  }
  func.func @transform_2(%arg0: i32) -> (i32, i32) {
    %c0_i32 = arith.constant 0 : i32
    %c0_i32_0 = arith.constant 0 : i32
    %c0_i32_1 = arith.constant 0 : i32
    return %c0_i32, %c0_i32_0 : i32, i32
  }
  func.func @transform_3(%arg0: i32) -> (i32, i32, i32) {
    %c0_i32 = arith.constant 0 : i32
    %c0_i32_0 = arith.constant 0 : i32
    %c0_i32_1 = arith.constant 0 : i32
    %c0_i32_2 = arith.constant 0 : i32
    return %c0_i32, %c0_i32_0, %c0_i32_1 : i32, i32, i32
  }
  func.func @transform_4(%arg0: i32) -> (i32, i32) {
    %c0_i32 = arith.constant 0 : i32
    %c0_i32_0 = arith.constant 0 : i32
    %c0_i32_1 = arith.constant 0 : i32
    return %c0_i32, %c0_i32_0 : i32, i32
  }
  func.func @transform_5(%arg0: i32) -> (i32, i32, i32) {
    %c0_i32 = arith.constant 0 : i32
    %c0_i32_0 = arith.constant 0 : i32
    %c0_i32_1 = arith.constant 0 : i32
    %c0_i32_2 = arith.constant 0 : i32
    return %c0_i32, %c0_i32_0, %c0_i32_1 : i32, i32, i32
  }
  func.func @transform_6(%arg0: i32) -> (i32, i32) {
    %c0_i32 = arith.constant 0 : i32
    %c0_i32_0 = arith.constant 0 : i32
    %c0_i32_1 = arith.constant 0 : i32
    return %c0_i32, %c0_i32_0 : i32, i32
  }
  func.func @transform_7(%arg0: i32) -> (i32, i32, i32) {
    %c0_i32 = arith.constant 0 : i32
    %c0_i32_0 = arith.constant 0 : i32
    %c0_i32_1 = arith.constant 0 : i32
    %c0_i32_2 = arith.constant 0 : i32
    return %c0_i32, %c0_i32_0, %c0_i32_1 : i32, i32, i32
  }
  func.func @transform_8(%arg0: i32) -> (i32, i32) {
    %c0_i32 = arith.constant 0 : i32
    %c0_i32_0 = arith.constant 0 : i32
    %c0_i32_1 = arith.constant 0 : i32
    return %c0_i32, %c0_i32_0 : i32, i32
  }
  func.func @transform_9(%arg0: i32) -> (i32, i32) {
    %c0_i32 = arith.constant 0 : i32
    %c0_i32_0 = arith.constant 0 : i32
    return %arg0, %c0_i32 : i32, i32
  }
}

</mosaic_0001>

<bundles_post_ra>
// kernel: tpu_custom_call.1
= control target key start
LH: loop header
LB: loop body
LE: loop exit
PB: predicated region body
PF: predicated region fallthrough
CT: control target
= control target key end

     0   :  { %14 = vsyncpa [#allocation6], 0  ;;  %s18832_s0 = inlined_call_operand.hbm [shape: f32[56,8,128], index: 0, kind: input, shape index: {}]   ;;  %s18833_s1 = inlined_call_operand.hbm [shape: f32[128,128], index: 1, kind: input, shape index: {}]   ;;  %s18834_s2 = inlined_call_operand.vmem [shape: f32[1,128], index: 2, kind: input, shape index: {}]   ;;  %s18835_s3 = inlined_call_operand.hbm [shape: f32[9,128,128], index: 3, kind: input, shape index: {}]   ;;  %s18836_s4 = inlined_call_operand.vmem [shape: f32[1,128], index: 4, kind: input, shape index: {}]   ;;  %s18837_s5 = inlined_call_operand.hbm [shape: f32[9,128,128], index: 5, kind: input, shape index: {}]   ;;  %s18838_s6 = inlined_call_operand.vmem [shape: f32[1,128], index: 6, kind: input, shape index: {}]   ;;  %s18839_s7 = inlined_call_operand.hbm [shape: f32[1,128,128], index: 7, kind: input, shape index: {}]   ;;  %s18840_s8 = inlined_call_operand.vmem [shape: f32[1,128], index: 8, kind: input, shape index: {}]   ;;  %s18841_s9 = inlined_call_operand.hbm [shape: f32[8,128], index: 9, kind: output, shape index: {}]  }
   0x1   :  { %15 = vsyncpa [#allocation9], 0 }
   0x2   :  { %16 = vsyncpa [#allocation12], 0 }
   0x3   :  { %17 = vsyncpa [#allocation7], 0  ;;  %s16061_s30 = smov [#allocation8]   ;;  %s16062_s11 = smov [#allocation11]  }
   0x4   :  { %s35_s10 = sshll.u32 %s16061_s30, 4  ;;  %s63_s12 = sshll.u32 %s16062_s11, 4  ;;  %s36_s10 = int_to_ptr.vmem [resolvable:$true] %s35_s10  ;;  %s16122_s12 = int_to_ptr.vmem [resolvable:$true] %s63_s12 }
   0x5   :  { %s15921_s15 = scalar_lea.hbm %s18833_s1, 2048 }
   0x6   :  { %p15922_p0 = scmp.ne.s32.totalorder %s18833_s1, %s15921_s15  ;;  %p15925_p1 = scmp.lt.u32.totalorder %s15921_s15, %s18833_s1 }
   0x8   :  { %p15927_p2 = pnand %p15925_p1, %p15922_p0 }
   0xa   :  { %15930 = shalt.err (!%p15927_p2)
}
   0xb   :  { %s15931_s20 = scalar_lea.vmem %s36_s10, 2048  ;;  %p15936_p4 = scmp.lt.s32.totalorder %s36_s10, %s36_s10 }
   0xc   :  { %p15932_p3 = scmp.ne.s32.totalorder %s36_s10, %s15931_s20  ;;  %p15937_p5 = scmp.lt.s32.totalorder %s15931_s20, %s15931_s20 }
   0xe   :  { %p15938_p6 = por %p15937_p5, %p15936_p4 }
  0x10   :  { %p15939_p7 = pnand %p15938_p6, %p15932_p3 }
  0x12   :  { %15942 = shalt.err (!%p15939_p7)
}
  0x13   :  { %s16063_s21 = smov 128   ;;  %s16064_s22 = smov 8  }
  0x14   :  { %41 = dma.hbm_to_vmem [thread:$0]  %s18833_s1, 2048, %s36_s10, [#allocation9], %s16063_s21, %s16063_s21, %s16064_s22  }
  0x15   :  { %s15943_s27 = scalar_lea.hbm %s18837_s5, 18432 }
  0x16   :  { %p15944_p8 = scmp.ne.s32.totalorder %s18837_s5, %s15943_s27  ;;  %p15947_p9 = scmp.lt.u32.totalorder %s15943_s27, %s18837_s5 }
  0x18   :  { %p15949_p10 = pnand %p15947_p9, %p15944_p8 }
  0x1a   :  { %15952 = shalt.err (!%p15949_p10)
}
  0x1b   :  { %s15953_s13 = scalar_lea.vmem %s16122_s12, 18432  ;;  %p15958_p12 = scmp.lt.s32.totalorder %s16122_s12, %s16122_s12 }
  0x1c   :  { %p15954_p11 = scmp.ne.s32.totalorder %s16122_s12, %s15953_s13  ;;  %p15959_p13 = scmp.lt.s32.totalorder %s15953_s13, %s15953_s13 }
  0x1e   :  { %p15960_p0 = por %p15959_p13, %p15958_p12 }
  0x20   :  { %p15961_p1 = pnand %p15960_p0, %p15954_p11 }
  0x22   :  { %15964 = shalt.err (!%p15961_p1)
}
  0x23   :  { %69 = dma.hbm_to_vmem [thread:$0]  %s18837_s5, 18432, %s16122_s12, [#allocation12], %s16063_s21, %s16063_s21, %s16064_s22  }
  0x24   :  { %s16065_s14 = smov [#allocation5]   ;;  %s16066_s16 = smov [#allocation10]  }
  0x25   :  { %s23_s15 = sshll.u32 %s16065_s14, 4  ;;  %s49_s17 = sshll.u32 %s16066_s16, 4  ;;  %s24_s15 = int_to_ptr.vmem [resolvable:$true] %s23_s15  ;;  %s16159_s17 = int_to_ptr.vmem [resolvable:$true] %s49_s17 }
  0x26   :  { %s15965_s20 = scalar_lea.hbm %s18832_s0, 7168 }
  0x27   :  { %p15966_p2 = scmp.ne.s32.totalorder %s18832_s0, %s15965_s20  ;;  %p15969_p3 = scmp.lt.u32.totalorder %s15965_s20, %s18832_s0 }
  0x29   :  { %p15971_p4 = pnand %p15969_p3, %p15966_p2 }
  0x2b   :  { %15974 = shalt.err (!%p15971_p4)
}
  0x2c   :  { %s15975_s5 = scalar_lea.vmem %s24_s15, 7168  ;;  %p15980_p6 = scmp.lt.s32.totalorder %s24_s15, %s24_s15 }
  0x2d   :  { %p15976_p5 = scmp.ne.s32.totalorder %s24_s15, %s15975_s5  ;;  %p15981_p7 = scmp.lt.s32.totalorder %s15975_s5, %s15975_s5 }
  0x2f   :  { %p15982_p8 = por %p15981_p7, %p15980_p6 }
  0x31   :  { %p15983_p9 = pnand %p15982_p8, %p15976_p5 }
  0x33   :  { %15986 = shalt.err (!%p15983_p9)
}
  0x34   :  { %29 = dma.hbm_to_vmem [thread:$0]  %s18832_s0, 7168, %s24_s15, [#allocation6], %s16063_s21, %s16063_s21, %s16064_s22  }
  0x35   :  { %s15987_s30 = scalar_lea.hbm %s18835_s3, 18432 }
  0x36   :  { %p15988_p10 = scmp.ne.s32.totalorder %s18835_s3, %s15987_s30  ;;  %p15991_p11 = scmp.lt.u32.totalorder %s15987_s30, %s18835_s3 }
  0x38   :  { %p15993_p12 = pnand %p15991_p11, %p15988_p10 }
  0x3a   :  { %15996 = shalt.err (!%p15993_p12)
}
  0x3b   :  { %s15997_s14 = scalar_lea.vmem %s16159_s17, 18432  ;;  %p16002_p0 = scmp.lt.s32.totalorder %s16159_s17, %s16159_s17 }
  0x3c   :  { %p15998_p13 = scmp.ne.s32.totalorder %s16159_s17, %s15997_s14  ;;  %p16003_p1 = scmp.lt.s32.totalorder %s15997_s14, %s15997_s14 }
  0x3e   :  { %p16004_p2 = por %p16003_p1, %p16002_p0 }
  0x40   :  { %p16005_p3 = pnand %p16004_p2, %p15998_p13 }
  0x42   :  { %16008 = shalt.err (!%p16005_p3)
}
  0x43   :  { %55 = dma.hbm_to_vmem [thread:$0]  %s18835_s3, 18432, %s16159_s17, [#allocation9], %s16063_s21, %s16063_s21, %s16064_s22  }
  0x44   :  { %s16067_s16 = smov [#allocation13]   ;;  %s16009_s23 = scalar_lea.hbm %s18839_s7, 2048 }
  0x45   :  { %s77_s18 = sshll.u32 %s16067_s16, 4  ;;  %p16010_p4 = scmp.ne.s32.totalorder %s18839_s7, %s16009_s23  ;;  %s78_s18 = int_to_ptr.vmem [resolvable:$true] %s77_s18 }
  0x46   :  { %p16013_p5 = scmp.lt.u32.totalorder %s16009_s23, %s18839_s7 }
  0x48   :  { %p16015_p6 = pnand %p16013_p5, %p16010_p4 }
  0x4a   :  { %16018 = shalt.err (!%p16015_p6)
}
  0x4b   :  { %s16019_s12 = scalar_lea.vmem %s78_s18, 2048  ;;  %p16024_p8 = scmp.lt.s32.totalorder %s78_s18, %s78_s18 }
  0x4c   :  { %p16020_p7 = scmp.ne.s32.totalorder %s78_s18, %s16019_s12  ;;  %p16025_p9 = scmp.lt.s32.totalorder %s16019_s12, %s16019_s12 }
  0x4e   :  { %p16026_p10 = por %p16025_p9, %p16024_p8 }
  0x50   :  { %p16027_p11 = pnand %p16026_p10, %p16020_p7 }
  0x52   :  { %16030 = shalt.err (!%p16027_p11)
}
  0x53   :  { %83 = dma.hbm_to_vmem [thread:$0]  %s18839_s7, 2048, %s78_s18, [#allocation12], %s16063_s21, %s16063_s21, %s16064_s22  }
  0x54   :  { %16053 = dma.done.wait [#allocation6], 7168  }
  0x55   :  { %16054 = vsyncadd [#allocation6], 4294960128 }
  0x56   :  { %16055 = dma.done.wait [#allocation9], 20480  }
  0x57   :  { %16056 = vsyncadd [#allocation9], 4294946816 }
  0x58   :  { %16057 = dma.done.wait [#allocation12], 20480  }
  0x59   :  { %16058 = vsyncadd [#allocation12], 4294946816  ;;  %v16068_v0 = vmov 0.0|0.0   ;;  %v157_v1 = vld [vmem:[#allocation8] sm:$0xff]  ;;  %v158_v2 = vld [vmem:[#allocation8 + $0x8] sm:$0xff]  ;;  %vm16069_vm0 = vmmov 0  }
  0x5a   :  { %13721 = vmatprep.subr.bf16.mxu1 %v16068_v0  ;;  %v159_v3 = vld [vmem:[#allocation8 + $0x10] sm:$0xff]  ;;  %v13689_v4 = vpack.c.bf16 %v158_v2, %v157_v1  ;;  %v160_v5 = vld [vmem:[#allocation8 + $0x18] sm:$0xff]  ;;  %v161_v7 = vld [vmem:[#allocation8 + $0x20] sm:$0xff]  ;;  %s16071_s19 = smov [#allocation14]  }
  0x5b   :  { %v13693_v6 = vpack.c.bf16 %v160_v5, %v159_v3  ;;  %v162_v8 = vld [vmem:[#allocation8 + $0x28] sm:$0xff]  ;;  %v101_v10 = vld [vmem:[#allocation5] sm:$0xff]  ;;  %v163_v11 = vld [vmem:[#allocation8 + $0x30] sm:$0xff]  ;;  %s8754_s20 = sshll.u32 %s16071_s19, 4  ;;  %s8755_s20 = int_to_ptr.vmem [resolvable:$true] %s8754_s20 }
  0x5c   :  { %13690 = vmatprep.subr.bf16.mxu0 %v13689_v4  ;;  %v13697_v9 = vpack.c.bf16 %v162_v8, %v161_v7  ;;  %v164_v12 = vld [vmem:[#allocation8 + $0x38] sm:$0xff]  ;;  %10420 = vmatprep.mubr.f32.mxu0 %v101_v10  ;;  %v165_v14 = vld [vmem:[#allocation8 + $0x40] sm:$0xff]  ;;  %v166_v15 = vld [vmem:[#allocation8 + $0x48] sm:$0xff]  ;;  %s16031_s23 = scalar_lea.vmem %s8755_s20, 128  ;;  %p16036_p13 = scmp.lt.s32.totalorder %s8755_s20, %s8755_s20 }
  0x5d   :  { %13692 = vmatpush3.bf16.msra.mxu0 %v13689_v4  ;;  %v13701_v13 = vpack.c.bf16 %v164_v12, %v163_v11  ;;  %v13705_v16 = vpack.c.bf16 %v166_v15, %v165_v14  ;;  %v167_v17 = vld [vmem:[#allocation8 + $0x50] sm:$0xff]  ;;  %v168_v18 = vld [vmem:[#allocation8 + $0x58] sm:$0xff]  ;;  %v658_v19 = vld [vmem:[#allocation10 + $0x80] sm:$0xff]  ;;  %p16032_p12 = scmp.ne.s32.totalorder %s8755_s20, %s16031_s23  ;;  %p16037_p0 = scmp.lt.s32.totalorder %s16031_s23, %s16031_s23 }
  0x5e   :  { %13694 = vmatprep.subr.bf16.mxu0 %v13693_v6  ;;  %v659_v20 = vld [vmem:[#allocation10 + $0x88] sm:$0xff]  ;;  %v13709_v21 = vpack.c.bf16 %v168_v18, %v167_v17  ;;  %v660_v23 = vld [vmem:[#allocation10 + $0x90] sm:$0xff]  ;;  %v169_v24 = vld [vmem:[#allocation8 + $0x60] sm:$0xff] }
  0x5f   :  { %v13722_v22 = vpack.c.bf16 %v659_v20, %v658_v19  ;;  %v170_v25 = vld [vmem:[#allocation8 + $0x68] sm:$0xff]  ;;  %v661_v26 = vld [vmem:[#allocation10 + $0x98] sm:$0xff]  ;;  %v662_v28 = vld [vmem:[#allocation10 + $0xa0] sm:$0xff]  ;;  %p16038_p1 = por %p16037_p0, %p16036_p13 }
  0x60   :  { %v13725_v27 = vpack.c.bf16 %v661_v26, %v660_v23  ;;  %v663_v29 = vld [vmem:[#allocation10 + $0xa8] sm:$0xff]  ;;  %v13713_v30 = vpack.c.bf16 %v170_v25, %v169_v24  ;;  %v171_v31 = vld [vmem:[#allocation8 + $0x70] sm:$0xff]  ;;  %v172_v32 = vld [vmem:[#allocation8 + $0x78] sm:$0xff] }
  0x61   :  { %13696 = vmatpush3.bf16.msra.mxu0 %v13693_v6  ;;  %13723 = vmatpush3.bf16.msra.mxu1 %v13722_v22  ;;  %v13728_v33 = vpack.c.bf16 %v663_v29, %v662_v28  ;;  %v664_v34 = vld [vmem:[#allocation10 + $0xb0] sm:$0xff]  ;;  %v665_v35 = vld [vmem:[#allocation10 + $0xb8] sm:$0xff]  ;;  %v13717_v36 = vpack.c.bf16 %v172_v32, %v171_v31  ;;  %v666_v38 = vld [vmem:[#allocation10 + $0xc0] sm:$0xff]  ;;  %p16039_p2 = pnand %p16038_p1, %p16032_p12 }
  0x62   :  { %13698 = vmatprep.subr.bf16.mxu0 %v13697_v9  ;;  %13724 = vmatprep.subr.bf16.mxu1 %v16068_v0  ;;  %v13731_v37 = vpack.c.bf16 %v665_v35, %v664_v34  ;;  %v667_v39 = vld [vmem:[#allocation10 + $0xc8] sm:$0xff]  ;;  %v997_v40 = vld [vmem:[#allocation10 + $0x200] sm:$0xff]  ;;  %v668_v45 = vld [vmem:[#allocation10 + $0xd0] sm:$0xff] }
  0x63   :  { %v998_v41 = vld [vmem:[#allocation10 + $0x208] sm:$0xff]  ;;  %v13734_v42 = vpack.c.bf16 %v667_v39, %v666_v38  ;;  %v669_v46 = vld [vmem:[#allocation10 + $0xd8] sm:$0xff]  ;;  %v103_v47 = vld [vmem:[#allocation5 + $0x10] sm:$0xff] }
  0x64   :  { %v102_v43 = vld [vmem:[#allocation5 + $0x8] sm:$0xff]  ;;  %v13818_v44 = vpack.c.bf16 %v998_v41, %v997_v40  ;;  %v999_v48 = vld [vmem:[#allocation10 + $0x210] sm:$0xff]  ;;  %v1000_v49 = vld [vmem:[#allocation10 + $0x218] sm:$0xff]  ;;  %v13737_v50 = vpack.c.bf16 %v669_v46, %v668_v45  ;;  %v18843_v45 = vmov 0.0  }
  0x65   :  { %13700 = vmatpush3.bf16.msra.mxu0 %v13697_v9  ;;  %13726 = vmatpush3.bf16.msra.mxu1 %v13725_v27  ;;  %v104_v51 = vld [vmem:[#allocation5 + $0x18] sm:$0xff]  ;;  %v13821_v52 = vpack.c.bf16 %v1000_v49, %v999_v48  ;;  %v670_v53 = vld [vmem:[#allocation10 + $0xe0] sm:$0xff]  ;;  %v671_v54 = vld [vmem:[#allocation10 + $0xe8] sm:$0xff] }
  0x66   :  { %13702 = vmatprep.subr.bf16.mxu0 %v13701_v13  ;;  %13727 = vmatprep.subr.bf16.mxu1 %v16068_v0  ;;  %v105_v55 = vld [vmem:[#allocation5 + $0x20] sm:$0xff]  ;;  %v1002_v57 = vld [vmem:[#allocation10 + $0x228] sm:$0xff]  ;;  %v13740_v58 = vpack.c.bf16 %v671_v54, %v670_v53  ;;  %v107_v61 = vld [vmem:[#allocation5 + $0x30] sm:$0xff] }
  0x67   :  { %v1001_v56 = vld [vmem:[#allocation10 + $0x220] sm:$0xff]  ;;  %v106_v59 = vld [vmem:[#allocation5 + $0x28] sm:$0xff]  ;;  %v108_v62 = vld [vmem:[#allocation5 + $0x38] sm:$0xff]  ;;  %10536 = vmatprep.mubr.msk.f32.mxu1 %vm16069_vm0, %v18843_v45 }
  0x68   :  { %v13824_v60 = vpack.c.bf16 %v1002_v57, %v1001_v56  ;;  %v109_v63 = vld [vmem:[#allocation5 + $0x40] sm:$0xff]  ;;  %v110_v1 = vld [vmem:[#allocation5 + $0x48] sm:$0xff]  ;;  %v111_v2 = vld [vmem:[#allocation5 + $0x50] sm:$0xff] }
  0x69   :  { %13704 = vmatpush3.bf16.msra.mxu0 %v13701_v13  ;;  %13729 = vmatpush3.bf16.msra.mxu1 %v13728_v33  ;;  %v112_v3 = vld [vmem:[#allocation5 + $0x58] sm:$0xff]  ;;  %v113_v4 = vld [vmem:[#allocation5 + $0x60] sm:$0xff]  ;;  %v114_v5 = vld [vmem:[#allocation5 + $0x68] sm:$0xff] }
  0x6a   :  { %13706 = vmatprep.subr.bf16.mxu0 %v13705_v16  ;;  %13730 = vmatprep.subr.bf16.mxu1 %v16068_v0  ;;  %v115_v6 = vld [vmem:[#allocation5 + $0x70] sm:$0xff]  ;;  %v116_v7 = vld [vmem:[#allocation5 + $0x78] sm:$0xff]  ;;  %v117_v8 = vld [vmem:[#allocation5 + $0x80] sm:$0xff] }
  0x6b   :  { %v118_v9 = vld [vmem:[#allocation5 + $0x88] sm:$0xff]  ;;  %v119_v10 = vld [vmem:[#allocation5 + $0x90] sm:$0xff]  ;;  %v120_v11 = vld [vmem:[#allocation5 + $0x98] sm:$0xff] }
  0x6c   :  { %v121_v12 = vld [vmem:[#allocation5 + $0xa0] sm:$0xff]  ;;  %v122_v13 = vld [vmem:[#allocation5 + $0xa8] sm:$0xff]  ;;  %v123_v14 = vld [vmem:[#allocation5 + $0xb0] sm:$0xff] }
  0x6d   :  { %13708 = vmatpush3.bf16.msra.mxu0 %v13705_v16  ;;  %13732 = vmatpush3.bf16.msra.mxu1 %v13731_v37  ;;  %v124_v15 = vld [vmem:[#allocation5 + $0xb8] sm:$0xff]  ;;  %v125_v16 = vld [vmem:[#allocation5 + $0xc0] sm:$0xff]  ;;  %v126_v17 = vld [vmem:[#allocation5 + $0xc8] sm:$0xff] }
  0x6e   :  { %13710 = vmatprep.subr.bf16.mxu0 %v13709_v21  ;;  %13733 = vmatprep.subr.bf16.mxu1 %v16068_v0  ;;  %v127_v18 = vld [vmem:[#allocation5 + $0xd0] sm:$0xff]  ;;  %v128_v19 = vld [vmem:[#allocation5 + $0xd8] sm:$0xff]  ;;  %v129_v20 = vld [vmem:[#allocation5 + $0xe0] sm:$0xff] }
  0x6f   :  { %v131_v22 = vld [vmem:[#allocation5 + $0xf0] sm:$0xff]  ;;  %v132_v23 = vld [vmem:[#allocation5 + $0xf8] sm:$0xff]  ;;  %v133_v24 = vld [vmem:[#allocation5 + $0x100] sm:$0xff] }
  0x70   :  { %v134_v25 = vld [vmem:[#allocation5 + $0x108] sm:$0xff]  ;;  %v135_v26 = vld [vmem:[#allocation5 + $0x110] sm:$0xff]  ;;  %v136_v27 = vld [vmem:[#allocation5 + $0x118] sm:$0xff] }
  0x71   :  { %13712 = vmatpush3.bf16.msra.mxu0 %v13709_v21  ;;  %13735 = vmatpush3.bf16.msra.mxu1 %v13734_v42  ;;  %v130_v21 = vld [vmem:[#allocation5 + $0xe8] sm:$0xff]  ;;  %v137_v28 = vld [vmem:[#allocation5 + $0x120] sm:$0xff]  ;;  %v140_v31 = vld [vmem:[#allocation5 + $0x138] sm:$0xff] }
  0x72   :  { %13714 = vmatprep.subr.bf16.mxu0 %v13713_v30  ;;  %13736 = vmatprep.subr.bf16.mxu1 %v16068_v0  ;;  %v138_v29 = vld [vmem:[#allocation5 + $0x128] sm:$0xff]  ;;  %v141_v32 = vld [vmem:[#allocation5 + $0x140] sm:$0xff]  ;;  %v143_v34 = vld [vmem:[#allocation5 + $0x150] sm:$0xff] }
  0x73   :  { %v142_v33 = vld [vmem:[#allocation5 + $0x148] sm:$0xff]  ;;  %v144_v35 = vld [vmem:[#allocation5 + $0x158] sm:$0xff]  ;;  %v145_v38 = vld [vmem:[#allocation5 + $0x160] sm:$0xff] }
  0x74   :  { %v673_v37 = vld [vmem:[#allocation10 + $0xf8] sm:$0xff]  ;;  %v1003_v40 = vld [vmem:[#allocation10 + $0x230] sm:$0xff]  ;;  %v1005_v46 = vld [vmem:[#allocation10 + $0x240] sm:$0xff] }
  0x75   :  { %13716 = vmatpush3.bf16.msra.mxu0 %v13713_v30  ;;  %13738 = vmatpush3.bf16.msra.mxu1 %v13737_v50  ;;  %v139_v30 = vld [vmem:[#allocation5 + $0x130] sm:$0xff]  ;;  %v1004_v41 = vld [vmem:[#allocation10 + $0x238] sm:$0xff]  ;;  %v149_v50 = vld [vmem:[#allocation5 + $0x180] sm:$0xff] }
  0x76   :  { %13718 = vmatprep.subr.bf16.mxu0 %v13717_v36  ;;  %13739 = vmatprep.subr.bf16.mxu1 %v16068_v0  ;;  %v13827_v42 = vpack.c.bf16 %v1004_v41, %v1003_v40  ;;  %v148_v49 = vld [vmem:[#allocation5 + $0x178] sm:$0xff]  ;;  %v150_v54 = vld [vmem:[#allocation5 + $0x188] sm:$0xff]  ;;  %v1009_v56 = vld [vmem:[#allocation10 + $0x260] sm:$0xff] }
  0x77   :  { %v1010_v57 = vld [vmem:[#allocation10 + $0x268] sm:$0xff]  ;;  %v1180_v40 = vld [vmem:[#allocation10 + $0x318] sm:$0xff] }
  0x79   :  { %13720 = vmatpush3.bf16.msra.mxu0 %v13717_v36  ;;  %13741 = vmatpush3.bf16.msra.mxu1 %v13740_v58  ;;  %v672_v36 = vld [vmem:[#allocation10 + $0xf0] sm:$0xff]  ;;  %v13836_v58 = vpack.c.bf16 %v1010_v57, %v1009_v56  ;;  %v1184_v57 = vld [vmem:[#allocation10 + $0x338] sm:$0xff] }
  0x7a   :  { %13817 = vmatprep.subr.bf16.mxu0 %v16068_v0  ;;  %13742 = vmatprep.subr.bf16.mxu1 %v16068_v0  ;;  %v13743_v39 = vpack.c.bf16 %v673_v37, %v672_v36  ;;  %v649_v36 = vld [vmem:[#allocation10 + $0x50] sm:$0xff]  ;;  %v650_v37 = vld [vmem:[#allocation10 + $0x58] sm:$0xff] }
  0x7b   :  { %v1183_v56 = vld [vmem:[#allocation10 + $0x330] sm:$0xff] }
  0x7c   :  { %10421 = vmatmul.mubr.f32.vlgmr.msra.gmra.mrb[0].mxu0 %v102_v43  ;;  %v146_v43 = vld [vmem:[#allocation5 + $0x168] sm:$0xff] }
  0x7d   :  { %10423 = vmatprep.mubr.f32.mxu0 %v103_v47  ;;  %13819 = vmatpush3.bf16.msra.mxu0 %v13818_v44  ;;  %v147_v44 = vld [vmem:[#allocation5 + $0x170] sm:$0xff]  ;;  %v1006_v47 = vld [vmem:[#allocation10 + $0x248] sm:$0xff] }
  0x7e   :  { %13820 = vmatprep.subr.bf16.mxu0 %v16068_v0  ;;  %13744 = vmatpush3.bf16.msra.mxu1 %v13743_v39  ;;  %v13830_v48 = vpack.c.bf16 %v1006_v47, %v1005_v46  ;;  %v1179_v39 = vld [vmem:[#allocation10 + $0x310] sm:$0xff]  ;;  %v651_v46 = vld [vmem:[#allocation10 + $0x60] sm:$0xff]  ;;  %v652_v47 = vld [vmem:[#allocation10 + $0x68] sm:$0xff] }
  0x7f   :  { %13745 = vmatprep.subr.bf16.mxu1 %v16068_v0 }
  0x80   :  { %10424 = vmatmul.mubr.f32.gmra.mrb[2].mxu0 %v104_v51  ;;  %v1007_v51 = vld [vmem:[#allocation10 + $0x250] sm:$0xff] }
  0x81   :  { %10426 = vmatprep.mubr.f32.mxu0 %v105_v55  ;;  %13822 = vmatpush3.bf16.msra.mxu0 %v13821_v52  ;;  %v1008_v52 = vld [vmem:[#allocation10 + $0x258] sm:$0xff]  ;;  %v151_v55 = vld [vmem:[#allocation5 + $0x190] sm:$0xff] }
  0x82   :  { %13823 = vmatprep.subr.bf16.mxu0 %v16068_v0  ;;  %v13833_v53 = vpack.c.bf16 %v1008_v52, %v1007_v51  ;;  %v16292_v52 = vpack.c.bf16 %v652_v47, %v651_v46  ;;  %v826_v46 = vld [vmem:[#allocation10 + $0x148] sm:$0xff]  ;;  %v1357_v47 = vld [vmem:[#allocation10 + $0x400] sm:$0xff] }
  0x84   :  { %10427 = vmatmul.mubr.f32.gmra.mrb[4].mxu0 %v106_v59  ;;  %v152_v59 = vld [vmem:[#allocation5 + $0x198] sm:$0xff] }
  0x85   :  { %10429 = vmatprep.mubr.f32.mxu0 %v107_v61  ;;  %13825 = vmatpush3.bf16.msra.mxu0 %v13824_v60  ;;  %v153_v60 = vld [vmem:[#allocation5 + $0x1a0] sm:$0xff]  ;;  %v1011_v61 = vld [vmem:[#allocation10 + $0x270] sm:$0xff] }
  0x86   :  { %13826 = vmatprep.subr.bf16.mxu0 %v16068_v0 }
  0x88   :  { %10430 = vmatmul.mubr.f32.gmra.mrb[6].mxu0 %v108_v62  ;;  %v1012_v62 = vld [vmem:[#allocation10 + $0x278] sm:$0xff] }
  0x89   :  { %10432 = vmatprep.mubr.f32.mxu0 %v109_v63  ;;  %13828 = vmatpush3.bf16.msra.mxu0 %v13827_v42  ;;  %v13839_v63 = vpack.c.bf16 %v1012_v62, %v1011_v61  ;;  %v13875_v62 = vpack.c.bf16 %v1184_v57, %v1183_v56  ;;  %v828_v56 = vld [vmem:[#allocation10 + $0x158] sm:$0xff]  ;;  %v1359_v57 = vld [vmem:[#allocation10 + $0x410] sm:$0xff] }
  0x8a   :  { %13829 = vmatprep.subr.bf16.mxu0 %v16068_v0 }
  0x8c   :  { %10433 = vmatmul.mubr.f32.gmra.mrb[8].mxu0 %v110_v1  ;;  %v154_v1 = vld [vmem:[#allocation5 + $0x1a8] sm:$0xff] }
  0x8d   :  { %10435 = vmatprep.mubr.f32.mxu0 %v111_v2  ;;  %13831 = vmatpush3.bf16.msra.mxu0 %v13830_v48  ;;  %v155_v2 = vld [vmem:[#allocation5 + $0x1b0] sm:$0xff]  ;;  %v1181_v48 = vld [vmem:[#allocation10 + $0x320] sm:$0xff] }
  0x8e   :  { %13832 = vmatprep.subr.bf16.mxu0 %v16068_v0 }
  0x90   :  { %10436 = vmatmul.mubr.f32.gmra.mrb[10].mxu0 %v112_v3  ;;  %v156_v3 = vld [vmem:[#allocation5 + $0x1b8] sm:$0xff] }
  0x91   :  { %10438 = vmatprep.mubr.f32.mxu0 %v113_v4  ;;  %13834 = vmatpush3.bf16.msra.mxu0 %v13833_v53  ;;  %v16236_v4 = vld [vmem:[%s18834_s2] ss:$0 sm:$0xff] }
  0x92   :  { %13835 = vmatprep.subr.bf16.mxu0 %v16068_v0 }
  0x94   :  { %10439 = vmatmul.mubr.f32.gmra.mrb[12].mxu0 %v114_v5  ;;  %v639_v5 = vld [vmem:[#allocation10] sm:$0xff] }
  0x95   :  { %10441 = vmatprep.mubr.f32.mxu0 %v115_v6  ;;  %13837 = vmatpush3.bf16.msra.mxu0 %v13836_v58  ;;  %v640_v6 = vld [vmem:[#allocation10 + $0x8] sm:$0xff] }
  0x96   :  { %13838 = vmatprep.subr.bf16.mxu0 %v16068_v0 }
  0x98   :  { %10442 = vmatmul.mubr.f32.gmra.mrb[14].mxu0 %v116_v7 }
  0x99   :  { %10444 = vmatprep.mubr.f32.mxu0 %v117_v8  ;;  %13840 = vmatpush3.bf16.msra.mxu0 %v13839_v63  ;;  %v817_v63 = vld [vmem:[#allocation10 + $0x100] sm:$0xff] }
  0x9a   :  { %13865 = vmatprep.subr.bf16.mxu0 %v16068_v0 }
  0x9c   :  { %10445 = vmatmul.mubr.f32.gmra.mrb[16].mxu0 %v118_v9 }
  0x9d   :  { %10447 = vmatprep.mubr.f32.mxu0 %v119_v10  ;;  %v16241_v10 = vpack.c.bf16 %v640_v6, %v639_v5 }
  0xa0   :  { %10448 = vmatmul.mubr.f32.gmra.mrb[18].mxu0 %v120_v11 }
  0xa1   :  { %10450 = vmatprep.mubr.f32.mxu0 %v121_v12  ;;  %v641_v12 = vld [vmem:[#allocation10 + $0x10] sm:$0xff] }
  0xa4   :  { %10451 = vmatmul.mubr.f32.gmra.mrb[20].mxu0 %v122_v13  ;;  %v642_v13 = vld [vmem:[#allocation10 + $0x18] sm:$0xff] }
  0xa5   :  { %10453 = vmatprep.mubr.f32.mxu0 %v123_v14 }
  0xa8   :  { %10454 = vmatmul.mubr.f32.gmra.mrb[22].mxu0 %v124_v15 }
  0xa9   :  { %10456 = vmatprep.mubr.f32.mxu0 %v125_v16  ;;  %v16248_v16 = vpack.c.bf16 %v642_v13, %v641_v12  ;;  %v820_v12 = vld [vmem:[#allocation10 + $0x118] sm:$0xff]  ;;  %v1187_v13 = vld [vmem:[#allocation10 + $0x350] sm:$0xff] }
  0xac   :  { %10457 = vmatmul.mubr.f32.gmra.mrb[24].mxu0 %v126_v17  ;;  %v643_v17 = vld [vmem:[#allocation10 + $0x20] sm:$0xff] }
  0xad   :  { %10459 = vmatprep.mubr.f32.mxu0 %v127_v18  ;;  %v644_v18 = vld [vmem:[#allocation10 + $0x28] sm:$0xff] }
  0xb0   :  { %10460 = vmatmul.mubr.f32.gmra.mrb[26].mxu0 %v128_v19 }
  0xb1   :  { %10462 = vmatprep.mubr.f32.mxu0 %v129_v20 }
  0xb4   :  { %10463 = vmatmul.mubr.f32.gmra.mrb[28].mxu0 %v130_v21  ;;  %v16258_v21 = vpack.c.bf16 %v644_v18, %v643_v17  ;;  %v1188_v17 = vld [vmem:[#allocation10 + $0x358] sm:$0xff] }
  0xb5   :  { %10465 = vmatprep.mubr.f32.mxu0 %v131_v22  ;;  %v645_v22 = vld [vmem:[#allocation10 + $0x30] sm:$0xff] }
  0xb8   :  { %10466 = vmatmul.mubr.f32.gmra.mrb[30].mxu0 %v132_v23  ;;  %v646_v23 = vld [vmem:[#allocation10 + $0x38] sm:$0xff] }
  0xb9   :  { %10468 = vmatprep.mubr.f32.mxu0 %v133_v24 }
  0xbc   :  { %10469 = vmatmul.mubr.f32.gmra.mrb[32].mxu0 %v134_v25 }
  0xbd   :  { %10471 = vmatprep.mubr.f32.mxu0 %v135_v26  ;;  %v16266_v26 = vpack.c.bf16 %v646_v23, %v645_v22  ;;  %v13881_v22 = vpack.c.bf16 %v1188_v17, %v1187_v13  ;;  %v821_v23 = vld [vmem:[#allocation10 + $0x120] sm:$0xff]  ;;  %v1363_v13 = vld [vmem:[#allocation10 + $0x430] sm:$0xff]  ;;  %v1364_v17 = vld [vmem:[#allocation10 + $0x438] sm:$0xff] }
  0xc0   :  { %10472 = vmatmul.mubr.f32.gmra.mrb[34].mxu0 %v136_v27  ;;  %v647_v27 = vld [vmem:[#allocation10 + $0x40] sm:$0xff] }
  0xc1   :  { %10474 = vmatprep.mubr.f32.mxu0 %v137_v28  ;;  %v648_v28 = vld [vmem:[#allocation10 + $0x48] sm:$0xff] }
  0xc4   :  { %10475 = vmatmul.mubr.f32.gmra.mrb[36].mxu0 %v138_v29 }
  0xc5   :  { %10477 = vmatprep.mubr.f32.mxu0 %v139_v30  ;;  %v1177_v30 = vld [vmem:[#allocation10 + $0x300] sm:$0xff] }
  0xc8   :  { %10478 = vmatmul.mubr.f32.gmra.mrb[38].mxu0 %v140_v31  ;;  %v1178_v31 = vld [vmem:[#allocation10 + $0x308] sm:$0xff] }
  0xc9   :  { %10480 = vmatprep.mubr.f32.mxu0 %v141_v32 }
  0xcc   :  { %10481 = vmatmul.mubr.f32.gmra.mrb[40].mxu0 %v142_v33 }
  0xcd   :  { %10483 = vmatprep.mubr.f32.mxu0 %v143_v34  ;;  %v16273_v34 = vpack.c.bf16 %v648_v28, %v647_v27  ;;  %v822_v27 = vld [vmem:[#allocation10 + $0x128] sm:$0xff]  ;;  %v1189_v28 = vld [vmem:[#allocation10 + $0x360] sm:$0xff] }
  0xd0   :  { %10484 = vmatmul.mubr.f32.gmra.mrb[42].mxu0 %v144_v35  ;;  %v13866_v35 = vpack.c.bf16 %v1178_v31, %v1177_v30  ;;  %v1190_v30 = vld [vmem:[#allocation10 + $0x368] sm:$0xff]  ;;  %v16322_v31 = vpack.c.bf16 %v822_v27, %v821_v23  ;;  %v13923_v27 = vpack.c.bf16 %v1364_v17, %v1363_v13  ;;  %v915_v13 = vld [vmem:[#allocation10 + $0x1c0] sm:$0xff] }
  0xd1   :  { %10486 = vmatprep.mubr.f32.mxu0 %v145_v38  ;;  %v916_v17 = vld [vmem:[#allocation10 + $0x1c8] sm:$0xff] }
  0xd4   :  { %10487 = vmatmul.mubr.f32.gmra.mrb[44].mxu0 %v146_v43  ;;  %v16281_v43 = vpack.c.bf16 %v650_v37, %v649_v36  ;;  %v1191_v36 = vld [vmem:[#allocation10 + $0x370] sm:$0xff]  ;;  %v1192_v37 = vld [vmem:[#allocation10 + $0x378] sm:$0xff] }
  0xd5   :  { %10489 = vmatprep.mubr.f32.mxu0 %v147_v44  ;;  %v13869_v44 = vpack.c.bf16 %v1180_v40, %v1179_v39  ;;  %v13887_v40 = vpack.c.bf16 %v1192_v37, %v1191_v36  ;;  %v909_v37 = vld [vmem:[#allocation10 + $0x190] sm:$0xff] }
  0xd8   :  { %10490 = vmatmul.mubr.f32.gmra.mrb[46].mxu0 %v148_v49  ;;  %v1182_v49 = vld [vmem:[#allocation10 + $0x328] sm:$0xff] }
  0xd9   :  { %10492 = vmatprep.mubr.f32.mxu0 %v149_v50  ;;  %v13872_v53 = vpack.c.bf16 %v1182_v49, %v1181_v48  ;;  %v1358_v48 = vld [vmem:[#allocation10 + $0x408] sm:$0xff] }
  0xdc   :  { %10493 = vmatmul.mubr.f32.gmra.mrb[48].mxu0 %v150_v54  ;;  %v653_v54 = vld [vmem:[#allocation10 + $0x70] sm:$0xff] }
  0xdd   :  { %10495 = vmatprep.mubr.f32.mxu0 %v151_v55  ;;  %v654_v55 = vld [vmem:[#allocation10 + $0x78] sm:$0xff] }
  0xe0   :  { %10496 = vmatmul.mubr.f32.gmra.mrb[50].mxu0 %v152_v59 }
  0xe1   :  { %10498 = vmatprep.mubr.f32.mxu0 %v153_v60  ;;  %v16299_v60 = vpack.c.bf16 %v654_v55, %v653_v54  ;;  %v13914_v54 = vpack.c.bf16 %v1358_v48, %v1357_v47  ;;  %v827_v55 = vld [vmem:[#allocation10 + $0x150] sm:$0xff] }
  0xe4   :  { %10499 = vmatmul.mubr.f32.gmra.mrb[52].mxu0 %v154_v1  ;;  %v818_v1 = vld [vmem:[#allocation10 + $0x108] sm:$0xff] }
  0xe5   :  { %10501 = vmatprep.mubr.f32.mxu0 %v155_v2  ;;  %v1185_v2 = vld [vmem:[#allocation10 + $0x340] sm:$0xff] }
  0xe8   :  { %10502 = vmatmul.mubr.f32.gmra.mrb[54].mxu0 %v156_v3  ;;  %v1186_v3 = vld [vmem:[#allocation10 + $0x348] sm:$0xff] }
  0xe9   :  { %10676 = vmatprep.mubr.msk.f32.mxu0 %vm16069_vm0, %v18843_v45 }
 0x14f   :  { %v10422_v7 = vpop.f32.mrb[0].mxu0 }
 0x150   :  { %v252_v8 = vadd.f32 %v10422_v7, %v16236_v4  ;;  %v16239_v9 = vpop.f32.mrb[1].mxu0  ;;  %v16310_v7 = vpack.c.bf16 %v818_v1, %v817_v63  ;;  %v829_v63 = vld [vmem:[#allocation10 + $0x160] sm:$0xff]  ;;  %v830_v1 = vld [vmem:[#allocation10 + $0x168] sm:$0xff] }
 0x151   :  { %v247_v61 = vadd.f32 %v16236_v4, %v16239_v9  ;;  %v13878_v9 = vpack.c.bf16 %v1186_v3, %v1185_v2  ;;  %v1361_v2 = vld [vmem:[#allocation10 + $0x420] sm:$0xff]  ;;  %v1362_v3 = vld [vmem:[#allocation10 + $0x428] sm:$0xff] }
 0x152   :  { %v526_v11 = vmax.f32 %v252_v8, 0.0 }
 0x153   :  { %v16243_v14 = vpop.f32.mrb[2].mxu0  ;;  %v525_v8 = vmax.f32 %v247_v61, 0.0  ;;  %v16343_v61 = vpack.c.bf16 %v828_v56, %v827_v55  ;;  %v912_v55 = vld [vmem:[#allocation10 + $0x1a8] sm:$0xff]  ;;  %v1369_v56 = vld [vmem:[#allocation10 + $0x460] sm:$0xff] }
 0x154   :  { %10537 = vmatmul.mubr.f32.vlgmr.msra.gmra.mrb[0].mxu1 %v526_v11  ;;  %v16245_v15 = vpop.f32.mrb[3].mxu0  ;;  %v819_v11 = vld [vmem:[#allocation10 + $0x110] sm:$0xff] }
 0x155   :  { %13747 = vmatpush3.bf16.msra.mxu1 %v16241_v10  ;;  %10571 = vmatprep.mubr.msk.f32.mxu1 %vm16069_vm0, %v18843_v45  ;;  %v16315_v18 = vpack.c.bf16 %v820_v12, %v819_v11  ;;  %v831_v11 = vld [vmem:[#allocation10 + $0x170] sm:$0xff]  ;;  %v832_v12 = vld [vmem:[#allocation10 + $0x178] sm:$0xff] }
 0x156   :  { %13748 = vmatprep.subr.bf16.mxu1 %v16068_v0  ;;  %v16359_v23 = vpack.c.bf16 %v832_v12, %v831_v11 }
 0x157   :  { %v16253_v19 = vpop.f32.mrb[4].mxu0 }
 0x158   :  { %v16255_v20 = vpop.f32.mrb[5].mxu0 }
 0x159   :  { %13750 = vmatpush3.bf16.msra.mxu1 %v16248_v16 }
 0x15a   :  { %13751 = vmatprep.subr.bf16.mxu1 %v16068_v0 }
 0x15b   :  { %v16261_v24 = vpop.f32.mrb[6].mxu0 }
 0x15c   :  { %v16263_v25 = vpop.f32.mrb[7].mxu0 }
 0x15d   :  { %13753 = vmatpush3.bf16.msra.mxu1 %v16258_v21 }
 0x15e   :  { %13754 = vmatprep.subr.bf16.mxu1 %v16068_v0 }
 0x15f   :  { %v16269_v29 = vpop.f32.mrb[8].mxu0 }
 0x160   :  { %v286_v32 = vpop.f32.mrb[9].mxu0 }
 0x161   :  { %v287_v33 = vadd.f32 %v16236_v4, %v286_v32  ;;  %13756 = vmatpush3.bf16.msra.mxu1 %v16266_v26  ;;  %v13884_v32 = vpack.c.bf16 %v1190_v30, %v1189_v28  ;;  %v907_v28 = vld [vmem:[#allocation10 + $0x180] sm:$0xff]  ;;  %v908_v30 = vld [vmem:[#allocation10 + $0x188] sm:$0xff] }
 0x162   :  { %13757 = vmatprep.subr.bf16.mxu1 %v16068_v0 }
 0x163   :  { %v533_v38 = vmax.f32 %v287_v33, 0.0  ;;  %v16276_v41 = vpop.f32.mrb[10].mxu0  ;;  %v823_v33 = vld [vmem:[#allocation10 + $0x130] sm:$0xff] }
 0x164   :  { %v16278_v42 = vpop.f32.mrb[11].mxu0 }
 0x165   :  { %13759 = vmatpush3.bf16.msra.mxu1 %v16273_v34  ;;  %10677 = vmatmul.mubr.f32.vlgmr.msra.gmra.mrb[56].mxu0 %v533_v38 }
 0x166   :  { %13867 = vmatpush3.bf16.msra.mxu0 %v13866_v35  ;;  %13760 = vmatprep.subr.bf16.mxu1 %v16068_v0  ;;  %v824_v35 = vld [vmem:[#allocation10 + $0x138] sm:$0xff] }
 0x167   :  { %13868 = vmatprep.subr.bf16.mxu0 %v16068_v0  ;;  %v16285_v50 = vpop.f32.mrb[12].mxu0  ;;  %10746 = vmatprep.mubr.msk.f32.mxu0 %vm16069_vm0, %v18843_v45  ;;  %v16330_v39 = vpack.c.bf16 %v824_v35, %v823_v33  ;;  %v1366_v33 = vld [vmem:[#allocation10 + $0x448] sm:$0xff] }
 0x168   :  { %v16289_v51 = vpop.f32.mrb[13].mxu0 }
 0x169   :  { %13762 = vmatpush3.bf16.msra.mxu1 %v16281_v43 }
 0x16a   :  { %13870 = vmatpush3.bf16.msra.mxu0 %v13869_v44  ;;  %13763 = vmatprep.subr.bf16.mxu1 %v16068_v0  ;;  %v825_v44 = vld [vmem:[#allocation10 + $0x140] sm:$0xff] }
 0x16b   :  { %13871 = vmatprep.subr.bf16.mxu0 %v16068_v0  ;;  %v16296_v58 = vpop.f32.mrb[14].mxu0 }
 0x16c   :  { %v316_v59 = vpop.f32.mrb[15].mxu0 }
 0x16d   :  { %13765 = vmatpush3.bf16.msra.mxu1 %v16292_v52  ;;  %v16328_v38 = vadd.f32 %v16236_v4, %v316_v59  ;;  %v1360_v59 = vld [vmem:[#allocation10 + $0x418] sm:$0xff] }
 0x16e   :  { %13873 = vmatpush3.bf16.msra.mxu0 %v13872_v53  ;;  %13766 = vmatprep.subr.bf16.mxu1 %v16068_v0  ;;  %v16336_v53 = vpack.c.bf16 %v826_v46, %v825_v44  ;;  %v1367_v44 = vld [vmem:[#allocation10 + $0x450] sm:$0xff]  ;;  %v1368_v46 = vld [vmem:[#allocation10 + $0x458] sm:$0xff] }
 0x16f   :  { %13874 = vmatprep.subr.bf16.mxu0 %v16068_v0  ;;  %v16305_v5 = vpop.f32.mrb[16].mxu0  ;;  %v18842_v49 = vmax.f32 %v16328_v38, 0.0  ;;  %v13929_v48 = vpack.c.bf16 %v1368_v46, %v1367_v44  ;;  %v922_v44 = vld [vmem:[#allocation10 + $0x1f8] sm:$0xff]  ;;  %v282_v46 = vadd.f32 %v16261_v24, %v16236_v4  ;;  %v1091_v24 = vld [vmem:[#allocation10 + $0x2a0] sm:$0xff] }
 0x170   :  { %v16307_v6 = vpop.f32.mrb[17].mxu0 }
 0x171   :  { %13768 = vmatpush3.bf16.msra.mxu1 %v16299_v60 }
 0x172   :  { %13876 = vmatpush3.bf16.msra.mxu0 %v13875_v62  ;;  %13769 = vmatprep.subr.bf16.mxu1 %v16068_v0  ;;  %v13917_v62 = vpack.c.bf16 %v1360_v59, %v1359_v57  ;;  %v1370_v57 = vld [vmem:[#allocation10 + $0x468] sm:$0xff] }
 0x173   :  { %13877 = vmatprep.subr.bf16.mxu0 %v16068_v0 }
 0x174   :  { %10572 = vmatmul.mubr.f32.vlgmr.msra.gmra.mrb[2].mxu1 %v525_v8  ;;  %v16350_v8 = vpack.c.bf16 %v830_v1, %v829_v63  ;;  %v913_v63 = vld [vmem:[#allocation10 + $0x1b0] sm:$0xff]  ;;  %v914_v1 = vld [vmem:[#allocation10 + $0x1b8] sm:$0xff] }
 0x175   :  { %13771 = vmatpush3.bf16.msra.mxu1 %v16310_v7  ;;  %10606 = vmatprep.mubr.msk.f32.mxu1 %vm16069_vm0, %v18843_v45  ;;  %v16386_v11 = vpack.c.bf16 %v914_v1, %v913_v63  ;;  %v1093_v63 = vld [vmem:[#allocation10 + $0x2b0] sm:$0xff]  ;;  %v1094_v1 = vld [vmem:[#allocation10 + $0x2b8] sm:$0xff] }
 0x176   :  { %13879 = vmatpush3.bf16.msra.mxu0 %v13878_v9  ;;  %13772 = vmatprep.subr.bf16.mxu1 %v16068_v0  ;;  %v13920_v9 = vpack.c.bf16 %v1362_v3, %v1361_v2  ;;  %v1371_v2 = vld [vmem:[#allocation10 + $0x470] sm:$0xff]  ;;  %v1372_v3 = vld [vmem:[#allocation10 + $0x478] sm:$0xff] }
 0x177   :  { %13880 = vmatprep.subr.bf16.mxu0 %v16068_v0  ;;  %v13935_v12 = vpack.c.bf16 %v1372_v3, %v1371_v2  ;;  %v16439_v2 = vpop.f32.mrb[18].mxu0 }
 0x178   :  { %v16445_v3 = vpop.f32.mrb[19].mxu0 }
 0x179   :  { %13774 = vmatpush3.bf16.msra.mxu1 %v16315_v18 }
 0x17a   :  { %13882 = vmatpush3.bf16.msra.mxu0 %v13881_v22  ;;  %13775 = vmatprep.subr.bf16.mxu1 %v16068_v0  ;;  %v16356_v22 = vadd.f32 %v16236_v4, %v16245_v15  ;;  %v16365_v15 = vpack.c.bf16 %v908_v30, %v907_v28  ;;  %v16393_v28 = vpack.c.bf16 %v916_v17, %v915_v13  ;;  %v918_v30 = vld [vmem:[#allocation10 + $0x1d8] sm:$0xff] }
 0x17b   :  { %13883 = vmatprep.subr.bf16.mxu0 %v16068_v0 }
 0x17c   :  { %v527_v35 = vmax.f32 %v16356_v22, 0.0 }
 0x17d   :  { %13777 = vmatpush3.bf16.msra.mxu1 %v16322_v31 }
 0x17e   :  { %13885 = vmatpush3.bf16.msra.mxu0 %v13884_v32  ;;  %13778 = vmatprep.subr.bf16.mxu1 %v16068_v0  ;;  %v1365_v32 = vld [vmem:[#allocation10 + $0x440] sm:$0xff] }
 0x17f   :  { %13886 = vmatprep.subr.bf16.mxu0 %v16068_v0  ;;  %v13926_v36 = vpack.c.bf16 %v1366_v33, %v1365_v32  ;;  %v919_v33 = vld [vmem:[#allocation10 + $0x1e0] sm:$0xff] }
 0x181   :  { %13780 = vmatpush3.bf16.msra.mxu1 %v16330_v39 }
 0x182   :  { %13888 = vmatpush3.bf16.msra.mxu0 %v13887_v40  ;;  %13781 = vmatprep.subr.bf16.mxu1 %v16068_v0  ;;  %v910_v40 = vld [vmem:[#allocation10 + $0x198] sm:$0xff] }
 0x183   :  { %13913 = vmatprep.subr.bf16.mxu0 %v16068_v0  ;;  %v16372_v47 = vpack.c.bf16 %v910_v40, %v909_v37  ;;  %v921_v40 = vld [vmem:[#allocation10 + $0x1f0] sm:$0xff] }
 0x185   :  { %13783 = vmatpush3.bf16.msra.mxu1 %v16336_v53  ;;  %10747 = vmatmul.mubr.f32.vlgmr.msra.gmra.mrb[58].mxu0 %v18842_v49 }
 0x186   :  { %13915 = vmatpush3.bf16.msra.mxu0 %v13914_v54  ;;  %13784 = vmatprep.subr.bf16.mxu1 %v16068_v0  ;;  %v911_v54 = vld [vmem:[#allocation10 + $0x1a0] sm:$0xff] }
 0x187   :  { %13916 = vmatprep.subr.bf16.mxu0 %v16068_v0  ;;  %10816 = vmatprep.mubr.msk.f32.mxu0 %vm16069_vm0, %v18843_v45  ;;  %v16379_v59 = vpack.c.bf16 %v912_v55, %v911_v54  ;;  %v1088_v54 = vld [vmem:[#allocation10 + $0x288] sm:$0xff]  ;;  %v532_v55 = vmax.f32 %v282_v46, 0.0  ;;  %v1102_v46 = vld [vmem:[#allocation10 + $0x2f8] sm:$0xff] }
 0x189   :  { %13786 = vmatpush3.bf16.msra.mxu1 %v16343_v61 }
 0x18a   :  { %13918 = vmatpush3.bf16.msra.mxu0 %v13917_v62  ;;  %13787 = vmatprep.subr.bf16.mxu1 %v16068_v0  ;;  %v13932_v62 = vpack.c.bf16 %v1370_v57, %v1369_v56  ;;  %v1089_v56 = vld [vmem:[#allocation10 + $0x290] sm:$0xff]  ;;  %v1090_v57 = vld [vmem:[#allocation10 + $0x298] sm:$0xff] }
 0x18b   :  { %13919 = vmatprep.subr.bf16.mxu0 %v16068_v0 }
 0x18d   :  { %13789 = vmatpush3.bf16.msra.mxu1 %v16350_v8 }
 0x18e   :  { %13921 = vmatpush3.bf16.msra.mxu0 %v13920_v9  ;;  %13790 = vmatprep.subr.bf16.mxu1 %v16068_v0  ;;  %v327_v9 = vadd.f32 %v16236_v4, %v16307_v6  ;;  %v917_v6 = vld [vmem:[#allocation10 + $0x1d0] sm:$0xff] }
 0x18f   :  { %13922 = vmatprep.subr.bf16.mxu0 %v16068_v0  ;;  %v16399_v32 = vpack.c.bf16 %v918_v30, %v917_v6  ;;  %v1097_v6 = vld [vmem:[#allocation10 + $0x2d0] sm:$0xff] }
 0x191   :  { %13792 = vmatpush3.bf16.msra.mxu1 %v16359_v23 }
 0x192   :  { %13924 = vmatpush3.bf16.msra.mxu0 %v13923_v27  ;;  %13793 = vmatprep.subr.bf16.mxu1 %v16068_v0  ;;  %v16390_v27 = vmax.f32 %v327_v9, 0.0  ;;  %v1095_v9 = vld [vmem:[#allocation10 + $0x2c0] sm:$0xff] }
 0x193   :  { %13925 = vmatprep.subr.bf16.mxu0 %v16068_v0 }
 0x194   :  { %10607 = vmatmul.mubr.f32.vlgmr.msra.gmra.mrb[4].mxu1 %v527_v35 }
 0x195   :  { %13795 = vmatpush3.bf16.msra.mxu1 %v16365_v15  ;;  %10641 = vmatprep.mubr.msk.f32.mxu1 %vm16069_vm0, %v18843_v45 }
 0x196   :  { %13927 = vmatpush3.bf16.msra.mxu0 %v13926_v36  ;;  %13796 = vmatprep.subr.bf16.mxu1 %v16068_v0  ;;  %v920_v36 = vld [vmem:[#allocation10 + $0x1e8] sm:$0xff] }
 0x197   :  { %13928 = vmatprep.subr.bf16.mxu0 %v16068_v0  ;;  %v16407_v37 = vpack.c.bf16 %v920_v36, %v919_v33 }
 0x199   :  { %13798 = vmatpush3.bf16.msra.mxu1 %v16372_v47 }
 0x19a   :  { %13930 = vmatpush3.bf16.msra.mxu0 %v13929_v48  ;;  %13799 = vmatprep.subr.bf16.mxu1 %v16068_v0  ;;  %v1087_v48 = vld [vmem:[#allocation10 + $0x280] sm:$0xff] }
 0x19b   :  { %13931 = vmatprep.subr.bf16.mxu0 %v16068_v0 }
 0x19d   :  { %13801 = vmatpush3.bf16.msra.mxu1 %v16379_v59 }
 0x19e   :  { %13933 = vmatpush3.bf16.msra.mxu0 %v13932_v62  ;;  %13802 = vmatprep.subr.bf16.mxu1 %v16068_v0 }
 0x19f   :  { %13934 = vmatprep.subr.bf16.mxu0 %v16068_v0 }
 0x1a1   :  { %13804 = vmatpush3.bf16.msra.mxu1 %v16386_v11 }
 0x1a2   :  { %13936 = vmatpush3.bf16.msra.mxu0 %v13935_v12  ;;  %13805 = vmatprep.subr.bf16.mxu1 %v16068_v0  ;;  %v16449_v12 = vpop.f32.mrb[20].mxu0 }
 0x1a3   :  { %13961 = vmatprep.subr.bf16.mxu0 %v16068_v0  ;;  %v16455_v17 = vpop.f32.mrb[21].mxu0 }
 0x1a4   :  { %v16459_v30 = vpop.f32.mrb[22].mxu0 }
 0x1a5   :  { %13807 = vmatpush3.bf16.msra.mxu1 %v16393_v28  ;;  %10817 = vmatmul.mubr.f32.vlgmr.msra.gmra.mrb[60].mxu0 %v16390_v27  ;;  %v16467_v36 = vpop.f32.mrb[23].mxu0 }
 0x1a6   :  { %13963 = vmatpush3.bf16.msra.mxu0 %v16241_v10  ;;  %13808 = vmatprep.subr.bf16.mxu1 %v16068_v0  ;;  %v16413_v10 = vpack.c.bf16 %v922_v44, %v921_v40  ;;  %v1100_v40 = vld [vmem:[#allocation10 + $0x2e8] sm:$0xff]  ;;  %v16474_v44 = vpop.f32.mrb[24].mxu0 }
 0x1a7   :  { %13964 = vmatprep.subr.bf16.mxu0 %v16068_v0  ;;  %10886 = vmatprep.mubr.msk.f32.mxu0 %vm16069_vm0, %v18843_v45 }
 0x1a9   :  { %13810 = vmatpush3.bf16.msra.mxu1 %v16399_v32 }
 0x1aa   :  { %13966 = vmatpush3.bf16.msra.mxu0 %v16248_v16  ;;  %13811 = vmatprep.subr.bf16.mxu1 %v16068_v0  ;;  %v16421_v16 = vpack.c.bf16 %v1088_v54, %v1087_v48 }
 0x1ab   :  { %13967 = vmatprep.subr.bf16.mxu0 %v16068_v0 }
 0x1ad   :  { %13813 = vmatpush3.bf16.msra.mxu1 %v16407_v37 }
 0x1ae   :  { %13969 = vmatpush3.bf16.msra.mxu0 %v16258_v21  ;;  %13814 = vmatprep.subr.bf16.mxu1 %v16068_v0  ;;  %v16427_v21 = vpack.c.bf16 %v1090_v57, %v1089_v56  ;;  %v292_v56 = vadd.f32 %v16269_v29, %v16236_v4  ;;  %v1268_v57 = vld [vmem:[#allocation10 + $0x388] sm:$0xff]  ;;  %v1269_v29 = vld [vmem:[#allocation10 + $0x390] sm:$0xff] }
 0x1af   :  { %13970 = vmatprep.subr.bf16.mxu0 %v16068_v0 }
 0x1b1   :  { %13816 = vmatpush3.bf16.msra.mxu1 %v16413_v10 }
 0x1b2   :  { %13972 = vmatpush3.bf16.msra.mxu0 %v16266_v26  ;;  %13841 = vmatprep.subr.bf16.mxu1 %v16068_v0  ;;  %v1092_v26 = vld [vmem:[#allocation10 + $0x2a8] sm:$0xff] }
 0x1b3   :  { %13973 = vmatprep.subr.bf16.mxu0 %v16068_v0  ;;  %v16435_v62 = vpack.c.bf16 %v1092_v26, %v1091_v24 }
 0x1b4   :  { %10642 = vmatmul.mubr.f32.vlgmr.msra.gmra.mrb[6].mxu1 %v532_v55 }
 0x1b5   :  { %13843 = vmatpush3.bf16.msra.mxu1 %v16421_v16  ;;  %10711 = vmatprep.mubr.msk.f32.mxu1 %vm16069_vm0, %v18843_v45 }
 0x1b6   :  { %13975 = vmatpush3.bf16.msra.mxu0 %v16273_v34  ;;  %13844 = vmatprep.subr.bf16.mxu1 %v16068_v0  ;;  %v16443_v34 = vpack.c.bf16 %v1094_v1, %v1093_v63  ;;  %v534_v1 = vmax.f32 %v292_v56, 0.0 }
 0x1b7   :  { %13976 = vmatprep.subr.bf16.mxu0 %v16068_v0 }
 0x1b9   :  { %13846 = vmatpush3.bf16.msra.mxu1 %v16427_v21 }
 0x1ba   :  { %13978 = vmatpush3.bf16.msra.mxu0 %v16281_v43  ;;  %13847 = vmatprep.subr.bf16.mxu1 %v16068_v0  ;;  %v1096_v43 = vld [vmem:[#allocation10 + $0x2c8] sm:$0xff] }
 0x1bb   :  { %13979 = vmatprep.subr.bf16.mxu0 %v16068_v0  ;;  %v16453_v13 = vpack.c.bf16 %v1096_v43, %v1095_v9 }
 0x1bd   :  { %13849 = vmatpush3.bf16.msra.mxu1 %v16435_v62 }
 0x1be   :  { %13981 = vmatpush3.bf16.msra.mxu0 %v16292_v52  ;;  %13850 = vmatprep.subr.bf16.mxu1 %v16068_v0  ;;  %v1098_v52 = vld [vmem:[#allocation10 + $0x2d8] sm:$0xff] }
 0x1bf   :  { %13982 = vmatprep.subr.bf16.mxu0 %v16068_v0  ;;  %v16465_v33 = vpack.c.bf16 %v1098_v52, %v1097_v6  ;;  %v1272_v52 = vld [vmem:[#allocation10 + $0x3a8] sm:$0xff] }
 0x1c1   :  { %13852 = vmatpush3.bf16.msra.mxu1 %v16443_v34 }
 0x1c2   :  { %13984 = vmatpush3.bf16.msra.mxu0 %v16299_v60  ;;  %13853 = vmatprep.subr.bf16.mxu1 %v16068_v0  ;;  %v1099_v60 = vld [vmem:[#allocation10 + $0x2e0] sm:$0xff] }
 0x1c3   :  { %14009 = vmatprep.subr.bf16.mxu0 %v16068_v0  ;;  %v16477_v22 = vpack.c.bf16 %v1100_v40, %v1099_v60 }
 0x1c5   :  { %13855 = vmatpush3.bf16.msra.mxu1 %v16453_v13  ;;  %10887 = vmatmul.mubr.f32.vlgmr.msra.gmra.mrb[62].mxu0 %v527_v35  ;;  %v16479_v35 = vpop.f32.mrb[25].mxu0 }
 0x1c6   :  { %14011 = vmatpush3.bf16.msra.mxu0 %v16365_v15  ;;  %13856 = vmatprep.subr.bf16.mxu1 %v16068_v0  ;;  %v1101_v15 = vld [vmem:[#allocation10 + $0x2f0] sm:$0xff]  ;;  %v16483_v48 = vpop.f32.mrb[26].mxu0 }
 0x1c7   :  { %14012 = vmatprep.subr.bf16.mxu0 %v16068_v0  ;;  %10956 = vmatprep.mubr.msk.f32.mxu0 %vm16069_vm0, %v18843_v45  ;;  %v16487_v54 = vpack.c.bf16 %v1102_v46, %v1101_v15  ;;  %v16489_v55 = vpop.f32.mrb[27].mxu0  ;;  %v1273_v46 = vld [vmem:[#allocation10 + $0x3b0] sm:$0xff] }
 0x1c8   :  { %v16495_v24 = vpop.f32.mrb[28].mxu0 }
 0x1c9   :  { %13858 = vmatpush3.bf16.msra.mxu1 %v16465_v33  ;;  %v16501_v63 = vpop.f32.mrb[29].mxu0 }
 0x1ca   :  { %14014 = vmatpush3.bf16.msra.mxu0 %v16372_v47  ;;  %13859 = vmatprep.subr.bf16.mxu1 %v16068_v0  ;;  %v1267_v47 = vld [vmem:[#allocation10 + $0x380] sm:$0xff]  ;;  %v16506_v9 = vpop.f32.mrb[30].mxu0 }
 0x1cb   :  { %14015 = vmatprep.subr.bf16.mxu0 %v16068_v0  ;;  %v16499_v26 = vpack.c.bf16 %v1268_v57, %v1267_v47  ;;  %v16513_v6 = vpop.f32.mrb[31].mxu0 }
 0x1cc   :  { %v16517_v60 = vpop.f32.mrb[32].mxu0 }
 0x1cd   :  { %13861 = vmatpush3.bf16.msra.mxu1 %v16477_v22  ;;  %v16523_v15 = vpop.f32.mrb[33].mxu0 }
 0x1ce   :  { %14017 = vmatpush3.bf16.msra.mxu0 %v16379_v59  ;;  %13862 = vmatprep.subr.bf16.mxu1 %v16068_v0  ;;  %v1270_v59 = vld [vmem:[#allocation10 + $0x398] sm:$0xff]  ;;  %v16527_v56 = vpop.f32.mrb[34].mxu0 }
 0x1cf   :  { %14018 = vmatprep.subr.bf16.mxu0 %v16068_v0  ;;  %v16509_v43 = vpack.c.bf16 %v1270_v59, %v1269_v29  ;;  %18846 = vst [vmem:[#allocation19_spill] sm:$0xff] %v16527_v56  ;;  %v16533_v57 = vpop.f32.mrb[35].mxu0  ;;  %v1275_v29 = vld [vmem:[#allocation10 + $0x3c0] sm:$0xff]  ;;  %v1477_v56 = vld [vmem:[#allocation10 + $0xa8] sm:$0xff] }
 0x1d0   :  { %18847 = vst [vmem:[#allocation20_spill] sm:$0xff] %v16533_v57  ;;  %v16537_v59 = vpop.f32.mrb[36].mxu0 }
 0x1d1   :  { %13864 = vmatpush3.bf16.msra.mxu1 %v16487_v54  ;;  %18848 = vst [vmem:[#allocation21_spill] sm:$0xff] %v16537_v59 }
 0x1d2   :  { %14020 = vmatpush3.bf16.msra.mxu0 %v16386_v11  ;;  %13889 = vmatprep.subr.bf16.mxu1 %v16068_v0  ;;  %v1271_v11 = vld [vmem:[#allocation10 + $0x3a0] sm:$0xff] }
 0x1d3   :  { %14021 = vmatprep.subr.bf16.mxu0 %v16068_v0  ;;  %v16521_v40 = vpack.c.bf16 %v1272_v52, %v1271_v11  ;;  %v16543_v52 = vpop.f32.mrb[37].mxu0 }
 0x1d4   :  { %10712 = vmatmul.mubr.f32.vlgmr.msra.gmra.mrb[8].mxu1 %v534_v1 }
 0x1d5   :  { %13891 = vmatpush3.bf16.msra.mxu1 %v16499_v26  ;;  %10781 = vmatprep.mubr.msk.f32.mxu1 %vm16069_vm0, %v18843_v45 }
 0x1d6   :  { %14023 = vmatpush3.bf16.msra.mxu0 %v16393_v28  ;;  %13892 = vmatprep.subr.bf16.mxu1 %v16068_v0  ;;  %v1274_v28 = vld [vmem:[#allocation10 + $0x3b8] sm:$0xff] }
 0x1d7   :  { %14024 = vmatprep.subr.bf16.mxu0 %v16068_v0  ;;  %v16531_v47 = vpack.c.bf16 %v1274_v28, %v1273_v46  ;;  %v1277_v46 = vld [vmem:[#allocation10 + $0x3d0] sm:$0xff]  ;;  %v16547_v28 = vpop.f32.mrb[38].mxu0 }
 0x1d8   :  { %18849 = vst [vmem:[#allocation22_spill] sm:$0xff] %v16547_v28  ;;  %v16553_v45 = vpop.f32.mrb[39].mxu0 }
 0x1d9   :  { %13894 = vmatpush3.bf16.msra.mxu1 %v16509_v43  ;;  %18850 = vst [vmem:[#allocation23_spill] sm:$0xff] %v16553_v45  ;;  %v16560_v28 = vpop.f32.mrb[40].mxu0 }
 0x1da   :  { %14026 = vmatpush3.bf16.msra.mxu0 %v16399_v32  ;;  %13895 = vmatprep.subr.bf16.mxu1 %v16068_v0  ;;  %v1276_v32 = vld [vmem:[#allocation10 + $0x3c8] sm:$0xff]  ;;  %18852 = vst [vmem:[#allocation24_spill] sm:$0xff] %v16560_v28 }
 0x1db   :  { %14027 = vmatprep.subr.bf16.mxu0 %v16068_v0  ;;  %v16541_v11 = vpack.c.bf16 %v1276_v32, %v1275_v29  ;;  %v1280_v29 = vld [vmem:[#allocation10 + $0x3e8] sm:$0xff]  ;;  %v18851_v32 = vmov 0.0  }
 0x1dd   :  { %13897 = vmatpush3.bf16.msra.mxu1 %v16521_v40 }
 0x1de   :  { %14029 = vmatpush3.bf16.msra.mxu0 %v16407_v37  ;;  %13898 = vmatprep.subr.bf16.mxu1 %v16068_v0  ;;  %v1278_v37 = vld [vmem:[#allocation10 + $0x3d8] sm:$0xff] }
 0x1df   :  { %14030 = vmatprep.subr.bf16.mxu0 %v16068_v0  ;;  %v16551_v49 = vpack.c.bf16 %v1278_v37, %v1277_v46  ;;  %v16565_v46 = vpop.f32.mrb[41].mxu0  ;;  %v1282_v37 = vld [vmem:[#allocation10 + $0x3f8] sm:$0xff] }
 0x1e0   :  { %18853 = vst [vmem:[#allocation25_spill] sm:$0xff] %v16565_v46  ;;  %v16569_v45 = vpop.f32.mrb[42].mxu0 }
 0x1e1   :  { %13900 = vmatpush3.bf16.msra.mxu1 %v16531_v47  ;;  %18854 = vst [vmem:[#allocation26_spill] sm:$0xff] %v16569_v45  ;;  %v16575_v28 = vpop.f32.mrb[43].mxu0 }
 0x1e2   :  { %14032 = vmatpush3.bf16.msra.mxu0 %v16413_v10  ;;  %13901 = vmatprep.subr.bf16.mxu1 %v16068_v0  ;;  %v1279_v10 = vld [vmem:[#allocation10 + $0x3e0] sm:$0xff]  ;;  %18855 = vst [vmem:[#allocation27_spill] sm:$0xff] %v16575_v28  ;;  %v16583_v46 = vpop.f32.mrb[44].mxu0 }
 0x1e3   :  { %14057 = vmatprep.subr.bf16.mxu0 %v16068_v0  ;;  %18856 = vst [vmem:[#allocation28_spill] sm:$0xff] %v16583_v46 }
 0x1e5   :  { %13903 = vmatpush3.bf16.msra.mxu1 %v16541_v11  ;;  %10957 = vmatmul.mubr.f32.vlgmr.msra.gmra.mrb[64].mxu0 %v534_v1  ;;  %v16563_v1 = vpack.c.bf16 %v1280_v29, %v1279_v10  ;;  %v16579_v10 = vadd.f32 %v16296_v58, %v16236_v4  ;;  %v1473_v29 = vld [vmem:[#allocation10 + $0x88] sm:$0xff]  ;;  %v1474_v58 = vld [vmem:[#allocation10 + $0x90] sm:$0xff] }
 0x1e6   :  { %14059 = vmatpush3.bf16.msra.mxu0 %v16421_v16  ;;  %13904 = vmatprep.subr.bf16.mxu1 %v16068_v0  ;;  %v1281_v16 = vld [vmem:[#allocation10 + $0x3f0] sm:$0xff] }
 0x1e7   :  { %14060 = vmatprep.subr.bf16.mxu0 %v16068_v0  ;;  %11026 = vmatprep.mubr.msk.f32.mxu0 %vm16069_vm0, %v18851_v32  ;;  %v16573_v59 = vpack.c.bf16 %v1282_v37, %v1281_v16  ;;  %v16589_v37 = vpop.f32.mrb[45].mxu0  ;;  %v18845_v45 = vmax.f32 %v16579_v10, 0.0 }
 0x1e8   :  { %18857 = vst [vmem:[#allocation29_spill] sm:$0xff] %v16589_v37  ;;  %v16597_v46 = vpop.f32.mrb[46].mxu0 }
 0x1e9   :  { %13906 = vmatpush3.bf16.msra.mxu1 %v16551_v49  ;;  %18858 = vst [vmem:[#allocation30_spill] sm:$0xff] %v16597_v46  ;;  %v1479_v46 = vld [vmem:[#allocation10 + $0xb8] sm:$0xff] }
 0x1ea   :  { %14062 = vmatpush3.bf16.msra.mxu0 %v16427_v21  ;;  %13907 = vmatprep.subr.bf16.mxu1 %v16068_v0  ;;  %v1472_v21 = vld [vmem:[#allocation10 + $0x80] sm:$0xff] }
 0x1eb   :  { %14063 = vmatprep.subr.bf16.mxu0 %v16068_v0  ;;  %v16587_v16 = vpack.c.bf16 %v1473_v29, %v1472_v21  ;;  %v16604_v29 = vpop.f32.mrb[47].mxu0 }
 0x1ec   :  { %18859 = vst [vmem:[#allocation31_spill] sm:$0xff] %v16604_v29  ;;  %v10494_v37 = vpop.f32.mrb[48].mxu0 }
 0x1ed   :  { %13909 = vmatpush3.bf16.msra.mxu1 %v16563_v1 }
 0x1ee   :  { %14065 = vmatpush3.bf16.msra.mxu0 %v16435_v62  ;;  %13910 = vmatprep.subr.bf16.mxu1 %v16068_v0  ;;  %v1475_v62 = vld [vmem:[#allocation10 + $0x98] sm:$0xff] }
 0x1ef   :  { %14066 = vmatprep.subr.bf16.mxu0 %v16068_v0  ;;  %v16600_v21 = vpack.c.bf16 %v1475_v62, %v1474_v58  ;;  %v16612_v58 = vpop.f32.mrb[49].mxu0  ;;  %v1478_v62 = vld [vmem:[#allocation10 + $0xb0] sm:$0xff] }
 0x1f0   :  { %18860 = vst [vmem:[#allocation32_spill] sm:$0xff] %v16612_v58  ;;  %v16618_v37 = vpack.c.bf16 %v1479_v46, %v1478_v62  ;;  %v16624_v58 = vadd.f32 %v16276_v41, %v16236_v4  ;;  %v1485_v62 = vld [vmem:[#allocation10 + $0xe8] sm:$0xff] }
 0x1f1   :  { %13912 = vmatpush3.bf16.msra.mxu1 %v16573_v59 }
 0x1f2   :  { %14068 = vmatpush3.bf16.msra.mxu0 %v16443_v34  ;;  %13937 = vmatprep.subr.bf16.mxu1 %v16068_v0  ;;  %v1476_v34 = vld [vmem:[#allocation10 + $0xa0] sm:$0xff]  ;;  %v536_v46 = vmax.f32 %v16624_v58, 0.0 }
 0x1f3   :  { %14069 = vmatprep.subr.bf16.mxu0 %v16068_v0 }
 0x1f4   :  { %10782 = vmatmul.mubr.f32.vlgmr.msra.gmra.mrb[10].mxu1 %v18845_v45  ;;  %v16610_v45 = vpack.c.bf16 %v1477_v56, %v1476_v34  ;;  %v1480_v56 = vld [vmem:[#allocation10 + $0xc0] sm:$0xff] }
 0x1f5   :  { %13939 = vmatpush3.bf16.msra.mxu1 %v16587_v16  ;;  %10851 = vmatprep.mubr.msk.f32.mxu1 %vm16069_vm0, %v18851_v32 }
 0x1f6   :  { %14071 = vmatpush3.bf16.msra.mxu0 %v16453_v13  ;;  %13940 = vmatprep.subr.bf16.mxu1 %v16068_v0  ;;  %v10497_v13 = vpop.f32.mrb[50].mxu0 }
 0x1f7   :  { %14072 = vmatprep.subr.bf16.mxu0 %v16068_v0  ;;  %v496_v29 = vpop.f32.mrb[51].mxu0 }
 0x1f8   :  { %v10500_v28 = vpop.f32.mrb[52].mxu0 }
 0x1f9   :  { %13942 = vmatpush3.bf16.msra.mxu1 %v16600_v21  ;;  %v506_v57 = vpop.f32.mrb[53].mxu0 }
 0x1fa   :  { %14074 = vmatpush3.bf16.msra.mxu0 %v16465_v33  ;;  %13943 = vmatprep.subr.bf16.mxu1 %v16068_v0  ;;  %v1481_v33 = vld [vmem:[#allocation10 + $0xc8] sm:$0xff]  ;;  %v10503_v34 = vpop.f32.mrb[54].mxu0  ;;  %v1483_v57 = vld [vmem:[#allocation10 + $0xd8] sm:$0xff] }
 0x1fb   :  { %14075 = vmatprep.subr.bf16.mxu0 %v16068_v0  ;;  %v516_v29 = vpop.f32.mrb[55].mxu0  ;;  %v16628_v28 = vpack.c.bf16 %v1481_v33, %v1480_v56  ;;  %v1486_v56 = vld [vmem:[#allocation10 + $0xf0] sm:$0xff]  ;;  %v1487_v33 = vld [vmem:[#allocation10 + $0xf8] sm:$0xff]  ;;  %v262_v34 = vadd.f32 %v16243_v14, %v16236_v4  ;;  %v16677_v14 = vadd.f32 %v16305_v5, %v16236_v4 }
 0x1fc   :  { %v1816_v29 = vld [vmem:[#allocation10 + $0x248] sm:$0xff] }
 0x1fd   :  { %13945 = vmatpush3.bf16.msra.mxu1 %v16610_v45 }
 0x1fe   :  { %14077 = vmatpush3.bf16.msra.mxu0 %v16477_v22  ;;  %13946 = vmatprep.subr.bf16.mxu1 %v16068_v0  ;;  %v1482_v22 = vld [vmem:[#allocation10 + $0xd0] sm:$0xff] }
 0x1ff   :  { %14078 = vmatprep.subr.bf16.mxu0 %v16068_v0  ;;  %v16637_v41 = vpack.c.bf16 %v1483_v57, %v1482_v22  ;;  %v2430_v22 = vld [vmem:[#allocation10 + $0x100] sm:$0xff]  ;;  %v2431_v57 = vld [vmem:[#allocation10 + $0x108] sm:$0xff] }
 0x201   :  { %13948 = vmatpush3.bf16.msra.mxu1 %v16618_v37 }
 0x202   :  { %14080 = vmatpush3.bf16.msra.mxu0 %v16487_v54  ;;  %13949 = vmatprep.subr.bf16.mxu1 %v16068_v0  ;;  %v1484_v54 = vld [vmem:[#allocation10 + $0xe0] sm:$0xff] }
 0x203   :  { %14105 = vmatprep.subr.bf16.mxu0 %v16068_v0  ;;  %v16645_v13 = vpack.c.bf16 %v1485_v62, %v1484_v54  ;;  %v14202_v54 = vpack.c.bf16 %v2431_v57, %v2430_v22  ;;  %v1817_v62 = vld [vmem:[#allocation10 + $0x250] sm:$0xff]  ;;  %v1984_v57 = vld [vmem:[#allocation10 + $0x300] sm:$0xff] }
 0x205   :  { %13951 = vmatpush3.bf16.msra.mxu1 %v16628_v28  ;;  %11027 = vmatmul.mubr.f32.vlgmr.msra.gmra.mrb[66].mxu0 %v536_v46 }
 0x206   :  { %14107 = vmatpush3.bf16.msra.mxu0 %v16499_v26  ;;  %13952 = vmatprep.subr.bf16.mxu1 %v16068_v0  ;;  %v16651_v26 = vpack.c.bf16 %v1487_v33, %v1486_v56  ;;  %v2432_v33 = vld [vmem:[#allocation10 + $0x110] sm:$0xff] }
 0x207   :  { %14108 = vmatprep.subr.bf16.mxu0 %v16068_v0  ;;  %11096 = vmatprep.mubr.msk.f32.mxu0 %vm16069_vm0, %v18851_v32 }
 0x209   :  { %13954 = vmatpush3.bf16.msra.mxu1 %v16637_v41 }
 0x20a   :  { %14110 = vmatpush3.bf16.msra.mxu0 %v16509_v43  ;;  %13955 = vmatprep.subr.bf16.mxu1 %v16068_v0  ;;  %v528_v43 = vmax.f32 %v262_v34, 0.0 }
 0x20b   :  { %14111 = vmatprep.subr.bf16.mxu0 %v16068_v0 }
 0x20d   :  { %13957 = vmatpush3.bf16.msra.mxu1 %v16645_v13 }
 0x20e   :  { %14113 = vmatpush3.bf16.msra.mxu0 %v16521_v40  ;;  %13958 = vmatprep.subr.bf16.mxu1 %v16068_v0  ;;  %v1812_v40 = vld [vmem:[#allocation10 + $0x228] sm:$0xff] }
 0x20f   :  { %14114 = vmatprep.subr.bf16.mxu0 %v16068_v0 }
 0x211   :  { %13960 = vmatpush3.bf16.msra.mxu1 %v16651_v26 }
 0x212   :  { %14116 = vmatpush3.bf16.msra.mxu0 %v16531_v47  ;;  %13985 = vmatprep.subr.bf16.mxu1 %v16068_v0 }
 0x213   :  { %14117 = vmatprep.subr.bf16.mxu0 %v16068_v0 }
 0x214   :  { %10852 = vmatmul.mubr.f32.vlgmr.msra.gmra.mrb[12].mxu1 %v528_v43 }
 0x215   :  { %13987 = vmatpush3.bf16.msra.mxu1 %v16310_v7  ;;  %10921 = vmatprep.mubr.msk.f32.mxu1 %vm16069_vm0, %v18851_v32  ;;  %v542_v7 = vmax.f32 %v16677_v14, 0.0 }
 0x216   :  { %14119 = vmatpush3.bf16.msra.mxu0 %v16541_v11  ;;  %13988 = vmatprep.subr.bf16.mxu1 %v16068_v0 }
 0x217   :  { %14120 = vmatprep.subr.bf16.mxu0 %v16068_v0 }
 0x219   :  { %13990 = vmatpush3.bf16.msra.mxu1 %v16315_v18  ;;  %v16703_v18 = vld [vmem:[%s18834_s2] ss:$0 sm:$0xff] }
 0x21a   :  { %14122 = vmatpush3.bf16.msra.mxu0 %v16551_v49  ;;  %13991 = vmatprep.subr.bf16.mxu1 %v16068_v0  ;;  %v1808_v49 = vld [vmem:[#allocation10 + $0x208] sm:$0xff] }
 0x21b   :  { %14123 = vmatprep.subr.bf16.mxu0 %v16068_v0 }
 0x21d   :  { %13993 = vmatpush3.bf16.msra.mxu1 %v16322_v31  ;;  %v16707_v31 = vadd.f32 %v16703_v18, %v16255_v20  ;;  %v1809_v20 = vld [vmem:[#allocation10 + $0x210] sm:$0xff] }
 0x21e   :  { %14125 = vmatpush3.bf16.msra.mxu0 %v16563_v1  ;;  %13994 = vmatprep.subr.bf16.mxu1 %v16068_v0  ;;  %v1813_v1 = vld [vmem:[#allocation10 + $0x230] sm:$0xff] }
 0x21f   :  { %14126 = vmatprep.subr.bf16.mxu0 %v16068_v0 }
 0x221   :  { %13996 = vmatpush3.bf16.msra.mxu1 %v16330_v39  ;;  %v1807_v39 = vld [vmem:[#allocation10 + $0x200] sm:$0xff] }
 0x222   :  { %14128 = vmatpush3.bf16.msra.mxu0 %v16573_v59  ;;  %13997 = vmatprep.subr.bf16.mxu1 %v16068_v0 }
 0x223   :  { %14153 = vmatprep.subr.bf16.mxu0 %v16068_v0 }
 0x225   :  { %13999 = vmatpush3.bf16.msra.mxu1 %v16336_v53  ;;  %11097 = vmatmul.mubr.f32.vlgmr.msra.gmra.mrb[68].mxu0 %v542_v7  ;;  %v16713_v53 = vpack.c.bf16 %v1808_v49, %v1807_v39  ;;  %v2434_v49 = vld [vmem:[#allocation10 + $0x120] sm:$0xff] }
 0x226   :  { %14155 = vmatpush3.bf16.msra.mxu0 %v16587_v16  ;;  %14000 = vmatprep.subr.bf16.mxu1 %v16068_v0  ;;  %v1814_v16 = vld [vmem:[#allocation10 + $0x238] sm:$0xff] }
 0x227   :  { %v16690_v4 = vpop.f32.mrb[0].mxu1  ;;  %14156 = vmatprep.subr.bf16.mxu0 %v16068_v0  ;;  %11166 = vmatprep.mubr.msk.f32.mxu0 %vm16069_vm0, %v18851_v32 }
 0x228   :  { %v10538_v5 = vpop.f32.mrb[1].mxu1 }
 0x229   :  { %14002 = vmatpush3.bf16.msra.mxu1 %v16343_v61  ;;  %v529_v61 = vmax.f32 %v16707_v31, 0.0  ;;  %v1820_v5 = vld [vmem:[#allocation10 + $0x268] sm:$0xff] }
 0x22a   :  { %14158 = vmatpush3.bf16.msra.mxu0 %v16600_v21  ;;  %14003 = vmatprep.subr.bf16.mxu1 %v16068_v0  ;;  %v16738_v21 = vpack.c.bf16 %v1814_v16, %v1813_v1  ;;  %v1821_v1 = vld [vmem:[#allocation10 + $0x270] sm:$0xff]  ;;  %v1822_v16 = vld [vmem:[#allocation10 + $0x278] sm:$0xff] }
 0x22b   :  { %14159 = vmatprep.subr.bf16.mxu0 %v16068_v0 }
 0x22d   :  { %14005 = vmatpush3.bf16.msra.mxu1 %v16350_v8  ;;  %v1810_v8 = vld [vmem:[#allocation10 + $0x218] sm:$0xff] }
 0x22e   :  { %14161 = vmatpush3.bf16.msra.mxu0 %v16610_v45  ;;  %14006 = vmatprep.subr.bf16.mxu1 %v16068_v0  ;;  %v16722_v45 = vpack.c.bf16 %v1810_v8, %v1809_v20  ;;  %v2435_v20 = vld [vmem:[#allocation10 + $0x128] sm:$0xff] }
 0x22f   :  { %14162 = vmatprep.subr.bf16.mxu0 %v16068_v0 }
 0x231   :  { %14008 = vmatpush3.bf16.msra.mxu1 %v16359_v23  ;;  %v1811_v23 = vld [vmem:[#allocation10 + $0x220] sm:$0xff] }
 0x232   :  { %14164 = vmatpush3.bf16.msra.mxu0 %v16618_v37  ;;  %14033 = vmatprep.subr.bf16.mxu1 %v16068_v0  ;;  %v16732_v59 = vpack.c.bf16 %v1812_v40, %v1811_v23  ;;  %v1815_v37 = vld [vmem:[#allocation10 + $0x240] sm:$0xff] }
 0x233   :  { %14165 = vmatprep.subr.bf16.mxu0 %v16068_v0 }
 0x234   :  { %10922 = vmatmul.mubr.f32.vlgmr.msra.gmra.mrb[14].mxu1 %v529_v61 }
 0x235   :  { %14035 = vmatpush3.bf16.msra.mxu1 %v16713_v53  ;;  %10991 = vmatprep.mubr.msk.f32.mxu1 %vm16069_vm0, %v18851_v32 }
 0x236   :  { %14167 = vmatpush3.bf16.msra.mxu0 %v16628_v28  ;;  %14036 = vmatprep.subr.bf16.mxu1 %v16068_v0  ;;  %v272_v28 = vadd.f32 %v16703_v18, %v16253_v19  ;;  %v2433_v19 = vld [vmem:[#allocation10 + $0x118] sm:$0xff] }
 0x237   :  { %14168 = vmatprep.subr.bf16.mxu0 %v16068_v0  ;;  %v14205_v43 = vpack.c.bf16 %v2433_v19, %v2432_v33 }
 0x238   :  { %v16729_v47 = vpop.f32.mrb[56].mxu0  ;;  %v530_v56 = vmax.f32 %v272_v28, 0.0  ;;  %v16767_v28 = vpack.c.bf16 %v1822_v16, %v1821_v1  ;;  %v2443_v1 = vld [vmem:[#allocation10 + $0x168] sm:$0xff] }
 0x239   :  { %14038 = vmatpush3.bf16.msra.mxu1 %v16722_v45  ;;  %v10678_v11 = vpop.f32.mrb[57].mxu0 }
 0x23a   :  { %14170 = vmatpush3.bf16.msra.mxu0 %v16637_v41  ;;  %14039 = vmatprep.subr.bf16.mxu1 %v16068_v0  ;;  %v16746_v41 = vpack.c.bf16 %v1816_v29, %v1815_v37  ;;  %v14208_v11 = vpack.c.bf16 %v2435_v20, %v2434_v49  ;;  %v2436_v37 = vld [vmem:[#allocation10 + $0x130] sm:$0xff]  ;;  %v2437_v29 = vld [vmem:[#allocation10 + $0x138] sm:$0xff]  ;;  %v1988_v20 = vld [vmem:[#allocation10 + $0x320] sm:$0xff] }
 0x23b   :  { %14171 = vmatprep.subr.bf16.mxu0 %v16068_v0  ;;  %v14211_v22 = vpack.c.bf16 %v2437_v29, %v2436_v37 }
 0x23d   :  { %14041 = vmatpush3.bf16.msra.mxu1 %v16732_v59 }
 0x23e   :  { %14173 = vmatpush3.bf16.msra.mxu0 %v16645_v13  ;;  %14042 = vmatprep.subr.bf16.mxu1 %v16068_v0  ;;  %v1818_v13 = vld [vmem:[#allocation10 + $0x258] sm:$0xff] }
 0x23f   :  { %14174 = vmatprep.subr.bf16.mxu0 %v16068_v0  ;;  %v16752_v34 = vpack.c.bf16 %v1818_v13, %v1817_v62  ;;  %v2438_v62 = vld [vmem:[#allocation10 + $0x140] sm:$0xff]  ;;  %v2439_v13 = vld [vmem:[#allocation10 + $0x148] sm:$0xff] }
 0x240   :  { %v14214_v19 = vpack.c.bf16 %v2439_v13, %v2438_v62  ;;  %v2445_v62 = vld [vmem:[#allocation10 + $0x178] sm:$0xff] }
 0x241   :  { %14044 = vmatpush3.bf16.msra.mxu1 %v16738_v21 }
 0x242   :  { %14176 = vmatpush3.bf16.msra.mxu0 %v16651_v26  ;;  %14045 = vmatprep.subr.bf16.mxu1 %v16068_v0  ;;  %v1819_v26 = vld [vmem:[#allocation10 + $0x260] sm:$0xff] }
 0x243   :  { %14201 = vmatprep.subr.bf16.mxu0 %v16068_v0  ;;  %v16762_v40 = vpack.c.bf16 %v1820_v5, %v1819_v26  ;;  %v2440_v26 = vld [vmem:[#allocation10 + $0x150] sm:$0xff]  ;;  %v2441_v5 = vld [vmem:[#allocation10 + $0x158] sm:$0xff] }
 0x244   :  { %v14217_v49 = vpack.c.bf16 %v2441_v5, %v2440_v26  ;;  %v1994_v5 = vld [vmem:[#allocation10 + $0x350] sm:$0xff] }
 0x245   :  { %14047 = vmatpush3.bf16.msra.mxu1 %v16746_v41  ;;  %11167 = vmatmul.mubr.f32.vlgmr.msra.gmra.mrb[70].mxu0 %v530_v56 }
 0x246   :  { %14203 = vmatpush3.bf16.msra.mxu0 %v14202_v54  ;;  %14048 = vmatprep.subr.bf16.mxu1 %v16068_v0  ;;  %v1985_v54 = vld [vmem:[#allocation10 + $0x308] sm:$0xff] }
 0x247   :  { %v810_v39 = vpop.f32.mrb[2].mxu1  ;;  %14204 = vmatprep.subr.bf16.mxu0 %v16068_v0  ;;  %11236 = vmatprep.mubr.msk.f32.mxu0 %vm16069_vm0, %v18851_v32  ;;  %v16774_v56 = vpack.c.bf16 %v1985_v54, %v1984_v57  ;;  %v1991_v57 = vld [vmem:[#allocation10 + $0x338] sm:$0xff]  ;;  %v2444_v54 = vld [vmem:[#allocation10 + $0x170] sm:$0xff] }
 0x248   :  { %v16759_v8 = vadd.f32 %v810_v39, %v16690_v4  ;;  %v10573_v23 = vpop.f32.mrb[3].mxu1  ;;  %v297_v4 = vadd.f32 %v16703_v18, %v16278_v42  ;;  %v1986_v42 = vld [vmem:[#allocation10 + $0x310] sm:$0xff] }
 0x249   :  { %14050 = vmatpush3.bf16.msra.mxu1 %v16752_v34  ;;  %v1989_v23 = vld [vmem:[#allocation10 + $0x328] sm:$0xff] }
 0x24a   :  { %14206 = vmatpush3.bf16.msra.mxu0 %v14205_v43  ;;  %14051 = vmatprep.subr.bf16.mxu1 %v16068_v0  ;;  %v535_v33 = vmax.f32 %v297_v4, 0.0  ;;  %v1987_v43 = vld [vmem:[#allocation10 + $0x318] sm:$0xff]  ;;  %v16788_v37 = vpack.c.bf16 %v1989_v23, %v1988_v20 }
 0x24b   :  { %14207 = vmatprep.subr.bf16.mxu0 %v16068_v0  ;;  %v16779_v39 = vpack.c.bf16 %v1987_v43, %v1986_v42  ;;  %v1993_v42 = vld [vmem:[#allocation10 + $0x348] sm:$0xff]  ;;  %v277_v43 = vadd.f32 %v16703_v18, %v16263_v25  ;;  %v1996_v25 = vld [vmem:[#allocation10 + $0x360] sm:$0xff] }
 0x24d   :  { %14053 = vmatpush3.bf16.msra.mxu1 %v16762_v40  ;;  %v531_v20 = vmax.f32 %v277_v43, 0.0 }
 0x24e   :  { %14209 = vmatpush3.bf16.msra.mxu0 %v14208_v11  ;;  %14054 = vmatprep.subr.bf16.mxu1 %v16068_v0  ;;  %v2442_v11 = vld [vmem:[#allocation10 + $0x160] sm:$0xff] }
 0x24f   :  { %14210 = vmatprep.subr.bf16.mxu0 %v16068_v0  ;;  %v14220_v4 = vpack.c.bf16 %v2443_v1, %v2442_v11  ;;  %v1997_v11 = vld [vmem:[#allocation10 + $0x368] sm:$0xff] }
 0x251   :  { %14056 = vmatpush3.bf16.msra.mxu1 %v16767_v28 }
 0x252   :  { %14212 = vmatpush3.bf16.msra.mxu0 %v14211_v22  ;;  %14081 = vmatprep.subr.bf16.mxu1 %v16068_v0  ;;  %v1990_v22 = vld [vmem:[#allocation10 + $0x330] sm:$0xff] }
 0x253   :  { %14213 = vmatprep.subr.bf16.mxu0 %v16068_v0  ;;  %v16793_v13 = vpack.c.bf16 %v1991_v57, %v1990_v22  ;;  %v16816_v22 = vpack.c.bf16 %v1997_v11, %v1996_v25  ;;  %v1999_v57 = vld [vmem:[#allocation10 + $0x378] sm:$0xff]  ;;  %v2170_v11 = vld [vmem:[#allocation10 + $0x440] sm:$0xff] }
 0x254   :  { %10992 = vmatmul.mubr.f32.vlgmr.msra.gmra.mrb[16].mxu1 %v535_v33  ;;  %v14223_v33 = vpack.c.bf16 %v2445_v62, %v2444_v54  ;;  %v2163_v62 = vld [vmem:[#allocation10 + $0x408] sm:$0xff]  ;;  %v2169_v25 = vld [vmem:[#allocation10 + $0x438] sm:$0xff] }
 0x255   :  { %14083 = vmatpush3.bf16.msra.mxu1 %v16774_v56  ;;  %11061 = vmatprep.mubr.msk.f32.mxu1 %vm16069_vm0, %v18851_v32 }
 0x256   :  { %14215 = vmatpush3.bf16.msra.mxu0 %v14214_v19  ;;  %14084 = vmatprep.subr.bf16.mxu1 %v16068_v0  ;;  %v1992_v19 = vld [vmem:[#allocation10 + $0x340] sm:$0xff] }
 0x257   :  { %14216 = vmatprep.subr.bf16.mxu0 %v16068_v0  ;;  %v16800_v26 = vpack.c.bf16 %v1993_v42, %v1992_v19  ;;  %v2165_v19 = vld [vmem:[#allocation10 + $0x418] sm:$0xff]  ;;  %v2167_v42 = vld [vmem:[#allocation10 + $0x428] sm:$0xff] }
 0x258   :  { %v16785_v16 = vpop.f32.mrb[58].mxu0 }
 0x259   :  { %14086 = vmatpush3.bf16.msra.mxu1 %v16779_v39  ;;  %v10748_v29 = vpop.f32.mrb[59].mxu0 }
 0x25a   :  { %14218 = vmatpush3.bf16.msra.mxu0 %v14217_v49  ;;  %14087 = vmatprep.subr.bf16.mxu1 %v16068_v0  ;;  %v1995_v49 = vld [vmem:[#allocation10 + $0x358] sm:$0xff] }
 0x25b   :  { %14219 = vmatprep.subr.bf16.mxu0 %v16068_v0  ;;  %v16805_v23 = vpack.c.bf16 %v1995_v49, %v1994_v5 }
 0x25d   :  { %14089 = vmatpush3.bf16.msra.mxu1 %v16788_v37 }
 0x25e   :  { %14221 = vmatpush3.bf16.msra.mxu0 %v14220_v4  ;;  %14090 = vmatprep.subr.bf16.mxu1 %v16068_v0 }
 0x25f   :  { %14222 = vmatprep.subr.bf16.mxu0 %v16068_v0 }
 0x261   :  { %14092 = vmatpush3.bf16.msra.mxu1 %v16793_v13 }
 0x262   :  { %14224 = vmatpush3.bf16.msra.mxu0 %v14223_v33  ;;  %14093 = vmatprep.subr.bf16.mxu1 %v16068_v0  ;;  %v2164_v33 = vld [vmem:[#allocation10 + $0x410] sm:$0xff] }
 0x263   :  { %14249 = vmatprep.subr.bf16.mxu0 %v16068_v0 }
 0x265   :  { %14095 = vmatpush3.bf16.msra.mxu1 %v16800_v26  ;;  %11237 = vmatmul.mubr.f32.vlgmr.msra.gmra.mrb[72].mxu0 %v531_v20  ;;  %v2168_v20 = vld [vmem:[#allocation10 + $0x430] sm:$0xff] }
 0x266   :  { %14251 = vmatpush3.bf16.msra.mxu0 %v16713_v53  ;;  %14096 = vmatprep.subr.bf16.mxu1 %v16068_v0  ;;  %v1998_v53 = vld [vmem:[#allocation10 + $0x370] sm:$0xff] }
 0x267   :  { %v899_v1 = vpop.f32.mrb[4].mxu1  ;;  %14252 = vmatprep.subr.bf16.mxu0 %v16068_v0  ;;  %11306 = vmatprep.mubr.msk.f32.mxu0 %vm16069_vm0, %v18851_v32  ;;  %v16822_v54 = vpack.c.bf16 %v1999_v57, %v1998_v53  ;;  %v2172_v53 = vld [vmem:[#allocation10 + $0x450] sm:$0xff]  ;;  %v2173_v57 = vld [vmem:[#allocation10 + $0x458] sm:$0xff] }
 0x268   :  { %v16813_v29 = vadd.f32 %v899_v1, %v16759_v8  ;;  %v10608_v4 = vpop.f32.mrb[5].mxu1  ;;  %v2162_v8 = vld [vmem:[#allocation10 + $0x400] sm:$0xff]  ;;  %v2171_v1 = vld [vmem:[#allocation10 + $0x448] sm:$0xff] }
 0x269   :  { %14098 = vmatpush3.bf16.msra.mxu1 %v16805_v23  ;;  %v307_v4 = vadd.f32 %v16703_v18, %v16289_v51  ;;  %v2174_v51 = vld [vmem:[#allocation10 + $0x460] sm:$0xff] }
 0x26a   :  { %14254 = vmatpush3.bf16.msra.mxu0 %v16722_v45  ;;  %14099 = vmatprep.subr.bf16.mxu1 %v16068_v0  ;;  %v16828_v45 = vpack.c.bf16 %v2163_v62, %v2162_v8  ;;  %v16865_v8 = vpack.c.bf16 %v2173_v57, %v2172_v53  ;;  %v2175_v62 = vld [vmem:[#allocation10 + $0x468] sm:$0xff] }
 0x26b   :  { %14255 = vmatprep.subr.bf16.mxu0 %v16068_v0 }
 0x26d   :  { %14101 = vmatpush3.bf16.msra.mxu1 %v16816_v22 }
 0x26e   :  { %14257 = vmatpush3.bf16.msra.mxu0 %v16732_v59  ;;  %14102 = vmatprep.subr.bf16.mxu1 %v16068_v0  ;;  %v16835_v59 = vpack.c.bf16 %v2165_v19, %v2164_v33 }
 0x26f   :  { %14258 = vmatprep.subr.bf16.mxu0 %v16068_v0 }
 0x271   :  { %14104 = vmatpush3.bf16.msra.mxu1 %v16822_v54 }
 0x272   :  { %14260 = vmatpush3.bf16.msra.mxu0 %v16738_v21  ;;  %14129 = vmatprep.subr.bf16.mxu1 %v16068_v0  ;;  %v2166_v21 = vld [vmem:[#allocation10 + $0x420] sm:$0xff] }
 0x273   :  { %14261 = vmatprep.subr.bf16.mxu0 %v16068_v0  ;;  %v16845_v5 = vpack.c.bf16 %v2167_v42, %v2166_v21  ;;  %v16874_v21 = vpack.c.bf16 %v2175_v62, %v2174_v51  ;;  %v2260_v51 = vld [vmem:[#allocation10 + $0x30] sm:$0xff]  ;;  %v2261_v62 = vld [vmem:[#allocation10 + $0x38] sm:$0xff] }
 0x274   :  { %11062 = vmatmul.mubr.f32.vlgmr.msra.gmra.mrb[18].mxu1 %v16390_v27 }
 0x275   :  { %14131 = vmatpush3.bf16.msra.mxu1 %v16828_v45  ;;  %11131 = vmatprep.mubr.msk.f32.mxu1 %vm16069_vm0, %v18851_v32 }
 0x276   :  { %14263 = vmatpush3.bf16.msra.mxu0 %v16746_v41  ;;  %14132 = vmatprep.subr.bf16.mxu1 %v16068_v0  ;;  %v16851_v41 = vpack.c.bf16 %v2169_v25, %v2168_v20  ;;  %v2255_v25 = vld [vmem:[#allocation10 + $0x8] sm:$0xff] }
 0x277   :  { %14264 = vmatprep.subr.bf16.mxu0 %v16068_v0 }
 0x278   :  { %v16842_v43 = vpop.f32.mrb[60].mxu0 }
 0x279   :  { %14134 = vmatpush3.bf16.msra.mxu1 %v16835_v59  ;;  %v10818_v49 = vpop.f32.mrb[61].mxu0 }
 0x27a   :  { %14266 = vmatpush3.bf16.msra.mxu0 %v16752_v34  ;;  %14135 = vmatprep.subr.bf16.mxu1 %v16068_v0  ;;  %v16859_v34 = vpack.c.bf16 %v2171_v1, %v2170_v11  ;;  %v2177_v49 = vld [vmem:[#allocation10 + $0x478] sm:$0xff]  ;;  %v2256_v1 = vld [vmem:[#allocation10 + $0x10] sm:$0xff] }
 0x27b   :  { %14267 = vmatprep.subr.bf16.mxu0 %v16068_v0 }
 0x27d   :  { %14137 = vmatpush3.bf16.msra.mxu1 %v16845_v5 }
 0x27e   :  { %14269 = vmatpush3.bf16.msra.mxu0 %v16762_v40  ;;  %14138 = vmatprep.subr.bf16.mxu1 %v16068_v0  ;;  %v537_v40 = vmax.f32 %v307_v4, 0.0  ;;  %v2259_v4 = vld [vmem:[#allocation10 + $0x28] sm:$0xff] }
 0x27f   :  { %14270 = vmatprep.subr.bf16.mxu0 %v16068_v0 }
 0x281   :  { %14140 = vmatpush3.bf16.msra.mxu1 %v16851_v41 }
 0x282   :  { %14272 = vmatpush3.bf16.msra.mxu0 %v16767_v28  ;;  %14141 = vmatprep.subr.bf16.mxu1 %v16068_v0 }
 0x283   :  { %14297 = vmatprep.subr.bf16.mxu0 %v16068_v0 }
 0x285   :  { %14143 = vmatpush3.bf16.msra.mxu1 %v16859_v34  ;;  %11307 = vmatmul.mubr.f32.vlgmr.msra.gmra.mrb[74].mxu0 %v537_v40 }
 0x286   :  { %14299 = vmatpush3.bf16.msra.mxu0 %v16774_v56  ;;  %14144 = vmatprep.subr.bf16.mxu1 %v16068_v0  ;;  %v2176_v56 = vld [vmem:[#allocation10 + $0x470] sm:$0xff] }
 0x287   :  { %v989_v33 = vpop.f32.mrb[6].mxu1  ;;  %14300 = vmatprep.subr.bf16.mxu0 %v16068_v0  ;;  %11376 = vmatprep.mubr.msk.f32.mxu0 %vm16069_vm0, %v18851_v32  ;;  %v16883_v20 = vpack.c.bf16 %v2177_v49, %v2176_v56  ;;  %v2265_v56 = vld [vmem:[#allocation10 + $0x58] sm:$0xff]  ;;  %v2266_v49 = vld [vmem:[#allocation10 + $0x60] sm:$0xff] }
 0x288   :  { %v993_v28 = vadd.f32 %v989_v33, %v16813_v29  ;;  %v10643_v19 = vpop.f32.mrb[7].mxu1  ;;  %v337_v29 = vadd.f32 %v16703_v18, %v16445_v3  ;;  %v2257_v3 = vld [vmem:[#allocation10 + $0x18] sm:$0xff]  ;;  %v2262_v33 = vld [vmem:[#allocation10 + $0x40] sm:$0xff] }
 0x289   :  { %14146 = vmatpush3.bf16.msra.mxu1 %v16865_v8  ;;  %v2264_v19 = vld [vmem:[#allocation10 + $0x50] sm:$0xff] }
 0x28a   :  { %v16877_v42 = vadd.f32 %v16729_v47, %v993_v28  ;;  %14302 = vmatpush3.bf16.msra.mxu0 %v16779_v39  ;;  %14147 = vmatprep.subr.bf16.mxu1 %v16068_v0  ;;  %v2254_v47 = vld [vmem:[#allocation10] sm:$0xff]  ;;  %v16893_v11 = vmax.f32 %v337_v29, 0.0  ;;  %v2263_v28 = vld [vmem:[#allocation10 + $0x48] sm:$0xff] }
 0x28b   :  { %14303 = vmatprep.subr.bf16.mxu0 %v16068_v0  ;;  %v16891_v39 = vpack.c.bf16 %v2255_v25, %v2254_v47  ;;  %v2267_v29 = vld [vmem:[#allocation10 + $0x68] sm:$0xff] }
 0x28d   :  { %14149 = vmatpush3.bf16.msra.mxu1 %v16874_v21 }
 0x28e   :  { %14305 = vmatpush3.bf16.msra.mxu0 %v16788_v37  ;;  %14150 = vmatprep.subr.bf16.mxu1 %v16068_v0  ;;  %v16900_v37 = vpack.c.bf16 %v2257_v3, %v2256_v1  ;;  %v16938_v1 = vpack.c.bf16 %v2267_v29, %v2266_v49  ;;  %v2269_v3 = vld [vmem:[#allocation10 + $0x78] sm:$0xff]  ;;  %v2527_v49 = vld [vmem:[#allocation10 + $0x1c8] sm:$0xff]  ;;  %v16981_v29 = vadd.f32 %v16703_v18, %v16455_v17 }
 0x28f   :  { %14306 = vmatprep.subr.bf16.mxu0 %v16068_v0 }
 0x291   :  { %14152 = vmatpush3.bf16.msra.mxu1 %v16883_v20 }
 0x292   :  { %14308 = vmatpush3.bf16.msra.mxu0 %v16793_v13  ;;  %14177 = vmatprep.subr.bf16.mxu1 %v16068_v0  ;;  %v2258_v13 = vld [vmem:[#allocation10 + $0x20] sm:$0xff] }
 0x293   :  { %14309 = vmatprep.subr.bf16.mxu0 %v16068_v0  ;;  %v16910_v40 = vpack.c.bf16 %v2259_v4, %v2258_v13 }
 0x294   :  { %11132 = vmatmul.mubr.f32.vlgmr.msra.gmra.mrb[20].mxu1 %v16893_v11 }
 0x295   :  { %14179 = vmatpush3.bf16.msra.mxu1 %v16891_v39  ;;  %11201 = vmatprep.mubr.msk.f32.mxu1 %vm16069_vm0, %v18851_v32 }
 0x296   :  { %14311 = vmatpush3.bf16.msra.mxu0 %v16800_v26  ;;  %14180 = vmatprep.subr.bf16.mxu1 %v16068_v0  ;;  %v16916_v26 = vpack.c.bf16 %v2261_v62, %v2260_v51  ;;  %v2521_v51 = vld [vmem:[#allocation10 + $0x198] sm:$0xff]  ;;  %v2523_v62 = vld [vmem:[#allocation10 + $0x1a8] sm:$0xff] }
 0x297   :  { %14312 = vmatprep.subr.bf16.mxu0 %v16068_v0 }
 0x298   :  { %v16907_v53 = vpop.f32.mrb[62].mxu0 }
 0x299   :  { %v10888_v57 = vpop.f32.mrb[63].mxu0  ;;  %14182 = vmatpush3.bf16.msra.mxu1 %v16900_v37 }
 0x29a   :  { %14314 = vmatpush3.bf16.msra.mxu0 %v16805_v23  ;;  %14183 = vmatprep.subr.bf16.mxu1 %v16068_v0  ;;  %v16922_v23 = vpack.c.bf16 %v2263_v28, %v2262_v33  ;;  %v2519_v57 = vld [vmem:[#allocation10 + $0x188] sm:$0xff] }
 0x29b   :  { %14315 = vmatprep.subr.bf16.mxu0 %v16068_v0 }
 0x29d   :  { %14185 = vmatpush3.bf16.msra.mxu1 %v16910_v40 }
 0x29e   :  { %14317 = vmatpush3.bf16.msra.mxu0 %v16816_v22  ;;  %14186 = vmatprep.subr.bf16.mxu1 %v16068_v0  ;;  %v16929_v22 = vpack.c.bf16 %v2265_v56, %v2264_v19  ;;  %v2525_v19 = vld [vmem:[#allocation10 + $0x1b8] sm:$0xff]  ;;  %v2526_v56 = vld [vmem:[#allocation10 + $0x1c0] sm:$0xff] }
 0x29f   :  { %14318 = vmatprep.subr.bf16.mxu0 %v16068_v0 }
 0x2a1   :  { %14188 = vmatpush3.bf16.msra.mxu1 %v16916_v26 }
 0x2a2   :  { %14320 = vmatpush3.bf16.msra.mxu0 %v16822_v54  ;;  %14189 = vmatprep.subr.bf16.mxu1 %v16068_v0 }
 0x2a3   :  { %14345 = vmatprep.subr.bf16.mxu0 %v16068_v0 }
 0x2a5   :  { %14191 = vmatpush3.bf16.msra.mxu1 %v16922_v23  ;;  %11377 = vmatmul.mubr.f32.vlgmr.msra.gmra.mrb[76].mxu0 %v16893_v11 }
 0x2a6   :  { %14347 = vmatpush3.bf16.msra.mxu0 %v16828_v45  ;;  %14192 = vmatprep.subr.bf16.mxu1 %v16068_v0  ;;  %v2268_v45 = vld [vmem:[#allocation10 + $0x70] sm:$0xff] }
 0x2a7   :  { %v1169_v47 = vpop.f32.mrb[8].mxu1  ;;  %14348 = vmatprep.subr.bf16.mxu0 %v16068_v0  ;;  %11446 = vmatprep.mubr.msk.f32.mxu0 %vm16069_vm0, %v18851_v32  ;;  %v16945_v4 = vpack.c.bf16 %v2269_v3, %v2268_v45 }
 0x2a8   :  { %v1173_v54 = vadd.f32 %v1169_v47, %v16877_v42  ;;  %v10713_v25 = vpop.f32.mrb[9].mxu1  ;;  %v2518_v42 = vld [vmem:[#allocation10 + $0x180] sm:$0xff]  ;;  %v2528_v47 = vld [vmem:[#allocation10 + $0x1d0] sm:$0xff] }
 0x2a9   :  { %14194 = vmatpush3.bf16.msra.mxu1 %v16929_v22  ;;  %v2531_v25 = vld [vmem:[#allocation10 + $0x1e8] sm:$0xff] }
 0x2aa   :  { %14350 = vmatpush3.bf16.msra.mxu0 %v16835_v59  ;;  %14195 = vmatprep.subr.bf16.mxu1 %v16068_v0  ;;  %v1263_v13 = vadd.f32 %v16785_v16, %v1173_v54  ;;  %v16951_v59 = vpack.c.bf16 %v2519_v57, %v2518_v42  ;;  %v2520_v16 = vld [vmem:[#allocation10 + $0x190] sm:$0xff]  ;;  %v545_v54 = vmax.f32 %v16981_v29, 0.0 }
 0x2ab   :  { %14351 = vmatprep.subr.bf16.mxu0 %v16068_v0 }
 0x2ad   :  { %14197 = vmatpush3.bf16.msra.mxu1 %v16938_v1 }
 0x2ae   :  { %14353 = vmatpush3.bf16.msra.mxu0 %v16845_v5  ;;  %14198 = vmatprep.subr.bf16.mxu1 %v16068_v0  ;;  %v16959_v5 = vpack.c.bf16 %v2521_v51, %v2520_v16  ;;  %v2533_v51 = vld [vmem:[#allocation10 + $0x1f8] sm:$0xff] }
 0x2af   :  { %14354 = vmatprep.subr.bf16.mxu0 %v16068_v0 }
 0x2b1   :  { %14200 = vmatpush3.bf16.msra.mxu1 %v16945_v4 }
 0x2b2   :  { %14356 = vmatpush3.bf16.msra.mxu0 %v16851_v41  ;;  %14225 = vmatprep.subr.bf16.mxu1 %v16068_v0  ;;  %v2522_v41 = vld [vmem:[#allocation10 + $0x1a0] sm:$0xff] }
 0x2b3   :  { %14357 = vmatprep.subr.bf16.mxu0 %v16068_v0  ;;  %v16969_v31 = vpack.c.bf16 %v2523_v62, %v2522_v41  ;;  %v2697_v62 = vld [vmem:[#allocation10 + $0x288] sm:$0xff] }
 0x2b4   :  { %11202 = vmatmul.mubr.f32.vlgmr.msra.gmra.mrb[22].mxu1 %v529_v61  ;;  %v2524_v61 = vld [vmem:[#allocation10 + $0x1b0] sm:$0xff] }
 0x2b5   :  { %14227 = vmatpush3.bf16.msra.mxu1 %v16951_v59  ;;  %11271 = vmatprep.mubr.msk.f32.mxu1 %vm16069_vm0, %v18851_v32 }
 0x2b6   :  { %14359 = vmatpush3.bf16.msra.mxu0 %v16859_v34  ;;  %14228 = vmatprep.subr.bf16.mxu1 %v16068_v0  ;;  %v16975_v34 = vpack.c.bf16 %v2525_v19, %v2524_v61  ;;  %v2701_v61 = vld [vmem:[#allocation10 + $0x2a8] sm:$0xff] }
 0x2b7   :  { %14360 = vmatprep.subr.bf16.mxu0 %v16068_v0 }
 0x2b8   :  { %v16966_v33 = vpop.f32.mrb[64].mxu0 }
 0x2b9   :  { %v10958_v28 = vpop.f32.mrb[65].mxu0  ;;  %14230 = vmatpush3.bf16.msra.mxu1 %v16959_v5 }
 0x2ba   :  { %14362 = vmatpush3.bf16.msra.mxu0 %v16865_v8  ;;  %14231 = vmatprep.subr.bf16.mxu1 %v16068_v0  ;;  %v16985_v8 = vpack.c.bf16 %v2527_v49, %v2526_v56  ;;  %v2699_v28 = vld [vmem:[#allocation10 + $0x298] sm:$0xff] }
 0x2bb   :  { %14363 = vmatprep.subr.bf16.mxu0 %v16068_v0  ;;  %v2703_v49 = vld [vmem:[#allocation10 + $0x2b8] sm:$0xff] }
 0x2bd   :  { %14233 = vmatpush3.bf16.msra.mxu1 %v16969_v31 }
 0x2be   :  { %14365 = vmatpush3.bf16.msra.mxu0 %v16874_v21  ;;  %14234 = vmatprep.subr.bf16.mxu1 %v16068_v0  ;;  %v2529_v21 = vld [vmem:[#allocation10 + $0x1d8] sm:$0xff] }
 0x2bf   :  { %14366 = vmatprep.subr.bf16.mxu0 %v16068_v0  ;;  %v16994_v17 = vpack.c.bf16 %v2529_v21, %v2528_v47  ;;  %v2704_v47 = vld [vmem:[#allocation10 + $0x2c0] sm:$0xff]  ;;  %v2705_v21 = vld [vmem:[#allocation10 + $0x2c8] sm:$0xff] }
 0x2c1   :  { %14236 = vmatpush3.bf16.msra.mxu1 %v16975_v34 }
 0x2c2   :  { %14368 = vmatpush3.bf16.msra.mxu0 %v16883_v20  ;;  %14237 = vmatprep.subr.bf16.mxu1 %v16068_v0  ;;  %v2530_v20 = vld [vmem:[#allocation10 + $0x1e0] sm:$0xff] }
 0x2c3   :  { %14393 = vmatprep.subr.bf16.mxu0 %v16068_v0  ;;  %v17002_v57 = vpack.c.bf16 %v2531_v25, %v2530_v20  ;;  %v2706_v20 = vld [vmem:[#allocation10 + $0x2d0] sm:$0xff]  ;;  %v2707_v25 = vld [vmem:[#allocation10 + $0x2d8] sm:$0xff] }
 0x2c5   :  { %14239 = vmatpush3.bf16.msra.mxu1 %v16985_v8  ;;  %11447 = vmatmul.mubr.f32.vlgmr.msra.gmra.mrb[78].mxu0 %v545_v54 }
 0x2c6   :  { %14395 = vmatpush3.bf16.msra.mxu0 %v16891_v39  ;;  %14240 = vmatprep.subr.bf16.mxu1 %v16068_v0  ;;  %v2532_v39 = vld [vmem:[#allocation10 + $0x1f0] sm:$0xff] }
 0x2c7   :  { %v1349_v45 = vpop.f32.mrb[10].mxu1  ;;  %14396 = vmatprep.subr.bf16.mxu0 %v16068_v0  ;;  %11516 = vmatprep.mubr.msk.f32.mxu0 %vm16069_vm0, %v18851_v32  ;;  %v17011_v41 = vpack.c.bf16 %v2533_v51, %v2532_v39 }
 0x2c8   :  { %v1353_v3 = vadd.f32 %v1349_v45, %v1263_v13  ;;  %v10783_v42 = vpop.f32.mrb[11].mxu1  ;;  %v2696_v13 = vld [vmem:[#allocation10 + $0x280] sm:$0xff]  ;;  %v17055_v45 = vpack.c.bf16 %v2707_v25, %v2706_v20  ;;  %v2880_v20 = vld [vmem:[#allocation10 + $0x3b8] sm:$0xff] }
 0x2c9   :  { %14242 = vmatpush3.bf16.msra.mxu1 %v16994_v17  ;;  %v2709_v42 = vld [vmem:[#allocation10 + $0x2e8] sm:$0xff]  ;;  %v2881_v25 = vld [vmem:[#allocation10 + $0x3c0] sm:$0xff] }
 0x2ca   :  { %v17005_v16 = vadd.f32 %v16842_v43, %v1353_v3  ;;  %14398 = vmatpush3.bf16.msra.mxu0 %v16900_v37  ;;  %14243 = vmatprep.subr.bf16.mxu1 %v16068_v0  ;;  %v17017_v43 = vpack.c.bf16 %v2697_v62, %v2696_v13  ;;  %v2698_v37 = vld [vmem:[#allocation10 + $0x290] sm:$0xff]  ;;  %v2708_v3 = vld [vmem:[#allocation10 + $0x2e0] sm:$0xff]  ;;  %v2711_v13 = vld [vmem:[#allocation10 + $0x2f8] sm:$0xff] }
 0x2cb   :  { %14399 = vmatprep.subr.bf16.mxu0 %v16068_v0 }
 0x2cd   :  { %14245 = vmatpush3.bf16.msra.mxu1 %v17002_v57 }
 0x2ce   :  { %14401 = vmatpush3.bf16.msra.mxu0 %v16910_v40  ;;  %14246 = vmatprep.subr.bf16.mxu1 %v16068_v0  ;;  %v17025_v40 = vpack.c.bf16 %v2699_v28, %v2698_v37  ;;  %v2873_v37 = vld [vmem:[#allocation10 + $0x380] sm:$0xff]  ;;  %v2874_v28 = vld [vmem:[#allocation10 + $0x388] sm:$0xff] }
 0x2cf   :  { %14402 = vmatprep.subr.bf16.mxu0 %v16068_v0 }
 0x2d1   :  { %14248 = vmatpush3.bf16.msra.mxu1 %v17011_v41 }
 0x2d2   :  { %14404 = vmatpush3.bf16.msra.mxu0 %v16916_v26  ;;  %14273 = vmatprep.subr.bf16.mxu1 %v16068_v0  ;;  %v2700_v26 = vld [vmem:[#allocation10 + $0x2a0] sm:$0xff] }
 0x2d3   :  { %14405 = vmatprep.subr.bf16.mxu0 %v16068_v0  ;;  %v17035_v58 = vpack.c.bf16 %v2701_v61, %v2700_v26  ;;  %v2875_v61 = vld [vmem:[#allocation10 + $0x390] sm:$0xff] }
 0x2d4   :  { %11272 = vmatmul.mubr.f32.vlgmr.msra.gmra.mrb[24].mxu1 %v536_v46  ;;  %v2702_v46 = vld [vmem:[#allocation10 + $0x2b0] sm:$0xff] }
 0x2d5   :  { %14275 = vmatpush3.bf16.msra.mxu1 %v17017_v43  ;;  %11341 = vmatprep.mubr.msk.f32.mxu1 %vm16069_vm0, %v18851_v32 }
 0x2d6   :  { %14407 = vmatpush3.bf16.msra.mxu0 %v16922_v23  ;;  %14276 = vmatprep.subr.bf16.mxu1 %v16068_v0  ;;  %v17041_v23 = vpack.c.bf16 %v2703_v49, %v2702_v46 }
 0x2d7   :  { %14408 = vmatprep.subr.bf16.mxu0 %v16068_v0 }
 0x2d8   :  { %v17032_v19 = vpop.f32.mrb[66].mxu0 }
 0x2d9   :  { %v11028_v56 = vpop.f32.mrb[67].mxu0  ;;  %14278 = vmatpush3.bf16.msra.mxu1 %v17025_v40 }
 0x2da   :  { %14410 = vmatpush3.bf16.msra.mxu0 %v16929_v22  ;;  %14279 = vmatprep.subr.bf16.mxu1 %v16068_v0  ;;  %v17047_v22 = vpack.c.bf16 %v2705_v21, %v2704_v47  ;;  %v2876_v56 = vld [vmem:[#allocation10 + $0x398] sm:$0xff]  ;;  %v2879_v21 = vld [vmem:[#allocation10 + $0x3b0] sm:$0xff] }
 0x2db   :  { %14411 = vmatprep.subr.bf16.mxu0 %v16068_v0 }
 0x2dd   :  { %14281 = vmatpush3.bf16.msra.mxu1 %v17035_v58 }
 0x2de   :  { %14413 = vmatpush3.bf16.msra.mxu0 %v16938_v1  ;;  %14282 = vmatprep.subr.bf16.mxu1 %v16068_v0  ;;  %v18861_v1 = vmax.f32 %v16328_v38, 0.0  ;;  %v17066_v38 = vpack.c.bf16 %v2709_v42, %v2708_v3  ;;  %v352_v3 = vadd.f32 %v16703_v18, %v16449_v12  ;;  %v2883_v42 = vld [vmem:[#allocation10 + $0x3d0] sm:$0xff]  ;;  %v2885_v12 = vld [vmem:[#allocation10 + $0x3e0] sm:$0xff] }
 0x2df   :  { %14414 = vmatprep.subr.bf16.mxu0 %v16068_v0 }
 0x2e1   :  { %14284 = vmatpush3.bf16.msra.mxu1 %v17041_v23 }
 0x2e2   :  { %14416 = vmatpush3.bf16.msra.mxu0 %v16945_v4  ;;  %14285 = vmatprep.subr.bf16.mxu1 %v16068_v0 }
 0x2e3   :  { %14441 = vmatprep.subr.bf16.mxu0 %v16068_v0 }
 0x2e5   :  { %14287 = vmatpush3.bf16.msra.mxu1 %v17047_v22  ;;  %11517 = vmatmul.mubr.f32.vlgmr.msra.gmra.mrb[80].mxu0 %v18861_v1  ;;  %v2882_v1 = vld [vmem:[#allocation10 + $0x3c8] sm:$0xff] }
 0x2e6   :  { %14443 = vmatpush3.bf16.msra.mxu0 %v16951_v59  ;;  %14288 = vmatprep.subr.bf16.mxu1 %v16068_v0  ;;  %v2710_v59 = vld [vmem:[#allocation10 + $0x2f0] sm:$0xff] }
 0x2e7   :  { %v1554_v4 = vpop.f32.mrb[12].mxu1  ;;  %14444 = vmatprep.subr.bf16.mxu0 %v16068_v0  ;;  %11586 = vmatprep.mubr.msk.f32.mxu0 %vm16069_vm0, %v18851_v32  ;;  %v17072_v62 = vpack.c.bf16 %v2711_v13, %v2710_v59  ;;  %v2886_v59 = vld [vmem:[#allocation10 + $0x3e8] sm:$0xff] }
 0x2e8   :  { %v17063_v39 = vadd.f32 %v16907_v53, %v1554_v4  ;;  %v10853_v51 = vpop.f32.mrb[13].mxu1  ;;  %v312_v53 = vadd.f32 %v16703_v18, %v16285_v50  ;;  %v17086_v50 = vpack.c.bf16 %v2876_v56, %v2875_v61  ;;  %v2884_v4 = vld [vmem:[#allocation10 + $0x3d8] sm:$0xff]  ;;  %v3072_v56 = vld [vmem:[#allocation10 + $0x88] sm:$0xff] }
 0x2e9   :  { %14290 = vmatpush3.bf16.msra.mxu1 %v17055_v45  ;;  %v17116_v51 = vpack.c.bf16 %v2884_v4, %v2883_v42  ;;  %v3080_v42 = vld [vmem:[#allocation10 + $0xc8] sm:$0xff] }
 0x2ea   :  { %14446 = vmatpush3.bf16.msra.mxu0 %v16959_v5  ;;  %14291 = vmatprep.subr.bf16.mxu1 %v16068_v0  ;;  %v17080_v5 = vpack.c.bf16 %v2874_v28, %v2873_v37  ;;  %v538_v26 = vmax.f32 %v312_v53, 0.0  ;;  %v17125_v37 = vpack.c.bf16 %v2886_v59, %v2885_v12  ;;  %v2888_v28 = vld [vmem:[#allocation10 + $0x3f8] sm:$0xff] }
 0x2eb   :  { %14447 = vmatprep.subr.bf16.mxu0 %v16068_v0  ;;  %v3082_v12 = vld [vmem:[#allocation10 + $0xd8] sm:$0xff] }
 0x2ed   :  { %14293 = vmatpush3.bf16.msra.mxu1 %v17066_v38 }
 0x2ee   :  { %14449 = vmatpush3.bf16.msra.mxu0 %v16969_v31  ;;  %14294 = vmatprep.subr.bf16.mxu1 %v16068_v0  ;;  %v2877_v31 = vld [vmem:[#allocation10 + $0x3a0] sm:$0xff] }
 0x2ef   :  { %14450 = vmatprep.subr.bf16.mxu0 %v16068_v0 }
 0x2f1   :  { %14296 = vmatpush3.bf16.msra.mxu1 %v17072_v62 }
 0x2f2   :  { %14452 = vmatpush3.bf16.msra.mxu0 %v16975_v34  ;;  %14321 = vmatprep.subr.bf16.mxu1 %v16068_v0  ;;  %v2878_v34 = vld [vmem:[#allocation10 + $0x3a8] sm:$0xff] }
 0x2f3   :  { %14453 = vmatprep.subr.bf16.mxu0 %v16068_v0  ;;  %v17096_v47 = vpack.c.bf16 %v2878_v34, %v2877_v31  ;;  %v3076_v34 = vld [vmem:[#allocation10 + $0xa8] sm:$0xff] }
 0x2f4   :  { %11342 = vmatmul.mubr.f32.vlgmr.msra.gmra.mrb[26].mxu1 %v538_v26 }
 0x2f5   :  { %14323 = vmatpush3.bf16.msra.mxu1 %v17080_v5  ;;  %11411 = vmatprep.mubr.msk.f32.mxu1 %vm16069_vm0, %v18851_v32 }
 0x2f6   :  { %14455 = vmatpush3.bf16.msra.mxu0 %v16985_v8  ;;  %14324 = vmatprep.subr.bf16.mxu1 %v16068_v0  ;;  %v17102_v8 = vpack.c.bf16 %v2880_v20, %v2879_v21 }
 0x2f7   :  { %14456 = vmatprep.subr.bf16.mxu0 %v16068_v0 }
 0x2f8   :  { %v17093_v46 = vpop.f32.mrb[68].mxu0 }
 0x2f9   :  { %v11098_v49 = vpop.f32.mrb[69].mxu0  ;;  %14326 = vmatpush3.bf16.msra.mxu1 %v17086_v50 }
 0x2fa   :  { %14458 = vmatpush3.bf16.msra.mxu0 %v16994_v17  ;;  %14327 = vmatprep.subr.bf16.mxu1 %v16068_v0  ;;  %v17110_v17 = vpack.c.bf16 %v2882_v1, %v2881_v25  ;;  %v3077_v25 = vld [vmem:[#allocation10 + $0xb0] sm:$0xff]  ;;  %v3078_v1 = vld [vmem:[#allocation10 + $0xb8] sm:$0xff] }
 0x2fb   :  { %14459 = vmatprep.subr.bf16.mxu0 %v16068_v0 }
 0x2fd   :  { %14329 = vmatpush3.bf16.msra.mxu1 %v17096_v47 }
 0x2fe   :  { %14461 = vmatpush3.bf16.msra.mxu0 %v17002_v57  ;;  %14330 = vmatprep.subr.bf16.mxu1 %v16068_v0  ;;  %v546_v57 = vmax.f32 %v352_v3, 0.0  ;;  %v3079_v3 = vld [vmem:[#allocation10 + $0xc0] sm:$0xff] }
 0x2ff   :  { %14462 = vmatprep.subr.bf16.mxu0 %v16068_v0 }
 0x301   :  { %14332 = vmatpush3.bf16.msra.mxu1 %v17102_v8 }
 0x302   :  { %14464 = vmatpush3.bf16.msra.mxu0 %v17011_v41  ;;  %14333 = vmatprep.subr.bf16.mxu1 %v16068_v0 }
 0x303   :  { %14489 = vmatprep.subr.bf16.mxu0 %v16068_v0 }
 0x305   :  { %14335 = vmatpush3.bf16.msra.mxu1 %v17110_v17  ;;  %11587 = vmatmul.mubr.f32.vlgmr.msra.gmra.mrb[82].mxu0 %v546_v57  ;;  %v17184_v57 = vpack.c.bf16 %v3080_v42, %v3079_v3  ;;  %v3234_v3 = vld [vmem:[#allocation10 + $0x130] sm:$0xff]  ;;  %v3235_v42 = vld [vmem:[#allocation10 + $0x138] sm:$0xff] }
 0x306   :  { %14491 = vmatpush3.bf16.msra.mxu0 %v17017_v43  ;;  %14336 = vmatprep.subr.bf16.mxu1 %v16068_v0  ;;  %v2887_v43 = vld [vmem:[#allocation10 + $0x3f0] sm:$0xff] }
 0x307   :  { %v1712_v13 = vpop.f32.mrb[14].mxu1  ;;  %14492 = vmatprep.subr.bf16.mxu0 %v16068_v0  ;;  %11656 = vmatprep.mubr.msk.f32.mxu0 %vm16069_vm0, %v18851_v32  ;;  %v17134_v61 = vpack.c.bf16 %v2888_v28, %v2887_v43 }
 0x308   :  { %v1716_v41 = vadd.f32 %v1712_v13, %v17063_v39  ;;  %v10923_v53 = vpop.f32.mrb[15].mxu1  ;;  %v17138_v39 = vadd.f32 %v16703_v18, %v16439_v2  ;;  %v3073_v2 = vld [vmem:[#allocation10 + $0x90] sm:$0xff]  ;;  %v3074_v18 = vld [vmem:[#allocation10 + $0x98] sm:$0xff]  ;;  %v3084_v13 = vld [vmem:[#allocation10 + $0xe8] sm:$0xff] }
 0x309   :  { %14338 = vmatpush3.bf16.msra.mxu1 %v17116_v51 }
 0x30a   :  { %14494 = vmatpush3.bf16.msra.mxu0 %v17025_v40  ;;  %14339 = vmatprep.subr.bf16.mxu1 %v16068_v0  ;;  %v17130_v26 = vadd.f32 %v16966_v33, %v1716_v41  ;;  %v3071_v40 = vld [vmem:[#allocation10 + $0x80] sm:$0xff]  ;;  %v544_v31 = vmax.f32 %v17138_v39, 0.0 }
 0x30b   :  { %14495 = vmatprep.subr.bf16.mxu0 %v16068_v0  ;;  %v17144_v33 = vpack.c.bf16 %v3072_v56, %v3071_v40  ;;  %v3086_v40 = vld [vmem:[#allocation10 + $0xf8] sm:$0xff] }
 0x30d   :  { %14341 = vmatpush3.bf16.msra.mxu1 %v17125_v37 }
 0x30e   :  { %14497 = vmatpush3.bf16.msra.mxu0 %v17035_v58  ;;  %14342 = vmatprep.subr.bf16.mxu1 %v16068_v0  ;;  %v17153_v58 = vpack.c.bf16 %v3074_v18, %v3073_v2  ;;  %v3229_v18 = vld [vmem:[#allocation10 + $0x108] sm:$0xff] }
 0x30f   :  { %14498 = vmatprep.subr.bf16.mxu0 %v16068_v0 }
 0x311   :  { %14344 = vmatpush3.bf16.msra.mxu1 %v17134_v61 }
 0x312   :  { %14500 = vmatpush3.bf16.msra.mxu0 %v17041_v23  ;;  %14369 = vmatprep.subr.bf16.mxu1 %v16068_v0  ;;  %v3075_v23 = vld [vmem:[#allocation10 + $0xa0] sm:$0xff] }
 0x313   :  { %14501 = vmatprep.subr.bf16.mxu0 %v16068_v0  ;;  %v17163_v20 = vpack.c.bf16 %v3076_v34, %v3075_v23  ;;  %v3231_v23 = vld [vmem:[#allocation10 + $0x118] sm:$0xff] }
 0x314   :  { %11412 = vmatmul.mubr.f32.vlgmr.msra.gmra.mrb[28].mxu1 %v544_v31 }
 0x315   :  { %14371 = vmatpush3.bf16.msra.mxu1 %v17144_v33  ;;  %11481 = vmatprep.mubr.msk.f32.mxu1 %vm16069_vm0, %v18851_v32 }
 0x316   :  { %14503 = vmatpush3.bf16.msra.mxu0 %v17047_v22  ;;  %14372 = vmatprep.subr.bf16.mxu1 %v16068_v0  ;;  %v17169_v22 = vpack.c.bf16 %v3078_v1, %v3077_v25 }
 0x317   :  { %14504 = vmatprep.subr.bf16.mxu0 %v16068_v0 }
 0x318   :  { %v17160_v49 = vpop.f32.mrb[70].mxu0 }
 0x319   :  { %v11168_v21 = vpop.f32.mrb[71].mxu0  ;;  %14374 = vmatpush3.bf16.msra.mxu1 %v17153_v58 }
 0x31a   :  { %14506 = vmatpush3.bf16.msra.mxu0 %v17055_v45  ;;  %14375 = vmatprep.subr.bf16.mxu1 %v16068_v0  ;;  %v17176_v45 = vld [vmem:[%s18834_s2] ss:$0 sm:$0xff]  ;;  %v3233_v21 = vld [vmem:[#allocation10 + $0x128] sm:$0xff] }
 0x31b   :  { %14507 = vmatprep.subr.bf16.mxu0 %v16068_v0  ;;  %v17180_v4 = vadd.f32 %v17176_v45, %v16459_v30 }
 0x31d   :  { %14377 = vmatpush3.bf16.msra.mxu1 %v17163_v20  ;;  %v548_v59 = vmax.f32 %v17180_v4, 0.0 }
 0x31e   :  { %14509 = vmatpush3.bf16.msra.mxu0 %v17066_v38  ;;  %14378 = vmatprep.subr.bf16.mxu1 %v16068_v0  ;;  %v3081_v38 = vld [vmem:[#allocation10 + $0xd0] sm:$0xff] }
 0x31f   :  { %14510 = vmatprep.subr.bf16.mxu0 %v16068_v0  ;;  %v17193_v30 = vpack.c.bf16 %v3082_v12, %v3081_v38  ;;  %v3236_v38 = vld [vmem:[#allocation10 + $0x140] sm:$0xff]  ;;  %v3237_v12 = vld [vmem:[#allocation10 + $0x148] sm:$0xff] }
 0x321   :  { %14380 = vmatpush3.bf16.msra.mxu1 %v17169_v22 }
 0x322   :  { %14512 = vmatpush3.bf16.msra.mxu0 %v17072_v62  ;;  %14381 = vmatprep.subr.bf16.mxu1 %v16068_v0  ;;  %v3083_v62 = vld [vmem:[#allocation10 + $0xe0] sm:$0xff] }
 0x323   :  { %14537 = vmatprep.subr.bf16.mxu0 %v16068_v0  ;;  %v17202_v28 = vpack.c.bf16 %v3084_v13, %v3083_v62  ;;  %v17245_v62 = vadd.f32 %v17176_v45, %v16495_v24  ;;  %v3238_v13 = vld [vmem:[#allocation10 + $0x150] sm:$0xff] }
 0x325   :  { %14383 = vmatpush3.bf16.msra.mxu1 %v17184_v57  ;;  %11657 = vmatmul.mubr.f32.vlgmr.msra.gmra.mrb[84].mxu0 %v548_v59 }
 0x326   :  { %14539 = vmatpush3.bf16.msra.mxu0 %v17080_v5  ;;  %14384 = vmatprep.subr.bf16.mxu1 %v16068_v0  ;;  %v3085_v5 = vld [vmem:[#allocation10 + $0xf0] sm:$0xff] }
 0x327   :  { %v1889_v41 = vpop.f32.mrb[16].mxu1  ;;  %14540 = vmatprep.subr.bf16.mxu0 %v16068_v0  ;;  %11726 = vmatprep.mubr.msk.f32.mxu0 %vm16069_vm0, %v18851_v32  ;;  %v17209_v2 = vpack.c.bf16 %v3086_v40, %v3085_v5 }
 0x328   :  { %v1893_v53 = vadd.f32 %v1889_v41, %v17130_v26  ;;  %v10993_v43 = vpop.f32.mrb[17].mxu1  ;;  %v3228_v26 = vld [vmem:[#allocation10 + $0x100] sm:$0xff]  ;;  %v554_v41 = vmax.f32 %v17245_v62, 0.0 }
 0x329   :  { %14386 = vmatpush3.bf16.msra.mxu1 %v17193_v30 }
 0x32a   :  { %14542 = vmatpush3.bf16.msra.mxu0 %v17086_v50  ;;  %14387 = vmatprep.subr.bf16.mxu1 %v16068_v0  ;;  %v1982_v56 = vadd.f32 %v17032_v19, %v1893_v53  ;;  %v17215_v50 = vpack.c.bf16 %v3229_v18, %v3228_v26  ;;  %v3230_v19 = vld [vmem:[#allocation10 + $0x110] sm:$0xff]  ;;  %v3241_v53 = vld [vmem:[#allocation10 + $0x168] sm:$0xff]  ;;  %v3243_v18 = vld [vmem:[#allocation10 + $0x178] sm:$0xff] }
 0x32b   :  { %14543 = vmatprep.subr.bf16.mxu0 %v16068_v0  ;;  %v17223_v34 = vpack.c.bf16 %v3231_v23, %v3230_v19 }
 0x32d   :  { %14389 = vmatpush3.bf16.msra.mxu1 %v17202_v28 }
 0x32e   :  { %14545 = vmatpush3.bf16.msra.mxu0 %v17096_v47  ;;  %14390 = vmatprep.subr.bf16.mxu1 %v16068_v0  ;;  %v18862_v47 = vmax.f32 %v16579_v10, 0.0 }
 0x32f   :  { %14546 = vmatprep.subr.bf16.mxu0 %v16068_v0 }
 0x331   :  { %14392 = vmatpush3.bf16.msra.mxu1 %v17209_v2 }
 0x332   :  { %14548 = vmatpush3.bf16.msra.mxu0 %v17102_v8  ;;  %14417 = vmatprep.subr.bf16.mxu1 %v16068_v0  ;;  %v3232_v8 = vld [vmem:[#allocation10 + $0x120] sm:$0xff] }
 0x333   :  { %14549 = vmatprep.subr.bf16.mxu0 %v16068_v0  ;;  %v17233_v10 = vpack.c.bf16 %v3233_v21, %v3232_v8  ;;  %v3409_v8 = vld [vmem:[#allocation10 + $0x218] sm:$0xff]  ;;  %v3411_v21 = vld [vmem:[#allocation10 + $0x228] sm:$0xff] }
 0x334   :  { %11482 = vmatmul.mubr.f32.vlgmr.msra.gmra.mrb[30].mxu1 %v18862_v47  ;;  %v3407_v47 = vld [vmem:[#allocation10 + $0x208] sm:$0xff] }
 0x335   :  { %14419 = vmatpush3.bf16.msra.mxu1 %v17215_v50  ;;  %11551 = vmatprep.mubr.msk.f32.mxu1 %vm16069_vm0, %v18851_v32 }
 0x336   :  { %14551 = vmatpush3.bf16.msra.mxu0 %v17110_v17  ;;  %14420 = vmatprep.subr.bf16.mxu1 %v16068_v0  ;;  %v17239_v17 = vpack.c.bf16 %v3235_v42, %v3234_v3 }
 0x337   :  { %14552 = vmatprep.subr.bf16.mxu0 %v16068_v0 }
 0x338   :  { %v17230_v25 = vpop.f32.mrb[72].mxu0 }
 0x339   :  { %v11238_v1 = vpop.f32.mrb[73].mxu0  ;;  %14422 = vmatpush3.bf16.msra.mxu1 %v17223_v34 }
 0x33a   :  { %14554 = vmatpush3.bf16.msra.mxu0 %v17116_v51  ;;  %14423 = vmatprep.subr.bf16.mxu1 %v16068_v0  ;;  %v17249_v51 = vpack.c.bf16 %v3237_v12, %v3236_v38  ;;  %v3412_v38 = vld [vmem:[#allocation10 + $0x230] sm:$0xff]  ;;  %v3413_v12 = vld [vmem:[#allocation10 + $0x238] sm:$0xff] }
 0x33b   :  { %14555 = vmatprep.subr.bf16.mxu0 %v16068_v0 }
 0x33d   :  { %14425 = vmatpush3.bf16.msra.mxu1 %v17233_v10 }
 0x33e   :  { %14557 = vmatpush3.bf16.msra.mxu0 %v17125_v37  ;;  %14426 = vmatprep.subr.bf16.mxu1 %v16068_v0  ;;  %v3239_v37 = vld [vmem:[#allocation10 + $0x158] sm:$0xff] }
 0x33f   :  { %14558 = vmatprep.subr.bf16.mxu0 %v16068_v0  ;;  %v17258_v24 = vpack.c.bf16 %v3239_v37, %v3238_v13  ;;  %v3414_v13 = vld [vmem:[#allocation10 + $0x240] sm:$0xff]  ;;  %v3415_v37 = vld [vmem:[#allocation10 + $0x248] sm:$0xff] }
 0x341   :  { %14428 = vmatpush3.bf16.msra.mxu1 %v17239_v17 }
 0x342   :  { %14560 = vmatpush3.bf16.msra.mxu0 %v17134_v61  ;;  %14429 = vmatprep.subr.bf16.mxu1 %v16068_v0  ;;  %v3240_v61 = vld [vmem:[#allocation10 + $0x160] sm:$0xff] }
 0x343   :  { %14585 = vmatprep.subr.bf16.mxu0 %v16068_v0  ;;  %v17266_v26 = vpack.c.bf16 %v3241_v53, %v3240_v61  ;;  %v3416_v61 = vld [vmem:[#allocation10 + $0x250] sm:$0xff]  ;;  %v3417_v53 = vld [vmem:[#allocation10 + $0x258] sm:$0xff] }
 0x345   :  { %14431 = vmatpush3.bf16.msra.mxu1 %v17249_v51  ;;  %11727 = vmatmul.mubr.f32.vlgmr.msra.gmra.mrb[86].mxu0 %v554_v41 }
 0x346   :  { %14587 = vmatpush3.bf16.msra.mxu0 %v17144_v33  ;;  %14432 = vmatprep.subr.bf16.mxu1 %v16068_v0  ;;  %v3242_v33 = vld [vmem:[#allocation10 + $0x170] sm:$0xff] }
 0x347   :  { %v2066_v43 = vpop.f32.mrb[18].mxu1  ;;  %14588 = vmatprep.subr.bf16.mxu0 %v16068_v0  ;;  %11796 = vmatprep.mubr.msk.f32.mxu0 %vm16069_vm0, %v18851_v32  ;;  %v17273_v23 = vpack.c.bf16 %v3243_v18, %v3242_v33 }
 0x348   :  { %v2070_v5 = vadd.f32 %v2066_v43, %v1982_v56  ;;  %v11063_v40 = vpop.f32.mrb[19].mxu1  ;;  %v3406_v56 = vld [vmem:[#allocation10 + $0x200] sm:$0xff] }
 0x349   :  { %14434 = vmatpush3.bf16.msra.mxu1 %v17258_v24  ;;  %v3418_v43 = vld [vmem:[#allocation10 + $0x260] sm:$0xff] }
 0x34a   :  { %14590 = vmatpush3.bf16.msra.mxu0 %v17153_v58  ;;  %14435 = vmatprep.subr.bf16.mxu1 %v16068_v0  ;;  %v2159_v19 = vadd.f32 %v17093_v46, %v2070_v5  ;;  %v17279_v58 = vpack.c.bf16 %v3407_v47, %v3406_v56  ;;  %v3408_v46 = vld [vmem:[#allocation10 + $0x210] sm:$0xff]  ;;  %v3419_v5 = vld [vmem:[#allocation10 + $0x268] sm:$0xff]  ;;  %v3584_v56 = vld [vmem:[#allocation10 + $0x300] sm:$0xff] }
 0x34b   :  { %14591 = vmatprep.subr.bf16.mxu0 %v16068_v0  ;;  %v17326_v14 = vpack.c.bf16 %v3419_v5, %v3418_v43  ;;  %v3585_v47 = vld [vmem:[#allocation10 + $0x308] sm:$0xff]  ;;  %v3595_v43 = vld [vmem:[#allocation10 + $0x358] sm:$0xff]  ;;  %v3596_v5 = vld [vmem:[#allocation10 + $0x360] sm:$0xff] }
 0x34d   :  { %14437 = vmatpush3.bf16.msra.mxu1 %v17266_v26 }
 0x34e   :  { %14593 = vmatpush3.bf16.msra.mxu0 %v17163_v20  ;;  %14438 = vmatprep.subr.bf16.mxu1 %v16068_v0  ;;  %v17286_v20 = vpack.c.bf16 %v3409_v8, %v3408_v46  ;;  %v3586_v8 = vld [vmem:[#allocation10 + $0x310] sm:$0xff] }
 0x34f   :  { %14594 = vmatprep.subr.bf16.mxu0 %v16068_v0 }
 0x351   :  { %14440 = vmatpush3.bf16.msra.mxu1 %v17273_v23 }
 0x352   :  { %14596 = vmatpush3.bf16.msra.mxu0 %v17169_v22  ;;  %14465 = vmatprep.subr.bf16.mxu1 %v16068_v0  ;;  %v3410_v22 = vld [vmem:[#allocation10 + $0x220] sm:$0xff] }
 0x353   :  { %14597 = vmatprep.subr.bf16.mxu0 %v16068_v0  ;;  %v17296_v42 = vpack.c.bf16 %v3411_v21, %v3410_v22  ;;  %v3587_v22 = vld [vmem:[#allocation10 + $0x318] sm:$0xff] }
 0x354   :  { %11552 = vmatmul.mubr.f32.vlgmr.msra.gmra.mrb[32].mxu1 %v16390_v27 }
 0x355   :  { %14467 = vmatpush3.bf16.msra.mxu1 %v17279_v58  ;;  %11621 = vmatprep.mubr.msk.f32.mxu1 %vm16069_vm0, %v18851_v32 }
 0x356   :  { %14599 = vmatpush3.bf16.msra.mxu0 %v17184_v57  ;;  %14468 = vmatprep.subr.bf16.mxu1 %v16068_v0  ;;  %v17302_v57 = vpack.c.bf16 %v3413_v12, %v3412_v38  ;;  %v3590_v12 = vld [vmem:[#allocation10 + $0x330] sm:$0xff] }
 0x357   :  { %14600 = vmatprep.subr.bf16.mxu0 %v16068_v0 }
 0x358   :  { %v17293_v1 = vpop.f32.mrb[74].mxu0 }
 0x359   :  { %v11308_v3 = vpop.f32.mrb[75].mxu0  ;;  %14470 = vmatpush3.bf16.msra.mxu1 %v17286_v20 }
 0x35a   :  { %14602 = vmatpush3.bf16.msra.mxu0 %v17193_v30  ;;  %14471 = vmatprep.subr.bf16.mxu1 %v16068_v0  ;;  %v17308_v30 = vpack.c.bf16 %v3415_v37, %v3414_v13  ;;  %v3591_v13 = vld [vmem:[#allocation10 + $0x338] sm:$0xff]  ;;  %v3592_v37 = vld [vmem:[#allocation10 + $0x340] sm:$0xff] }
 0x35b   :  { %14603 = vmatprep.subr.bf16.mxu0 %v16068_v0 }
 0x35d   :  { %14473 = vmatpush3.bf16.msra.mxu1 %v17296_v42 }
 0x35e   :  { %14605 = vmatpush3.bf16.msra.mxu0 %v17202_v28  ;;  %14474 = vmatprep.subr.bf16.mxu1 %v16068_v0  ;;  %v17316_v28 = vpack.c.bf16 %v3417_v53, %v3416_v61  ;;  %v3593_v61 = vld [vmem:[#allocation10 + $0x348] sm:$0xff]  ;;  %v3594_v53 = vld [vmem:[#allocation10 + $0x350] sm:$0xff] }
 0x35f   :  { %14606 = vmatprep.subr.bf16.mxu0 %v16068_v0 }
 0x361   :  { %14476 = vmatpush3.bf16.msra.mxu1 %v17302_v57 }
 0x362   :  { %14608 = vmatpush3.bf16.msra.mxu0 %v17209_v2  ;;  %14477 = vmatprep.subr.bf16.mxu1 %v16068_v0 }
 0x363   :  { %14633 = vmatprep.subr.bf16.mxu0 %v16068_v0 }
 0x365   :  { %14479 = vmatpush3.bf16.msra.mxu1 %v17308_v30  ;;  %11797 = vmatmul.mubr.f32.vlgmr.msra.gmra.mrb[88].mxu0 %v542_v7  ;;  %v3420_v7 = vld [vmem:[#allocation10 + $0x270] sm:$0xff] }
 0x366   :  { %14635 = vmatpush3.bf16.msra.mxu0 %v17215_v50  ;;  %14480 = vmatprep.subr.bf16.mxu1 %v16068_v0  ;;  %v3421_v50 = vld [vmem:[#allocation10 + $0x278] sm:$0xff] }
 0x367   :  { %v2244_v2 = vpop.f32.mrb[20].mxu1  ;;  %14636 = vmatprep.subr.bf16.mxu0 %v16068_v0  ;;  %11866 = vmatprep.mubr.msk.f32.mxu0 %vm16069_vm0, %v18851_v32  ;;  %v17332_v18 = vpack.c.bf16 %v3421_v50, %v3420_v7 }
 0x368   :  { %v17323_v40 = vadd.f32 %v2244_v2, %v2159_v19  ;;  %v11133_v33 = vpop.f32.mrb[21].mxu1  ;;  %v357_v19 = vadd.f32 %v17176_v45, %v16467_v36  ;;  %v17346_v36 = vpack.c.bf16 %v3587_v22, %v3586_v8  ;;  %v3597_v2 = vld [vmem:[#allocation10 + $0x368] sm:$0xff]  ;;  %v3765_v22 = vld [vmem:[#allocation10 + $0x418] sm:$0xff] }
 0x369   :  { %14482 = vmatpush3.bf16.msra.mxu1 %v17316_v28  ;;  %v17384_v50 = vpack.c.bf16 %v3597_v2, %v3596_v5  ;;  %v3772_v5 = vld [vmem:[#allocation10 + $0x450] sm:$0xff]  ;;  %v3773_v2 = vld [vmem:[#allocation10 + $0x458] sm:$0xff] }
 0x36a   :  { %14638 = vmatpush3.bf16.msra.mxu0 %v17223_v34  ;;  %14483 = vmatprep.subr.bf16.mxu1 %v16068_v0  ;;  %v17340_v34 = vpack.c.bf16 %v3585_v47, %v3584_v56  ;;  %v547_v46 = vmax.f32 %v357_v19, 0.0  ;;  %v3599_v19 = vld [vmem:[#allocation10 + $0x378] sm:$0xff] }
 0x36b   :  { %14639 = vmatprep.subr.bf16.mxu0 %v16068_v0 }
 0x36d   :  { %14485 = vmatpush3.bf16.msra.mxu1 %v17326_v14 }
 0x36e   :  { %14641 = vmatpush3.bf16.msra.mxu0 %v17233_v10  ;;  %14486 = vmatprep.subr.bf16.mxu1 %v16068_v0  ;;  %v3588_v10 = vld [vmem:[#allocation10 + $0x320] sm:$0xff] }
 0x36f   :  { %14642 = vmatprep.subr.bf16.mxu0 %v16068_v0 }
 0x371   :  { %14488 = vmatpush3.bf16.msra.mxu1 %v17332_v18 }
 0x372   :  { %14644 = vmatpush3.bf16.msra.mxu0 %v17239_v17  ;;  %14513 = vmatprep.subr.bf16.mxu1 %v16068_v0  ;;  %v3589_v17 = vld [vmem:[#allocation10 + $0x328] sm:$0xff] }
 0x373   :  { %14645 = vmatprep.subr.bf16.mxu0 %v16068_v0  ;;  %v17356_v38 = vpack.c.bf16 %v3589_v17, %v3588_v10  ;;  %v3767_v10 = vld [vmem:[#allocation10 + $0x428] sm:$0xff] }
 0x374   :  { %11622 = vmatmul.mubr.f32.vlgmr.msra.gmra.mrb[34].mxu1 %v547_v46  ;;  %v3763_v46 = vld [vmem:[#allocation10 + $0x408] sm:$0xff] }
 0x375   :  { %14515 = vmatpush3.bf16.msra.mxu1 %v17340_v34  ;;  %11691 = vmatprep.mubr.msk.f32.mxu1 %vm16069_vm0, %v18851_v32 }
 0x376   :  { %14647 = vmatpush3.bf16.msra.mxu0 %v17249_v51  ;;  %14516 = vmatprep.subr.bf16.mxu1 %v16068_v0  ;;  %v17362_v51 = vpack.c.bf16 %v3591_v13, %v3590_v12  ;;  %v3768_v13 = vld [vmem:[#allocation10 + $0x430] sm:$0xff] }
 0x377   :  { %14648 = vmatprep.subr.bf16.mxu0 %v16068_v0 }
 0x378   :  { %v17353_v21 = vpop.f32.mrb[76].mxu0 }
 0x379   :  { %v11378_v3 = vpop.f32.mrb[77].mxu0  ;;  %14518 = vmatpush3.bf16.msra.mxu1 %v17346_v36 }
 0x37a   :  { %14650 = vmatpush3.bf16.msra.mxu0 %v17258_v24  ;;  %14519 = vmatprep.subr.bf16.mxu1 %v16068_v0  ;;  %v17368_v24 = vpack.c.bf16 %v3593_v61, %v3592_v37  ;;  %v3769_v37 = vld [vmem:[#allocation10 + $0x438] sm:$0xff]  ;;  %v3770_v61 = vld [vmem:[#allocation10 + $0x440] sm:$0xff] }
 0x37b   :  { %14651 = vmatprep.subr.bf16.mxu0 %v16068_v0 }
 0x37d   :  { %14521 = vmatpush3.bf16.msra.mxu1 %v17356_v38 }
 0x37e   :  { %14653 = vmatpush3.bf16.msra.mxu0 %v17266_v26  ;;  %14522 = vmatprep.subr.bf16.mxu1 %v16068_v0  ;;  %v17375_v26 = vpack.c.bf16 %v3595_v43, %v3594_v53  ;;  %v3771_v53 = vld [vmem:[#allocation10 + $0x448] sm:$0xff]  ;;  %v367_v43 = vadd.f32 %v17176_v45, %v16479_v35  ;;  %v3774_v35 = vld [vmem:[#allocation10 + $0x460] sm:$0xff] }
 0x37f   :  { %14654 = vmatprep.subr.bf16.mxu0 %v16068_v0 }
 0x381   :  { %14524 = vmatpush3.bf16.msra.mxu1 %v17362_v51 }
 0x382   :  { %14656 = vmatpush3.bf16.msra.mxu0 %v17273_v23  ;;  %14525 = vmatprep.subr.bf16.mxu1 %v16068_v0 }
 0x383   :  { %14681 = vmatprep.subr.bf16.mxu0 %v16068_v0 }
 0x385   :  { %14527 = vmatpush3.bf16.msra.mxu1 %v17368_v24  ;;  %11867 = vmatmul.mubr.f32.vlgmr.msra.gmra.mrb[90].mxu0 %v16893_v11 }
 0x386   :  { %14683 = vmatpush3.bf16.msra.mxu0 %v17279_v58  ;;  %14528 = vmatprep.subr.bf16.mxu1 %v16068_v0  ;;  %v3598_v58 = vld [vmem:[#allocation10 + $0x370] sm:$0xff] }
 0x387   :  { %v2424_v33 = vpop.f32.mrb[22].mxu1  ;;  %14684 = vmatprep.subr.bf16.mxu0 %v16068_v0  ;;  %11936 = vmatprep.mubr.msk.f32.mxu0 %vm16069_vm0, %v18851_v32  ;;  %v17391_v47 = vpack.c.bf16 %v3599_v19, %v3598_v58 }
 0x388   :  { %v2425_v23 = vadd.f32 %v2424_v33, %v17160_v49  ;;  %v11203_v7 = vpop.f32.mrb[23].mxu1  ;;  %v17395_v49 = vadd.f32 %v17176_v45, %v16501_v63  ;;  %v3764_v63 = vld [vmem:[#allocation10 + $0x410] sm:$0xff]  ;;  %v17440_v33 = vpack.c.bf16 %v3773_v2, %v3772_v5  ;;  %v3862_v5 = vld [vmem:[#allocation10 + $0x40] sm:$0xff]  ;;  %v3863_v2 = vld [vmem:[#allocation10 + $0x48] sm:$0xff] }
 0x389   :  { %14530 = vmatpush3.bf16.msra.mxu1 %v17375_v26 }
 0x38a   :  { %14686 = vmatpush3.bf16.msra.mxu0 %v17286_v20  ;;  %14531 = vmatprep.subr.bf16.mxu1 %v16068_v0  ;;  %v2516_v56 = vadd.f32 %v17230_v25, %v2425_v23  ;;  %v3762_v20 = vld [vmem:[#allocation10 + $0x400] sm:$0xff]  ;;  %v553_v8 = vmax.f32 %v17395_v49, 0.0  ;;  %v3775_v23 = vld [vmem:[#allocation10 + $0x468] sm:$0xff] }
 0x38b   :  { %14687 = vmatprep.subr.bf16.mxu0 %v16068_v0  ;;  %v17401_v25 = vpack.c.bf16 %v3763_v46, %v3762_v20  ;;  %v17448_v19 = vpack.c.bf16 %v3775_v23, %v3774_v35  ;;  %v3777_v20 = vld [vmem:[#allocation10 + $0x478] sm:$0xff]  ;;  %v3866_v23 = vld [vmem:[#allocation10 + $0x60] sm:$0xff] }
 0x38c   :  { %v3865_v35 = vld [vmem:[#allocation10 + $0x58] sm:$0xff] }
 0x38d   :  { %14533 = vmatpush3.bf16.msra.mxu1 %v17384_v50 }
 0x38e   :  { %14689 = vmatpush3.bf16.msra.mxu0 %v17296_v42  ;;  %14534 = vmatprep.subr.bf16.mxu1 %v16068_v0  ;;  %v17410_v42 = vpack.c.bf16 %v3765_v22, %v3764_v63  ;;  %v3855_v22 = vld [vmem:[#allocation10 + $0x8] sm:$0xff] }
 0x38f   :  { %14690 = vmatprep.subr.bf16.mxu0 %v16068_v0 }
 0x391   :  { %14536 = vmatpush3.bf16.msra.mxu1 %v17391_v47 }
 0x392   :  { %14692 = vmatpush3.bf16.msra.mxu0 %v17302_v57  ;;  %14561 = vmatprep.subr.bf16.mxu1 %v16068_v0  ;;  %v3766_v57 = vld [vmem:[#allocation10 + $0x420] sm:$0xff] }
 0x393   :  { %14693 = vmatprep.subr.bf16.mxu0 %v16068_v0  ;;  %v17420_v12 = vpack.c.bf16 %v3767_v10, %v3766_v57  ;;  %v3856_v10 = vld [vmem:[#allocation10 + $0x10] sm:$0xff] }
 0x394   :  { %11692 = vmatmul.mubr.f32.vlgmr.msra.gmra.mrb[36].mxu1 %v553_v8 }
 0x395   :  { %14563 = vmatpush3.bf16.msra.mxu1 %v17401_v25  ;;  %11761 = vmatprep.mubr.msk.f32.mxu1 %vm16069_vm0, %v18851_v32 }
 0x396   :  { %14695 = vmatpush3.bf16.msra.mxu0 %v17308_v30  ;;  %14564 = vmatprep.subr.bf16.mxu1 %v16068_v0  ;;  %v17426_v30 = vpack.c.bf16 %v3769_v37, %v3768_v13 }
 0x397   :  { %14696 = vmatprep.subr.bf16.mxu0 %v16068_v0 }
 0x398   :  { %v17417_v17 = vpop.f32.mrb[78].mxu0 }
 0x399   :  { %v11448_v3 = vpop.f32.mrb[79].mxu0  ;;  %14566 = vmatpush3.bf16.msra.mxu1 %v17410_v42 }
 0x39a   :  { %14698 = vmatpush3.bf16.msra.mxu0 %v17316_v28  ;;  %14567 = vmatprep.subr.bf16.mxu1 %v16068_v0  ;;  %v17434_v28 = vpack.c.bf16 %v3771_v53, %v3770_v61  ;;  %v3859_v3 = vld [vmem:[#allocation10 + $0x28] sm:$0xff]  ;;  %v3860_v53 = vld [vmem:[#allocation10 + $0x30] sm:$0xff] }
 0x39b   :  { %14699 = vmatprep.subr.bf16.mxu0 %v16068_v0 }
 0x39d   :  { %14569 = vmatpush3.bf16.msra.mxu1 %v17420_v12 }
 0x39e   :  { %14701 = vmatpush3.bf16.msra.mxu0 %v17326_v14  ;;  %14570 = vmatprep.subr.bf16.mxu1 %v16068_v0  ;;  %v549_v14 = vmax.f32 %v367_v43, 0.0  ;;  %v3861_v43 = vld [vmem:[#allocation10 + $0x38] sm:$0xff] }
 0x39f   :  { %14702 = vmatprep.subr.bf16.mxu0 %v16068_v0 }
 0x3a1   :  { %14572 = vmatpush3.bf16.msra.mxu1 %v17426_v30 }
 0x3a2   :  { %14704 = vmatpush3.bf16.msra.mxu0 %v17332_v18  ;;  %14573 = vmatprep.subr.bf16.mxu1 %v16068_v0 }
 0x3a3   :  { %14729 = vmatprep.subr.bf16.mxu0 %v16068_v0 }
 0x3a5   :  { %14575 = vmatpush3.bf16.msra.mxu1 %v17434_v28  ;;  %11937 = vmatmul.mubr.f32.vlgmr.msra.gmra.mrb[92].mxu0 %v549_v14  ;;  %v3864_v14 = vld [vmem:[#allocation10 + $0x50] sm:$0xff] }
 0x3a6   :  { %14731 = vmatpush3.bf16.msra.mxu0 %v17340_v34  ;;  %14576 = vmatprep.subr.bf16.mxu1 %v16068_v0  ;;  %v3776_v34 = vld [vmem:[#allocation10 + $0x470] sm:$0xff] }
 0x3a7   :  { %v2600_v7 = vpop.f32.mrb[24].mxu1  ;;  %14732 = vmatprep.subr.bf16.mxu0 %v16068_v0  ;;  %12006 = vmatprep.mubr.msk.f32.mxu0 %vm16069_vm0, %v18851_v32  ;;  %v17455_v63 = vpack.c.bf16 %v3777_v20, %v3776_v34  ;;  %v3869_v20 = vld [vmem:[#allocation10 + $0x78] sm:$0xff] }
 0x3a8   :  { %v2604_v18 = vadd.f32 %v2600_v7, %v2516_v56  ;;  %v11273_v58 = vpop.f32.mrb[25].mxu1  ;;  %v397_v56 = vadd.f32 %v17176_v45, %v16513_v6  ;;  %v3857_v6 = vld [vmem:[#allocation10 + $0x18] sm:$0xff]  ;;  %v3867_v7 = vld [vmem:[#allocation10 + $0x68] sm:$0xff] }
 0x3a9   :  { %14578 = vmatpush3.bf16.msra.mxu1 %v17440_v33  ;;  %v17509_v34 = vpack.c.bf16 %v3867_v7, %v3866_v23  ;;  %v4128_v23 = vld [vmem:[#allocation10 + $0x1e0] sm:$0xff] }
 0x3aa   :  { %14734 = vmatpush3.bf16.msra.mxu0 %v17346_v36  ;;  %14579 = vmatprep.subr.bf16.mxu1 %v16068_v0  ;;  %v2693_v46 = vadd.f32 %v17293_v1, %v2604_v18  ;;  %v3854_v36 = vld [vmem:[#allocation10] sm:$0xff]  ;;  %v17465_v57 = vmax.f32 %v397_v56, 0.0 }
 0x3ab   :  { %14735 = vmatprep.subr.bf16.mxu0 %v16068_v0  ;;  %v17463_v1 = vpack.c.bf16 %v3855_v22, %v3854_v36  ;;  %v4117_v22 = vld [vmem:[#allocation10 + $0x188] sm:$0xff] }
 0x3ad   :  { %14581 = vmatpush3.bf16.msra.mxu1 %v17448_v19 }
 0x3ae   :  { %14737 = vmatpush3.bf16.msra.mxu0 %v17356_v38  ;;  %14582 = vmatprep.subr.bf16.mxu1 %v16068_v0  ;;  %v17472_v38 = vpack.c.bf16 %v3857_v6, %v3856_v10  ;;  %v4119_v10 = vld [vmem:[#allocation10 + $0x198] sm:$0xff]  ;;  %v4121_v6 = vld [vmem:[#allocation10 + $0x1a8] sm:$0xff] }
 0x3af   :  { %14738 = vmatprep.subr.bf16.mxu0 %v16068_v0 }
 0x3b1   :  { %14584 = vmatpush3.bf16.msra.mxu1 %v17455_v63 }
 0x3b2   :  { %14740 = vmatpush3.bf16.msra.mxu0 %v17362_v51  ;;  %14609 = vmatprep.subr.bf16.mxu1 %v16068_v0  ;;  %v3858_v51 = vld [vmem:[#allocation10 + $0x20] sm:$0xff] }
 0x3b3   :  { %14741 = vmatprep.subr.bf16.mxu0 %v16068_v0  ;;  %v17482_v61 = vpack.c.bf16 %v3859_v3, %v3858_v51 }
 0x3b4   :  { %11762 = vmatmul.mubr.f32.vlgmr.msra.gmra.mrb[38].mxu1 %v17465_v57 }
 0x3b5   :  { %14611 = vmatpush3.bf16.msra.mxu1 %v17463_v1  ;;  %11831 = vmatprep.mubr.msk.f32.mxu1 %vm16069_vm0, %v18851_v32 }
 0x3b6   :  { %14743 = vmatpush3.bf16.msra.mxu0 %v17368_v24  ;;  %14612 = vmatprep.subr.bf16.mxu1 %v16068_v0  ;;  %v17488_v24 = vpack.c.bf16 %v3861_v43, %v3860_v53  ;;  %v4123_v53 = vld [vmem:[#allocation10 + $0x1b8] sm:$0xff]  ;;  %v4124_v43 = vld [vmem:[#allocation10 + $0x1c0] sm:$0xff] }
 0x3b7   :  { %14744 = vmatprep.subr.bf16.mxu0 %v16068_v0 }
 0x3b8   :  { %v17479_v13 = vpop.f32.mrb[80].mxu0 }
 0x3b9   :  { %v11518_v37 = vpop.f32.mrb[81].mxu0  ;;  %14614 = vmatpush3.bf16.msra.mxu1 %v17472_v38 }
 0x3ba   :  { %14746 = vmatpush3.bf16.msra.mxu0 %v17375_v26  ;;  %14615 = vmatprep.subr.bf16.mxu1 %v16068_v0  ;;  %v17494_v26 = vpack.c.bf16 %v3863_v2, %v3862_v5  ;;  %v4122_v37 = vld [vmem:[#allocation10 + $0x1b0] sm:$0xff]  ;;  %v4125_v5 = vld [vmem:[#allocation10 + $0x1c8] sm:$0xff]  ;;  %v407_v2 = vadd.f32 %v17176_v45, %v16523_v15 }
 0x3bb   :  { %14747 = vmatprep.subr.bf16.mxu0 %v16068_v0 }
 0x3bd   :  { %14617 = vmatpush3.bf16.msra.mxu1 %v17482_v61 }
 0x3be   :  { %14749 = vmatpush3.bf16.msra.mxu0 %v17384_v50  ;;  %14618 = vmatprep.subr.bf16.mxu1 %v16068_v0  ;;  %v17501_v50 = vpack.c.bf16 %v3865_v35, %v3864_v14  ;;  %v4126_v14 = vld [vmem:[#allocation10 + $0x1d0] sm:$0xff]  ;;  %v4127_v35 = vld [vmem:[#allocation10 + $0x1d8] sm:$0xff] }
 0x3bf   :  { %14750 = vmatprep.subr.bf16.mxu0 %v16068_v0  ;;  %v17562_v15 = vpack.c.bf16 %v4127_v35, %v4126_v14  ;;  %v4307_v14 = vld [vmem:[#allocation10 + $0x2e8] sm:$0xff] }
 0x3c1   :  { %14620 = vmatpush3.bf16.msra.mxu1 %v17488_v24 }
 0x3c2   :  { %14752 = vmatpush3.bf16.msra.mxu0 %v17391_v47  ;;  %14621 = vmatprep.subr.bf16.mxu1 %v16068_v0 }
 0x3c3   :  { %14777 = vmatprep.subr.bf16.mxu0 %v16068_v0 }
 0x3c5   :  { %14623 = vmatpush3.bf16.msra.mxu1 %v17494_v26  ;;  %12007 = vmatmul.mubr.f32.vlgmr.msra.gmra.mrb[94].mxu0 %v17465_v57 }
 0x3c6   :  { %14779 = vmatpush3.bf16.msra.mxu0 %v17401_v25  ;;  %14624 = vmatprep.subr.bf16.mxu1 %v16068_v0  ;;  %v3868_v25 = vld [vmem:[#allocation10 + $0x70] sm:$0xff] }
 0x3c7   :  { %v2778_v18 = vpop.f32.mrb[26].mxu1  ;;  %14780 = vmatprep.subr.bf16.mxu0 %v16068_v0  ;;  %12076 = vmatprep.mubr.msk.f32.mxu0 %vm16069_vm0, %v18851_v32  ;;  %v17516_v36 = vpack.c.bf16 %v3869_v20, %v3868_v25  ;;  %v4131_v20 = vld [vmem:[#allocation10 + $0x1f8] sm:$0xff] }
 0x3c8   :  { %v2782_v47 = vadd.f32 %v2778_v18, %v2693_v46  ;;  %v11343_v58 = vpop.f32.mrb[27].mxu1  ;;  %v4116_v46 = vld [vmem:[#allocation10 + $0x180] sm:$0xff] }
 0x3c9   :  { %14626 = vmatpush3.bf16.msra.mxu1 %v17501_v50 }
 0x3ca   :  { %14782 = vmatpush3.bf16.msra.mxu0 %v17410_v42  ;;  %14627 = vmatprep.subr.bf16.mxu1 %v16068_v0  ;;  %v2870_v56 = vadd.f32 %v17353_v21, %v2782_v47  ;;  %v17522_v42 = vpack.c.bf16 %v4117_v22, %v4116_v46  ;;  %v4118_v21 = vld [vmem:[#allocation10 + $0x190] sm:$0xff]  ;;  %v4295_v22 = vld [vmem:[#allocation10 + $0x288] sm:$0xff] }
 0x3cb   :  { %14783 = vmatprep.subr.bf16.mxu0 %v16068_v0 }
 0x3cd   :  { %14629 = vmatpush3.bf16.msra.mxu1 %v17509_v34 }
 0x3ce   :  { %14785 = vmatpush3.bf16.msra.mxu0 %v17420_v12  ;;  %14630 = vmatprep.subr.bf16.mxu1 %v16068_v0  ;;  %v17529_v12 = vpack.c.bf16 %v4119_v10, %v4118_v21  ;;  %v4297_v21 = vld [vmem:[#allocation10 + $0x298] sm:$0xff]  ;;  %v4299_v10 = vld [vmem:[#allocation10 + $0x2a8] sm:$0xff] }
 0x3cf   :  { %14786 = vmatprep.subr.bf16.mxu0 %v16068_v0 }
 0x3d1   :  { %14632 = vmatpush3.bf16.msra.mxu1 %v17516_v36 }
 0x3d2   :  { %14788 = vmatpush3.bf16.msra.mxu0 %v17426_v30  ;;  %14657 = vmatprep.subr.bf16.mxu1 %v16068_v0  ;;  %v4120_v30 = vld [vmem:[#allocation10 + $0x1a0] sm:$0xff] }
 0x3d3   :  { %14789 = vmatprep.subr.bf16.mxu0 %v16068_v0 }
 0x3d4   :  { %11832 = vmatmul.mubr.f32.vlgmr.msra.gmra.mrb[40].mxu1 %v16390_v27  ;;  %v17539_v27 = vpack.c.bf16 %v4121_v6, %v4120_v30 }
 0x3d5   :  { %14659 = vmatpush3.bf16.msra.mxu1 %v17522_v42  ;;  %11901 = vmatprep.mubr.msk.f32.mxu1 %vm16069_vm0, %v18851_v32 }
 0x3d6   :  { %14791 = vmatpush3.bf16.msra.mxu0 %v17434_v28  ;;  %14660 = vmatprep.subr.bf16.mxu1 %v16068_v0  ;;  %v17545_v28 = vpack.c.bf16 %v4123_v53, %v4122_v37  ;;  %v4302_v37 = vld [vmem:[#allocation10 + $0x2c0] sm:$0xff]  ;;  %v4303_v53 = vld [vmem:[#allocation10 + $0x2c8] sm:$0xff] }
 0x3d7   :  { %14792 = vmatprep.subr.bf16.mxu0 %v16068_v0 }
 0x3d8   :  { %v17536_v51 = vpop.f32.mrb[82].mxu0 }
 0x3d9   :  { %v11588_v3 = vpop.f32.mrb[83].mxu0  ;;  %14662 = vmatpush3.bf16.msra.mxu1 %v17529_v12 }
 0x3da   :  { %14794 = vmatpush3.bf16.msra.mxu0 %v17440_v33  ;;  %14663 = vmatprep.subr.bf16.mxu1 %v16068_v0  ;;  %v17553_v33 = vpack.c.bf16 %v4125_v5, %v4124_v43  ;;  %v4301_v3 = vld [vmem:[#allocation10 + $0x2b8] sm:$0xff]  ;;  %v4304_v43 = vld [vmem:[#allocation10 + $0x2d0] sm:$0xff] }
 0x3db   :  { %14795 = vmatprep.subr.bf16.mxu0 %v16068_v0  ;;  %v4305_v5 = vld [vmem:[#allocation10 + $0x2d8] sm:$0xff] }
 0x3dd   :  { %14665 = vmatpush3.bf16.msra.mxu1 %v17539_v27 }
 0x3de   :  { %14797 = vmatpush3.bf16.msra.mxu0 %v17448_v19  ;;  %14666 = vmatprep.subr.bf16.mxu1 %v16068_v0  ;;  %v17557_v19 = vmax.f32 %v407_v2, 0.0  ;;  %v4306_v2 = vld [vmem:[#allocation10 + $0x2e0] sm:$0xff] }
 0x3df   :  { %14798 = vmatprep.subr.bf16.mxu0 %v16068_v0 }
 0x3e1   :  { %14668 = vmatpush3.bf16.msra.mxu1 %v17545_v28 }
 0x3e2   :  { %14800 = vmatpush3.bf16.msra.mxu0 %v17455_v63  ;;  %14669 = vmatprep.subr.bf16.mxu1 %v16068_v0  ;;  %v4129_v63 = vld [vmem:[#allocation10 + $0x1e8] sm:$0xff] }
 0x3e3   :  { %14825 = vmatprep.subr.bf16.mxu0 %v16068_v0  ;;  %v17570_v58 = vpack.c.bf16 %v4129_v63, %v4128_v23  ;;  %v4309_v63 = vld [vmem:[#allocation10 + $0x2f8] sm:$0xff] }
 0x3e5   :  { %14671 = vmatpush3.bf16.msra.mxu1 %v17553_v33  ;;  %12077 = vmatmul.mubr.f32.vlgmr.msra.gmra.mrb[96].mxu0 %v17557_v19 }
 0x3e6   :  { %14827 = vmatpush3.bf16.msra.mxu0 %v17463_v1  ;;  %14672 = vmatprep.subr.bf16.mxu1 %v16068_v0  ;;  %v4130_v1 = vld [vmem:[#allocation10 + $0x1f0] sm:$0xff] }
 0x3e7   :  { %v2955_v7 = vpop.f32.mrb[28].mxu1  ;;  %14828 = vmatprep.subr.bf16.mxu0 %v16068_v0  ;;  %12146 = vmatprep.mubr.msk.f32.mxu0 %vm16069_vm0, %v18851_v32  ;;  %v17579_v46 = vpack.c.bf16 %v4131_v20, %v4130_v1  ;;  %v4473_v20 = vld [vmem:[#allocation10 + $0x390] sm:$0xff] }
 0x3e8   :  { %v2959_v18 = vadd.f32 %v2955_v7, %v2870_v56  ;;  %v11413_v47 = vpop.f32.mrb[29].mxu1  ;;  %v4294_v56 = vld [vmem:[#allocation10 + $0x280] sm:$0xff] }
 0x3e9   :  { %14674 = vmatpush3.bf16.msra.mxu1 %v17562_v15  ;;  %v4472_v47 = vld [vmem:[#allocation10 + $0x388] sm:$0xff] }
 0x3ea   :  { %v17573_v25 = vadd.f32 %v17417_v17, %v2959_v18  ;;  %14830 = vmatpush3.bf16.msra.mxu0 %v17472_v38  ;;  %14675 = vmatprep.subr.bf16.mxu1 %v16068_v0  ;;  %v17585_v17 = vpack.c.bf16 %v4295_v22, %v4294_v56  ;;  %v4296_v38 = vld [vmem:[#allocation10 + $0x290] sm:$0xff]  ;;  %v4471_v18 = vld [vmem:[#allocation10 + $0x380] sm:$0xff]  ;;  %v4474_v56 = vld [vmem:[#allocation10 + $0x398] sm:$0xff] }
 0x3eb   :  { %14831 = vmatprep.subr.bf16.mxu0 %v16068_v0 }
 0x3ed   :  { %14677 = vmatpush3.bf16.msra.mxu1 %v17570_v58 }
 0x3ee   :  { %14833 = vmatpush3.bf16.msra.mxu0 %v17482_v61  ;;  %14678 = vmatprep.subr.bf16.mxu1 %v16068_v0  ;;  %v17593_v61 = vpack.c.bf16 %v4297_v21, %v4296_v38  ;;  %v4477_v21 = vld [vmem:[#allocation10 + $0x3b0] sm:$0xff] }
 0x3ef   :  { %14834 = vmatprep.subr.bf16.mxu0 %v16068_v0 }
 0x3f1   :  { %14680 = vmatpush3.bf16.msra.mxu1 %v17579_v46 }
 0x3f2   :  { %14836 = vmatpush3.bf16.msra.mxu0 %v17488_v24  ;;  %14705 = vmatprep.subr.bf16.mxu1 %v16068_v0  ;;  %v4298_v24 = vld [vmem:[#allocation10 + $0x2a0] sm:$0xff] }
 0x3f3   :  { %14837 = vmatprep.subr.bf16.mxu0 %v16068_v0  ;;  %v17603_v4 = vpack.c.bf16 %v4299_v10, %v4298_v24  ;;  %v4478_v24 = vld [vmem:[#allocation10 + $0x3b8] sm:$0xff]  ;;  %v4479_v10 = vld [vmem:[#allocation10 + $0x3c0] sm:$0xff] }
 0x3f4   :  { %11902 = vmatmul.mubr.f32.vlgmr.msra.gmra.mrb[42].mxu1 %v548_v59  ;;  %v4300_v59 = vld [vmem:[#allocation10 + $0x2b0] sm:$0xff] }
 0x3f5   :  { %14707 = vmatpush3.bf16.msra.mxu1 %v17585_v17  ;;  %11971 = vmatprep.mubr.msk.f32.mxu1 %vm16069_vm0, %v18851_v32 }
 0x3f6   :  { %14839 = vmatpush3.bf16.msra.mxu0 %v17494_v26  ;;  %14708 = vmatprep.subr.bf16.mxu1 %v16068_v0  ;;  %v17609_v26 = vpack.c.bf16 %v4301_v3, %v4300_v59  ;;  %v4481_v59 = vld [vmem:[#allocation10 + $0x3d0] sm:$0xff]  ;;  %v4482_v3 = vld [vmem:[#allocation10 + $0x3d8] sm:$0xff] }
 0x3f7   :  { %14840 = vmatprep.subr.bf16.mxu0 %v16068_v0 }
 0x3f8   :  { %v17600_v30 = vpop.f32.mrb[84].mxu0 }
 0x3f9   :  { %v11658_v6 = vpop.f32.mrb[85].mxu0  ;;  %14710 = vmatpush3.bf16.msra.mxu1 %v17593_v61 }
 0x3fa   :  { %14842 = vmatpush3.bf16.msra.mxu0 %v17501_v50  ;;  %14711 = vmatprep.subr.bf16.mxu1 %v16068_v0  ;;  %v17615_v50 = vpack.c.bf16 %v4303_v53, %v4302_v37  ;;  %v4480_v6 = vld [vmem:[#allocation10 + $0x3c8] sm:$0xff]  ;;  %v4483_v37 = vld [vmem:[#allocation10 + $0x3e0] sm:$0xff] }
 0x3fb   :  { %14843 = vmatprep.subr.bf16.mxu0 %v16068_v0  ;;  %v4484_v53 = vld [vmem:[#allocation10 + $0x3e8] sm:$0xff] }
 0x3fd   :  { %14713 = vmatpush3.bf16.msra.mxu1 %v17603_v4 }
 0x3fe   :  { %14845 = vmatpush3.bf16.msra.mxu0 %v17509_v34  ;;  %14714 = vmatprep.subr.bf16.mxu1 %v16068_v0  ;;  %v17622_v34 = vpack.c.bf16 %v4305_v5, %v4304_v43 }
 0x3ff   :  { %14846 = vmatprep.subr.bf16.mxu0 %v16068_v0 }
 0x401   :  { %14716 = vmatpush3.bf16.msra.mxu1 %v17609_v26 }
 0x402   :  { %14848 = vmatpush3.bf16.msra.mxu0 %v17516_v36  ;;  %14717 = vmatprep.subr.bf16.mxu1 %v16068_v0 }
 0x403   :  { %14873 = vmatprep.subr.bf16.mxu0 %v16068_v0 }
 0x405   :  { %14719 = vmatpush3.bf16.msra.mxu1 %v17615_v50  ;;  %12147 = vmatmul.mubr.f32.vlgmr.msra.gmra.mrb[98].mxu0 %v16893_v11  ;;  %v17633_v11 = vpack.c.bf16 %v4307_v14, %v4306_v2  ;;  %v17690_v2 = vpack.c.bf16 %v4484_v53, %v4483_v37  ;;  %v4486_v14 = vld [vmem:[#allocation10 + $0x3f8] sm:$0xff] }
 0x406   :  { %14875 = vmatpush3.bf16.msra.mxu0 %v17522_v42  ;;  %14720 = vmatprep.subr.bf16.mxu1 %v16068_v0  ;;  %v4308_v42 = vld [vmem:[#allocation10 + $0x2f0] sm:$0xff] }
 0x407   :  { %v3153_v35 = vpop.f32.mrb[30].mxu1  ;;  %14876 = vmatprep.subr.bf16.mxu0 %v16068_v0  ;;  %12216 = vmatprep.mubr.msk.f32.mxu0 %vm16069_vm0, %v18851_v32  ;;  %v17639_v7 = vpack.c.bf16 %v4309_v63, %v4308_v42  ;;  %v4670_v42 = vld [vmem:[#allocation10 + $0x88] sm:$0xff] }
 0x408   :  { %v17630_v36 = vadd.f32 %v17479_v13, %v3153_v35  ;;  %v11483_v23 = vpop.f32.mrb[31].mxu1  ;;  %v372_v13 = vadd.f32 %v17176_v45, %v16474_v44  ;;  %v17653_v44 = vpack.c.bf16 %v4474_v56, %v4473_v20  ;;  %v4475_v45 = vld [vmem:[#allocation10 + $0x3a0] sm:$0xff] }
 0x409   :  { %14722 = vmatpush3.bf16.msra.mxu1 %v17622_v34 }
 0x40a   :  { %14878 = vmatpush3.bf16.msra.mxu0 %v17529_v12  ;;  %14723 = vmatprep.subr.bf16.mxu1 %v16068_v0  ;;  %v17647_v12 = vpack.c.bf16 %v4472_v47, %v4471_v18  ;;  %v550_v1 = vmax.f32 %v372_v13, 0.0  ;;  %v4672_v18 = vld [vmem:[#allocation10 + $0x98] sm:$0xff]  ;;  %v4674_v47 = vld [vmem:[#allocation10 + $0xa8] sm:$0xff] }
 0x40b   :  { %14879 = vmatprep.subr.bf16.mxu0 %v16068_v0 }
 0x40d   :  { %14725 = vmatpush3.bf16.msra.mxu1 %v17633_v11 }
 0x40e   :  { %14881 = vmatpush3.bf16.msra.mxu0 %v17539_v27  ;;  %14726 = vmatprep.subr.bf16.mxu1 %v16068_v0  ;;  %v4476_v27 = vld [vmem:[#allocation10 + $0x3a8] sm:$0xff] }
 0x40f   :  { %14882 = vmatprep.subr.bf16.mxu0 %v16068_v0  ;;  %v17663_v38 = vpack.c.bf16 %v4476_v27, %v4475_v45  ;;  %v4675_v45 = vld [vmem:[#allocation10 + $0xb0] sm:$0xff]  ;;  %v4676_v27 = vld [vmem:[#allocation10 + $0xb8] sm:$0xff] }
 0x411   :  { %14728 = vmatpush3.bf16.msra.mxu1 %v17639_v7 }
 0x412   :  { %14884 = vmatpush3.bf16.msra.mxu0 %v17545_v28  ;;  %14753 = vmatprep.subr.bf16.mxu1 %v16068_v0 }
 0x413   :  { %14885 = vmatprep.subr.bf16.mxu0 %v16068_v0 }
 0x414   :  { %11972 = vmatmul.mubr.f32.vlgmr.msra.gmra.mrb[44].mxu1 %v550_v1 }
 0x415   :  { %14755 = vmatpush3.bf16.msra.mxu1 %v17647_v12  ;;  %12041 = vmatprep.mubr.msk.f32.mxu1 %vm16069_vm0, %v18851_v32 }
 0x416   :  { %14887 = vmatpush3.bf16.msra.mxu0 %v17553_v33  ;;  %14756 = vmatprep.subr.bf16.mxu1 %v16068_v0  ;;  %v17669_v33 = vpack.c.bf16 %v4478_v24, %v4477_v21  ;;  %v4678_v21 = vld [vmem:[#allocation10 + $0xc8] sm:$0xff] }
 0x417   :  { %14888 = vmatprep.subr.bf16.mxu0 %v16068_v0 }
 0x418   :  { %v17660_v28 = vpop.f32.mrb[86].mxu0 }
 0x419   :  { %v11728_v22 = vpop.f32.mrb[87].mxu0  ;;  %14758 = vmatpush3.bf16.msra.mxu1 %v17653_v44 }
 0x41a   :  { %14890 = vmatpush3.bf16.msra.mxu0 %v17562_v15  ;;  %14759 = vmatprep.subr.bf16.mxu1 %v16068_v0  ;;  %v17675_v15 = vpack.c.bf16 %v4480_v6, %v4479_v10  ;;  %v4677_v22 = vld [vmem:[#allocation10 + $0xc0] sm:$0xff]  ;;  %v4679_v10 = vld [vmem:[#allocation10 + $0xd0] sm:$0xff]  ;;  %v4680_v6 = vld [vmem:[#allocation10 + $0xd8] sm:$0xff] }
 0x41b   :  { %14891 = vmatprep.subr.bf16.mxu0 %v16068_v0 }
 0x41d   :  { %14761 = vmatpush3.bf16.msra.mxu1 %v17663_v38 }
 0x41e   :  { %14893 = vmatpush3.bf16.msra.mxu0 %v17570_v58  ;;  %14762 = vmatprep.subr.bf16.mxu1 %v16068_v0  ;;  %v17681_v58 = vpack.c.bf16 %v4482_v3, %v4481_v59  ;;  %v17753_v59 = vpack.c.bf16 %v4680_v6, %v4679_v10  ;;  %v4682_v3 = vld [vmem:[#allocation10 + $0xe8] sm:$0xff] }
 0x41f   :  { %14894 = vmatprep.subr.bf16.mxu0 %v16068_v0 }
 0x421   :  { %14764 = vmatpush3.bf16.msra.mxu1 %v17669_v33 }
 0x422   :  { %14896 = vmatpush3.bf16.msra.mxu0 %v17579_v46  ;;  %14765 = vmatprep.subr.bf16.mxu1 %v16068_v0 }
 0x423   :  { %14921 = vmatprep.subr.bf16.mxu0 %v16068_v0 }
 0x425   :  { %14767 = vmatpush3.bf16.msra.mxu1 %v17675_v15  ;;  %12217 = vmatmul.mubr.f32.vlgmr.msra.gmra.mrb[100].mxu0 %v550_v1 }
 0x426   :  { %14923 = vmatpush3.bf16.msra.mxu0 %v17585_v17  ;;  %14768 = vmatprep.subr.bf16.mxu1 %v16068_v0  ;;  %v4485_v17 = vld [vmem:[#allocation10 + $0x3f0] sm:$0xff] }
 0x427   :  { %v3310_v43 = vpop.f32.mrb[32].mxu1  ;;  %14924 = vmatprep.subr.bf16.mxu0 %v16068_v0  ;;  %12286 = vmatprep.mubr.msk.f32.mxu0 %vm16069_vm0, %v18851_v32  ;;  %v17699_v23 = vpack.c.bf16 %v4486_v14, %v4485_v17  ;;  %v4826_v14 = vld [vmem:[#allocation10 + $0x100] sm:$0xff] }
 0x428   :  { %v3314_v46 = vadd.f32 %v3310_v43, %v17630_v36  ;;  %v11553_v5 = vpop.f32.mrb[33].mxu1  ;;  %v17704_v36 = vld [vmem:[%s18834_s2] ss:$0 sm:$0xff] }
 0x429   :  { %14770 = vmatpush3.bf16.msra.mxu1 %v17681_v58  ;;  %v382_v24 = vadd.f32 %v17704_v36, %v16483_v48  ;;  %v4681_v48 = vld [vmem:[#allocation10 + $0xe0] sm:$0xff] }
 0x42a   :  { %14926 = vmatpush3.bf16.msra.mxu0 %v17593_v61  ;;  %14771 = vmatprep.subr.bf16.mxu1 %v16068_v0  ;;  %v17695_v35 = vadd.f32 %v17536_v51, %v3314_v46  ;;  %v17708_v61 = vadd.f32 %v17704_v36, %v16506_v9  ;;  %v4669_v51 = vld [vmem:[#allocation10 + $0x80] sm:$0xff]  ;;  %v4671_v9 = vld [vmem:[#allocation10 + $0x90] sm:$0xff]  ;;  %v17762_v43 = vpack.c.bf16 %v4682_v3, %v4681_v48  ;;  %v4684_v46 = vld [vmem:[#allocation10 + $0xf8] sm:$0xff] }
 0x42b   :  { %14927 = vmatprep.subr.bf16.mxu0 %v16068_v0  ;;  %v17714_v63 = vpack.c.bf16 %v4670_v42, %v4669_v51  ;;  %v4829_v51 = vld [vmem:[#allocation10 + $0x118] sm:$0xff]  ;;  %v4831_v42 = vld [vmem:[#allocation10 + $0x128] sm:$0xff] }
 0x42c   :  { %v556_v13 = vmax.f32 %v17708_v61, 0.0  ;;  %v4841_v48 = vld [vmem:[#allocation10 + $0x178] sm:$0xff] }
 0x42d   :  { %14773 = vmatpush3.bf16.msra.mxu1 %v17690_v2 }
 0x42e   :  { %14929 = vmatpush3.bf16.msra.mxu0 %v17603_v4  ;;  %14774 = vmatprep.subr.bf16.mxu1 %v16068_v0  ;;  %v17723_v4 = vpack.c.bf16 %v4672_v18, %v4671_v9 }
 0x42f   :  { %14930 = vmatprep.subr.bf16.mxu0 %v16068_v0 }
 0x431   :  { %14776 = vmatpush3.bf16.msra.mxu1 %v17699_v23 }
 0x432   :  { %14932 = vmatpush3.bf16.msra.mxu0 %v17609_v26  ;;  %14801 = vmatprep.subr.bf16.mxu1 %v16068_v0  ;;  %v4673_v26 = vld [vmem:[#allocation10 + $0xa0] sm:$0xff] }
 0x433   :  { %14933 = vmatprep.subr.bf16.mxu0 %v16068_v0  ;;  %v17733_v56 = vpack.c.bf16 %v4674_v47, %v4673_v26  ;;  %v4833_v26 = vld [vmem:[#allocation10 + $0x138] sm:$0xff]  ;;  %v4834_v47 = vld [vmem:[#allocation10 + $0x140] sm:$0xff] }
 0x434   :  { %12042 = vmatmul.mubr.f32.vlgmr.msra.gmra.mrb[46].mxu1 %v556_v13 }
 0x435   :  { %14803 = vmatpush3.bf16.msra.mxu1 %v17714_v63  ;;  %12111 = vmatprep.mubr.msk.f32.mxu1 %vm16069_vm0, %v18851_v32 }
 0x436   :  { %14935 = vmatpush3.bf16.msra.mxu0 %v17615_v50  ;;  %14804 = vmatprep.subr.bf16.mxu1 %v16068_v0  ;;  %v17739_v50 = vpack.c.bf16 %v4676_v27, %v4675_v45  ;;  %v17805_v45 = vadd.f32 %v17704_v36, %v16517_v60  ;;  %v4836_v27 = vld [vmem:[#allocation10 + $0x150] sm:$0xff] }
 0x437   :  { %14936 = vmatprep.subr.bf16.mxu0 %v16068_v0 }
 0x438   :  { %v17730_v1 = vpop.f32.mrb[88].mxu0 }
 0x439   :  { %v11798_v20 = vpop.f32.mrb[89].mxu0  ;;  %14806 = vmatpush3.bf16.msra.mxu1 %v17723_v4 }
 0x43a   :  { %14938 = vmatpush3.bf16.msra.mxu0 %v17622_v34  ;;  %14807 = vmatprep.subr.bf16.mxu1 %v16068_v0  ;;  %v17747_v34 = vpack.c.bf16 %v4678_v21, %v4677_v22  ;;  %v4835_v20 = vld [vmem:[#allocation10 + $0x148] sm:$0xff]  ;;  %v558_v22 = vmax.f32 %v17805_v45, 0.0 }
 0x43b   :  { %14939 = vmatprep.subr.bf16.mxu0 %v16068_v0  ;;  %v4839_v21 = vld [vmem:[#allocation10 + $0x168] sm:$0xff] }
 0x43d   :  { %14809 = vmatpush3.bf16.msra.mxu1 %v17733_v56 }
 0x43e   :  { %14941 = vmatpush3.bf16.msra.mxu0 %v17633_v11  ;;  %14810 = vmatprep.subr.bf16.mxu1 %v16068_v0  ;;  %v552_v11 = vmax.f32 %v382_v24, 0.0 }
 0x43f   :  { %14942 = vmatprep.subr.bf16.mxu0 %v16068_v0 }
 0x441   :  { %14812 = vmatpush3.bf16.msra.mxu1 %v17739_v50 }
 0x442   :  { %14944 = vmatpush3.bf16.msra.mxu0 %v17639_v7  ;;  %14813 = vmatprep.subr.bf16.mxu1 %v16068_v0 }
 0x443   :  { %14969 = vmatprep.subr.bf16.mxu0 %v16068_v0 }
 0x445   :  { %14815 = vmatpush3.bf16.msra.mxu1 %v17747_v34  ;;  %12287 = vmatmul.mubr.f32.vlgmr.msra.gmra.mrb[102].mxu0 %v552_v11 }
 0x446   :  { %14971 = vmatpush3.bf16.msra.mxu0 %v17647_v12  ;;  %14816 = vmatprep.subr.bf16.mxu1 %v16068_v0  ;;  %v4683_v12 = vld [vmem:[#allocation10 + $0xf0] sm:$0xff] }
 0x447   :  { %v3488_v37 = vpop.f32.mrb[34].mxu1  ;;  %14972 = vmatprep.subr.bf16.mxu0 %v16068_v0  ;;  %12356 = vmatprep.mubr.msk.f32.mxu0 %vm16069_vm0, %v18851_v32  ;;  %v17769_v17 = vpack.c.bf16 %v4684_v46, %v4683_v12  ;;  %v5006_v12 = vld [vmem:[#allocation10 + $0x218] sm:$0xff]  ;;  %v5008_v46 = vld [vmem:[#allocation10 + $0x228] sm:$0xff] }
 0x448   :  { %v3492_v7 = vadd.f32 %v3488_v37, %v17695_v35  ;;  %v11623_v53 = vpop.f32.mrb[35].mxu1  ;;  %v4827_v35 = vld [vmem:[#allocation10 + $0x108] sm:$0xff] }
 0x449   :  { %14818 = vmatpush3.bf16.msra.mxu1 %v17753_v59  ;;  %v5004_v53 = vld [vmem:[#allocation10 + $0x208] sm:$0xff] }
 0x44a   :  { %14974 = vmatpush3.bf16.msra.mxu0 %v17653_v44  ;;  %14819 = vmatprep.subr.bf16.mxu1 %v16068_v0  ;;  %v3581_v5 = vadd.f32 %v17600_v30, %v3492_v7  ;;  %v17775_v44 = vpack.c.bf16 %v4827_v35, %v4826_v14  ;;  %v4828_v30 = vld [vmem:[#allocation10 + $0x110] sm:$0xff]  ;;  %v5003_v7 = vld [vmem:[#allocation10 + $0x200] sm:$0xff]  ;;  %v5010_v35 = vld [vmem:[#allocation10 + $0x238] sm:$0xff] }
 0x44b   :  { %14975 = vmatprep.subr.bf16.mxu0 %v16068_v0 }
 0x44d   :  { %14821 = vmatpush3.bf16.msra.mxu1 %v17762_v43 }
 0x44e   :  { %14977 = vmatpush3.bf16.msra.mxu0 %v17663_v38  ;;  %14822 = vmatprep.subr.bf16.mxu1 %v16068_v0  ;;  %v17783_v38 = vpack.c.bf16 %v4829_v51, %v4828_v30  ;;  %v5011_v30 = vld [vmem:[#allocation10 + $0x240] sm:$0xff]  ;;  %v5012_v51 = vld [vmem:[#allocation10 + $0x248] sm:$0xff] }
 0x44f   :  { %14978 = vmatprep.subr.bf16.mxu0 %v16068_v0 }
 0x451   :  { %14824 = vmatpush3.bf16.msra.mxu1 %v17769_v17 }
 0x452   :  { %14980 = vmatpush3.bf16.msra.mxu0 %v17669_v33  ;;  %14849 = vmatprep.subr.bf16.mxu1 %v16068_v0  ;;  %v4830_v33 = vld [vmem:[#allocation10 + $0x120] sm:$0xff] }
 0x453   :  { %14981 = vmatprep.subr.bf16.mxu0 %v16068_v0  ;;  %v17793_v39 = vpack.c.bf16 %v4831_v42, %v4830_v33  ;;  %v5013_v33 = vld [vmem:[#allocation10 + $0x250] sm:$0xff]  ;;  %v5014_v42 = vld [vmem:[#allocation10 + $0x258] sm:$0xff] }
 0x454   :  { %12112 = vmatmul.mubr.f32.vlgmr.msra.gmra.mrb[48].mxu1 %v544_v31  ;;  %v4832_v31 = vld [vmem:[#allocation10 + $0x130] sm:$0xff] }
 0x455   :  { %14851 = vmatpush3.bf16.msra.mxu1 %v17775_v44  ;;  %12181 = vmatprep.mubr.msk.f32.mxu1 %vm16069_vm0, %v18851_v32 }
 0x456   :  { %14983 = vmatpush3.bf16.msra.mxu0 %v17675_v15  ;;  %14852 = vmatprep.subr.bf16.mxu1 %v16068_v0  ;;  %v17799_v15 = vpack.c.bf16 %v4833_v26, %v4832_v31  ;;  %v5016_v31 = vld [vmem:[#allocation10 + $0x268] sm:$0xff] }
 0x457   :  { %14984 = vmatprep.subr.bf16.mxu0 %v16068_v0 }
 0x458   :  { %v17790_v9 = vpop.f32.mrb[90].mxu0 }
 0x459   :  { %v11868_v18 = vpop.f32.mrb[91].mxu0  ;;  %14854 = vmatpush3.bf16.msra.mxu1 %v17783_v38 }
 0x45a   :  { %14986 = vmatpush3.bf16.msra.mxu0 %v17681_v58  ;;  %14855 = vmatprep.subr.bf16.mxu1 %v16068_v0  ;;  %v17809_v58 = vpack.c.bf16 %v4835_v20, %v4834_v47  ;;  %v5015_v18 = vld [vmem:[#allocation10 + $0x260] sm:$0xff] }
 0x45b   :  { %14987 = vmatprep.subr.bf16.mxu0 %v16068_v0  ;;  %v17887_v62 = vpack.c.bf16 %v5016_v31, %v5015_v18  ;;  %v5359_v18 = vld [vmem:[#allocation10 + $0x408] sm:$0xff]  ;;  %v5361_v31 = vld [vmem:[#allocation10 + $0x418] sm:$0xff] }
 0x45d   :  { %14857 = vmatpush3.bf16.msra.mxu1 %v17793_v39 }
 0x45e   :  { %14989 = vmatpush3.bf16.msra.mxu0 %v17690_v2  ;;  %14858 = vmatprep.subr.bf16.mxu1 %v16068_v0  ;;  %v4837_v2 = vld [vmem:[#allocation10 + $0x158] sm:$0xff] }
 0x45f   :  { %14990 = vmatprep.subr.bf16.mxu0 %v16068_v0  ;;  %v17818_v60 = vpack.c.bf16 %v4837_v2, %v4836_v27  ;;  %v377_v27 = vadd.f32 %v17704_v36, %v16489_v55  ;;  %v5180_v2 = vld [vmem:[#allocation10 + $0x300] sm:$0xff] }
 0x461   :  { %14860 = vmatpush3.bf16.msra.mxu1 %v17799_v15 }
 0x462   :  { %14992 = vmatpush3.bf16.msra.mxu0 %v17699_v23  ;;  %14861 = vmatprep.subr.bf16.mxu1 %v16068_v0  ;;  %v4838_v23 = vld [vmem:[#allocation10 + $0x160] sm:$0xff] }
 0x463   :  { %15017 = vmatprep.subr.bf16.mxu0 %v16068_v0  ;;  %v17826_v11 = vpack.c.bf16 %v4839_v21, %v4838_v23  ;;  %v5181_v23 = vld [vmem:[#allocation10 + $0x308] sm:$0xff]  ;;  %v551_v21 = vmax.f32 %v377_v27, 0.0  ;;  %v5364_v27 = vld [vmem:[#allocation10 + $0x430] sm:$0xff] }
 0x465   :  { %14863 = vmatpush3.bf16.msra.mxu1 %v17809_v58  ;;  %12357 = vmatmul.mubr.f32.vlgmr.msra.gmra.mrb[104].mxu0 %v558_v22 }
 0x466   :  { %15019 = vmatpush3.bf16.msra.mxu0 %v17714_v63  ;;  %14864 = vmatprep.subr.bf16.mxu1 %v16068_v0  ;;  %v4840_v63 = vld [vmem:[#allocation10 + $0x170] sm:$0xff] }
 0x467   :  { %v3666_v24 = vpop.f32.mrb[36].mxu1  ;;  %15020 = vmatprep.subr.bf16.mxu0 %v16068_v0  ;;  %12426 = vmatprep.mubr.msk.f32.mxu0 %vm16069_vm0, %v18851_v32  ;;  %v17833_v37 = vpack.c.bf16 %v4841_v48, %v4840_v63 }
 0x468   :  { %v3670_v10 = vadd.f32 %v3666_v24, %v3581_v5  ;;  %v11693_v6 = vpop.f32.mrb[37].mxu1  ;;  %v5182_v24 = vld [vmem:[#allocation10 + $0x310] sm:$0xff] }
 0x469   :  { %14866 = vmatpush3.bf16.msra.mxu1 %v17818_v60 }
 0x46a   :  { %15022 = vmatpush3.bf16.msra.mxu0 %v17723_v4  ;;  %14867 = vmatprep.subr.bf16.mxu1 %v16068_v0  ;;  %v3759_v3 = vadd.f32 %v17660_v28, %v3670_v10  ;;  %v17839_v4 = vpack.c.bf16 %v5004_v53, %v5003_v7  ;;  %v5005_v28 = vld [vmem:[#allocation10 + $0x210] sm:$0xff]  ;;  %v5183_v10 = vld [vmem:[#allocation10 + $0x318] sm:$0xff]  ;;  %v5188_v53 = vld [vmem:[#allocation10 + $0x340] sm:$0xff] }
 0x46b   :  { %15023 = vmatprep.subr.bf16.mxu0 %v16068_v0  ;;  %v17907_v55 = vpack.c.bf16 %v5183_v10, %v5182_v24  ;;  %v5187_v7 = vld [vmem:[#allocation10 + $0x338] sm:$0xff]  ;;  %v427_v24 = vadd.f32 %v17704_v36, %v16543_v52  ;;  %v5368_v10 = vld [vmem:[#allocation10 + $0x450] sm:$0xff]  ;;  %v5370_v52 = vld [vmem:[#allocation10 + $0x460] sm:$0xff] }
 0x46d   :  { %14869 = vmatpush3.bf16.msra.mxu1 %v17826_v11 }
 0x46e   :  { %15025 = vmatpush3.bf16.msra.mxu0 %v17733_v56  ;;  %14870 = vmatprep.subr.bf16.mxu1 %v16068_v0  ;;  %v17847_v56 = vpack.c.bf16 %v5006_v12, %v5005_v28  ;;  %v5189_v28 = vld [vmem:[#allocation10 + $0x348] sm:$0xff]  ;;  %v5190_v12 = vld [vmem:[#allocation10 + $0x350] sm:$0xff] }
 0x46f   :  { %15026 = vmatprep.subr.bf16.mxu0 %v16068_v0 }
 0x471   :  { %14872 = vmatpush3.bf16.msra.mxu1 %v17833_v37 }
 0x472   :  { %15028 = vmatpush3.bf16.msra.mxu0 %v17739_v50  ;;  %14897 = vmatprep.subr.bf16.mxu1 %v16068_v0  ;;  %v5007_v50 = vld [vmem:[#allocation10 + $0x220] sm:$0xff] }
 0x473   :  { %15029 = vmatprep.subr.bf16.mxu0 %v16068_v0  ;;  %v17857_v29 = vpack.c.bf16 %v5008_v46, %v5007_v50  ;;  %v5191_v50 = vld [vmem:[#allocation10 + $0x358] sm:$0xff]  ;;  %v5192_v46 = vld [vmem:[#allocation10 + $0x360] sm:$0xff] }
 0x474   :  { %12182 = vmatmul.mubr.f32.vlgmr.msra.gmra.mrb[50].mxu1 %v545_v54  ;;  %v5009_v54 = vld [vmem:[#allocation10 + $0x230] sm:$0xff] }
 0x475   :  { %14899 = vmatpush3.bf16.msra.mxu1 %v17839_v4  ;;  %12251 = vmatprep.mubr.msk.f32.mxu1 %vm16069_vm0, %v18851_v32 }
 0x476   :  { %15031 = vmatpush3.bf16.msra.mxu0 %v17747_v34  ;;  %14900 = vmatprep.subr.bf16.mxu1 %v16068_v0  ;;  %v17863_v34 = vpack.c.bf16 %v5010_v35, %v5009_v54 }
 0x477   :  { %15032 = vmatprep.subr.bf16.mxu0 %v16068_v0 }
 0x478   :  { %v17854_v5 = vpop.f32.mrb[92].mxu0 }
 0x479   :  { %v11938_v14 = vpop.f32.mrb[93].mxu0  ;;  %14902 = vmatpush3.bf16.msra.mxu1 %v17847_v56 }
 0x47a   :  { %15034 = vmatpush3.bf16.msra.mxu0 %v17753_v59  ;;  %14903 = vmatprep.subr.bf16.mxu1 %v16068_v0  ;;  %v17869_v59 = vpack.c.bf16 %v5012_v51, %v5011_v30  ;;  %v5193_v14 = vld [vmem:[#allocation10 + $0x368] sm:$0xff]  ;;  %v5195_v51 = vld [vmem:[#allocation10 + $0x378] sm:$0xff] }
 0x47b   :  { %15035 = vmatprep.subr.bf16.mxu0 %v16068_v0  ;;  %v17945_v30 = vpack.c.bf16 %v5193_v14, %v5192_v46  ;;  %v18863_v46 = vld [vmem:[#allocation20_spill] sm:$0xff] }
 0x47c   :  { %v18014_v14 = vadd.f32 %v17704_v36, %v18863_v46 }
 0x47d   :  { %14905 = vmatpush3.bf16.msra.mxu1 %v17857_v29 }
 0x47e   :  { %15037 = vmatpush3.bf16.msra.mxu0 %v17762_v43  ;;  %14906 = vmatprep.subr.bf16.mxu1 %v16068_v0  ;;  %v17877_v43 = vpack.c.bf16 %v5014_v42, %v5013_v33 }
 0x47f   :  { %15038 = vmatprep.subr.bf16.mxu0 %v16068_v0 }
 0x481   :  { %14908 = vmatpush3.bf16.msra.mxu1 %v17863_v34 }
 0x482   :  { %15040 = vmatpush3.bf16.msra.mxu0 %v17769_v17  ;;  %14909 = vmatprep.subr.bf16.mxu1 %v16068_v0 }
 0x483   :  { %15065 = vmatprep.subr.bf16.mxu0 %v16068_v0 }
 0x485   :  { %14911 = vmatpush3.bf16.msra.mxu1 %v17869_v59  ;;  %12427 = vmatmul.mubr.f32.vlgmr.msra.gmra.mrb[106].mxu0 %v554_v41  ;;  %v5017_v41 = vld [vmem:[#allocation10 + $0x270] sm:$0xff] }
 0x486   :  { %15067 = vmatpush3.bf16.msra.mxu0 %v17775_v44  ;;  %14912 = vmatprep.subr.bf16.mxu1 %v16068_v0  ;;  %v5018_v44 = vld [vmem:[#allocation10 + $0x278] sm:$0xff] }
 0x487   :  { %v3844_v17 = vpop.f32.mrb[38].mxu1  ;;  %15068 = vmatprep.subr.bf16.mxu0 %v16068_v0  ;;  %12496 = vmatprep.mubr.msk.f32.mxu0 %vm16069_vm0, %v18851_v32  ;;  %v17893_v20 = vpack.c.bf16 %v5018_v44, %v5017_v41 }
 0x488   :  { %v17884_v26 = vadd.f32 %v3844_v17, %v3759_v3  ;;  %v11763_v47 = vpop.f32.mrb[39].mxu1  ;;  %v5186_v3 = vld [vmem:[#allocation10 + $0x330] sm:$0xff]  ;;  %v5363_v17 = vld [vmem:[#allocation10 + $0x428] sm:$0xff] }
 0x489   :  { %14914 = vmatpush3.bf16.msra.mxu1 %v17877_v43 }
 0x48a   :  { %15070 = vmatpush3.bf16.msra.mxu0 %v17783_v38  ;;  %14915 = vmatprep.subr.bf16.mxu1 %v16068_v0  ;;  %v17901_v38 = vpack.c.bf16 %v5181_v23, %v5180_v2  ;;  %v5365_v2 = vld [vmem:[#allocation10 + $0x438] sm:$0xff]  ;;  %v5366_v23 = vld [vmem:[#allocation10 + $0x440] sm:$0xff] }
 0x48b   :  { %15071 = vmatprep.subr.bf16.mxu0 %v16068_v0 }
 0x48d   :  { %14917 = vmatpush3.bf16.msra.mxu1 %v17887_v62 }
 0x48e   :  { %15073 = vmatpush3.bf16.msra.mxu0 %v17793_v39  ;;  %14918 = vmatprep.subr.bf16.mxu1 %v16068_v0  ;;  %v5184_v39 = vld [vmem:[#allocation10 + $0x320] sm:$0xff] }
 0x48f   :  { %15074 = vmatprep.subr.bf16.mxu0 %v16068_v0 }
 0x491   :  { %14920 = vmatpush3.bf16.msra.mxu1 %v17893_v20 }
 0x492   :  { %15076 = vmatpush3.bf16.msra.mxu0 %v17799_v15  ;;  %14945 = vmatprep.subr.bf16.mxu1 %v16068_v0  ;;  %v5185_v15 = vld [vmem:[#allocation10 + $0x328] sm:$0xff] }
 0x493   :  { %15077 = vmatprep.subr.bf16.mxu0 %v16068_v0  ;;  %v17917_v48 = vpack.c.bf16 %v5185_v15, %v5184_v39  ;;  %v5369_v39 = vld [vmem:[#allocation10 + $0x458] sm:$0xff] }
 0x494   :  { %12252 = vmatmul.mubr.f32.vlgmr.msra.gmra.mrb[52].mxu1 %v551_v21  ;;  %v5367_v21 = vld [vmem:[#allocation10 + $0x448] sm:$0xff]  ;;  %v17995_v15 = vpack.c.bf16 %v5369_v39, %v5368_v10 }
 0x495   :  { %14947 = vmatpush3.bf16.msra.mxu1 %v17901_v38  ;;  %12321 = vmatprep.mubr.msk.f32.mxu1 %vm16069_vm0, %v18851_v32  ;;  %v5463_v10 = vld [vmem:[#allocation10 + $0x68] sm:$0xff] }
 0x496   :  { %15079 = vmatpush3.bf16.msra.mxu0 %v17809_v58  ;;  %14948 = vmatprep.subr.bf16.mxu1 %v16068_v0  ;;  %v17923_v58 = vpack.c.bf16 %v5187_v7, %v5186_v3 }
 0x497   :  { %15080 = vmatprep.subr.bf16.mxu0 %v16068_v0 }
 0x498   :  { %v17914_v6 = vpop.f32.mrb[94].mxu0 }
 0x499   :  { %v12008_v63 = vpop.f32.mrb[95].mxu0  ;;  %14950 = vmatpush3.bf16.msra.mxu1 %v17907_v55 }
 0x49a   :  { %15082 = vmatpush3.bf16.msra.mxu0 %v17818_v60  ;;  %14951 = vmatprep.subr.bf16.mxu1 %v16068_v0  ;;  %v17929_v60 = vpack.c.bf16 %v5189_v28, %v5188_v53  ;;  %v5371_v63 = vld [vmem:[#allocation10 + $0x468] sm:$0xff]  ;;  %v5373_v28 = vld [vmem:[#allocation10 + $0x478] sm:$0xff] }
 0x49b   :  { %15083 = vmatprep.subr.bf16.mxu0 %v16068_v0  ;;  %v18003_v53 = vpack.c.bf16 %v5371_v63, %v5370_v52  ;;  %v5465_v63 = vld [vmem:[#allocation10 + $0x78] sm:$0xff] }
 0x49d   :  { %14953 = vmatpush3.bf16.msra.mxu1 %v17917_v48 }
 0x49e   :  { %15085 = vmatpush3.bf16.msra.mxu0 %v17826_v11  ;;  %14954 = vmatprep.subr.bf16.mxu1 %v16068_v0  ;;  %v17936_v11 = vpack.c.bf16 %v5191_v50, %v5190_v12 }
 0x49f   :  { %15086 = vmatprep.subr.bf16.mxu0 %v16068_v0 }
 0x4a1   :  { %14956 = vmatpush3.bf16.msra.mxu1 %v17923_v58 }
 0x4a2   :  { %15088 = vmatpush3.bf16.msra.mxu0 %v17833_v37  ;;  %14957 = vmatprep.subr.bf16.mxu1 %v16068_v0 }
 0x4a3   :  { %15113 = vmatprep.subr.bf16.mxu0 %v16068_v0 }
 0x4a5   :  { %14959 = vmatpush3.bf16.msra.mxu1 %v17929_v60  ;;  %12497 = vmatmul.mubr.f32.vlgmr.msra.gmra.mrb[108].mxu0 %v17465_v57 }
 0x4a6   :  { %15115 = vmatpush3.bf16.msra.mxu0 %v17839_v4  ;;  %14960 = vmatprep.subr.bf16.mxu1 %v16068_v0  ;;  %v5194_v4 = vld [vmem:[#allocation10 + $0x370] sm:$0xff] }
 0x4a7   :  { %v4023_v54 = vpop.f32.mrb[40].mxu1  ;;  %15116 = vmatprep.subr.bf16.mxu0 %v16068_v0  ;;  %12566 = vmatprep.mubr.msk.f32.mxu0 %vm16069_vm0, %v18851_v32  ;;  %v17952_v42 = vpack.c.bf16 %v5195_v51, %v5194_v4  ;;  %v5453_v4 = vld [vmem:[#allocation10 + $0x18] sm:$0xff]  ;;  %v5455_v51 = vld [vmem:[#allocation10 + $0x28] sm:$0xff] }
 0x4a8   :  { %v4024_v37 = vadd.f32 %v4023_v54, %v17730_v1  ;;  %v11833_v35 = vpop.f32.mrb[41].mxu1  ;;  %v5358_v1 = vld [vmem:[#allocation10 + $0x400] sm:$0xff]  ;;  %v5451_v54 = vld [vmem:[#allocation10 + $0x8] sm:$0xff] }
 0x4a9   :  { %14962 = vmatpush3.bf16.msra.mxu1 %v17936_v11  ;;  %v5452_v35 = vld [vmem:[#allocation10 + $0x10] sm:$0xff] }
 0x4aa   :  { %15118 = vmatpush3.bf16.msra.mxu0 %v17847_v56  ;;  %14963 = vmatprep.subr.bf16.mxu1 %v16068_v0  ;;  %v4114_v33 = vadd.f32 %v17790_v9, %v4024_v37  ;;  %v17958_v56 = vpack.c.bf16 %v5359_v18, %v5358_v1  ;;  %v5360_v9 = vld [vmem:[#allocation10 + $0x410] sm:$0xff]  ;;  %v559_v37 = vmax.f32 %v18014_v14, 0.0 }
 0x4ab   :  { %15119 = vmatprep.subr.bf16.mxu0 %v16068_v0 }
 0x4ad   :  { %14965 = vmatpush3.bf16.msra.mxu1 %v17945_v30 }
 0x4ae   :  { %15121 = vmatpush3.bf16.msra.mxu0 %v17857_v29  ;;  %14966 = vmatprep.subr.bf16.mxu1 %v16068_v0  ;;  %v17965_v29 = vpack.c.bf16 %v5361_v31, %v5360_v9  ;;  %v5456_v9 = vld [vmem:[#allocation10 + $0x30] sm:$0xff]  ;;  %v5457_v31 = vld [vmem:[#allocation10 + $0x38] sm:$0xff] }
 0x4af   :  { %15122 = vmatprep.subr.bf16.mxu0 %v16068_v0 }
 0x4b1   :  { %14968 = vmatpush3.bf16.msra.mxu1 %v17952_v42 }
 0x4b2   :  { %15124 = vmatpush3.bf16.msra.mxu0 %v17863_v34  ;;  %14993 = vmatprep.subr.bf16.mxu1 %v16068_v0  ;;  %v5362_v34 = vld [vmem:[#allocation10 + $0x420] sm:$0xff] }
 0x4b3   :  { %15125 = vmatprep.subr.bf16.mxu0 %v16068_v0  ;;  %v17975_v44 = vpack.c.bf16 %v5363_v17, %v5362_v34  ;;  %v5458_v34 = vld [vmem:[#allocation10 + $0x40] sm:$0xff]  ;;  %v5459_v17 = vld [vmem:[#allocation10 + $0x48] sm:$0xff] }
 0x4b4   :  { %12322 = vmatmul.mubr.f32.vlgmr.msra.gmra.mrb[54].mxu1 %v17557_v19 }
 0x4b5   :  { %14995 = vmatpush3.bf16.msra.mxu1 %v17958_v56  ;;  %12391 = vmatprep.mubr.msk.f32.mxu1 %vm16069_vm0, %v18851_v32 }
 0x4b6   :  { %15127 = vmatpush3.bf16.msra.mxu0 %v17869_v59  ;;  %14996 = vmatprep.subr.bf16.mxu1 %v16068_v0  ;;  %v17981_v59 = vpack.c.bf16 %v5365_v2, %v5364_v27  ;;  %v5460_v2 = vld [vmem:[#allocation10 + $0x50] sm:$0xff] }
 0x4b7   :  { %15128 = vmatprep.subr.bf16.mxu0 %v16068_v0 }
 0x4b8   :  { %v17972_v47 = vpop.f32.mrb[96].mxu0 }
 0x4b9   :  { %v12078_v41 = vpop.f32.mrb[97].mxu0  ;;  %14998 = vmatpush3.bf16.msra.mxu1 %v17965_v29 }
 0x4ba   :  { %15130 = vmatpush3.bf16.msra.mxu0 %v17877_v43  ;;  %14999 = vmatprep.subr.bf16.mxu1 %v16068_v0  ;;  %v17989_v43 = vpack.c.bf16 %v5367_v21, %v5366_v23  ;;  %v18864_v41 = vld [vmem:[#allocation27_spill] sm:$0xff]  ;;  %v5461_v23 = vld [vmem:[#allocation10 + $0x58] sm:$0xff] }
 0x4bb   :  { %15131 = vmatprep.subr.bf16.mxu0 %v16068_v0  ;;  %v457_v27 = vadd.f32 %v17704_v36, %v18864_v41  ;;  %v18059_v21 = vpack.c.bf16 %v5461_v23, %v5460_v2 }
 0x4bd   :  { %15001 = vmatpush3.bf16.msra.mxu1 %v17975_v44 }
 0x4be   :  { %15133 = vmatpush3.bf16.msra.mxu0 %v17887_v62  ;;  %15002 = vmatprep.subr.bf16.mxu1 %v16068_v0  ;;  %v561_v62 = vmax.f32 %v427_v24, 0.0  ;;  %v5462_v24 = vld [vmem:[#allocation10 + $0x60] sm:$0xff] }
 0x4bf   :  { %15134 = vmatprep.subr.bf16.mxu0 %v16068_v0  ;;  %v18067_v52 = vpack.c.bf16 %v5463_v10, %v5462_v24  ;;  %v18866_v10 = vld [vmem:[#allocation19_spill] sm:$0xff] }
 0x4c1   :  { %15004 = vmatpush3.bf16.msra.mxu1 %v17981_v59 }
 0x4c2   :  { %15136 = vmatpush3.bf16.msra.mxu0 %v17893_v20  ;;  %15005 = vmatprep.subr.bf16.mxu1 %v16068_v0 }
 0x4c3   :  { %15161 = vmatprep.subr.bf16.mxu0 %v16068_v0 }
 0x4c5   :  { %15007 = vmatpush3.bf16.msra.mxu1 %v17989_v43  ;;  %12567 = vmatmul.mubr.f32.vlgmr.msra.gmra.mrb[110].mxu0 %v561_v62 }
 0x4c6   :  { %15163 = vmatpush3.bf16.msra.mxu0 %v17901_v38  ;;  %15008 = vmatprep.subr.bf16.mxu1 %v16068_v0  ;;  %v5372_v38 = vld [vmem:[#allocation10 + $0x470] sm:$0xff] }
 0x4c7   :  { %v4198_v3 = vpop.f32.mrb[42].mxu1  ;;  %15164 = vmatprep.subr.bf16.mxu0 %v16068_v0  ;;  %12636 = vmatprep.mubr.msk.f32.mxu0 %vm16069_vm0, %v18851_v32  ;;  %v18010_v50 = vpack.c.bf16 %v5373_v28, %v5372_v38  ;;  %v5714_v38 = vld [vmem:[#allocation10 + $0x188] sm:$0xff]  ;;  %v5716_v28 = vld [vmem:[#allocation10 + $0x198] sm:$0xff] }
 0x4c8   :  { %v4202_v20 = vadd.f32 %v4198_v3, %v4114_v33  ;;  %v11903_v7 = vpop.f32.mrb[43].mxu1 }
 0x4c9   :  { %15010 = vmatpush3.bf16.msra.mxu1 %v17995_v15  ;;  %v5713_v7 = vld [vmem:[#allocation10 + $0x180] sm:$0xff] }
 0x4ca   :  { %15166 = vmatpush3.bf16.msra.mxu0 %v17907_v55  ;;  %15011 = vmatprep.subr.bf16.mxu1 %v16068_v0  ;;  %v4291_v12 = vadd.f32 %v17854_v5, %v4202_v20  ;;  %v5450_v55 = vld [vmem:[#allocation10] sm:$0xff] }
 0x4cb   :  { %15167 = vmatprep.subr.bf16.mxu0 %v16068_v0  ;;  %v18020_v5 = vpack.c.bf16 %v5451_v54, %v5450_v55  ;;  %v5720_v54 = vld [vmem:[#allocation10 + $0x1b8] sm:$0xff] }
 0x4cd   :  { %15013 = vmatpush3.bf16.msra.mxu1 %v18003_v53 }
 0x4ce   :  { %15169 = vmatpush3.bf16.msra.mxu0 %v17917_v48  ;;  %15014 = vmatprep.subr.bf16.mxu1 %v16068_v0  ;;  %v18029_v48 = vpack.c.bf16 %v5453_v4, %v5452_v35  ;;  %v5721_v35 = vld [vmem:[#allocation10 + $0x1c0] sm:$0xff]  ;;  %v5722_v4 = vld [vmem:[#allocation10 + $0x1c8] sm:$0xff] }
 0x4cf   :  { %15170 = vmatprep.subr.bf16.mxu0 %v16068_v0 }
 0x4d1   :  { %15016 = vmatpush3.bf16.msra.mxu1 %v18010_v50 }
 0x4d2   :  { %15172 = vmatpush3.bf16.msra.mxu0 %v17923_v58  ;;  %15041 = vmatprep.subr.bf16.mxu1 %v16068_v0  ;;  %v5454_v58 = vld [vmem:[#allocation10 + $0x20] sm:$0xff] }
 0x4d3   :  { %15173 = vmatprep.subr.bf16.mxu0 %v16068_v0  ;;  %v18039_v18 = vpack.c.bf16 %v5455_v51, %v5454_v58  ;;  %v18865_v58 = vld [vmem:[#allocation29_spill] sm:$0xff] }
 0x4d4   :  { %12392 = vmatmul.mubr.f32.vlgmr.msra.gmra.mrb[56].mxu1 %v559_v37  ;;  %v18110_v51 = vadd.f32 %v17704_v36, %v18865_v58 }
 0x4d5   :  { %15043 = vmatpush3.bf16.msra.mxu1 %v18020_v5  ;;  %12461 = vmatprep.mubr.msk.f32.mxu1 %vm16069_vm0, %v18851_v32 }
 0x4d6   :  { %15175 = vmatpush3.bf16.msra.mxu0 %v17929_v60  ;;  %15044 = vmatprep.subr.bf16.mxu1 %v16068_v0  ;;  %v18045_v60 = vpack.c.bf16 %v5457_v31, %v5456_v9  ;;  %v569_v9 = vmax.f32 %v18110_v51, 0.0 }
 0x4d7   :  { %15176 = vmatprep.subr.bf16.mxu0 %v16068_v0 }
 0x4d8   :  { %v18036_v33 = vpop.f32.mrb[98].mxu0 }
 0x4d9   :  { %v12148_v1 = vpop.f32.mrb[99].mxu0  ;;  %15046 = vmatpush3.bf16.msra.mxu1 %v18029_v48 }
 0x4da   :  { %15178 = vmatpush3.bf16.msra.mxu0 %v17936_v11  ;;  %15047 = vmatprep.subr.bf16.mxu1 %v16068_v0  ;;  %v18053_v11 = vpack.c.bf16 %v5459_v17, %v5458_v34  ;;  %v5723_v1 = vld [vmem:[#allocation10 + $0x1d0] sm:$0xff]  ;;  %v5726_v34 = vld [vmem:[#allocation10 + $0x1e8] sm:$0xff] }
 0x4db   :  { %15179 = vmatprep.subr.bf16.mxu0 %v16068_v0 }
 0x4dd   :  { %15049 = vmatpush3.bf16.msra.mxu1 %v18039_v18 }
 0x4de   :  { %15181 = vmatpush3.bf16.msra.mxu0 %v17945_v30  ;;  %15050 = vmatprep.subr.bf16.mxu1 %v16068_v0  ;;  %v567_v30 = vmax.f32 %v457_v27, 0.0 }
 0x4df   :  { %15182 = vmatprep.subr.bf16.mxu0 %v16068_v0 }
 0x4e1   :  { %15052 = vmatpush3.bf16.msra.mxu1 %v18045_v60 }
 0x4e2   :  { %15184 = vmatpush3.bf16.msra.mxu0 %v17952_v42  ;;  %15053 = vmatprep.subr.bf16.mxu1 %v16068_v0 }
 0x4e3   :  { %15209 = vmatprep.subr.bf16.mxu0 %v16068_v0 }
 0x4e5   :  { %15055 = vmatpush3.bf16.msra.mxu1 %v18053_v11  ;;  %12637 = vmatmul.mubr.f32.vlgmr.msra.gmra.mrb[112].mxu0 %v567_v30  ;;  %v5728_v30 = vld [vmem:[#allocation10 + $0x1f8] sm:$0xff] }
 0x4e6   :  { %15211 = vmatpush3.bf16.msra.mxu0 %v17958_v56  ;;  %15056 = vmatprep.subr.bf16.mxu1 %v16068_v0  ;;  %v5464_v56 = vld [vmem:[#allocation10 + $0x70] sm:$0xff] }
 0x4e7   :  { %v4376_v39 = vpop.f32.mrb[44].mxu1  ;;  %15212 = vmatprep.subr.bf16.mxu0 %v16068_v0  ;;  %12706 = vmatprep.mubr.msk.f32.mxu0 %vm16069_vm0, %v18851_v32  ;;  %v18074_v20 = vpack.c.bf16 %v5465_v63, %v5464_v56  ;;  %v5893_v56 = vld [vmem:[#allocation10 + $0x290] sm:$0xff]  ;;  %v5894_v63 = vld [vmem:[#allocation10 + $0x298] sm:$0xff] }
 0x4e8   :  { %v4380_v42 = vadd.f32 %v4376_v39, %v4291_v12  ;;  %v11973_v62 = vpop.f32.mrb[45].mxu1  ;;  %v5718_v12 = vld [vmem:[#allocation10 + $0x1a8] sm:$0xff]  ;;  %v422_v39 = vadd.f32 %v17704_v36, %v18866_v10  ;;  %v18154_v36 = vpack.c.bf16 %v5894_v63, %v5893_v56  ;;  %v6073_v10 = vld [vmem:[#allocation10 + $0x3a0] sm:$0xff]  ;;  %v6076_v56 = vld [vmem:[#allocation10 + $0x3b8] sm:$0xff] }
 0x4e9   :  { %15058 = vmatpush3.bf16.msra.mxu1 %v18059_v21  ;;  %v6077_v63 = vld [vmem:[#allocation10 + $0x3c0] sm:$0xff] }
 0x4ea   :  { %15214 = vmatpush3.bf16.msra.mxu0 %v17965_v29  ;;  %15059 = vmatprep.subr.bf16.mxu1 %v16068_v0  ;;  %v4468_v3 = vadd.f32 %v17914_v6, %v4380_v42  ;;  %v18080_v29 = vpack.c.bf16 %v5714_v38, %v5713_v7  ;;  %v5715_v6 = vld [vmem:[#allocation10 + $0x190] sm:$0xff]  ;;  %v5892_v42 = vld [vmem:[#allocation10 + $0x288] sm:$0xff]  ;;  %v560_v62 = vmax.f32 %v422_v39, 0.0 }
 0x4eb   :  { %15215 = vmatprep.subr.bf16.mxu0 %v16068_v0 }
 0x4ed   :  { %15061 = vmatpush3.bf16.msra.mxu1 %v18067_v52 }
 0x4ee   :  { %15217 = vmatpush3.bf16.msra.mxu0 %v17975_v44  ;;  %15062 = vmatprep.subr.bf16.mxu1 %v16068_v0  ;;  %v18088_v44 = vpack.c.bf16 %v5716_v28, %v5715_v6  ;;  %v5897_v6 = vld [vmem:[#allocation10 + $0x2b0] sm:$0xff]  ;;  %v5898_v28 = vld [vmem:[#allocation10 + $0x2b8] sm:$0xff] }
 0x4ef   :  { %15218 = vmatprep.subr.bf16.mxu0 %v16068_v0 }
 0x4f1   :  { %15064 = vmatpush3.bf16.msra.mxu1 %v18074_v20 }
 0x4f2   :  { %15220 = vmatpush3.bf16.msra.mxu0 %v17981_v59  ;;  %15089 = vmatprep.subr.bf16.mxu1 %v16068_v0  ;;  %v5717_v59 = vld [vmem:[#allocation10 + $0x1a0] sm:$0xff] }
 0x4f3   :  { %15221 = vmatprep.subr.bf16.mxu0 %v16068_v0  ;;  %v18098_v49 = vpack.c.bf16 %v5718_v12, %v5717_v59  ;;  %v5899_v59 = vld [vmem:[#allocation10 + $0x2c0] sm:$0xff]  ;;  %v5900_v12 = vld [vmem:[#allocation10 + $0x2c8] sm:$0xff] }
 0x4f4   :  { %12462 = vmatmul.mubr.f32.vlgmr.msra.gmra.mrb[58].mxu1 %v553_v8  ;;  %v5719_v8 = vld [vmem:[#allocation10 + $0x1b0] sm:$0xff] }
 0x4f5   :  { %15091 = vmatpush3.bf16.msra.mxu1 %v18080_v29  ;;  %12531 = vmatprep.mubr.msk.f32.mxu1 %vm16069_vm0, %v18851_v32 }
 0x4f6   :  { %15223 = vmatpush3.bf16.msra.mxu0 %v17989_v43  ;;  %15092 = vmatprep.subr.bf16.mxu1 %v16068_v0  ;;  %v18104_v43 = vpack.c.bf16 %v5720_v54, %v5719_v8  ;;  %v5902_v8 = vld [vmem:[#allocation10 + $0x2d8] sm:$0xff]  ;;  %v5903_v54 = vld [vmem:[#allocation10 + $0x2e0] sm:$0xff] }
 0x4f7   :  { %15224 = vmatprep.subr.bf16.mxu0 %v16068_v0 }
 0x4f8   :  { %v18095_v46 = vpop.f32.mrb[100].mxu0 }
 0x4f9   :  { %v12218_v55 = vpop.f32.mrb[101].mxu0  ;;  %15094 = vmatpush3.bf16.msra.mxu1 %v18088_v44 }
 0x4fa   :  { %15226 = vmatpush3.bf16.msra.mxu0 %v17995_v15  ;;  %15095 = vmatprep.subr.bf16.mxu1 %v16068_v0  ;;  %v18114_v15 = vpack.c.bf16 %v5722_v4, %v5721_v35  ;;  %v5901_v55 = vld [vmem:[#allocation10 + $0x2d0] sm:$0xff]  ;;  %v5904_v35 = vld [vmem:[#allocation10 + $0x2e8] sm:$0xff] }
 0x4fb   :  { %15227 = vmatprep.subr.bf16.mxu0 %v16068_v0 }
 0x4fd   :  { %15097 = vmatpush3.bf16.msra.mxu1 %v18098_v49 }
 0x4fe   :  { %15229 = vmatpush3.bf16.msra.mxu0 %v18003_v53  ;;  %15098 = vmatprep.subr.bf16.mxu1 %v16068_v0  ;;  %v5724_v53 = vld [vmem:[#allocation10 + $0x1d8] sm:$0xff] }
 0x4ff   :  { %15230 = vmatprep.subr.bf16.mxu0 %v16068_v0  ;;  %v18123_v31 = vpack.c.bf16 %v5724_v53, %v5723_v1  ;;  %v5906_v1 = vld [vmem:[#allocation10 + $0x2f8] sm:$0xff] }
 0x501   :  { %15100 = vmatpush3.bf16.msra.mxu1 %v18104_v43 }
 0x502   :  { %15232 = vmatpush3.bf16.msra.mxu0 %v18010_v50  ;;  %15101 = vmatprep.subr.bf16.mxu1 %v16068_v0  ;;  %v5725_v50 = vld [vmem:[#allocation10 + $0x1e0] sm:$0xff] }
 0x503   :  { %15257 = vmatprep.subr.bf16.mxu0 %v16068_v0  ;;  %v18131_v2 = vpack.c.bf16 %v5726_v34, %v5725_v50  ;;  %v18867_v50 = vld [vmem:[#allocation21_spill] sm:$0xff] }
 0x505   :  { %15103 = vmatpush3.bf16.msra.mxu1 %v18114_v15  ;;  %12707 = vmatmul.mubr.f32.vlgmr.msra.gmra.mrb[114].mxu0 %v569_v9 }
 0x506   :  { %15259 = vmatpush3.bf16.msra.mxu0 %v18020_v5  ;;  %15104 = vmatprep.subr.bf16.mxu1 %v16068_v0  ;;  %v5727_v5 = vld [vmem:[#allocation10 + $0x1f0] sm:$0xff] }
 0x507   :  { %v4553_v17 = vpop.f32.mrb[46].mxu1  ;;  %15260 = vmatprep.subr.bf16.mxu0 %v16068_v0  ;;  %12776 = vmatprep.mubr.msk.f32.mxu0 %vm16069_vm0, %v18851_v32  ;;  %v18140_v24 = vpack.c.bf16 %v5728_v30, %v5727_v5  ;;  %v6071_v5 = vld [vmem:[#allocation10 + $0x390] sm:$0xff]  ;;  %v6072_v30 = vld [vmem:[#allocation10 + $0x398] sm:$0xff] }
 0x508   :  { %v4557_v41 = vadd.f32 %v4553_v17, %v4468_v3  ;;  %v12043_v27 = vpop.f32.mrb[47].mxu1  ;;  %v6070_v17 = vld [vmem:[#allocation10 + $0x388] sm:$0xff] }
 0x509   :  { %15106 = vmatpush3.bf16.msra.mxu1 %v18123_v31 }
 0x50a   :  { %v18134_v23 = vadd.f32 %v17972_v47, %v4557_v41  ;;  %15262 = vmatpush3.bf16.msra.mxu0 %v18029_v48  ;;  %15107 = vmatprep.subr.bf16.mxu1 %v16068_v0  ;;  %v5891_v47 = vld [vmem:[#allocation10 + $0x280] sm:$0xff] }
 0x50b   :  { %15263 = vmatprep.subr.bf16.mxu0 %v16068_v0  ;;  %v18148_v48 = vpack.c.bf16 %v5892_v42, %v5891_v47 }
 0x50d   :  { %15109 = vmatpush3.bf16.msra.mxu1 %v18131_v2 }
 0x50e   :  { %15265 = vmatpush3.bf16.msra.mxu0 %v18039_v18  ;;  %15110 = vmatprep.subr.bf16.mxu1 %v16068_v0  ;;  %v5895_v18 = vld [vmem:[#allocation10 + $0x2a0] sm:$0xff] }
 0x50f   :  { %15266 = vmatprep.subr.bf16.mxu0 %v16068_v0 }
 0x511   :  { %15112 = vmatpush3.bf16.msra.mxu1 %v18140_v24 }
 0x512   :  { %15268 = vmatpush3.bf16.msra.mxu0 %v18045_v60  ;;  %15137 = vmatprep.subr.bf16.mxu1 %v16068_v0  ;;  %v5896_v60 = vld [vmem:[#allocation10 + $0x2a8] sm:$0xff] }
 0x513   :  { %15269 = vmatprep.subr.bf16.mxu0 %v16068_v0  ;;  %v18164_v38 = vpack.c.bf16 %v5896_v60, %v5895_v18  ;;  %v6078_v18 = vld [vmem:[#allocation10 + $0x3c8] sm:$0xff]  ;;  %v6079_v60 = vld [vmem:[#allocation10 + $0x3d0] sm:$0xff] }
 0x514   :  { %12532 = vmatmul.mubr.f32.vlgmr.msra.gmra.mrb[60].mxu1 %v560_v62  ;;  %v6075_v62 = vld [vmem:[#allocation10 + $0x3b0] sm:$0xff] }
 0x515   :  { %15139 = vmatpush3.bf16.msra.mxu1 %v18148_v48  ;;  %12601 = vmatprep.mubr.msk.f32.mxu1 %vm16069_vm0, %v18851_v32 }
 0x516   :  { %15271 = vmatpush3.bf16.msra.mxu0 %v18053_v11  ;;  %15140 = vmatprep.subr.bf16.mxu1 %v16068_v0  ;;  %v18170_v11 = vpack.c.bf16 %v5898_v28, %v5897_v6  ;;  %v6081_v6 = vld [vmem:[#allocation10 + $0x3e0] sm:$0xff]  ;;  %v6082_v28 = vld [vmem:[#allocation10 + $0x3e8] sm:$0xff] }
 0x517   :  { %15272 = vmatprep.subr.bf16.mxu0 %v16068_v0 }
 0x518   :  { %v18161_v3 = vpop.f32.mrb[102].mxu0 }
 0x519   :  { %v12288_v7 = vpop.f32.mrb[103].mxu0  ;;  %15142 = vmatpush3.bf16.msra.mxu1 %v18154_v36 }
 0x51a   :  { %15274 = vmatpush3.bf16.msra.mxu0 %v18059_v21  ;;  %15143 = vmatprep.subr.bf16.mxu1 %v16068_v0  ;;  %v18176_v21 = vpack.c.bf16 %v5900_v12, %v5899_v59  ;;  %v6080_v7 = vld [vmem:[#allocation10 + $0x3d8] sm:$0xff] }
 0x51b   :  { %15275 = vmatprep.subr.bf16.mxu0 %v16068_v0 }
 0x51d   :  { %15145 = vmatpush3.bf16.msra.mxu1 %v18164_v38 }
 0x51e   :  { %15277 = vmatpush3.bf16.msra.mxu0 %v18067_v52  ;;  %15146 = vmatprep.subr.bf16.mxu1 %v16068_v0  ;;  %v18183_v52 = vpack.c.bf16 %v5902_v8, %v5901_v55  ;;  %v18256_v55 = vpack.c.bf16 %v6082_v28, %v6081_v6  ;;  %v6084_v8 = vld [vmem:[#allocation10 + $0x3f8] sm:$0xff] }
 0x51f   :  { %15278 = vmatprep.subr.bf16.mxu0 %v16068_v0 }
 0x521   :  { %15148 = vmatpush3.bf16.msra.mxu1 %v18170_v11 }
 0x522   :  { %15280 = vmatpush3.bf16.msra.mxu0 %v18074_v20  ;;  %15149 = vmatprep.subr.bf16.mxu1 %v16068_v0 }
 0x523   :  { %15305 = vmatprep.subr.bf16.mxu0 %v16068_v0 }
 0x525   :  { %15151 = vmatpush3.bf16.msra.mxu1 %v18176_v21  ;;  %12777 = vmatmul.mubr.f32.vlgmr.msra.gmra.mrb[116].mxu0 %v17465_v57  ;;  %v18194_v57 = vpack.c.bf16 %v5904_v35, %v5903_v54 }
 0x526   :  { %15307 = vmatpush3.bf16.msra.mxu0 %v18080_v29  ;;  %15152 = vmatprep.subr.bf16.mxu1 %v16068_v0  ;;  %v5905_v29 = vld [vmem:[#allocation10 + $0x2f0] sm:$0xff] }
 0x527   :  { %v4751_v4 = vpop.f32.mrb[48].mxu1  ;;  %15308 = vmatprep.subr.bf16.mxu0 %v16068_v0  ;;  %12846 = vmatprep.mubr.msk.f32.mxu0 %vm16069_vm0, %v18851_v32  ;;  %v18200_v53 = vpack.c.bf16 %v5906_v1, %v5905_v29  ;;  %v6269_v1 = vld [vmem:[#allocation10 + $0x90] sm:$0xff] }
 0x528   :  { %v18191_v20 = vadd.f32 %v18036_v33, %v4751_v4  ;;  %v12113_v58 = vpop.f32.mrb[49].mxu1  ;;  %v18205_v33 = vld [vmem:[%s18834_s2] ss:$0 sm:$0xff] }
 0x529   :  { %15154 = vmatpush3.bf16.msra.mxu1 %v18183_v52  ;;  %v432_v34 = vadd.f32 %v18205_v33, %v18867_v50  ;;  %v18868_v4 = vld [vmem:[#allocation26_spill] sm:$0xff]  ;;  %v6268_v58 = vld [vmem:[#allocation10 + $0x88] sm:$0xff]  ;;  %v6270_v50 = vld [vmem:[#allocation10 + $0x98] sm:$0xff] }
 0x52a   :  { %15310 = vmatpush3.bf16.msra.mxu0 %v18088_v44  ;;  %15155 = vmatprep.subr.bf16.mxu1 %v16068_v0  ;;  %v6069_v44 = vld [vmem:[#allocation10 + $0x380] sm:$0xff] }
 0x52b   :  { %15311 = vmatprep.subr.bf16.mxu0 %v16068_v0  ;;  %v18213_v41 = vpack.c.bf16 %v6070_v17, %v6069_v44  ;;  %v562_v27 = vmax.f32 %v432_v34, 0.0  ;;  %v6271_v34 = vld [vmem:[#allocation10 + $0xa0] sm:$0xff] }
 0x52d   :  { %15157 = vmatpush3.bf16.msra.mxu1 %v18194_v57 }
 0x52e   :  { %15313 = vmatpush3.bf16.msra.mxu0 %v18098_v49  ;;  %15158 = vmatprep.subr.bf16.mxu1 %v16068_v0  ;;  %v18219_v49 = vpack.c.bf16 %v6072_v30, %v6071_v5  ;;  %v6273_v5 = vld [vmem:[#allocation10 + $0xb0] sm:$0xff]  ;;  %v6274_v30 = vld [vmem:[#allocation10 + $0xb8] sm:$0xff] }
 0x52f   :  { %15314 = vmatprep.subr.bf16.mxu0 %v16068_v0 }
 0x531   :  { %15160 = vmatpush3.bf16.msra.mxu1 %v18200_v53 }
 0x532   :  { %15316 = vmatpush3.bf16.msra.mxu0 %v18104_v43  ;;  %15185 = vmatprep.subr.bf16.mxu1 %v16068_v0  ;;  %v6074_v43 = vld [vmem:[#allocation10 + $0x3a8] sm:$0xff] }
 0x533   :  { %15317 = vmatprep.subr.bf16.mxu0 %v16068_v0  ;;  %v18229_v42 = vpack.c.bf16 %v6074_v43, %v6073_v10  ;;  %v6275_v10 = vld [vmem:[#allocation10 + $0xc0] sm:$0xff]  ;;  %v6276_v43 = vld [vmem:[#allocation10 + $0xc8] sm:$0xff] }
 0x534   :  { %12602 = vmatmul.mubr.f32.vlgmr.msra.gmra.mrb[62].mxu1 %v562_v27 }
 0x535   :  { %15187 = vmatpush3.bf16.msra.mxu1 %v18213_v41  ;;  %12671 = vmatprep.mubr.msk.f32.mxu1 %vm16069_vm0, %v18851_v32 }
 0x536   :  { %15319 = vmatpush3.bf16.msra.mxu0 %v18114_v15  ;;  %15188 = vmatprep.subr.bf16.mxu1 %v16068_v0  ;;  %v18235_v15 = vpack.c.bf16 %v6076_v56, %v6075_v62  ;;  %v6277_v56 = vld [vmem:[#allocation10 + $0xd0] sm:$0xff] }
 0x537   :  { %15320 = vmatprep.subr.bf16.mxu0 %v16068_v0 }
 0x538   :  { %v18226_v39 = vpop.f32.mrb[104].mxu0 }
 0x539   :  { %v12358_v47 = vpop.f32.mrb[105].mxu0  ;;  %15190 = vmatpush3.bf16.msra.mxu1 %v18219_v49 }
 0x53a   :  { %15322 = vmatpush3.bf16.msra.mxu0 %v18123_v31  ;;  %15191 = vmatprep.subr.bf16.mxu1 %v16068_v0  ;;  %v18241_v31 = vpack.c.bf16 %v6078_v18, %v6077_v63  ;;  %v18869_v47 = vld [vmem:[#allocation22_spill] sm:$0xff] }
 0x53b   :  { %15323 = vmatprep.subr.bf16.mxu0 %v16068_v0  ;;  %v18299_v62 = vadd.f32 %v18205_v33, %v18869_v47 }
 0x53d   :  { %15193 = vmatpush3.bf16.msra.mxu1 %v18229_v42  ;;  %v564_v63 = vmax.f32 %v18299_v62, 0.0 }
 0x53e   :  { %15325 = vmatpush3.bf16.msra.mxu0 %v18131_v2  ;;  %15194 = vmatprep.subr.bf16.mxu1 %v16068_v0  ;;  %v18247_v2 = vpack.c.bf16 %v6080_v7, %v6079_v60  ;;  %v6280_v60 = vld [vmem:[#allocation10 + $0xe8] sm:$0xff] }
 0x53f   :  { %15326 = vmatprep.subr.bf16.mxu0 %v16068_v0 }
 0x541   :  { %15196 = vmatpush3.bf16.msra.mxu1 %v18235_v15 }
 0x542   :  { %15328 = vmatpush3.bf16.msra.mxu0 %v18140_v24  ;;  %15197 = vmatprep.subr.bf16.mxu1 %v16068_v0 }
 0x543   :  { %15353 = vmatprep.subr.bf16.mxu0 %v16068_v0 }
 0x545   :  { %15199 = vmatpush3.bf16.msra.mxu1 %v18241_v31  ;;  %12847 = vmatmul.mubr.f32.vlgmr.msra.gmra.mrb[118].mxu0 %v562_v27 }
 0x546   :  { %15355 = vmatpush3.bf16.msra.mxu0 %v18148_v48  ;;  %15200 = vmatprep.subr.bf16.mxu1 %v16068_v0  ;;  %v6083_v48 = vld [vmem:[#allocation10 + $0x3f0] sm:$0xff] }
 0x547   :  { %v4908_v59 = vpop.f32.mrb[50].mxu1  ;;  %15356 = vmatprep.subr.bf16.mxu0 %v16068_v0  ;;  %12916 = vmatprep.mubr.msk.f32.mxu0 %vm16069_vm0, %v18851_v32  ;;  %v18263_v35 = vpack.c.bf16 %v6084_v8, %v6083_v48  ;;  %v6424_v8 = vld [vmem:[#allocation10 + $0x100] sm:$0xff] }
 0x548   :  { %v4912_v24 = vadd.f32 %v4908_v59, %v18191_v20  ;;  %v12183_v12 = vpop.f32.mrb[51].mxu1  ;;  %v462_v20 = vadd.f32 %v18205_v33, %v18868_v4  ;;  %v6427_v4 = vld [vmem:[#allocation10 + $0x118] sm:$0xff] }
 0x549   :  { %15202 = vmatpush3.bf16.msra.mxu1 %v18247_v2 }
 0x54a   :  { %15358 = vmatpush3.bf16.msra.mxu0 %v18154_v36  ;;  %15203 = vmatprep.subr.bf16.mxu1 %v16068_v0  ;;  %v5000_v54 = vadd.f32 %v18095_v46, %v4912_v24  ;;  %v6267_v36 = vld [vmem:[#allocation10 + $0x80] sm:$0xff]  ;;  %v568_v29 = vmax.f32 %v462_v20, 0.0  ;;  %v6282_v24 = vld [vmem:[#allocation10 + $0xf8] sm:$0xff]  ;;  %v6429_v20 = vld [vmem:[#allocation10 + $0x128] sm:$0xff] }
 0x54b   :  { %15359 = vmatprep.subr.bf16.mxu0 %v16068_v0  ;;  %v18271_v46 = vpack.c.bf16 %v6268_v58, %v6267_v36 }
 0x54d   :  { %15205 = vmatpush3.bf16.msra.mxu1 %v18256_v55 }
 0x54e   :  { %15361 = vmatpush3.bf16.msra.mxu0 %v18164_v38  ;;  %15206 = vmatprep.subr.bf16.mxu1 %v16068_v0  ;;  %v18277_v38 = vpack.c.bf16 %v6270_v50, %v6269_v1  ;;  %v6432_v1 = vld [vmem:[#allocation10 + $0x140] sm:$0xff]  ;;  %v6433_v50 = vld [vmem:[#allocation10 + $0x148] sm:$0xff] }
 0x54f   :  { %15362 = vmatprep.subr.bf16.mxu0 %v16068_v0 }
 0x551   :  { %15208 = vmatpush3.bf16.msra.mxu1 %v18263_v35 }
 0x552   :  { %15364 = vmatpush3.bf16.msra.mxu0 %v18170_v11  ;;  %15233 = vmatprep.subr.bf16.mxu1 %v16068_v0  ;;  %v6272_v11 = vld [vmem:[#allocation10 + $0xa8] sm:$0xff] }
 0x553   :  { %15365 = vmatprep.subr.bf16.mxu0 %v16068_v0  ;;  %v18287_v27 = vpack.c.bf16 %v6272_v11, %v6271_v34  ;;  %v18870_v34 = vld [vmem:[#allocation28_spill] sm:$0xff] }
 0x554   :  { %12672 = vmatmul.mubr.f32.vlgmr.msra.gmra.mrb[64].mxu1 %v568_v29  ;;  %v6431_v29 = vld [vmem:[#allocation10 + $0x138] sm:$0xff]  ;;  %v472_v11 = vadd.f32 %v18205_v33, %v18870_v34 }
 0x555   :  { %15235 = vmatpush3.bf16.msra.mxu1 %v18271_v46  ;;  %12741 = vmatprep.mubr.msk.f32.mxu1 %vm16069_vm0, %v18851_v32 }
 0x556   :  { %15367 = vmatpush3.bf16.msra.mxu0 %v18176_v21  ;;  %15236 = vmatprep.subr.bf16.mxu1 %v16068_v0  ;;  %v18293_v21 = vpack.c.bf16 %v6274_v30, %v6273_v5  ;;  %v6435_v5 = vld [vmem:[#allocation10 + $0x158] sm:$0xff] }
 0x557   :  { %15368 = vmatprep.subr.bf16.mxu0 %v16068_v0 }
 0x558   :  { %v18284_v44 = vpop.f32.mrb[106].mxu0 }
 0x559   :  { %v12428_v17 = vpop.f32.mrb[107].mxu0  ;;  %15238 = vmatpush3.bf16.msra.mxu1 %v18277_v38 }
 0x55a   :  { %15370 = vmatpush3.bf16.msra.mxu0 %v18183_v52  ;;  %15239 = vmatprep.subr.bf16.mxu1 %v16068_v0  ;;  %v18303_v52 = vpack.c.bf16 %v6276_v43, %v6275_v10  ;;  %v6434_v17 = vld [vmem:[#allocation10 + $0x150] sm:$0xff]  ;;  %v6436_v10 = vld [vmem:[#allocation10 + $0x160] sm:$0xff]  ;;  %v6437_v43 = vld [vmem:[#allocation10 + $0x168] sm:$0xff] }
 0x55b   :  { %15371 = vmatprep.subr.bf16.mxu0 %v16068_v0  ;;  %v18371_v30 = vpack.c.bf16 %v6435_v5, %v6434_v17  ;;  %v18871_v17 = vld [vmem:[#allocation23_spill] sm:$0xff] }
 0x55c   :  { %v437_v5 = vadd.f32 %v18205_v33, %v18871_v17  ;;  %v6965_v17 = vld [vmem:[#allocation10 + $0x448] sm:$0xff] }
 0x55d   :  { %15241 = vmatpush3.bf16.msra.mxu1 %v18287_v27 }
 0x55e   :  { %15373 = vmatpush3.bf16.msra.mxu0 %v18194_v57  ;;  %15242 = vmatprep.subr.bf16.mxu1 %v16068_v0  ;;  %v6278_v57 = vld [vmem:[#allocation10 + $0xd8] sm:$0xff] }
 0x55f   :  { %15374 = vmatprep.subr.bf16.mxu0 %v16068_v0  ;;  %v18312_v18 = vpack.c.bf16 %v6278_v57, %v6277_v56  ;;  %v18379_v57 = vpack.c.bf16 %v6437_v43, %v6436_v10  ;;  %v6779_v10 = vld [vmem:[#allocation10 + $0x308] sm:$0xff]  ;;  %v563_v43 = vmax.f32 %v437_v5, 0.0  ;;  %v18872_v5 = vld [vmem:[#allocation25_spill] sm:$0xff] }
 0x561   :  { %15244 = vmatpush3.bf16.msra.mxu1 %v18293_v21 }
 0x562   :  { %15376 = vmatpush3.bf16.msra.mxu0 %v18200_v53  ;;  %15245 = vmatprep.subr.bf16.mxu1 %v16068_v0  ;;  %v6279_v53 = vld [vmem:[#allocation10 + $0xe0] sm:$0xff] }
 0x563   :  { %15401 = vmatprep.subr.bf16.mxu0 %v16068_v0  ;;  %v18320_v59 = vpack.c.bf16 %v6280_v60, %v6279_v53  ;;  %v6439_v53 = vld [vmem:[#allocation10 + $0x178] sm:$0xff] }
 0x565   :  { %15247 = vmatpush3.bf16.msra.mxu1 %v18303_v52  ;;  %12917 = vmatmul.mubr.f32.vlgmr.msra.gmra.mrb[120].mxu0 %v564_v63 }
 0x566   :  { %15403 = vmatpush3.bf16.msra.mxu0 %v18213_v41  ;;  %15248 = vmatprep.subr.bf16.mxu1 %v16068_v0  ;;  %v6281_v41 = vld [vmem:[#allocation10 + $0xf0] sm:$0xff] }
 0x567   :  { %v5085_v7 = vpop.f32.mrb[52].mxu1  ;;  %15404 = vmatprep.subr.bf16.mxu0 %v16068_v0  ;;  %12986 = vmatprep.mubr.msk.f32.mxu0 %vm16069_vm0, %v18851_v32  ;;  %v18327_v48 = vpack.c.bf16 %v6282_v24, %v6281_v41  ;;  %v6604_v41 = vld [vmem:[#allocation10 + $0x218] sm:$0xff]  ;;  %v6606_v24 = vld [vmem:[#allocation10 + $0x228] sm:$0xff] }
 0x568   :  { %v5089_v6 = vadd.f32 %v5085_v7, %v5000_v54  ;;  %v12253_v28 = vpop.f32.mrb[53].mxu1  ;;  %v6425_v54 = vld [vmem:[#allocation10 + $0x108] sm:$0xff] }
 0x569   :  { %15250 = vmatpush3.bf16.msra.mxu1 %v18312_v18  ;;  %v6602_v28 = vld [vmem:[#allocation10 + $0x208] sm:$0xff] }
 0x56a   :  { %15406 = vmatpush3.bf16.msra.mxu0 %v18219_v49  ;;  %15251 = vmatprep.subr.bf16.mxu1 %v16068_v0  ;;  %v5178_v12 = vadd.f32 %v18161_v3, %v5089_v6  ;;  %v18333_v49 = vpack.c.bf16 %v6425_v54, %v6424_v8  ;;  %v6426_v3 = vld [vmem:[#allocation10 + $0x110] sm:$0xff]  ;;  %v6601_v6 = vld [vmem:[#allocation10 + $0x200] sm:$0xff] }
 0x56b   :  { %15407 = vmatprep.subr.bf16.mxu0 %v16068_v0 }
 0x56d   :  { %15253 = vmatpush3.bf16.msra.mxu1 %v18320_v59 }
 0x56e   :  { %15409 = vmatpush3.bf16.msra.mxu0 %v18229_v42  ;;  %15254 = vmatprep.subr.bf16.mxu1 %v16068_v0  ;;  %v18341_v42 = vpack.c.bf16 %v6427_v4, %v6426_v3  ;;  %v6607_v3 = vld [vmem:[#allocation10 + $0x230] sm:$0xff]  ;;  %v6608_v4 = vld [vmem:[#allocation10 + $0x238] sm:$0xff] }
 0x56f   :  { %15410 = vmatprep.subr.bf16.mxu0 %v16068_v0 }
 0x571   :  { %15256 = vmatpush3.bf16.msra.mxu1 %v18327_v48 }
 0x572   :  { %15412 = vmatpush3.bf16.msra.mxu0 %v18235_v15  ;;  %15281 = vmatprep.subr.bf16.mxu1 %v16068_v0  ;;  %v6428_v15 = vld [vmem:[#allocation10 + $0x120] sm:$0xff] }
 0x573   :  { %15413 = vmatprep.subr.bf16.mxu0 %v16068_v0  ;;  %v18351_v61 = vpack.c.bf16 %v6429_v20, %v6428_v15  ;;  %v6609_v15 = vld [vmem:[#allocation10 + $0x240] sm:$0xff]  ;;  %v6610_v20 = vld [vmem:[#allocation10 + $0x248] sm:$0xff] }
 0x574   :  { %12742 = vmatmul.mubr.f32.vlgmr.msra.gmra.mrb[66].mxu1 %v556_v13  ;;  %v6430_v13 = vld [vmem:[#allocation10 + $0x130] sm:$0xff] }
 0x575   :  { %15283 = vmatpush3.bf16.msra.mxu1 %v18333_v49  ;;  %12811 = vmatprep.mubr.msk.f32.mxu1 %vm16069_vm0, %v18851_v32 }
 0x576   :  { %15415 = vmatpush3.bf16.msra.mxu0 %v18241_v31  ;;  %15284 = vmatprep.subr.bf16.mxu1 %v16068_v0  ;;  %v18357_v31 = vpack.c.bf16 %v6431_v29, %v6430_v13  ;;  %v6612_v13 = vld [vmem:[#allocation10 + $0x258] sm:$0xff]  ;;  %v6613_v29 = vld [vmem:[#allocation10 + $0x260] sm:$0xff] }
 0x577   :  { %15416 = vmatprep.subr.bf16.mxu0 %v16068_v0 }
 0x578   :  { %v18348_v36 = vpop.f32.mrb[108].mxu0 }
 0x579   :  { %v12498_v58 = vpop.f32.mrb[109].mxu0  ;;  %15286 = vmatpush3.bf16.msra.mxu1 %v18341_v42 }
 0x57a   :  { %15418 = vmatpush3.bf16.msra.mxu0 %v18247_v2  ;;  %15287 = vmatprep.subr.bf16.mxu1 %v16068_v0  ;;  %v18365_v2 = vpack.c.bf16 %v6433_v50, %v6432_v1  ;;  %v6611_v58 = vld [vmem:[#allocation10 + $0x250] sm:$0xff]  ;;  %v6614_v1 = vld [vmem:[#allocation10 + $0x268] sm:$0xff] }
 0x57b   :  { %15419 = vmatprep.subr.bf16.mxu0 %v16068_v0  ;;  %v18439_v45 = vpack.c.bf16 %v6614_v1, %v6613_v29  ;;  %v6959_v29 = vld [vmem:[#allocation10 + $0x418] sm:$0xff]  ;;  %v6961_v1 = vld [vmem:[#allocation10 + $0x428] sm:$0xff] }
 0x57d   :  { %15289 = vmatpush3.bf16.msra.mxu1 %v18351_v61 }
 0x57e   :  { %15421 = vmatpush3.bf16.msra.mxu0 %v18256_v55  ;;  %15290 = vmatprep.subr.bf16.mxu1 %v16068_v0  ;;  %v570_v55 = vmax.f32 %v472_v11, 0.0 }
 0x57f   :  { %15422 = vmatprep.subr.bf16.mxu0 %v16068_v0 }
 0x581   :  { %15292 = vmatpush3.bf16.msra.mxu1 %v18357_v31 }
 0x582   :  { %15424 = vmatpush3.bf16.msra.mxu0 %v18263_v35  ;;  %15293 = vmatprep.subr.bf16.mxu1 %v16068_v0 }
 0x583   :  { %15449 = vmatprep.subr.bf16.mxu0 %v16068_v0 }
 0x585   :  { %15295 = vmatpush3.bf16.msra.mxu1 %v18365_v2  ;;  %12987 = vmatmul.mubr.f32.vlgmr.msra.gmra.mrb[122].mxu0 %v570_v55  ;;  %v6778_v55 = vld [vmem:[#allocation10 + $0x300] sm:$0xff] }
 0x586   :  { %15451 = vmatpush3.bf16.msra.mxu0 %v18271_v46  ;;  %15296 = vmatprep.subr.bf16.mxu1 %v16068_v0  ;;  %v6438_v46 = vld [vmem:[#allocation10 + $0x170] sm:$0xff] }
 0x587   :  { %v5262_v47 = vpop.f32.mrb[54].mxu1  ;;  %15452 = vmatprep.subr.bf16.mxu0 %v16068_v0  ;;  %13056 = vmatprep.mubr.msk.f32.mxu0 %vm16069_vm0, %v18851_v32  ;;  %v18386_v7 = vpack.c.bf16 %v6439_v53, %v6438_v46 }
 0x588   :  { %v5266_v35 = vadd.f32 %v5262_v47, %v5178_v12  ;;  %v12323_v56 = vpop.f32.mrb[55].mxu1  ;;  %v6780_v47 = vld [vmem:[#allocation10 + $0x310] sm:$0xff] }
 0x589   :  { %15298 = vmatpush3.bf16.msra.mxu1 %v18371_v30  ;;  %v6782_v56 = vld [vmem:[#allocation10 + $0x320] sm:$0xff] }
 0x58a   :  { %15454 = vmatpush3.bf16.msra.mxu0 %v18277_v38  ;;  %15299 = vmatprep.subr.bf16.mxu1 %v16068_v0  ;;  %v5355_v60 = vadd.f32 %v18226_v39, %v5266_v35  ;;  %v18392_v38 = vpack.c.bf16 %v6602_v28, %v6601_v6  ;;  %v6603_v39 = vld [vmem:[#allocation10 + $0x210] sm:$0xff]  ;;  %v6781_v35 = vld [vmem:[#allocation10 + $0x318] sm:$0xff] }
 0x58b   :  { %15455 = vmatprep.subr.bf16.mxu0 %v16068_v0  ;;  %v6784_v6 = vld [vmem:[#allocation10 + $0x330] sm:$0xff]  ;;  %v6785_v28 = vld [vmem:[#allocation10 + $0x338] sm:$0xff] }
 0x58d   :  { %15301 = vmatpush3.bf16.msra.mxu1 %v18379_v57 }
 0x58e   :  { %15457 = vmatpush3.bf16.msra.mxu0 %v18287_v27  ;;  %15302 = vmatprep.subr.bf16.mxu1 %v16068_v0  ;;  %v18399_v27 = vpack.c.bf16 %v6604_v41, %v6603_v39  ;;  %v6786_v39 = vld [vmem:[#allocation10 + $0x340] sm:$0xff]  ;;  %v6787_v41 = vld [vmem:[#allocation10 + $0x348] sm:$0xff] }
 0x58f   :  { %15458 = vmatprep.subr.bf16.mxu0 %v16068_v0 }
 0x591   :  { %15304 = vmatpush3.bf16.msra.mxu1 %v18386_v7 }
 0x592   :  { %15460 = vmatpush3.bf16.msra.mxu0 %v18293_v21  ;;  %15329 = vmatprep.subr.bf16.mxu1 %v16068_v0  ;;  %v6605_v21 = vld [vmem:[#allocation10 + $0x220] sm:$0xff] }
 0x593   :  { %15461 = vmatprep.subr.bf16.mxu0 %v16068_v0  ;;  %v18409_v54 = vpack.c.bf16 %v6606_v24, %v6605_v21  ;;  %v6788_v21 = vld [vmem:[#allocation10 + $0x350] sm:$0xff]  ;;  %v6789_v24 = vld [vmem:[#allocation10 + $0x358] sm:$0xff] }
 0x594   :  { %12812 = vmatmul.mubr.f32.vlgmr.msra.gmra.mrb[68].mxu1 %v17557_v19 }
 0x595   :  { %15331 = vmatpush3.bf16.msra.mxu1 %v18392_v38  ;;  %12881 = vmatprep.mubr.msk.f32.mxu1 %vm16069_vm0, %v18851_v32 }
 0x596   :  { %15463 = vmatpush3.bf16.msra.mxu0 %v18303_v52  ;;  %15332 = vmatprep.subr.bf16.mxu1 %v16068_v0  ;;  %v18415_v52 = vpack.c.bf16 %v6608_v4, %v6607_v3  ;;  %v6791_v3 = vld [vmem:[#allocation10 + $0x368] sm:$0xff] }
 0x597   :  { %15464 = vmatprep.subr.bf16.mxu0 %v16068_v0 }
 0x598   :  { %v18406_v12 = vpop.f32.mrb[110].mxu0 }
 0x599   :  { %v12568_v8 = vpop.f32.mrb[111].mxu0  ;;  %15334 = vmatpush3.bf16.msra.mxu1 %v18399_v27 }
 0x59a   :  { %15466 = vmatpush3.bf16.msra.mxu0 %v18312_v18  ;;  %15335 = vmatprep.subr.bf16.mxu1 %v16068_v0  ;;  %v18421_v18 = vpack.c.bf16 %v6610_v20, %v6609_v15  ;;  %v6790_v8 = vld [vmem:[#allocation10 + $0x360] sm:$0xff] }
 0x59b   :  { %15467 = vmatprep.subr.bf16.mxu0 %v16068_v0  ;;  %v18498_v14 = vpack.c.bf16 %v6791_v3, %v6790_v8  ;;  %v7049_v8 = vld [vmem:[#allocation10 + $0x8] sm:$0xff] }
 0x59d   :  { %15337 = vmatpush3.bf16.msra.mxu1 %v18409_v54 }
 0x59e   :  { %15469 = vmatpush3.bf16.msra.mxu0 %v18320_v59  ;;  %15338 = vmatprep.subr.bf16.mxu1 %v16068_v0  ;;  %v18429_v59 = vpack.c.bf16 %v6612_v13, %v6611_v58  ;;  %v6957_v13 = vld [vmem:[#allocation10 + $0x408] sm:$0xff] }
 0x59f   :  { %15470 = vmatprep.subr.bf16.mxu0 %v16068_v0 }
 0x5a1   :  { %15340 = vmatpush3.bf16.msra.mxu1 %v18415_v52 }
 0x5a2   :  { %15472 = vmatpush3.bf16.msra.mxu0 %v18327_v48  ;;  %15341 = vmatprep.subr.bf16.mxu1 %v16068_v0 }
 0x5a3   :  { %15497 = vmatprep.subr.bf16.mxu0 %v16068_v0 }
 0x5a5   :  { %15343 = vmatpush3.bf16.msra.mxu1 %v18421_v18  ;;  %13057 = vmatmul.mubr.f32.vlgmr.msra.gmra.mrb[124].mxu0 %v558_v22  ;;  %v6615_v22 = vld [vmem:[#allocation10 + $0x270] sm:$0xff] }
 0x5a6   :  { %15499 = vmatpush3.bf16.msra.mxu0 %v18333_v49  ;;  %15344 = vmatprep.subr.bf16.mxu1 %v16068_v0  ;;  %v6616_v49 = vld [vmem:[#allocation10 + $0x278] sm:$0xff] }
 0x5a7   :  { %v5440_v48 = vpop.f32.mrb[56].mxu1  ;;  %15500 = vmatprep.subr.bf16.mxu0 %v16068_v0  ;;  %13126 = vmatprep.mubr.msk.f32.mxu0 %vm16069_vm0, %v18851_v32  ;;  %v18445_v11 = vpack.c.bf16 %v6616_v49, %v6615_v22  ;;  %v6963_v22 = vld [vmem:[#allocation10 + $0x438] sm:$0xff]  ;;  %v6964_v49 = vld [vmem:[#allocation10 + $0x440] sm:$0xff] }
 0x5a8   :  { %v18436_v50 = vadd.f32 %v5440_v48, %v5355_v60  ;;  %v12393_v34 = vpop.f32.mrb[57].mxu1 }
 0x5a9   :  { %15346 = vmatpush3.bf16.msra.mxu1 %v18429_v59 }
 0x5aa   :  { %15502 = vmatpush3.bf16.msra.mxu0 %v18341_v42  ;;  %15347 = vmatprep.subr.bf16.mxu1 %v16068_v0  ;;  %v18453_v42 = vpack.c.bf16 %v6779_v10, %v6778_v55  ;;  %v447_v55 = vadd.f32 %v18205_v33, %v18872_v5  ;;  %v6966_v10 = vld [vmem:[#allocation10 + $0x450] sm:$0xff] }
 0x5ab   :  { %15503 = vmatprep.subr.bf16.mxu0 %v16068_v0  ;;  %v7062_v5 = vld [vmem:[#allocation10 + $0x70] sm:$0xff] }
 0x5ad   :  { %15349 = vmatpush3.bf16.msra.mxu1 %v18439_v45 }
 0x5ae   :  { %15505 = vmatpush3.bf16.msra.mxu0 %v18351_v61  ;;  %15350 = vmatprep.subr.bf16.mxu1 %v16068_v0  ;;  %v18459_v61 = vpack.c.bf16 %v6781_v35, %v6780_v47  ;;  %v6968_v35 = vld [vmem:[#allocation10 + $0x460] sm:$0xff] }
 0x5af   :  { %15506 = vmatprep.subr.bf16.mxu0 %v16068_v0 }
 0x5b1   :  { %15352 = vmatpush3.bf16.msra.mxu1 %v18445_v11 }
 0x5b2   :  { %15508 = vmatpush3.bf16.msra.mxu0 %v18357_v31  ;;  %15377 = vmatprep.subr.bf16.mxu1 %v16068_v0  ;;  %v6783_v31 = vld [vmem:[#allocation10 + $0x328] sm:$0xff] }
 0x5b3   :  { %15509 = vmatprep.subr.bf16.mxu0 %v16068_v0  ;;  %v18469_v60 = vpack.c.bf16 %v6783_v31, %v6782_v56  ;;  %v6969_v56 = vld [vmem:[#allocation10 + $0x468] sm:$0xff] }
 0x5b4   :  { %12882 = vmatmul.mubr.f32.vlgmr.msra.gmra.mrb[70].mxu1 %v563_v43  ;;  %v6967_v43 = vld [vmem:[#allocation10 + $0x458] sm:$0xff] }
 0x5b5   :  { %15379 = vmatpush3.bf16.msra.mxu1 %v18453_v42  ;;  %12951 = vmatprep.mubr.msk.f32.mxu1 %vm16069_vm0, %v18851_v32  ;;  %v18549_v47 = vpack.c.bf16 %v6967_v43, %v6966_v10  ;;  %v7310_v43 = vld [vmem:[#allocation10 + $0x180] sm:$0xff] }
 0x5b6   :  { %15511 = vmatpush3.bf16.msra.mxu0 %v18365_v2  ;;  %15380 = vmatprep.subr.bf16.mxu1 %v16068_v0  ;;  %v18475_v2 = vpack.c.bf16 %v6785_v28, %v6784_v6  ;;  %v18557_v6 = vpack.c.bf16 %v6969_v56, %v6968_v35  ;;  %v6971_v28 = vld [vmem:[#allocation10 + $0x478] sm:$0xff]  ;;  %v7314_v56 = vld [vmem:[#allocation10 + $0x1a0] sm:$0xff] }
 0x5b7   :  { %15512 = vmatprep.subr.bf16.mxu0 %v16068_v0  ;;  %v7313_v35 = vld [vmem:[#allocation10 + $0x198] sm:$0xff] }
 0x5b8   :  { %v18466_v46 = vpop.f32.mrb[112].mxu0 }
 0x5b9   :  { %v12638_v53 = vpop.f32.mrb[113].mxu0  ;;  %15382 = vmatpush3.bf16.msra.mxu1 %v18459_v61 }
 0x5ba   :  { %15514 = vmatpush3.bf16.msra.mxu0 %v18371_v30  ;;  %15383 = vmatprep.subr.bf16.mxu1 %v16068_v0  ;;  %v18481_v30 = vpack.c.bf16 %v6787_v41, %v6786_v39 }
 0x5bb   :  { %15515 = vmatprep.subr.bf16.mxu0 %v16068_v0 }
 0x5bd   :  { %15385 = vmatpush3.bf16.msra.mxu1 %v18469_v60 }
 0x5be   :  { %15517 = vmatpush3.bf16.msra.mxu0 %v18379_v57  ;;  %15386 = vmatprep.subr.bf16.mxu1 %v16068_v0  ;;  %v18489_v57 = vpack.c.bf16 %v6789_v24, %v6788_v21  ;;  %v18873_v21 = vld [vmem:[#allocation31_spill] sm:$0xff] }
 0x5bf   :  { %15518 = vmatprep.subr.bf16.mxu0 %v16068_v0  ;;  %v477_v24 = vadd.f32 %v18205_v33, %v18873_v21  ;;  %v18874_v21 = vld [vmem:[#allocation32_spill] sm:$0xff] }
 0x5c1   :  { %15388 = vmatpush3.bf16.msra.mxu1 %v18475_v2  ;;  %v571_v3 = vmax.f32 %v477_v24, 0.0  ;;  %v487_v24 = vadd.f32 %v18205_v33, %v18874_v21 }
 0x5c2   :  { %15520 = vmatpush3.bf16.msra.mxu0 %v18386_v7  ;;  %15389 = vmatprep.subr.bf16.mxu1 %v16068_v0 }
 0x5c3   :  { %15545 = vmatprep.subr.bf16.mxu0 %v16068_v0 }
 0x5c5   :  { %15391 = vmatpush3.bf16.msra.mxu1 %v18481_v30  ;;  %13127 = vmatmul.mubr.f32.vlgmr.msra.gmra.mrb[126].mxu0 %v559_v37  ;;  %v6792_v37 = vld [vmem:[#allocation10 + $0x370] sm:$0xff] }
 0x5c6   :  { %15547 = vmatpush3.bf16.msra.mxu0 %v18392_v38  ;;  %15392 = vmatprep.subr.bf16.mxu1 %v16068_v0  ;;  %v6793_v38 = vld [vmem:[#allocation10 + $0x378] sm:$0xff] }
 0x5c7   :  { %v5619_v7 = vpop.f32.mrb[58].mxu1  ;;  %15548 = vmatprep.subr.bf16.mxu0 %v16068_v0  ;;  %13196 = vmatprep.mubr.msk.f32.mxu0 %vm16069_vm0, %v18851_v32  ;;  %v18505_v58 = vpack.c.bf16 %v6793_v38, %v6792_v37  ;;  %v7053_v37 = vld [vmem:[#allocation10 + $0x28] sm:$0xff] }
 0x5c8   :  { %v5620_v4 = vadd.f32 %v5619_v7, %v18284_v44  ;;  %v12463_v15 = vpop.f32.mrb[59].mxu1  ;;  %v6956_v44 = vld [vmem:[#allocation10 + $0x400] sm:$0xff]  ;;  %v7050_v7 = vld [vmem:[#allocation10 + $0x10] sm:$0xff] }
 0x5c9   :  { %15394 = vmatpush3.bf16.msra.mxu1 %v18489_v57  ;;  %v7052_v15 = vld [vmem:[#allocation10 + $0x20] sm:$0xff] }
 0x5ca   :  { %15550 = vmatpush3.bf16.msra.mxu0 %v18399_v27  ;;  %15395 = vmatprep.subr.bf16.mxu1 %v16068_v0  ;;  %v5710_v20 = vadd.f32 %v18348_v36, %v5620_v4  ;;  %v18511_v27 = vpack.c.bf16 %v6957_v13, %v6956_v44  ;;  %v6958_v36 = vld [vmem:[#allocation10 + $0x410] sm:$0xff]  ;;  %v7051_v4 = vld [vmem:[#allocation10 + $0x18] sm:$0xff] }
 0x5cb   :  { %15551 = vmatprep.subr.bf16.mxu0 %v16068_v0  ;;  %v7054_v44 = vld [vmem:[#allocation10 + $0x30] sm:$0xff]  ;;  %v7055_v13 = vld [vmem:[#allocation10 + $0x38] sm:$0xff] }
 0x5cd   :  { %15397 = vmatpush3.bf16.msra.mxu1 %v18498_v14 }
 0x5ce   :  { %15553 = vmatpush3.bf16.msra.mxu0 %v18409_v54  ;;  %15398 = vmatprep.subr.bf16.mxu1 %v16068_v0  ;;  %v18519_v54 = vpack.c.bf16 %v6959_v29, %v6958_v36  ;;  %v7056_v36 = vld [vmem:[#allocation10 + $0x40] sm:$0xff]  ;;  %v7057_v29 = vld [vmem:[#allocation10 + $0x48] sm:$0xff] }
 0x5cf   :  { %15554 = vmatprep.subr.bf16.mxu0 %v16068_v0 }
 0x5d1   :  { %15400 = vmatpush3.bf16.msra.mxu1 %v18505_v58 }
 0x5d2   :  { %15556 = vmatpush3.bf16.msra.mxu0 %v18415_v52  ;;  %15425 = vmatprep.subr.bf16.mxu1 %v16068_v0  ;;  %v6960_v52 = vld [vmem:[#allocation10 + $0x420] sm:$0xff] }
 0x5d3   :  { %15557 = vmatprep.subr.bf16.mxu0 %v16068_v0  ;;  %v18529_v51 = vpack.c.bf16 %v6961_v1, %v6960_v52  ;;  %v15486_v52 = vpack.c.bf16 %v7057_v29, %v7056_v36  ;;  %v7059_v1 = vld [vmem:[#allocation10 + $0x58] sm:$0xff] }
 0x5d4   :  { %12952 = vmatmul.mubr.f32.vlgmr.msra.gmra.mrb[72].mxu1 %v569_v9  ;;  %v6962_v9 = vld [vmem:[#allocation10 + $0x430] sm:$0xff] }
 0x5d5   :  { %15427 = vmatpush3.bf16.msra.mxu1 %v18511_v27  ;;  %13021 = vmatprep.mubr.msk.f32.mxu1 %vm16069_vm0, %v18851_v32 }
 0x5d6   :  { %15559 = vmatpush3.bf16.msra.mxu0 %v18421_v18  ;;  %15428 = vmatprep.subr.bf16.mxu1 %v16068_v0  ;;  %v18535_v18 = vpack.c.bf16 %v6963_v22, %v6962_v9  ;;  %v7061_v9 = vld [vmem:[#allocation10 + $0x68] sm:$0xff] }
 0x5d7   :  { %15560 = vmatprep.subr.bf16.mxu0 %v16068_v0 }
 0x5d8   :  { %v18526_v48 = vpop.f32.mrb[114].mxu0 }
 0x5d9   :  { %v12708_v34 = vpop.f32.mrb[115].mxu0  ;;  %15430 = vmatpush3.bf16.msra.mxu1 %v18519_v54 }
 0x5da   :  { %15562 = vmatpush3.bf16.msra.mxu0 %v18429_v59  ;;  %15431 = vmatprep.subr.bf16.mxu1 %v16068_v0  ;;  %v18543_v59 = vpack.c.bf16 %v6965_v17, %v6964_v49 }
 0x5db   :  { %15563 = vmatprep.subr.bf16.mxu0 %v16068_v0 }
 0x5dd   :  { %15433 = vmatpush3.bf16.msra.mxu1 %v18529_v51 }
 0x5de   :  { %15565 = vmatpush3.bf16.msra.mxu0 %v18439_v45  ;;  %15434 = vmatprep.subr.bf16.mxu1 %v16068_v0  ;;  %v565_v45 = vmax.f32 %v447_v55, 0.0 }
 0x5df   :  { %15566 = vmatprep.subr.bf16.mxu0 %v16068_v0 }
 0x5e1   :  { %15436 = vmatpush3.bf16.msra.mxu1 %v18535_v18 }
 0x5e2   :  { %15568 = vmatpush3.bf16.msra.mxu0 %v18445_v11  ;;  %15437 = vmatprep.subr.bf16.mxu1 %v16068_v0 }
 0x5e3   :  { %15593 = vmatprep.subr.bf16.mxu0 %v16068_v0 }
 0x5e5   :  { %15439 = vmatpush3.bf16.msra.mxu1 %v18543_v59  ;;  %13197 = vmatmul.mubr.f32.vlgmr.msra.gmra.mrb[128].mxu0 %v565_v45  ;;  %v7311_v45 = vld [vmem:[#allocation10 + $0x188] sm:$0xff] }
 0x5e6   :  { %15595 = vmatpush3.bf16.msra.mxu0 %v18453_v42  ;;  %15440 = vmatprep.subr.bf16.mxu1 %v16068_v0  ;;  %v6970_v42 = vld [vmem:[#allocation10 + $0x470] sm:$0xff] }
 0x5e7   :  { %v5795_v31 = vpop.f32.mrb[60].mxu1  ;;  %15596 = vmatprep.subr.bf16.mxu0 %v16068_v0  ;;  %13266 = vmatprep.mubr.msk.f32.mxu0 %vm16069_vm0, %v18851_v32  ;;  %v18564_v41 = vpack.c.bf16 %v6971_v28, %v6970_v42  ;;  %v7317_v42 = vld [vmem:[#allocation10 + $0x1b8] sm:$0xff]  ;;  %v7318_v28 = vld [vmem:[#allocation10 + $0x1c0] sm:$0xff] }
 0x5e8   :  { %v5799_v11 = vadd.f32 %v5795_v31, %v5710_v20  ;;  %v12533_v53 = vpop.f32.mrb[61].mxu1  ;;  %v15480_v20 = vpack.c.bf16 %v7053_v37, %v7052_v15  ;;  %v7315_v31 = vld [vmem:[#allocation10 + $0x1a8] sm:$0xff]  ;;  %v7322_v37 = vld [vmem:[#allocation10 + $0x1e0] sm:$0xff] }
 0x5e9   :  { %15442 = vmatpush3.bf16.msra.mxu1 %v18549_v47  ;;  %v15528_v53 = vpack.c.bf16 %v7315_v31, %v7314_v56  ;;  %v7859_v56 = vld [vmem:[#allocation11 + $0x60] sm:$0xff]  ;;  %v7860_v31 = vld [vmem:[#allocation11 + $0x68] sm:$0xff] }
 0x5ea   :  { %15598 = vmatpush3.bf16.msra.mxu0 %v18459_v61  ;;  %15443 = vmatprep.subr.bf16.mxu1 %v16068_v0  ;;  %v5888_v39 = vadd.f32 %v18406_v12, %v5799_v11  ;;  %v7048_v61 = vld [vmem:[#allocation10] sm:$0xff] }
 0x5eb   :  { %15599 = vmatprep.subr.bf16.mxu0 %v16068_v0  ;;  %v15474_v12 = vpack.c.bf16 %v7049_v8, %v7048_v61  ;;  %v7848_v61 = vld [vmem:[#allocation11 + $0x8] sm:$0xff] }
 0x5ed   :  { %15445 = vmatpush3.bf16.msra.mxu1 %v18557_v6 }
 0x5ee   :  { %15601 = vmatpush3.bf16.msra.mxu0 %v18469_v60  ;;  %15446 = vmatprep.subr.bf16.mxu1 %v16068_v0  ;;  %v15477_v60 = vpack.c.bf16 %v7051_v4, %v7050_v7  ;;  %v573_v7 = vmax.f32 %v487_v24, 0.0  ;;  %v7849_v4 = vld [vmem:[#allocation11 + $0x10] sm:$0xff] }
 0x5ef   :  { %15602 = vmatprep.subr.bf16.mxu0 %v16068_v0 }
 0x5f1   :  { %15448 = vmatpush3.bf16.msra.mxu1 %v18564_v41 }
 0x5f2   :  { %15604 = vmatpush3.bf16.msra.mxu0 %v18475_v2  ;;  %15473 = vmatprep.subr.bf16.mxu1 %v16068_v0 }
 0x5f3   :  { %15605 = vmatprep.subr.bf16.mxu0 %v16068_v0 }
 0x5f4   :  { %13022 = vmatmul.mubr.f32.vlgmr.msra.gmra.mrb[74].mxu1 %v571_v3 }
 0x5f5   :  { %15475 = vmatpush3.bf16.msra.mxu1 %v15474_v12  ;;  %13091 = vmatprep.mubr.msk.f32.mxu1 %vm16069_vm0, %v18851_v32 }
 0x5f6   :  { %15607 = vmatpush3.bf16.msra.mxu0 %v18481_v30  ;;  %15476 = vmatprep.subr.bf16.mxu1 %v16068_v0  ;;  %v15483_v30 = vpack.c.bf16 %v7055_v13, %v7054_v44  ;;  %v7852_v44 = vld [vmem:[#allocation11 + $0x28] sm:$0xff] }
 0x5f7   :  { %15608 = vmatprep.subr.bf16.mxu0 %v16068_v0 }
 0x5f8   :  { %v18580_v2 = vpop.f32.mrb[116].mxu0 }
 0x5f9   :  { %v12778_v38 = vpop.f32.mrb[117].mxu0  ;;  %15478 = vmatpush3.bf16.msra.mxu1 %v15477_v60  ;;  %v7850_v60 = vld [vmem:[#allocation11 + $0x18] sm:$0xff] }
 0x5fa   :  { %15610 = vmatpush3.bf16.msra.mxu0 %v18489_v57  ;;  %15479 = vmatprep.subr.bf16.mxu1 %v16068_v0  ;;  %v7058_v57 = vld [vmem:[#allocation10 + $0x50] sm:$0xff]  ;;  %v15693_v15 = vpack.c.bf16 %v7850_v60, %v7849_v4  ;;  %v7323_v38 = vld [vmem:[#allocation10 + $0x1e8] sm:$0xff]  ;;  %v7499_v60 = vld [vmem:[#allocation10 + $0x2d8] sm:$0xff] }
 0x5fb   :  { %15611 = vmatprep.subr.bf16.mxu0 %v16068_v0  ;;  %v15489_v34 = vpack.c.bf16 %v7059_v1, %v7058_v57  ;;  %v15540_v36 = vpack.c.bf16 %v7323_v38, %v7322_v37  ;;  %v7324_v57 = vld [vmem:[#allocation10 + $0x1f0] sm:$0xff]  ;;  %v7325_v1 = vld [vmem:[#allocation10 + $0x1f8] sm:$0xff] }
 0x5fc   :  { %v7498_v4 = vld [vmem:[#allocation10 + $0x2d0] sm:$0xff]  ;;  %v8115_v37 = vld [vmem:[#allocation11 + $0x198] sm:$0xff] }
 0x5fd   :  { %15481 = vmatpush3.bf16.msra.mxu1 %v15480_v20  ;;  %v7851_v20 = vld [vmem:[#allocation11 + $0x20] sm:$0xff] }
 0x5fe   :  { %15613 = vmatpush3.bf16.msra.mxu0 %v18498_v14  ;;  %15482 = vmatprep.subr.bf16.mxu1 %v16068_v0  ;;  %v7060_v14 = vld [vmem:[#allocation10 + $0x60] sm:$0xff] }
 0x5ff   :  { %15614 = vmatprep.subr.bf16.mxu0 %v16068_v0  ;;  %v15492_v17 = vpack.c.bf16 %v7061_v9, %v7060_v14  ;;  %v7854_v14 = vld [vmem:[#allocation11 + $0x38] sm:$0xff]  ;;  %v15543_v9 = vpack.c.bf16 %v7325_v1, %v7324_v57 }
 0x601   :  { %15484 = vmatpush3.bf16.msra.mxu1 %v15483_v30 }
 0x602   :  { %15616 = vmatpush3.bf16.msra.mxu0 %v18505_v58  ;;  %15485 = vmatprep.subr.bf16.mxu1 %v16068_v0 }
 0x603   :  { %15641 = vmatprep.subr.bf16.mxu0 %v16068_v0 }
 0x605   :  { %15487 = vmatpush3.bf16.msra.mxu1 %v15486_v52  ;;  %13267 = vmatmul.mubr.f32.vlgmr.msra.gmra.mrb[130].mxu0 %v571_v3  ;;  %v7320_v3 = vld [vmem:[#allocation10 + $0x1d0] sm:$0xff]  ;;  %v15696_v52 = vpack.c.bf16 %v7852_v44, %v7851_v20  ;;  %v7501_v20 = vld [vmem:[#allocation10 + $0x2e8] sm:$0xff] }
 0x606   :  { %15643 = vmatpush3.bf16.msra.mxu0 %v18511_v27  ;;  %15488 = vmatprep.subr.bf16.mxu1 %v16068_v0  ;;  %v7063_v27 = vld [vmem:[#allocation10 + $0x78] sm:$0xff] }
 0x607   :  { %v5973_v22 = vpop.f32.mrb[62].mxu1  ;;  %15644 = vmatprep.subr.bf16.mxu0 %v16068_v0  ;;  %13336 = vmatprep.mubr.msk.f32.mxu0 %vm16069_vm0, %v18851_v32  ;;  %v15495_v10 = vpack.c.bf16 %v7063_v27, %v7062_v5 }
 0x608   :  { %v5977_v58 = vadd.f32 %v5973_v22, %v5888_v39  ;;  %v12603_v49 = vpop.f32.mrb[63].mxu1  ;;  %v7319_v39 = vld [vmem:[#allocation10 + $0x1c8] sm:$0xff] }
 0x609   :  { %15490 = vmatpush3.bf16.msra.mxu1 %v15489_v34  ;;  %v15534_v8 = vpack.c.bf16 %v7319_v39, %v7318_v28  ;;  %v7853_v34 = vld [vmem:[#allocation11 + $0x30] sm:$0xff]  ;;  %v7489_v49 = vld [vmem:[#allocation10 + $0x288] sm:$0xff]  ;;  %v7862_v28 = vld [vmem:[#allocation11 + $0x78] sm:$0xff] }
 0x60a   :  { %15646 = vmatpush3.bf16.msra.mxu0 %v18519_v54  ;;  %15491 = vmatprep.subr.bf16.mxu1 %v16068_v0  ;;  %v18599_v55 = vadd.f32 %v18466_v46, %v5977_v58  ;;  %v15522_v54 = vpack.c.bf16 %v7311_v45, %v7310_v43  ;;  %v7312_v46 = vld [vmem:[#allocation10 + $0x190] sm:$0xff]  ;;  %v15699_v22 = vpack.c.bf16 %v7854_v14, %v7853_v34  ;;  %v7488_v58 = vld [vmem:[#allocation10 + $0x280] sm:$0xff]  ;;  %v7858_v45 = vld [vmem:[#allocation11 + $0x58] sm:$0xff] }
 0x60b   :  { %15647 = vmatprep.subr.bf16.mxu0 %v16068_v0  ;;  %v15570_v5 = vpack.c.bf16 %v7489_v49, %v7488_v58  ;;  %v7857_v43 = vld [vmem:[#allocation11 + $0x50] sm:$0xff]  ;;  %v18654_v39 = vld [vmem:[%s18836_s4] ss:$0 sm:$0xff]  ;;  %v7503_v14 = vld [vmem:[#allocation10 + $0x2f8] sm:$0xff] }
 0x60c   :  { %v7502_v34 = vld [vmem:[#allocation10 + $0x2f0] sm:$0xff] }
 0x60d   :  { %15493 = vmatpush3.bf16.msra.mxu1 %v15492_v17  ;;  %v7856_v17 = vld [vmem:[#allocation11 + $0x48] sm:$0xff]  ;;  %v15591_v58 = vpack.c.bf16 %v7503_v14, %v7502_v34  ;;  %v18875_v49 = vld [vmem:[#allocation24_spill] sm:$0xff]  ;;  %v8294_v34 = vld [vmem:[#allocation11 + $0x2a0] sm:$0xff] }
 0x60e   :  { %15649 = vmatpush3.bf16.msra.mxu0 %v18529_v51  ;;  %15494 = vmatprep.subr.bf16.mxu1 %v16068_v0  ;;  %v15525_v51 = vpack.c.bf16 %v7313_v35, %v7312_v46  ;;  %v15705_v46 = vpack.c.bf16 %v7858_v45, %v7857_v43  ;;  %v7492_v35 = vld [vmem:[#allocation10 + $0x2a0] sm:$0xff]  ;;  %v8295_v14 = vld [vmem:[#allocation11 + $0x2a8] sm:$0xff] }
 0x60f   :  { %15650 = vmatprep.subr.bf16.mxu0 %v16068_v0 }
 0x611   :  { %15496 = vmatpush3.bf16.msra.mxu1 %v15495_v10  ;;  %v7491_v10 = vld [vmem:[#allocation10 + $0x298] sm:$0xff] }
 0x612   :  { %15652 = vmatpush3.bf16.msra.mxu0 %v18535_v18  ;;  %15521 = vmatprep.subr.bf16.mxu1 %v16068_v0 }
 0x613   :  { %15653 = vmatprep.subr.bf16.mxu0 %v16068_v0 }
 0x614   :  { %13092 = vmatmul.mubr.f32.vlgmr.msra.gmra.mrb[76].mxu1 %v17557_v19  ;;  %v7316_v19 = vld [vmem:[#allocation10 + $0x1b0] sm:$0xff] }
 0x615   :  { %15523 = vmatpush3.bf16.msra.mxu1 %v15522_v54  ;;  %13161 = vmatprep.mubr.msk.f32.mxu1 %vm16069_vm0, %v18851_v32 }
 0x616   :  { %15655 = vmatpush3.bf16.msra.mxu0 %v18543_v59  ;;  %15524 = vmatprep.subr.bf16.mxu1 %v16068_v0  ;;  %v15531_v59 = vpack.c.bf16 %v7317_v42, %v7316_v19  ;;  %v7494_v19 = vld [vmem:[#allocation10 + $0x2b0] sm:$0xff]  ;;  %v7495_v42 = vld [vmem:[#allocation10 + $0x2b8] sm:$0xff] }
 0x617   :  { %15656 = vmatprep.subr.bf16.mxu0 %v16068_v0  ;;  %v15579_v21 = vpack.c.bf16 %v7495_v42, %v7494_v19  ;;  %v8124_v19 = vld [vmem:[#allocation11 + $0x1e0] sm:$0xff]  ;;  %v8125_v42 = vld [vmem:[#allocation11 + $0x1e8] sm:$0xff] }
 0x618   :  { %v18614_v18 = vpop.f32.mrb[118].mxu0 }
 0x619   :  { %v12848_v11 = vpop.f32.mrb[119].mxu0  ;;  %15526 = vmatpush3.bf16.msra.mxu1 %v15525_v51  ;;  %v7493_v51 = vld [vmem:[#allocation10 + $0x2a8] sm:$0xff] }
 0x61a   :  { %15658 = vmatpush3.bf16.msra.mxu0 %v18549_v47  ;;  %15527 = vmatprep.subr.bf16.mxu1 %v16068_v0  ;;  %v7847_v47 = vld [vmem:[#allocation11] sm:$0xff]  ;;  %v15576_v62 = vpack.c.bf16 %v7493_v51, %v7492_v35  ;;  %v7668_v35 = vld [vmem:[#allocation10 + $0x398] sm:$0xff]  ;;  %v8122_v51 = vld [vmem:[#allocation11 + $0x1d0] sm:$0xff] }
 0x61b   :  { %15659 = vmatprep.subr.bf16.mxu0 %v16068_v0  ;;  %v15690_v12 = vpack.c.bf16 %v7848_v61, %v7847_v47  ;;  %v7496_v47 = vld [vmem:[#allocation10 + $0x2c0] sm:$0xff]  ;;  %v7497_v61 = vld [vmem:[#allocation10 + $0x2c8] sm:$0xff] }
 0x61d   :  { %15529 = vmatpush3.bf16.msra.mxu1 %v15528_v53 }
 0x61e   :  { %15661 = vmatpush3.bf16.msra.mxu0 %v18557_v6  ;;  %15530 = vmatprep.subr.bf16.mxu1 %v16068_v0  ;;  %v7321_v6 = vld [vmem:[#allocation10 + $0x1d8] sm:$0xff] }
 0x61f   :  { %15662 = vmatprep.subr.bf16.mxu0 %v16068_v0  ;;  %v15537_v33 = vpack.c.bf16 %v7321_v6, %v7320_v3  ;;  %v8113_v3 = vld [vmem:[#allocation11 + $0x188] sm:$0xff]  ;;  %v15582_v6 = vpack.c.bf16 %v7497_v61, %v7496_v47  ;;  %v7671_v47 = vld [vmem:[#allocation10 + $0x3b0] sm:$0xff]  ;;  %v7672_v61 = vld [vmem:[#allocation10 + $0x3b8] sm:$0xff] }
 0x621   :  { %15532 = vmatpush3.bf16.msra.mxu1 %v15531_v59  ;;  %v7861_v59 = vld [vmem:[#allocation11 + $0x70] sm:$0xff] }
 0x622   :  { %15664 = vmatpush3.bf16.msra.mxu0 %v18564_v41  ;;  %15533 = vmatprep.subr.bf16.mxu1 %v16068_v0  ;;  %v15711_v24 = vpack.c.bf16 %v7862_v28, %v7861_v59 }
 0x623   :  { %15689 = vmatprep.subr.bf16.mxu0 %v16068_v0 }
 0x625   :  { %15535 = vmatpush3.bf16.msra.mxu1 %v15534_v8  ;;  %13337 = vmatmul.mubr.f32.vlgmr.msra.gmra.mrb[132].mxu0 %v573_v7  ;;  %v1450_v8 = vadd.f32 %v18654_v39, %v17005_v16  ;;  %v15585_v16 = vpack.c.bf16 %v7499_v60, %v7498_v4  ;;  %v7674_v4 = vld [vmem:[#allocation10 + $0x3c8] sm:$0xff]  ;;  %v3849_v60 = vadd.f32 %v18654_v39, %v17884_v26 }
 0x626   :  { %15691 = vmatpush3.bf16.msra.mxu0 %v15690_v12  ;;  %15536 = vmatprep.subr.bf16.mxu1 %v16068_v0  ;;  %v8112_v12 = vld [vmem:[#allocation11 + $0x180] sm:$0xff] }
 0x627   :  { %v6151_v41 = vpop.f32.mrb[64].mxu1  ;;  %15692 = vmatprep.subr.bf16.mxu0 %v16068_v0  ;;  %13406 = vmatprep.mubr.msk.f32.mxu0 %vm16069_vm0, %v18851_v32  ;;  %v15738_v7 = vpack.c.bf16 %v8113_v3, %v8112_v12  ;;  %v8127_v12 = vld [vmem:[#allocation11 + $0x1f8] sm:$0xff]  ;;  %v15627_v3 = vpack.c.bf16 %v7672_v61, %v7671_v47  ;;  %v8303_v47 = vld [vmem:[#allocation11 + $0x2e8] sm:$0xff] }
 0x628   :  { %v6155_v13 = vadd.f32 %v6151_v41, %v18599_v55  ;;  %v12673_v30 = vpop.f32.mrb[65].mxu1  ;;  %v7490_v55 = vld [vmem:[#allocation10 + $0x290] sm:$0xff]  ;;  %v7500_v41 = vld [vmem:[#allocation10 + $0x2e0] sm:$0xff] }
 0x629   :  { %15538 = vmatpush3.bf16.msra.mxu1 %v15537_v33  ;;  %v15573_v54 = vpack.c.bf16 %v7491_v10, %v7490_v55  ;;  %v1451_v33 = vmax.f32 %v1450_v8, 0.0  ;;  %v8117_v30 = vld [vmem:[#allocation11 + $0x1a8] sm:$0xff]  ;;  %v15588_v57 = vpack.c.bf16 %v7501_v20, %v7500_v41  ;;  %v8120_v55 = vld [vmem:[#allocation11 + $0x1c0] sm:$0xff]  ;;  %v8126_v8 = vld [vmem:[#allocation11 + $0x1f0] sm:$0xff]  ;;  %v3850_v20 = vmax.f32 %v3849_v60, 0.0 }
 0x62a   :  { %v18633_v29 = vadd.f32 %v18526_v48, %v6155_v13  ;;  %15694 = vmatpush3.bf16.msra.mxu0 %v15693_v15  ;;  %15539 = vmatprep.subr.bf16.mxu1 %v16068_v0  ;;  %v7855_v48 = vld [vmem:[#allocation11 + $0x40] sm:$0xff]  ;;  %v8114_v15 = vld [vmem:[#allocation11 + $0x190] sm:$0xff]  ;;  %v8121_v10 = vld [vmem:[#allocation11 + $0x1c8] sm:$0xff] }
 0x62b   :  { %15695 = vmatprep.subr.bf16.mxu0 %v16068_v0  ;;  %v15702_v27 = vpack.c.bf16 %v7856_v17, %v7855_v48  ;;  %v15741_v38 = vpack.c.bf16 %v8115_v37, %v8114_v15  ;;  %v8116_v13 = vld [vmem:[#allocation11 + $0x1a0] sm:$0xff]  ;;  %v8291_v15 = vld [vmem:[#allocation11 + $0x288] sm:$0xff]  ;;  %v7676_v41 = vld [vmem:[#allocation10 + $0x3d8] sm:$0xff] }
 0x62c   :  { %v15744_v1 = vpack.c.bf16 %v8117_v30, %v8116_v13  ;;  %v8293_v13 = vld [vmem:[#allocation11 + $0x298] sm:$0xff] }
 0x62d   :  { %15541 = vmatpush3.bf16.msra.mxu1 %v15540_v36  ;;  %v8305_v60 = vld [vmem:[#allocation11 + $0x2f8] sm:$0xff] }
 0x62e   :  { %15697 = vmatpush3.bf16.msra.mxu0 %v15696_v52  ;;  %15542 = vmatprep.subr.bf16.mxu1 %v16068_v0 }
 0x62f   :  { %15698 = vmatprep.subr.bf16.mxu0 %v16068_v0 }
 0x631   :  { %15544 = vmatpush3.bf16.msra.mxu1 %v15543_v9  ;;  %v8118_v9 = vld [vmem:[#allocation11 + $0x1b0] sm:$0xff] }
 0x632   :  { %15700 = vmatpush3.bf16.msra.mxu0 %v15699_v22  ;;  %15569 = vmatprep.subr.bf16.mxu1 %v16068_v0  ;;  %v8119_v22 = vld [vmem:[#allocation11 + $0x1b8] sm:$0xff] }
 0x633   :  { %15701 = vmatprep.subr.bf16.mxu0 %v16068_v0  ;;  %v15747_v17 = vpack.c.bf16 %v8119_v22, %v8118_v9 }
 0x634   :  { %13162 = vmatmul.mubr.f32.vlgmr.msra.gmra.mrb[78].mxu1 %v564_v63  ;;  %v15708_v63 = vpack.c.bf16 %v7860_v31, %v7859_v56  ;;  %v8123_v56 = vld [vmem:[#allocation11 + $0x1d8] sm:$0xff] }
 0x635   :  { %15571 = vmatpush3.bf16.msra.mxu1 %v15570_v5  ;;  %13231 = vmatprep.mubr.msk.f32.mxu1 %vm16069_vm0, %v18851_v32  ;;  %v7665_v5 = vld [vmem:[#allocation10 + $0x380] sm:$0xff] }
 0x636   :  { %15703 = vmatpush3.bf16.msra.mxu0 %v15702_v27  ;;  %15572 = vmatprep.subr.bf16.mxu1 %v16068_v0  ;;  %v7666_v27 = vld [vmem:[#allocation10 + $0x388] sm:$0xff] }
 0x637   :  { %15704 = vmatprep.subr.bf16.mxu0 %v16068_v0  ;;  %v15618_v43 = vpack.c.bf16 %v7666_v27, %v7665_v5  ;;  %v8296_v27 = vld [vmem:[#allocation11 + $0x2b0] sm:$0xff] }
 0x638   :  { %v18647_v11 = vpop.f32.mrb[120].mxu0 }
 0x639   :  { %v12918_v53 = vpop.f32.mrb[121].mxu0  ;;  %15574 = vmatpush3.bf16.msra.mxu1 %v15573_v54  ;;  %v15750_v54 = vpack.c.bf16 %v8121_v10, %v8120_v55  ;;  %v8297_v55 = vld [vmem:[#allocation11 + $0x2b8] sm:$0xff] }
 0x63a   :  { %15706 = vmatpush3.bf16.msra.mxu0 %v15705_v46  ;;  %15575 = vmatprep.subr.bf16.mxu1 %v16068_v0  ;;  %v7667_v46 = vld [vmem:[#allocation10 + $0x390] sm:$0xff]  ;;  %v15753_v53 = vpack.c.bf16 %v8123_v56, %v8122_v51 }
 0x63b   :  { %15707 = vmatprep.subr.bf16.mxu0 %v16068_v0  ;;  %v15621_v31 = vpack.c.bf16 %v7668_v35, %v7667_v46  ;;  %v7866_v46 = vld [vmem:[#allocation11 + $0x88] sm:$0xff]  ;;  %v8298_v35 = vld [vmem:[#allocation11 + $0x2c0] sm:$0xff] }
 0x63d   :  { %15577 = vmatpush3.bf16.msra.mxu1 %v15576_v62  ;;  %v7669_v62 = vld [vmem:[#allocation10 + $0x3a0] sm:$0xff] }
 0x63e   :  { %15709 = vmatpush3.bf16.msra.mxu0 %v15708_v63  ;;  %15578 = vmatprep.subr.bf16.mxu1 %v16068_v0  ;;  %v7670_v63 = vld [vmem:[#allocation10 + $0x3a8] sm:$0xff] }
 0x63f   :  { %15710 = vmatprep.subr.bf16.mxu0 %v16068_v0 }
 0x641   :  { %15580 = vmatpush3.bf16.msra.mxu1 %v15579_v21  ;;  %v15624_v21 = vpack.c.bf16 %v7670_v63, %v7669_v62  ;;  %v7868_v62 = vld [vmem:[#allocation11 + $0x98] sm:$0xff] }
 0x642   :  { %15712 = vmatpush3.bf16.msra.mxu0 %v15711_v24  ;;  %15581 = vmatprep.subr.bf16.mxu1 %v16068_v0  ;;  %v15756_v24 = vpack.c.bf16 %v8125_v42, %v8124_v19  ;;  %v8301_v63 = vld [vmem:[#allocation11 + $0x2d8] sm:$0xff] }
 0x643   :  { %15737 = vmatprep.subr.bf16.mxu0 %v16068_v0 }
 0x645   :  { %15583 = vmatpush3.bf16.msra.mxu1 %v15582_v6  ;;  %13407 = vmatmul.mubr.f32.vlgmr.msra.gmra.mrb[134].mxu0 %v1451_v33  ;;  %v15759_v6 = vpack.c.bf16 %v8127_v12, %v8126_v8  ;;  %v8290_v33 = vld [vmem:[#allocation11 + $0x280] sm:$0xff] }
 0x646   :  { %15739 = vmatpush3.bf16.msra.mxu0 %v15738_v7  ;;  %15584 = vmatprep.subr.bf16.mxu1 %v16068_v0  ;;  %v7673_v7 = vld [vmem:[#allocation10 + $0x3c0] sm:$0xff] }
 0x647   :  { %v6349_v44 = vpop.f32.mrb[66].mxu1  ;;  %15740 = vmatprep.subr.bf16.mxu0 %v16068_v0  ;;  %13476 = vmatprep.mubr.msk.f32.mxu0 %vm16069_vm0, %v18851_v32  ;;  %v15630_v37 = vpack.c.bf16 %v7674_v4, %v7673_v7  ;;  %v7872_v7 = vld [vmem:[#allocation11 + $0xb8] sm:$0xff]  ;;  %v8304_v4 = vld [vmem:[#allocation11 + $0x2f0] sm:$0xff] }
 0x648   :  { %v18667_v36 = vadd.f32 %v18580_v2, %v6349_v44  ;;  %v12743_v52 = vpop.f32.mrb[67].mxu1  ;;  %v18674_v2 = vld [vmem:[%s18834_s2] ss:$0 sm:$0xff]  ;;  %v8292_v44 = vld [vmem:[#allocation11 + $0x290] sm:$0xff] }
 0x649   :  { %15586 = vmatpush3.bf16.msra.mxu1 %v15585_v16  ;;  %v452_v48 = vadd.f32 %v18674_v2, %v18875_v49  ;;  %v15786_v16 = vpack.c.bf16 %v8291_v15, %v8290_v33  ;;  %v15789_v30 = vpack.c.bf16 %v8293_v13, %v8292_v44  ;;  %v7677_v52 = vld [vmem:[#allocation10 + $0x3e0] sm:$0xff]  ;;  %v15792_v49 = vpack.c.bf16 %v8295_v14, %v8294_v34  ;;  %v7875_v13 = vld [vmem:[#allocation11 + $0xd0] sm:$0xff]  ;;  %v7878_v14 = vld [vmem:[#allocation11 + $0xe8] sm:$0xff] }
 0x64a   :  { %15742 = vmatpush3.bf16.msra.mxu0 %v15741_v38  ;;  %15587 = vmatprep.subr.bf16.mxu1 %v16068_v0  ;;  %v7675_v38 = vld [vmem:[#allocation10 + $0x3d0] sm:$0xff]  ;;  %v15807_v15 = vpack.c.bf16 %v8305_v60, %v8304_v4  ;;  %v7877_v34 = vld [vmem:[#allocation11 + $0xe0] sm:$0xff]  ;;  %v8030_v4 = vld [vmem:[#allocation11 + $0x138] sm:$0xff] }
 0x64b   :  { %15743 = vmatprep.subr.bf16.mxu0 %v16068_v0  ;;  %v566_v45 = vmax.f32 %v452_v48, 0.0  ;;  %v15633_v26 = vpack.c.bf16 %v7676_v41, %v7675_v38  ;;  %v7679_v48 = vld [vmem:[#allocation10 + $0x3f0] sm:$0xff]  ;;  %v5445_v38 = vadd.f32 %v18654_v39, %v18436_v50  ;;  %v8468_v41 = vld [vmem:[#allocation11 + $0x380] sm:$0xff] }
 0x64d   :  { %15589 = vmatpush3.bf16.msra.mxu1 %v15588_v57  ;;  %v7678_v57 = vld [vmem:[#allocation10 + $0x3e8] sm:$0xff] }
 0x64e   :  { %15745 = vmatpush3.bf16.msra.mxu0 %v15744_v1  ;;  %15590 = vmatprep.subr.bf16.mxu1 %v16068_v0 }
 0x64f   :  { %15746 = vmatprep.subr.bf16.mxu0 %v16068_v0 }
 0x651   :  { %15592 = vmatpush3.bf16.msra.mxu1 %v15591_v58  ;;  %v15636_v58 = vpack.c.bf16 %v7678_v57, %v7677_v52  ;;  %v5446_v52 = vmax.f32 %v5445_v38, 0.0  ;;  %v8470_v57 = vld [vmem:[#allocation11 + $0x390] sm:$0xff]  ;;  %v8032_v38 = vld [vmem:[#allocation11 + $0x148] sm:$0xff] }
 0x652   :  { %15748 = vmatpush3.bf16.msra.mxu0 %v15747_v17  ;;  %15617 = vmatprep.subr.bf16.mxu1 %v16068_v0  ;;  %v7680_v17 = vld [vmem:[#allocation10 + $0x3f8] sm:$0xff] }
 0x653   :  { %15749 = vmatprep.subr.bf16.mxu0 %v16068_v0  ;;  %v15639_v10 = vpack.c.bf16 %v7680_v17, %v7679_v48 }
 0x654   :  { %13232 = vmatmul.mubr.f32.vlgmr.msra.gmra.mrb[80].mxu1 %v566_v45  ;;  %v15795_v45 = vpack.c.bf16 %v8297_v55, %v8296_v27  ;;  %v15684_v27 = vpack.c.bf16 %v7878_v14, %v7877_v34  ;;  %v7879_v55 = vld [vmem:[#allocation11 + $0xf0] sm:$0xff] }
 0x655   :  { %15619 = vmatpush3.bf16.msra.mxu1 %v15618_v43  ;;  %13301 = vmatprep.mubr.msk.f32.mxu1 %vm16069_vm0, %v18851_v32  ;;  %v18876_v43 = vld [vmem:[#allocation30_spill] sm:$0xff]  ;;  %v8037_v14 = vld [vmem:[#allocation11 + $0x170] sm:$0xff] }
 0x656   :  { %15751 = vmatpush3.bf16.msra.mxu0 %v15750_v54  ;;  %15620 = vmatprep.subr.bf16.mxu1 %v16068_v0  ;;  %v7865_v54 = vld [vmem:[#allocation11 + $0x80] sm:$0xff] }
 0x657   :  { %15752 = vmatprep.subr.bf16.mxu0 %v16068_v0  ;;  %v15666_v51 = vpack.c.bf16 %v7866_v46, %v7865_v54  ;;  %v8475_v54 = vld [vmem:[#allocation11 + $0x3b8] sm:$0xff] }
 0x658   :  { %v18686_v59 = vpop.f32.mrb[122].mxu0 }
 0x659   :  { %v12988_v28 = vpop.f32.mrb[123].mxu0  ;;  %15622 = vmatpush3.bf16.msra.mxu1 %v15621_v31 }
 0x65a   :  { %15754 = vmatpush3.bf16.msra.mxu0 %v15753_v53  ;;  %15623 = vmatprep.subr.bf16.mxu1 %v16068_v0  ;;  %v7867_v53 = vld [vmem:[#allocation11 + $0x90] sm:$0xff]  ;;  %v7869_v28 = vld [vmem:[#allocation11 + $0xa0] sm:$0xff] }
 0x65b   :  { %15755 = vmatprep.subr.bf16.mxu0 %v16068_v0  ;;  %v15669_v19 = vpack.c.bf16 %v7868_v62, %v7867_v53  ;;  %v8025_v62 = vld [vmem:[#allocation11 + $0x110] sm:$0xff] }
 0x65d   :  { %15625 = vmatpush3.bf16.msra.mxu1 %v15624_v21  ;;  %v7870_v21 = vld [vmem:[#allocation11 + $0xa8] sm:$0xff] }
 0x65e   :  { %15757 = vmatpush3.bf16.msra.mxu0 %v15756_v24  ;;  %15626 = vmatprep.subr.bf16.mxu1 %v16068_v0  ;;  %v8302_v24 = vld [vmem:[#allocation11 + $0x2e0] sm:$0xff]  ;;  %v15672_v12 = vpack.c.bf16 %v7870_v21, %v7869_v28  ;;  %v8028_v21 = vld [vmem:[#allocation11 + $0x128] sm:$0xff] }
 0x65f   :  { %15758 = vmatprep.subr.bf16.mxu0 %v16068_v0  ;;  %v8027_v28 = vld [vmem:[#allocation11 + $0x120] sm:$0xff] }
 0x661   :  { %15628 = vmatpush3.bf16.msra.mxu1 %v15627_v3  ;;  %v15804_v3 = vpack.c.bf16 %v8303_v47, %v8302_v24  ;;  %v8480_v47 = vld [vmem:[#allocation11 + $0x3e0] sm:$0xff] }
 0x662   :  { %15760 = vmatpush3.bf16.msra.mxu0 %v15759_v6  ;;  %15629 = vmatprep.subr.bf16.mxu1 %v16068_v0  ;;  %v7871_v6 = vld [vmem:[#allocation11 + $0xb0] sm:$0xff] }
 0x663   :  { %15785 = vmatprep.subr.bf16.mxu0 %v16068_v0  ;;  %v15675_v33 = vpack.c.bf16 %v7872_v7, %v7871_v6  ;;  %v15720_v6 = vpack.c.bf16 %v8028_v21, %v8027_v28  ;;  %v8029_v7 = vld [vmem:[#allocation11 + $0x130] sm:$0xff] }
 0x665   :  { %15631 = vmatpush3.bf16.msra.mxu1 %v15630_v37  ;;  %13477 = vmatmul.mubr.f32.vlgmr.msra.gmra.mrb[136].mxu0 %v3850_v20  ;;  %v7873_v37 = vld [vmem:[#allocation11 + $0xc0] sm:$0xff]  ;;  %v8469_v20 = vld [vmem:[#allocation11 + $0x388] sm:$0xff] }
 0x666   :  { %15787 = vmatpush3.bf16.msra.mxu0 %v15786_v16  ;;  %15632 = vmatprep.subr.bf16.mxu1 %v16068_v0  ;;  %v7874_v16 = vld [vmem:[#allocation11 + $0xc8] sm:$0xff] }
 0x667   :  { %v6506_v1 = vpop.f32.mrb[68].mxu1  ;;  %15788 = vmatprep.subr.bf16.mxu0 %v16068_v0  ;;  %13546 = vmatprep.mubr.msk.f32.mxu0 %vm16069_vm0, %v18851_v32  ;;  %v15678_v44 = vpack.c.bf16 %v7874_v16, %v7873_v37  ;;  %v15723_v37 = vpack.c.bf16 %v8030_v4, %v8029_v7  ;;  %v8031_v16 = vld [vmem:[#allocation11 + $0x140] sm:$0xff]  ;;  %v8380_v4 = vld [vmem:[#allocation11 + $0x308] sm:$0xff] }
 0x668   :  { %v6510_v9 = vadd.f32 %v6506_v1, %v18667_v36  ;;  %v12813_v22 = vpop.f32.mrb[69].mxu1  ;;  %v482_v36 = vadd.f32 %v18674_v2, %v18876_v43  ;;  %v8300_v2 = vld [vmem:[#allocation11 + $0x2d0] sm:$0xff]  ;;  %v8471_v1 = vld [vmem:[#allocation11 + $0x398] sm:$0xff]  ;;  %v8379_v7 = vld [vmem:[#allocation11 + $0x300] sm:$0xff] }
 0x669   :  { %15634 = vmatpush3.bf16.msra.mxu1 %v15633_v26  ;;  %v15801_v42 = vpack.c.bf16 %v8301_v63, %v8300_v2  ;;  %v7876_v26 = vld [vmem:[#allocation11 + $0xd8] sm:$0xff] }
 0x66a   :  { %15790 = vmatpush3.bf16.msra.mxu0 %v15789_v30  ;;  %15635 = vmatprep.subr.bf16.mxu1 %v16068_v0  ;;  %v18703_v5 = vadd.f32 %v18614_v18, %v6510_v9  ;;  %v8299_v18 = vld [vmem:[#allocation11 + $0x2c8] sm:$0xff]  ;;  %v572_v56 = vmax.f32 %v482_v36, 0.0  ;;  %v15834_v30 = vpack.c.bf16 %v8469_v20, %v8468_v41  ;;  %v15681_v50 = vpack.c.bf16 %v7876_v26, %v7875_v13  ;;  %v8026_v2 = vld [vmem:[#allocation11 + $0x118] sm:$0xff] }
 0x66b   :  { %15791 = vmatprep.subr.bf16.mxu0 %v16068_v0  ;;  %v15798_v31 = vpack.c.bf16 %v8299_v18, %v8298_v35  ;;  %v15837_v9 = vpack.c.bf16 %v8471_v1, %v8470_v57  ;;  %v8023_v35 = vld [vmem:[#allocation11 + $0x100] sm:$0xff]  ;;  %v8024_v18 = vld [vmem:[#allocation11 + $0x108] sm:$0xff]  ;;  %v15726_v20 = vpack.c.bf16 %v8032_v38, %v8031_v16  ;;  %v8034_v13 = vld [vmem:[#allocation11 + $0x158] sm:$0xff] }
 0x66c   :  { %v8384_v38 = vld [vmem:[#allocation11 + $0x328] sm:$0xff] }
 0x66d   :  { %15637 = vmatpush3.bf16.msra.mxu1 %v15636_v58  ;;  %v8472_v58 = vld [vmem:[#allocation11 + $0x3a0] sm:$0xff] }
 0x66e   :  { %15793 = vmatpush3.bf16.msra.mxu0 %v15792_v49  ;;  %15638 = vmatprep.subr.bf16.mxu1 %v16068_v0  ;;  %v8473_v49 = vld [vmem:[#allocation11 + $0x3a8] sm:$0xff] }
 0x66f   :  { %15794 = vmatprep.subr.bf16.mxu0 %v16068_v0  ;;  %v15840_v36 = vpack.c.bf16 %v8473_v49, %v8472_v58  ;;  %v3049_v49 = vadd.f32 %v18654_v39, %v17573_v25  ;;  %v8205_v25 = vld [vmem:[#allocation11 + $0x220] sm:$0xff] }
 0x671   :  { %15640 = vmatpush3.bf16.msra.mxu1 %v15639_v10  ;;  %v7880_v10 = vld [vmem:[#allocation11 + $0xf8] sm:$0xff] }
 0x672   :  { %15796 = vmatpush3.bf16.msra.mxu0 %v15795_v45  ;;  %15665 = vmatprep.subr.bf16.mxu1 %v16068_v0  ;;  %v8474_v45 = vld [vmem:[#allocation11 + $0x3b0] sm:$0xff]  ;;  %v15687_v46 = vpack.c.bf16 %v7880_v10, %v7879_v55  ;;  %v3050_v55 = vmax.f32 %v3049_v49, 0.0 }
 0x673   :  { %15797 = vmatprep.subr.bf16.mxu0 %v16068_v0  ;;  %v8203_v10 = vld [vmem:[#allocation11 + $0x210] sm:$0xff] }
 0x674   :  { %13302 = vmatmul.mubr.f32.vlgmr.msra.gmra.mrb[82].mxu1 %v572_v56  ;;  %v8477_v56 = vld [vmem:[#allocation11 + $0x3c8] sm:$0xff] }
 0x675   :  { %15667 = vmatpush3.bf16.msra.mxu1 %v15666_v51  ;;  %13371 = vmatprep.mubr.msk.f32.mxu1 %vm16069_vm0, %v18851_v32  ;;  %v15843_v51 = vpack.c.bf16 %v8475_v54, %v8474_v45 }
 0x676   :  { %15799 = vmatpush3.bf16.msra.mxu0 %v15798_v31  ;;  %15668 = vmatprep.subr.bf16.mxu1 %v16068_v0  ;;  %v15714_v31 = vpack.c.bf16 %v8024_v18, %v8023_v35  ;;  %v8208_v35 = vld [vmem:[#allocation11 + $0x238] sm:$0xff] }
 0x677   :  { %15800 = vmatprep.subr.bf16.mxu0 %v16068_v0 }
 0x678   :  { %v18716_v61 = vpop.f32.mrb[124].mxu0 }
 0x679   :  { %v13058_v8 = vpop.f32.mrb[125].mxu0  ;;  %15670 = vmatpush3.bf16.msra.mxu1 %v15669_v19  ;;  %v8479_v19 = vld [vmem:[#allocation11 + $0x3d8] sm:$0xff] }
 0x67a   :  { %15802 = vmatpush3.bf16.msra.mxu0 %v15801_v42  ;;  %15671 = vmatprep.subr.bf16.mxu1 %v16068_v0  ;;  %v15717_v42 = vpack.c.bf16 %v8026_v2, %v8025_v62  ;;  %v8481_v8 = vld [vmem:[#allocation11 + $0x3e8] sm:$0xff]  ;;  %v8213_v2 = vld [vmem:[#allocation11 + $0x260] sm:$0xff] }
 0x67b   :  { %15803 = vmatprep.subr.bf16.mxu0 %v16068_v0  ;;  %v15852_v60 = vpack.c.bf16 %v8481_v8, %v8480_v47  ;;  %v8216_v47 = vld [vmem:[#allocation11 + $0x278] sm:$0xff] }
 0x67d   :  { %15673 = vmatpush3.bf16.msra.mxu1 %v15672_v12 }
 0x67e   :  { %15805 = vmatpush3.bf16.msra.mxu0 %v15804_v3  ;;  %15674 = vmatprep.subr.bf16.mxu1 %v16068_v0 }
 0x67f   :  { %15806 = vmatprep.subr.bf16.mxu0 %v16068_v0 }
 0x681   :  { %15676 = vmatpush3.bf16.msra.mxu1 %v15675_v33  ;;  %v8482_v33 = vld [vmem:[#allocation11 + $0x3f0] sm:$0xff] }
 0x682   :  { %15808 = vmatpush3.bf16.msra.mxu0 %v15807_v15  ;;  %15677 = vmatprep.subr.bf16.mxu1 %v16068_v0  ;;  %v8483_v15 = vld [vmem:[#allocation11 + $0x3f8] sm:$0xff] }
 0x683   :  { %15833 = vmatprep.subr.bf16.mxu0 %v16068_v0  ;;  %v15855_v41 = vpack.c.bf16 %v8483_v15, %v8482_v33  ;;  %v8381_v15 = vld [vmem:[#allocation11 + $0x310] sm:$0xff] }
 0x685   :  { %15679 = vmatpush3.bf16.msra.mxu1 %v15678_v44  ;;  %13547 = vmatmul.mubr.f32.vlgmr.msra.gmra.mrb[138].mxu0 %v5446_v52  ;;  %v8033_v44 = vld [vmem:[#allocation11 + $0x150] sm:$0xff]  ;;  %v8036_v52 = vld [vmem:[#allocation11 + $0x168] sm:$0xff] }
 0x686   :  { %15680 = vmatprep.subr.bf16.mxu1 %v16068_v0  ;;  %15835 = vmatpush3.bf16.msra.mxu0 %v15834_v30  ;;  %v15729_v26 = vpack.c.bf16 %v8034_v13, %v8033_v44  ;;  %v8035_v30 = vld [vmem:[#allocation11 + $0x160] sm:$0xff]  ;;  %v8385_v13 = vld [vmem:[#allocation11 + $0x330] sm:$0xff] }
 0x687   :  { %v6683_v22 = vpop.f32.mrb[70].mxu1  ;;  %15836 = vmatprep.subr.bf16.mxu0 %v16068_v0  ;;  %13616 = vmatprep.mubr.msk.f32.mxu0 %vm16069_vm0, %v18851_v32  ;;  %v15732_v34 = vpack.c.bf16 %v8036_v52, %v8035_v30  ;;  %v8387_v52 = vld [vmem:[#allocation11 + $0x340] sm:$0xff] }
 0x688   :  { %v6687_v48 = vadd.f32 %v6683_v22, %v18703_v5  ;;  %v12883_v17 = vpop.f32.mrb[71].mxu1  ;;  %v2249_v5 = vadd.f32 %v18654_v39, %v17323_v40  ;;  %v8478_v40 = vld [vmem:[#allocation11 + $0x3d0] sm:$0xff] }
 0x689   :  { %15682 = vmatpush3.bf16.msra.mxu1 %v15681_v50  ;;  %v15849_v24 = vpack.c.bf16 %v8479_v19, %v8478_v40  ;;  %v8202_v17 = vld [vmem:[#allocation11 + $0x208] sm:$0xff] }
 0x68a   :  { %15683 = vmatprep.subr.bf16.mxu1 %v16068_v0  ;;  %v18733_v43 = vadd.f32 %v18647_v11, %v6687_v48  ;;  %15838 = vmatpush3.bf16.msra.mxu0 %v15837_v9  ;;  %v8476_v11 = vld [vmem:[#allocation11 + $0x3c0] sm:$0xff]  ;;  %v2250_v53 = vmax.f32 %v2249_v5, 0.0  ;;  %v8038_v9 = vld [vmem:[#allocation11 + $0x178] sm:$0xff]  ;;  %v8207_v5 = vld [vmem:[#allocation11 + $0x230] sm:$0xff] }
 0x68b   :  { %15839 = vmatprep.subr.bf16.mxu0 %v16068_v0  ;;  %v15846_v63 = vpack.c.bf16 %v8477_v56, %v8476_v11  ;;  %v15735_v58 = vpack.c.bf16 %v8038_v9, %v8037_v14  ;;  %v8201_v48 = vld [vmem:[#allocation11 + $0x200] sm:$0xff]  ;;  %v15771_v18 = vpack.c.bf16 %v8208_v35, %v8207_v5  ;;  %v8210_v11 = vld [vmem:[#allocation11 + $0x248] sm:$0xff]  ;;  %v8560_v5 = vld [vmem:[#allocation11 + $0x418] sm:$0xff] }
 0x68c   :  { %v8391_v9 = vld [vmem:[#allocation11 + $0x360] sm:$0xff] }
 0x68d   :  { %15685 = vmatpush3.bf16.msra.mxu1 %v15684_v27  ;;  %v15762_v27 = vpack.c.bf16 %v8202_v17, %v8201_v48 }
 0x68e   :  { %15686 = vmatprep.subr.bf16.mxu1 %v16068_v0  ;;  %15841 = vmatpush3.bf16.msra.mxu0 %v15840_v36 }
 0x68f   :  { %15842 = vmatprep.subr.bf16.mxu0 %v16068_v0 }
 0x691   :  { %15688 = vmatpush3.bf16.msra.mxu1 %v15687_v46 }
 0x692   :  { %15713 = vmatprep.subr.bf16.mxu1 %v16068_v0  ;;  %15844 = vmatpush3.bf16.msra.mxu0 %v15843_v51  ;;  %v8209_v51 = vld [vmem:[#allocation11 + $0x240] sm:$0xff] }
 0x693   :  { %15845 = vmatprep.subr.bf16.mxu0 %v16068_v0  ;;  %v15774_v56 = vpack.c.bf16 %v8210_v11, %v8209_v51 }
 0x694   :  { %13372 = vmatmul.mubr.f32.vlgmr.msra.gmra.mrb[84].mxu1 %v2250_v53  ;;  %v8212_v53 = vld [vmem:[#allocation11 + $0x258] sm:$0xff] }
 0x695   :  { %15715 = vmatpush3.bf16.msra.mxu1 %v15714_v31  ;;  %13441 = vmatprep.mubr.msk.f32.mxu1 %vm16069_vm0, %v18851_v32  ;;  %v8211_v31 = vld [vmem:[#allocation11 + $0x250] sm:$0xff] }
 0x696   :  { %15716 = vmatprep.subr.bf16.mxu1 %v16068_v0  ;;  %15847 = vmatpush3.bf16.msra.mxu0 %v15846_v63  ;;  %v15777_v62 = vpack.c.bf16 %v8212_v53, %v8211_v31  ;;  %v8214_v63 = vld [vmem:[#allocation11 + $0x268] sm:$0xff]  ;;  %v8564_v31 = vld [vmem:[#allocation11 + $0x438] sm:$0xff] }
 0x697   :  { %15848 = vmatprep.subr.bf16.mxu0 %v16068_v0  ;;  %v15780_v28 = vpack.c.bf16 %v8214_v63, %v8213_v2  ;;  %v8566_v2 = vld [vmem:[#allocation11 + $0x448] sm:$0xff]  ;;  %v8567_v63 = vld [vmem:[#allocation11 + $0x450] sm:$0xff] }
 0x698   :  { %v18746_v12 = vpop.f32.mrb[126].mxu0 }
 0x699   :  { %v13128_v3 = vpop.f32.mrb[127].mxu0  ;;  %15718 = vmatpush3.bf16.msra.mxu1 %v15717_v42 }
 0x69a   :  { %15719 = vmatprep.subr.bf16.mxu1 %v16068_v0  ;;  %15850 = vmatpush3.bf16.msra.mxu0 %v15849_v24  ;;  %v8215_v24 = vld [vmem:[#allocation11 + $0x270] sm:$0xff] }
 0x69b   :  { %15851 = vmatprep.subr.bf16.mxu0 %v16068_v0  ;;  %v15783_v3 = vpack.c.bf16 %v8216_v47, %v8215_v24 }
 0x69d   :  { %15721 = vmatpush3.bf16.msra.mxu1 %v15720_v6  ;;  %v4647_v6 = vadd.f32 %v18654_v39, %v18134_v23  ;;  %v8383_v23 = vld [vmem:[#allocation11 + $0x320] sm:$0xff] }
 0x69e   :  { %15722 = vmatprep.subr.bf16.mxu1 %v16068_v0  ;;  %15853 = vmatpush3.bf16.msra.mxu0 %v15852_v60  ;;  %v15810_v60 = vpack.c.bf16 %v8380_v4, %v8379_v7  ;;  %v15816_v44 = vpack.c.bf16 %v8384_v38, %v8383_v23  ;;  %v8572_v7 = vld [vmem:[#allocation11 + $0x478] sm:$0xff] }
 0x69f   :  { %15854 = vmatprep.subr.bf16.mxu0 %v16068_v0  ;;  %v4648_v33 = vmax.f32 %v4647_v6, 0.0  ;;  %v8571_v6 = vld [vmem:[#allocation11 + $0x470] sm:$0xff] }
 0x6a0   :  { %v15879_v4 = vpack.c.bf16 %v8572_v7, %v8571_v6 }
 0x6a1   :  { %15724 = vmatpush3.bf16.msra.mxu1 %v15723_v37  ;;  %v8382_v37 = vld [vmem:[#allocation11 + $0x318] sm:$0xff] }
 0x6a2   :  { %15725 = vmatprep.subr.bf16.mxu1 %v16068_v0  ;;  %15856 = vmatpush3.bf16.msra.mxu0 %v15855_v41  ;;  %v15813_v16 = vpack.c.bf16 %v8382_v37, %v8381_v15 }
 0x6a3   :  { %15881 = vmatprep.subr.bf16.mxu0 %v16068_v0 }
 0x6a5   :  { %15727 = vmatpush3.bf16.msra.mxu1 %v15726_v20 }
 0x6a6   :  { %15728 = vmatprep.subr.bf16.mxu1 %v16068_v0 }
 0x6a7   :  { %v6860_v57 = vpop.f32.mrb[72].mxu1 }
 0x6a8   :  { %v6864_v1 = vadd.f32 %v6860_v57, %v18733_v43  ;;  %v12953_v50 = vpop.f32.mrb[73].mxu1  ;;  %v8204_v43 = vld [vmem:[#allocation11 + $0x218] sm:$0xff]  ;;  %v8388_v57 = vld [vmem:[#allocation11 + $0x348] sm:$0xff] }
 0x6a9   :  { %15730 = vmatpush3.bf16.msra.mxu1 %v15729_v26  ;;  %v15765_v36 = vpack.c.bf16 %v8204_v43, %v8203_v10  ;;  %v8386_v26 = vld [vmem:[#allocation11 + $0x338] sm:$0xff]  ;;  %v8389_v50 = vld [vmem:[#allocation11 + $0x350] sm:$0xff] }
 0x6aa   :  { %15731 = vmatprep.subr.bf16.mxu1 %v16068_v0  ;;  %v6953_v22 = vadd.f32 %v18686_v59, %v6864_v1  ;;  %v8206_v59 = vld [vmem:[#allocation11 + $0x228] sm:$0xff]  ;;  %v15819_v30 = vpack.c.bf16 %v8386_v26, %v8385_v13  ;;  %v15822_v1 = vpack.c.bf16 %v8388_v57, %v8387_v52  ;;  %v8654_v26 = vld [vmem:[#allocation13] sm:$0xff]  ;;  %v8656_v52 = vld [vmem:[#allocation13 + $0x10] sm:$0xff] }
 0x6ab   :  { %v15768_v46 = vpack.c.bf16 %v8206_v59, %v8205_v25  ;;  %v8557_v25 = vld [vmem:[#allocation11 + $0x400] sm:$0xff]  ;;  %v8558_v59 = vld [vmem:[#allocation11 + $0x408] sm:$0xff] }
 0x6ad   :  { %15733 = vmatpush3.bf16.msra.mxu1 %v15732_v34  ;;  %v8390_v34 = vld [vmem:[#allocation11 + $0x358] sm:$0xff] }
 0x6ae   :  { %15734 = vmatprep.subr.bf16.mxu1 %v16068_v0  ;;  %v15825_v14 = vpack.c.bf16 %v8390_v34, %v8389_v50 }
 0x6b1   :  { %15736 = vmatpush3.bf16.msra.mxu1 %v15735_v58 }
 0x6b2   :  { %15761 = vmatprep.subr.bf16.mxu1 %v16068_v0 }
 0x6b4   :  { %13442 = vmatmul.mubr.f32.vlgmr.msra.gmra.mrb[86].mxu1 %v3050_v55  ;;  %v8394_v55 = vld [vmem:[#allocation11 + $0x378] sm:$0xff] }
 0x6b5   :  { %15763 = vmatpush3.bf16.msra.mxu1 %v15762_v27  ;;  %13511 = vmatprep.mubr.msk.f32.mxu1 %vm16069_vm0, %v18851_v32  ;;  %v8393_v27 = vld [vmem:[#allocation11 + $0x370] sm:$0xff] }
 0x6b6   :  { %15764 = vmatprep.subr.bf16.mxu1 %v16068_v0  ;;  %v15831_v43 = vpack.c.bf16 %v8394_v55, %v8393_v27  ;;  %v8662_v27 = vld [vmem:[#allocation13 + $0x40] sm:$0xff]  ;;  %v8663_v55 = vld [vmem:[#allocation13 + $0x48] sm:$0xff] }
 0x6b8   :  { %v18765_v45 = vpop.f32.mrb[128].mxu0 }
 0x6b9   :  { %v13198_v54 = vpop.f32.mrb[129].mxu0  ;;  %15766 = vmatpush3.bf16.msra.mxu1 %v15765_v36  ;;  %v6245_v36 = vadd.f32 %v18654_v39, %v18633_v29  ;;  %v8561_v29 = vld [vmem:[#allocation11 + $0x420] sm:$0xff] }
 0x6ba   :  { %15767 = vmatprep.subr.bf16.mxu1 %v16068_v0 }
 0x6bb   :  { %v6246_v54 = vmax.f32 %v6245_v36, 0.0  ;;  %v8665_v36 = vld [vmem:[#allocation13 + $0x58] sm:$0xff] }
 0x6bd   :  { %15769 = vmatpush3.bf16.msra.mxu1 %v15768_v46  ;;  %v8559_v46 = vld [vmem:[#allocation11 + $0x410] sm:$0xff] }
 0x6be   :  { %15770 = vmatprep.subr.bf16.mxu1 %v16068_v0  ;;  %v15861_v35 = vpack.c.bf16 %v8560_v5, %v8559_v46 }
 0x6c1   :  { %15772 = vmatpush3.bf16.msra.mxu1 %v15771_v18 }
 0x6c2   :  { %15773 = vmatprep.subr.bf16.mxu1 %v16068_v0 }
 0x6c5   :  { %15775 = vmatpush3.bf16.msra.mxu1 %v15774_v56  ;;  %v8563_v56 = vld [vmem:[#allocation11 + $0x430] sm:$0xff] }
 0x6c6   :  { %15776 = vmatprep.subr.bf16.mxu1 %v16068_v0  ;;  %v15867_v53 = vpack.c.bf16 %v8564_v31, %v8563_v56 }
 0x6c7   :  { %v7038_v40 = vpop.f32.mrb[74].mxu1 }
 0x6c8   :  { %v7042_v19 = vadd.f32 %v7038_v40, %v6953_v22  ;;  %v13023_v42 = vpop.f32.mrb[75].mxu1  ;;  %v8392_v22 = vld [vmem:[#allocation11 + $0x368] sm:$0xff]  ;;  %v8568_v40 = vld [vmem:[#allocation11 + $0x458] sm:$0xff] }
 0x6c9   :  { %15778 = vmatpush3.bf16.msra.mxu1 %v15777_v62  ;;  %v15828_v17 = vpack.c.bf16 %v8392_v22, %v8391_v9  ;;  %v8565_v62 = vld [vmem:[#allocation11 + $0x440] sm:$0xff]  ;;  %v8659_v22 = vld [vmem:[#allocation13 + $0x28] sm:$0xff] }
 0x6ca   :  { %v7043_v21 = vadd.f32 %v18654_v39, %v7042_v19  ;;  %15779 = vmatprep.subr.bf16.mxu1 %v16068_v0  ;;  %v15873_v19 = vpack.c.bf16 %v8568_v40, %v8567_v63  ;;  %v8569_v42 = vld [vmem:[#allocation11 + $0x460] sm:$0xff] }
 0x6cb   :  { %v8658_v9 = vld [vmem:[#allocation13 + $0x20] sm:$0xff] }
 0x6cc   :  { %v7044_v8 = vmax.f32 %v7043_v21, 0.0 }
 0x6cd   :  { %15781 = vmatpush3.bf16.msra.mxu1 %v15780_v28  ;;  %v8570_v28 = vld [vmem:[#allocation11 + $0x468] sm:$0xff] }
 0x6ce   :  { %13617 = vmatmul.mubr.f32.vlgmr.msra.gmra.mrb[140].mxu0 %v7044_v8  ;;  %15782 = vmatprep.subr.bf16.mxu1 %v16068_v0  ;;  %v15876_v8 = vpack.c.bf16 %v8570_v28, %v8569_v42 }
 0x6cf   :  { %13686 = vmatprep.mubr.msk.f32.mxu0 %vm16069_vm0, %v18851_v32 }
 0x6d1   :  { %15784 = vmatpush3.bf16.msra.mxu1 %v15783_v3 }
 0x6d2   :  { %15809 = vmatprep.subr.bf16.mxu1 %v16068_v0 }
 0x6d4   :  { %13512 = vmatmul.mubr.f32.vlgmr.msra.gmra.mrb[88].mxu1 %v4648_v33 }
 0x6d5   :  { %15811 = vmatpush3.bf16.msra.mxu1 %v15810_v60  ;;  %13581 = vmatprep.mubr.msk.f32.mxu1 %vm16069_vm0, %v18851_v32 }
 0x6d6   :  { %15812 = vmatprep.subr.bf16.mxu1 %v16068_v0 }
 0x6d8   :  { %v18782_v41 = vpop.f32.mrb[130].mxu0 }
 0x6d9   :  { %v13268_v20 = vpop.f32.mrb[131].mxu0  ;;  %15814 = vmatpush3.bf16.msra.mxu1 %v15813_v16 }
 0x6da   :  { %15815 = vmatprep.subr.bf16.mxu1 %v16068_v0 }
 0x6dd   :  { %15817 = vmatpush3.bf16.msra.mxu1 %v15816_v44 }
 0x6de   :  { %15818 = vmatprep.subr.bf16.mxu1 %v16068_v0 }
 0x6e1   :  { %15820 = vmatpush3.bf16.msra.mxu1 %v15819_v30  ;;  %v8655_v30 = vld [vmem:[#allocation13 + $0x8] sm:$0xff] }
 0x6e2   :  { %15821 = vmatprep.subr.bf16.mxu1 %v16068_v0  ;;  %v15882_v57 = vpack.c.bf16 %v8655_v30, %v8654_v26 }
 0x6e4   :  { %15883 = vmatpush3.bf16.msra.mxu0 %v15882_v57 }
 0x6e5   :  { %15823 = vmatpush3.bf16.msra.mxu1 %v15822_v1  ;;  %v8657_v1 = vld [vmem:[#allocation13 + $0x18] sm:$0xff]  ;;  %15884 = vmatprep.subr.bf16.mxu0 %v16068_v0 }
 0x6e6   :  { %15824 = vmatprep.subr.bf16.mxu1 %v16068_v0  ;;  %v15885_v34 = vpack.c.bf16 %v8657_v1, %v8656_v52 }
 0x6e7   :  { %v7217_v58 = vpop.f32.mrb[76].mxu1 }
 0x6e8   :  { %v7218_v49 = vadd.f32 %v7217_v58, %v18716_v61  ;;  %v13093_v48 = vpop.f32.mrb[77].mxu1  ;;  %v15858_v61 = vpack.c.bf16 %v8558_v59, %v8557_v25  ;;  %15886 = vmatpush3.bf16.msra.mxu0 %v15885_v34  ;;  %v15888_v58 = vpack.c.bf16 %v8659_v22, %v8658_v9 }
 0x6e9   :  { %15826 = vmatpush3.bf16.msra.mxu1 %v15825_v14  ;;  %15887 = vmatprep.subr.bf16.mxu0 %v16068_v0  ;;  %v8661_v48 = vld [vmem:[#allocation13 + $0x38] sm:$0xff] }
 0x6ea   :  { %15827 = vmatprep.subr.bf16.mxu1 %v16068_v0  ;;  %v7308_v10 = vadd.f32 %v18746_v12, %v7218_v49  ;;  %v8562_v12 = vld [vmem:[#allocation11 + $0x428] sm:$0xff]  ;;  %v8660_v49 = vld [vmem:[#allocation13 + $0x30] sm:$0xff] }
 0x6eb   :  { %v15864_v11 = vpack.c.bf16 %v8562_v12, %v8561_v29 }
 0x6ec   :  { %15889 = vmatpush3.bf16.msra.mxu0 %v15888_v58 }
 0x6ed   :  { %15829 = vmatpush3.bf16.msra.mxu1 %v15828_v17  ;;  %v15891_v17 = vpack.c.bf16 %v8661_v48, %v8660_v49  ;;  %15890 = vmatprep.subr.bf16.mxu0 %v16068_v0 }
 0x6ee   :  { %15830 = vmatprep.subr.bf16.mxu1 %v16068_v0 }
 0x6f0   :  { %15892 = vmatpush3.bf16.msra.mxu0 %v15891_v17 }
 0x6f1   :  { %15832 = vmatpush3.bf16.msra.mxu1 %v15831_v43  ;;  %15893 = vmatprep.subr.bf16.mxu0 %v16068_v0  ;;  %v8664_v43 = vld [vmem:[#allocation13 + $0x50] sm:$0xff] }
 0x6f2   :  { %15857 = vmatprep.subr.bf16.mxu1 %v16068_v0  ;;  %v15897_v59 = vpack.c.bf16 %v8665_v36, %v8664_v43 }
 0x6f4   :  { %13582 = vmatmul.mubr.f32.vlgmr.msra.gmra.mrb[90].mxu1 %v6246_v54 }
 0x6f5   :  { %15859 = vmatpush3.bf16.msra.mxu1 %v15858_v61  ;;  %13651 = vmatprep.mubr.msk.f32.mxu1 %vm16069_vm0, %v18851_v32  ;;  %v15870_v32 = vpack.c.bf16 %v8566_v2, %v8565_v62  ;;  %v8669_v62 = vld [vmem:[#allocation13 + $0x78] sm:$0xff] }
 0x6f6   :  { %15860 = vmatprep.subr.bf16.mxu1 %v16068_v0 }
 0x6f8   :  { %v7836_v18 = vpop.f32.mrb[132].mxu0 }
 0x6f9   :  { %v13338_v51 = vpop.f32.mrb[133].mxu0  ;;  %15862 = vmatpush3.bf16.msra.mxu1 %v15861_v35 }
 0x6fa   :  { %15863 = vmatprep.subr.bf16.mxu1 %v16068_v0  ;;  %v8667_v51 = vld [vmem:[#allocation13 + $0x68] sm:$0xff] }
 0x6fd   :  { %15865 = vmatpush3.bf16.msra.mxu1 %v15864_v11 }
 0x6fe   :  { %15866 = vmatprep.subr.bf16.mxu1 %v16068_v0 }
 0x701   :  { %15868 = vmatpush3.bf16.msra.mxu1 %v15867_v53  ;;  %v8668_v53 = vld [vmem:[#allocation13 + $0x70] sm:$0xff] }
 0x702   :  { %15869 = vmatprep.subr.bf16.mxu1 %v16068_v0  ;;  %v15903_v2 = vpack.c.bf16 %v8669_v62, %v8668_v53 }
 0x705   :  { %15871 = vmatpush3.bf16.msra.mxu1 %v15870_v32 }
 0x706   :  { %15872 = vmatprep.subr.bf16.mxu1 %v16068_v0 }
 0x707   :  { %v7392_v21 = vpop.f32.mrb[78].mxu1 }
 0x708   :  { %v7396_v24 = vadd.f32 %v7392_v21, %v7308_v10  ;;  %v13163_v47 = vpop.f32.mrb[79].mxu1 }
 0x709   :  { %15874 = vmatpush3.bf16.msra.mxu1 %v15873_v19  ;;  %v8767_v47 = vld [vmem:[%s18838_s6] ss:$0 sm:$0xff] }
 0x70a   :  { %v7485_v3 = vadd.f32 %v18765_v45, %v7396_v24  ;;  %15875 = vmatprep.subr.bf16.mxu1 %v16068_v0 }
 0x70d   :  { %15877 = vmatpush3.bf16.msra.mxu1 %v15876_v8 }
 0x70e   :  { %15878 = vmatprep.subr.bf16.mxu1 %v16068_v0 }
 0x711   :  { %15880 = vmatpush3.bf16.msra.mxu1 %v15879_v4  ;;  %v8768_v4 = vld [vmem:[%s18840_s8] ss:$0 sm:$0xff] }
 0x718   :  { %v8017_v60 = vpop.f32.mrb[134].mxu0 }
 0x719   :  { %v13408_v33 = vpop.f32.mrb[135].mxu0 }
 0x727   :  { %v7570_v15 = vpop.f32.mrb[80].mxu1 }
 0x728   :  { %v7574_v37 = vadd.f32 %v7570_v15, %v7485_v3  ;;  %v13233_v16 = vpop.f32.mrb[81].mxu1 }
 0x72a   :  { %v7662_v23 = vadd.f32 %v18782_v41, %v7574_v37 }
 0x738   :  { %v8194_v38 = vpop.f32.mrb[136].mxu0 }
 0x739   :  { %v13478_v20 = vpop.f32.mrb[137].mxu0 }
 0x747   :  { %v7747_v44 = vpop.f32.mrb[82].mxu1 }
 0x748   :  { %v7751_v45 = vadd.f32 %v7747_v44, %v7662_v23  ;;  %v13303_v13 = vpop.f32.mrb[83].mxu1 }
 0x74a   :  { %v7840_v50 = vadd.f32 %v7836_v18, %v7751_v45  ;;  %v8666_v18 = vld [vmem:[#allocation13 + $0x60] sm:$0xff] }
 0x74b   :  { %v15900_v56 = vpack.c.bf16 %v8667_v51, %v8666_v18 }
 0x74c   :  { %v7841_v14 = vadd.f32 %v18654_v39, %v7840_v50  ;;  %v15894_v39 = vpack.c.bf16 %v8663_v55, %v8662_v27 }
 0x74e   :  { %v7842_v41 = vmax.f32 %v7841_v14, 0.0  ;;  %15895 = vmatpush3.bf16.msra.mxu0 %v15894_v39 }
 0x74f   :  { %15896 = vmatprep.subr.bf16.mxu0 %v16068_v0 }
 0x750   :  { %13652 = vmatmul.mubr.f32.vlgmr.msra.gmra.mrb[92].mxu1 %v7842_v41 }
 0x752   :  { %15898 = vmatpush3.bf16.msra.mxu0 %v15897_v59 }
 0x753   :  { %15899 = vmatprep.subr.bf16.mxu0 %v16068_v0 }
 0x756   :  { %15901 = vmatpush3.bf16.msra.mxu0 %v15900_v56 }
 0x757   :  { %15902 = vmatprep.subr.bf16.mxu0 %v16068_v0 }
 0x758   :  { %v8372_v10 = vpop.f32.mrb[138].mxu0 }
 0x759   :  { %v13548_v25 = vpop.f32.mrb[139].mxu0 }
 0x75a   :  { %15904 = vmatpush3.bf16.msra.mxu0 %v15903_v2 }
 0x767   :  { %v7947_v61 = vpop.f32.mrb[84].mxu1 }
 0x768   :  { %v8018_v54 = vadd.f32 %v8017_v60, %v7947_v61  ;;  %v13373_v46 = vpop.f32.mrb[85].mxu1 }
 0x787   :  { %v8105_v5 = vpop.f32.mrb[86].mxu1 }
 0x788   :  { %v8109_v35 = vadd.f32 %v8105_v5, %v8018_v54  ;;  %v13443_v29 = vpop.f32.mrb[87].mxu1 }
 0x78a   :  { %v8198_v12 = vadd.f32 %v8194_v38, %v8109_v35 }
 0x7a1   :  { %v8550_v11 = vpop.f32.mrb[140].mxu0 }
 0x7a2   :  { %v13618_v31 = vpop.f32.mrb[141].mxu0 }
 0x7a7   :  { %v8283_v32 = vpop.f32.mrb[88].mxu1 }
 0x7a8   :  { %v8287_v63 = vadd.f32 %v8283_v32, %v8198_v12  ;;  %v13513_v40 = vpop.f32.mrb[89].mxu1 }
 0x7aa   :  { %v8376_v19 = vadd.f32 %v8372_v10, %v8287_v63 }
 0x7c7   :  { %v8461_v42 = vpop.f32.mrb[90].mxu1 }
 0x7c8   :  { %v8465_v28 = vadd.f32 %v8461_v42, %v8376_v19  ;;  %v13583_v21 = vpop.f32.mrb[91].mxu1 }
 0x7ca   :  { %v8554_v24 = vadd.f32 %v8550_v11, %v8465_v28 }
 0x823   :  { %v8639_v8 = vpop.f32.mrb[92].mxu1 }
 0x824   :  { %v8643_v3 = vadd.f32 %v8639_v8, %v8554_v24  ;;  %v13653_v6 = vpop.f32.mrb[93].mxu1 }
 0x826   :  { %v8650_v0 = vadd.f32 %v8767_v47, %v8643_v3 }
 0x828   :  { %v8651_v7 = vmax.f32 %v8650_v0, 0.0 }
 0x82a   :  { %13687 = vmatmul.mubr.f32.vlgmr.msra.gmra.mrb[142].mxu0 %v8651_v7 }
 0x8fd   :  { %v8743_v60 = vpop.f32.mrb[142].mxu0 }
 0x8fe   :  { %v8744_v33 = vadd.f32 %v8768_v4, %v8743_v60  ;;  %v13688_v15 = vpop.f32.mrb[143].mxu0 }
 0x900   :  { %8747 = vst [vmem:[#allocation14] sm:$0xff] %v8744_v33 }
 0x901   :  { %16042 = shalt.err (!%p16039_p2)
}
 0x902   :  { %s16043_s25 = scalar_lea.hbm %s18841_s9, 128 }
 0x903   :  { %p16044_p3 = scmp.ne.s32.totalorder %s18841_s9, %s16043_s25  ;;  %p16047_p4 = scmp.lt.u32.totalorder %s16043_s25, %s18841_s9 }
 0x905   :  { %p16049_p5 = pnand %p16047_p4, %p16044_p3 }
 0x907   :  { %16052 = shalt.err (!%p16049_p5)
}
 0x908   :  { %8757 = dma.vmem_to_hbm [thread:$0]  %s8755_s20, 128, %s18841_s9, [#allocation7]  }
 0x909   :  { %16059 = dma.done.wait [#allocation7], 128  }
 0x90a   :  { %16060 = vsyncadd [#allocation7], 4294967168 }
 0x90b   :  { %8761 = vsyncpa [#allocation6], 1 }
 0x90c   :  { %8762 = vsyncpa [#allocation9], 1 }
 0x90d   :  { %8763 = vsyncpa [#allocation12], 1 }
 0x90e   :  { %8764 = vsyncpa [#allocation7], 1 }

</bundles_post_ra>
